<compile_context>
chip_gen: v5e
topology: v5e:2x2
jax: 0.10.0
libtpu: 0.0.40
codegen_flags: <defaults>
</compile_context>

<pallas_src>
import numpy as np
import jax
import jax.numpy as jnp
from jax.experimental import pallas as pl
from jax.experimental.pallas import tpu as pltpu

EPS = 1e-5


# ---------------------------------------------------------------------------
# Fused kernel factory: trunk + side heads + resize + fuse, one batch element
# per grid step.  S = #sides, L = #trunk layers, side_hw = per-side (H, W).
# ---------------------------------------------------------------------------
def _make_fused_kernel(S, L, side_hw, H0, W0, C):
    def kernel(*refs):
        i = 0
        shifts_ref = refs[i]; i += 1           # SMEM (S,)   folded side BN shift
        fw_ref = refs[i]; i += 1               # SMEM (S,)   fuse weights
        fb_ref = refs[i]; i += 1               # SMEM (1,)   fuse bias
        x_refs = refs[i:i + S]; i += S         # (1, Hs, Ws, C) bf16 inputs
        wconv_refs = refs[i:i + L]; i += L     # (9C, C) bf16  BN-folded conv W
        bconv_refs = refs[i:i + L]; i += L     # (1, C)  f32   BN-folded bias
        w1_refs = refs[i:i + S]; i += S        # (1, C)  f32   folded 1x1 side W
        rh_refs = refs[i:i + S]; i += S        # (H0, Hs) f32  row interp
        rwt_refs = refs[i:i + S]; i += S       # (Ws, W0) f32  col interp (T)
        o_ref = refs[i]; i += 1                # (1, S+1, H0, W0) f32
        xpad_ref = refs[i]; i += 1             # VMEM (Hmax+2, Wmax+2, C) f32
        patch_ref = refs[i]                    # VMEM (HWmax, 9C) bf16

        fused = jnp.zeros((H0, W0), jnp.float32)

        for s in range(S):                     # static unroll over sides
            H, W = side_hw[s]
            HW = H * W

            # Zero the padded-activation scratch once per side; the 1-pixel
            # halo then stays 0 across all trunk layers of this side.
            xpad_ref[...] = jnp.zeros(xpad_ref.shape, xpad_ref.dtype)

            y = x_refs[s][0].astype(jnp.float32)            # (H, W, C)

            # ---- shared trunk: L x [conv3x3 (pad=1) + folded BN + ReLU] ----
            for l in range(L):
                xpad_ref[1:H + 1, 1:W + 1, :] = y           # interior only
                # im2col: pack the 9 shifted taps along lanes -> (HW, 9C).
                # kh rides the free outer dim; the kw sublane fixups run on
                # otherwise-idle XLU/load slots (tiny at these sizes).
                t = 0
                for kh in range(3):
                    for kw in range(3):
                        tap = xpad_ref[kh:kh + H, kw:kw + W, :].reshape(HW, C)
                        patch_ref[0:HW, t * C:(t + 1) * C] = tap.astype(
                            patch_ref.dtype)
                        t += 1
                # ONE bf16 MXU matmul with K = 9C, f32 accumulation.
                acc = jnp.dot(patch_ref[0:HW, :], wconv_refs[l][...],
                              preferred_element_type=jnp.float32)   # (HW, C)
                acc = jnp.maximum(acc + bconv_refs[l][...], 0.0)     # f32 VPU
                y = acc.reshape(H, W, C)

            # ---- side head: 1x1 conv (+BN), then bilinear resize ----------
            # Channel contraction over C=8 lanes: a few VPU/XLU ops on an
            # otherwise-idle unit; kept instead of the (H, W*C) reshape-fold
            # whose minor-dim relayout is not guaranteed to lower.
            q = jnp.sum(y * w1_refs[s][...][None, :, :], axis=-1)    # (H, W)
            p = jnp.dot(rh_refs[s][...], q,
                        preferred_element_type=jnp.float32)          # (H0, W)
            p = jnp.dot(p, rwt_refs[s][...],
                        preferred_element_type=jnp.float32)          # (H0, W0)
            p = p + shifts_ref[s]

            o_ref[0, s] = p                     # side map (known-good layout)
            fused = fused + p * fw_ref[s]       # fuse accumulated in-register

        # ---- fuse: 1x1 conv over the S side maps ---------------------------
        o_ref[0, S] = fused + fb_ref[0]

    return kernel


# ---------------------------------------------------------------------------
# Glue: bilinear (align_corners=False) interpolation matrices, params, forward
# ---------------------------------------------------------------------------
def bilinear_matrix(out_size, in_size):
    """Row i: weights over input pixels for output pixel i, matching
    F.interpolate(mode='bilinear', align_corners=False) along one axis."""
    if out_size == in_size:
        return jnp.eye(out_size, dtype=jnp.float32)
    scale = in_size / out_size
    i = np.arange(out_size)
    src = np.maximum(scale * (i + 0.5) - 0.5, 0.0)
    i0 = np.minimum(np.floor(src).astype(np.int64), in_size - 1)
    i1 = np.minimum(i0 + 1, in_size - 1)
    l1 = src - i0
    l0 = 1.0 - l1
    m = np.zeros((out_size, in_size), dtype=np.float32)
    m[i, i0] += l0
    m[i, i1] += l1
    return jnp.asarray(m)


def init_params(key, f_channels, num_sides, num_layers=2):
    C = f_channels
    keys = iter(jax.random.split(key, num_layers * 5 + num_sides * 5))
    conv = []
    for _ in range(num_layers):
        w = jax.random.normal(next(keys), (3, 3, C, C), jnp.float32) / np.sqrt(9 * C)
        gamma = 1.0 + 0.1 * jax.random.normal(next(keys), (C,), jnp.float32)
        beta = 0.1 * jax.random.normal(next(keys), (C,), jnp.float32)
        mean = 0.1 * jax.random.normal(next(keys), (C,), jnp.float32)
        var = 1.0 + 0.1 * jax.random.uniform(next(keys), (C,), jnp.float32)
        scale = gamma / jnp.sqrt(var + EPS)
        conv.append((w * scale[None, None, None, :],
                     (beta - scale * mean).reshape(1, C)))
    sides = []
    for _ in range(num_sides):
        w = jax.random.normal(next(keys), (C,), jnp.float32) / np.sqrt(C)
        gamma = 1.0 + 0.1 * jax.random.normal(next(keys), (1,), jnp.float32)
        beta = 0.1 * jax.random.normal(next(keys), (1,), jnp.float32)
        mean = 0.1 * jax.random.normal(next(keys), (1,), jnp.float32)
        var = 1.0 + 0.1 * jax.random.uniform(next(keys), (1,), jnp.float32)
        scale = gamma / jnp.sqrt(var + EPS)
        sides.append(((w * scale).reshape(1, C),
                      (beta - scale * mean).reshape(1)))
    fuse_w = jnp.full((num_sides,), 1.0 / num_sides, jnp.float32)  # nn.init.constant_
    fuse_b = jnp.zeros((1,), jnp.float32)
    return dict(conv=conv, sides=sides, fuse_w=fuse_w, fuse_b=fuse_b)


def conv_side_head_forward(cs_nchw, params):
    """Returns (ps, p): ps = list of (N,1,H0,W0); p = (N,1,H0,W0) — like PyTorch."""
    cs = [jnp.transpose(c, (0, 2, 3, 1)) for c in cs_nchw]   # NCHW -> NHWC
    N, H0, W0, C = cs[0].shape
    S = len(cs)
    L = len(params["conv"])
    side_hw = [(c.shape[1], c.shape[2]) for c in cs]
    Hmax = max(h for h, _ in side_hw)
    Wmax = max(w for _, w in side_hw)
    HWmax = max(h * w for h, w in side_hw)

    # bf16 operands for the MXU / halved HBM DMA; math stays f32 in-kernel.
    xs = [c.astype(jnp.bfloat16) for c in cs]
    wconv = [w.reshape(9 * C, C).astype(jnp.bfloat16) for w, _ in params["conv"]]
    bconv = [b for _, b in params["conv"]]
    w1 = [w for w, _ in params["sides"]]
    shifts = jnp.concatenate([sh for _, sh in params["sides"]])       # (S,)
    rh_list = [bilinear_matrix(H0, h) for h, _ in side_hw]            # (H0, Hs)
    rwt_list = [bilinear_matrix(W0, w).T for _, w in side_hw]         # (Ws, W0)

    smem = pl.BlockSpec(memory_space=pltpu.MemorySpace.SMEM)
    in_specs = [smem, smem, smem]
    args = [shifts, params["fuse_w"], params["fuse_b"]]
    for s in range(S):
        Hs, Ws = side_hw[s]
        in_specs.append(pl.BlockSpec((1, Hs, Ws, C), lambda n: (n, 0, 0, 0)))
        args.append(xs[s])
    for l in range(L):  # constant index_map -> weights stay VMEM-resident
        in_specs.append(pl.BlockSpec((9 * C, C), lambda n: (0, 0)))
        args.append(wconv[l])
    for l in range(L):
        in_specs.append(pl.BlockSpec((1, C), lambda n: (0, 0)))
        args.append(bconv[l])
    for s in range(S):
        in_specs.append(pl.BlockSpec((1, C), lambda n: (0, 0)))
        args.append(w1[s])
    for s in range(S):
        Hs, _ = side_hw[s]
        in_specs.append(pl.BlockSpec((H0, Hs), lambda n: (0, 0)))
        args.append(rh_list[s])
    for s in range(S):
        _, Ws = side_hw[s]
        in_specs.append(pl.BlockSpec((Ws, W0), lambda n: (0, 0)))
        args.append(rwt_list[s])

    # Advisory cost estimate (flops ~ trunk matmuls + resize matmuls).
    flops = 0
    for Hs, Ws in side_hw:
        hw = Hs * Ws
        flops += L * 2 * hw * 9 * C * C          # trunk convs
        flops += 2 * hw * C                      # 1x1 side conv
        flops += 2 * H0 * Hs * Ws + 2 * H0 * Ws * W0   # bilinear resize
    flops += 2 * S * H0 * W0                     # fuse
    flops *= N
    bytes_acc = sum(int(np.prod(a.shape)) * a.dtype.itemsize for a in args)
    bytes_acc += N * (S + 1) * H0 * W0 * 4

    kernel = _make_fused_kernel(S, L, side_hw, H0, W0, C)
    out = pl.pallas_call(
        kernel,
        out_shape=jax.ShapeDtypeStruct((N, S + 1, H0, W0), jnp.float32),
        grid=(N,),
        in_specs=in_specs,
        out_specs=pl.BlockSpec((1, S + 1, H0, W0), lambda n: (n, 0, 0, 0)),
        scratch_shapes=[
            pltpu.VMEM((Hmax + 2, Wmax + 2, C), jnp.float32),   # padded act
            pltpu.VMEM((HWmax, 9 * C), jnp.bfloat16),           # im2col patches
        ],
        compiler_params=pltpu.CompilerParams(
            dimension_semantics=("parallel",),   # batch -> both TCs on v7x
            vmem_limit_bytes=32 * 1024 * 1024),  # explicit; fits all gens
        cost_estimate=pl.CostEstimate(
            flops=int(flops), transcendentals=0, bytes_accessed=int(bytes_acc)),
    )(*args)

    ps = [out[:, s:s + 1] for s in range(S)]     # each (N, 1, H0, W0)
    p = out[:, S:S + 1]                          # (N, 1, H0, W0)
    return ps, p


if __name__ == "__main__":
    key = jax.random.PRNGKey(0)
    N, C = 2, 8
    side_in_channels = [C, C]          # two side inputs, shared f_channels = 8
    k0, k1, kp = jax.random.split(key, 3)
    c0 = jax.random.normal(k0, (N, C, 16, 16), jnp.float32)   # highest resolution
    c1 = jax.random.normal(k1, (N, C, 8, 8), jnp.float32)     # upsampled to 16x16

    params = init_params(kp, C, len(side_in_channels), num_layers=2)
    ps, p = conv_side_head_forward([c0, c1], params)

    p = jax.block_until_ready(p)
    for x in ps:
        jax.block_until_ready(x)

    # Sanity: fuse weights are 1/S and bias 0 -> fused map equals mean of sides.
    ref = jnp.mean(jnp.concatenate(ps, axis=1), axis=1, keepdims=True)
    assert p.shape == (N, 1, 16, 16) and all(x.shape == (N, 1, 16, 16) for x in ps)
    assert jnp.allclose(p, ref, atol=1e-4), "fuse output mismatch"
    print("KERNEL_OK")
</pallas_src>

<mosaic_0001>
module attributes {stable_mosaic.version = 11 : i64} {
  func.func @kernel(%arg0: i32, %arg1: memref<2xf32, #tpu.memory_space<smem>>, %arg2: memref<2xf32, #tpu.memory_space<smem>>, %arg3: memref<1xf32, #tpu.memory_space<smem>>, %arg4: memref<1x16x16x8xbf16, #tpu.memory_space<vmem>>, %arg5: memref<1x8x8x8xbf16, #tpu.memory_space<vmem>>, %arg6: memref<72x8xbf16, #tpu.memory_space<vmem>>, %arg7: memref<72x8xbf16, #tpu.memory_space<vmem>>, %arg8: memref<1x8xf32, #tpu.memory_space<vmem>>, %arg9: memref<1x8xf32, #tpu.memory_space<vmem>>, %arg10: memref<1x8xf32, #tpu.memory_space<vmem>>, %arg11: memref<1x8xf32, #tpu.memory_space<vmem>>, %arg12: memref<16x16xf32, #tpu.memory_space<vmem>>, %arg13: memref<16x8xf32, #tpu.memory_space<vmem>>, %arg14: memref<16x16xf32, #tpu.memory_space<vmem>>, %arg15: memref<8x16xf32, #tpu.memory_space<vmem>>, %arg16: memref<1x3x16x16xf32, #tpu.memory_space<vmem>>, %arg17: memref<18x18x8xf32, #tpu.memory_space<vmem>>, %arg18: memref<256x72xbf16, #tpu.memory_space<vmem>>) attributes {dimension_semantics = [#tpu.dimension_semantics<parallel>], iteration_bounds = array<i64: 2>, scalar_prefetch = 0 : i64, scratch_operands = 2 : i64, tpu.core_type = #tpu.core_type<tc>, window_params = [{transform_indices = @transform_0, window_bounds = array<i64: 2>}, {transform_indices = @transform_1, window_bounds = array<i64: 2>}, {transform_indices = @transform_2, window_bounds = array<i64: 1>}, {transform_indices = @transform_3, window_bounds = array<i64: 1, 16, 16, 8>}, {transform_indices = @transform_4, window_bounds = array<i64: 1, 8, 8, 8>}, {pipeline_mode = #tpu.pipeline_mode<synchronous>, transform_indices = @transform_5, window_bounds = array<i64: 72, 8>}, {pipeline_mode = #tpu.pipeline_mode<synchronous>, transform_indices = @transform_6, window_bounds = array<i64: 72, 8>}, {pipeline_mode = #tpu.pipeline_mode<synchronous>, transform_indices = @transform_7, window_bounds = array<i64: 1, 8>}, {pipeline_mode = #tpu.pipeline_mode<synchronous>, transform_indices = @transform_8, window_bounds = array<i64: 1, 8>}, {pipeline_mode = #tpu.pipeline_mode<synchronous>, transform_indices = @transform_9, window_bounds = array<i64: 1, 8>}, {pipeline_mode = #tpu.pipeline_mode<synchronous>, transform_indices = @transform_10, window_bounds = array<i64: 1, 8>}, {pipeline_mode = #tpu.pipeline_mode<synchronous>, transform_indices = @transform_11, window_bounds = array<i64: 16, 16>}, {pipeline_mode = #tpu.pipeline_mode<synchronous>, transform_indices = @transform_12, window_bounds = array<i64: 16, 8>}, {pipeline_mode = #tpu.pipeline_mode<synchronous>, transform_indices = @transform_13, window_bounds = array<i64: 16, 16>}, {pipeline_mode = #tpu.pipeline_mode<synchronous>, transform_indices = @transform_14, window_bounds = array<i64: 8, 16>}, {transform_indices = @transform_15, window_bounds = array<i64: 1, 3, 16, 16>}]} {
    %cst = arith.constant 0.000000e+00 : f32
    %0 = vector.broadcast %cst : f32 to vector<16x16xf32>
    %cst_0 = arith.constant 0.000000e+00 : f32
    %1 = vector.broadcast %cst_0 : f32 to vector<18x18x8xf32>
    %c0 = arith.constant 0 : index
    %c0_1 = arith.constant 0 : index
    %c0_2 = arith.constant 0 : index
    %2 = vector.load %arg17[%c0, %c0_1, %c0_2] : memref<18x18x8xf32, #tpu.memory_space<vmem>>, vector<18x18x8xf32>
    tpu.vector_store %arg17[%c0, %c0_1, %c0_2], %1 {strides = array<i32>} : memref<18x18x8xf32, #tpu.memory_space<vmem>>, vector<18x18x8xf32>,
    %c0_3 = arith.constant 0 : index
    %c0_4 = arith.constant 0 : index
    %c0_5 = arith.constant 0 : index
    %c0_6 = arith.constant 0 : index
    %3 = vector.load %arg4[%c0_3, %c0_4, %c0_5, %c0_6] : memref<1x16x16x8xbf16, #tpu.memory_space<vmem>>, vector<1x16x16x8xbf16>
    %4 = vector.shape_cast %3 : vector<1x16x16x8xbf16> to vector<16x16x8xbf16>
    %5 = arith.extf %4 : vector<16x16x8xbf16> to vector<16x16x8xf32>
    %c1 = arith.constant 1 : index
    %c1_7 = arith.constant 1 : index
    %c0_8 = arith.constant 0 : index
    %6 = vector.load %arg17[%c1, %c1_7, %c0_8] : memref<18x18x8xf32, #tpu.memory_space<vmem>>, vector<16x16x8xf32>
    tpu.vector_store %arg17[%c1, %c1_7, %c0_8], %5 {strides = array<i32>} : memref<18x18x8xf32, #tpu.memory_space<vmem>>, vector<16x16x8xf32>,
    %c0_9 = arith.constant 0 : index
    %c0_10 = arith.constant 0 : index
    %c0_11 = arith.constant 0 : index
    %7 = vector.load %arg17[%c0_9, %c0_10, %c0_11] : memref<18x18x8xf32, #tpu.memory_space<vmem>>, vector<16x16x8xf32>
    %8 = vector.shape_cast %7 : vector<16x16x8xf32> to vector<256x8xf32>
    %9 = arith.truncf %8 : vector<256x8xf32> to vector<256x8xbf16>
    %c0_12 = arith.constant 0 : index
    %c0_13 = arith.constant 0 : index
    %10 = vector.load %arg18[%c0_12, %c0_13] : memref<256x72xbf16, #tpu.memory_space<vmem>>, vector<256x8xbf16>
    tpu.vector_store %arg18[%c0_12, %c0_13], %9 {strides = array<i32>} : memref<256x72xbf16, #tpu.memory_space<vmem>>, vector<256x8xbf16>,
    %c0_14 = arith.constant 0 : index
    %c1_15 = arith.constant 1 : index
    %c0_16 = arith.constant 0 : index
    %11 = vector.load %arg17[%c0_14, %c1_15, %c0_16] : memref<18x18x8xf32, #tpu.memory_space<vmem>>, vector<16x16x8xf32>
    %12 = vector.shape_cast %11 : vector<16x16x8xf32> to vector<256x8xf32>
    %13 = arith.truncf %12 : vector<256x8xf32> to vector<256x8xbf16>
    %c0_17 = arith.constant 0 : index
    %c8 = arith.constant 8 : index
    %14 = vector.load %arg18[%c0_17, %c8] : memref<256x72xbf16, #tpu.memory_space<vmem>>, vector<256x8xbf16>
    tpu.vector_store %arg18[%c0_17, %c8], %13 {strides = array<i32>} : memref<256x72xbf16, #tpu.memory_space<vmem>>, vector<256x8xbf16>,
    %c0_18 = arith.constant 0 : index
    %c2 = arith.constant 2 : index
    %c0_19 = arith.constant 0 : index
    %15 = vector.load %arg17[%c0_18, %c2, %c0_19] : memref<18x18x8xf32, #tpu.memory_space<vmem>>, vector<16x16x8xf32>
    %16 = vector.shape_cast %15 : vector<16x16x8xf32> to vector<256x8xf32>
    %17 = arith.truncf %16 : vector<256x8xf32> to vector<256x8xbf16>
    %c0_20 = arith.constant 0 : index
    %c16 = arith.constant 16 : index
    %18 = vector.load %arg18[%c0_20, %c16] : memref<256x72xbf16, #tpu.memory_space<vmem>>, vector<256x8xbf16>
    tpu.vector_store %arg18[%c0_20, %c16], %17 {strides = array<i32>} : memref<256x72xbf16, #tpu.memory_space<vmem>>, vector<256x8xbf16>,
    %c1_21 = arith.constant 1 : index
    %c0_22 = arith.constant 0 : index
    %c0_23 = arith.constant 0 : index
    %19 = vector.load %arg17[%c1_21, %c0_22, %c0_23] : memref<18x18x8xf32, #tpu.memory_space<vmem>>, vector<16x16x8xf32>
    %20 = vector.shape_cast %19 : vector<16x16x8xf32> to vector<256x8xf32>
    %21 = arith.truncf %20 : vector<256x8xf32> to vector<256x8xbf16>
    %c0_24 = arith.constant 0 : index
    %c24 = arith.constant 24 : index
    %22 = vector.load %arg18[%c0_24, %c24] : memref<256x72xbf16, #tpu.memory_space<vmem>>, vector<256x8xbf16>
    tpu.vector_store %arg18[%c0_24, %c24], %21 {strides = array<i32>} : memref<256x72xbf16, #tpu.memory_space<vmem>>, vector<256x8xbf16>,
    %c1_25 = arith.constant 1 : index
    %c1_26 = arith.constant 1 : index
    %c0_27 = arith.constant 0 : index
    %23 = vector.load %arg17[%c1_25, %c1_26, %c0_27] : memref<18x18x8xf32, #tpu.memory_space<vmem>>, vector<16x16x8xf32>
    %24 = vector.shape_cast %23 : vector<16x16x8xf32> to vector<256x8xf32>
    %25 = arith.truncf %24 : vector<256x8xf32> to vector<256x8xbf16>
    %c0_28 = arith.constant 0 : index
    %c32 = arith.constant 32 : index
    %26 = vector.load %arg18[%c0_28, %c32] : memref<256x72xbf16, #tpu.memory_space<vmem>>, vector<256x8xbf16>
    tpu.vector_store %arg18[%c0_28, %c32], %25 {strides = array<i32>} : memref<256x72xbf16, #tpu.memory_space<vmem>>, vector<256x8xbf16>,
    %c1_29 = arith.constant 1 : index
    %c2_30 = arith.constant 2 : index
    %c0_31 = arith.constant 0 : index
    %27 = vector.load %arg17[%c1_29, %c2_30, %c0_31] : memref<18x18x8xf32, #tpu.memory_space<vmem>>, vector<16x16x8xf32>
    %28 = vector.shape_cast %27 : vector<16x16x8xf32> to vector<256x8xf32>
    %29 = arith.truncf %28 : vector<256x8xf32> to vector<256x8xbf16>
    %c0_32 = arith.constant 0 : index
    %c40 = arith.constant 40 : index
    %30 = vector.load %arg18[%c0_32, %c40] : memref<256x72xbf16, #tpu.memory_space<vmem>>, vector<256x8xbf16>
    tpu.vector_store %arg18[%c0_32, %c40], %29 {strides = array<i32>} : memref<256x72xbf16, #tpu.memory_space<vmem>>, vector<256x8xbf16>,
    %c2_33 = arith.constant 2 : index
    %c0_34 = arith.constant 0 : index
    %c0_35 = arith.constant 0 : index
    %31 = vector.load %arg17[%c2_33, %c0_34, %c0_35] : memref<18x18x8xf32, #tpu.memory_space<vmem>>, vector<16x16x8xf32>
    %32 = vector.shape_cast %31 : vector<16x16x8xf32> to vector<256x8xf32>
    %33 = arith.truncf %32 : vector<256x8xf32> to vector<256x8xbf16>
    %c0_36 = arith.constant 0 : index
    %c48 = arith.constant 48 : index
    %34 = vector.load %arg18[%c0_36, %c48] : memref<256x72xbf16, #tpu.memory_space<vmem>>, vector<256x8xbf16>
    tpu.vector_store %arg18[%c0_36, %c48], %33 {strides = array<i32>} : memref<256x72xbf16, #tpu.memory_space<vmem>>, vector<256x8xbf16>,
    %c2_37 = arith.constant 2 : index
    %c1_38 = arith.constant 1 : index
    %c0_39 = arith.constant 0 : index
    %35 = vector.load %arg17[%c2_37, %c1_38, %c0_39] : memref<18x18x8xf32, #tpu.memory_space<vmem>>, vector<16x16x8xf32>
    %36 = vector.shape_cast %35 : vector<16x16x8xf32> to vector<256x8xf32>
    %37 = arith.truncf %36 : vector<256x8xf32> to vector<256x8xbf16>
    %c0_40 = arith.constant 0 : index
    %c56 = arith.constant 56 : index
    %38 = vector.load %arg18[%c0_40, %c56] : memref<256x72xbf16, #tpu.memory_space<vmem>>, vector<256x8xbf16>
    tpu.vector_store %arg18[%c0_40, %c56], %37 {strides = array<i32>} : memref<256x72xbf16, #tpu.memory_space<vmem>>, vector<256x8xbf16>,
    %c2_41 = arith.constant 2 : index
    %c2_42 = arith.constant 2 : index
    %c0_43 = arith.constant 0 : index
    %39 = vector.load %arg17[%c2_41, %c2_42, %c0_43] : memref<18x18x8xf32, #tpu.memory_space<vmem>>, vector<16x16x8xf32>
    %40 = vector.shape_cast %39 : vector<16x16x8xf32> to vector<256x8xf32>
    %41 = arith.truncf %40 : vector<256x8xf32> to vector<256x8xbf16>
    %c0_44 = arith.constant 0 : index
    %c64 = arith.constant 64 : index
    %42 = vector.load %arg18[%c0_44, %c64] : memref<256x72xbf16, #tpu.memory_space<vmem>>, vector<256x8xbf16>
    tpu.vector_store %arg18[%c0_44, %c64], %41 {strides = array<i32>} : memref<256x72xbf16, #tpu.memory_space<vmem>>, vector<256x8xbf16>,
    %c0_45 = arith.constant 0 : index
    %c0_46 = arith.constant 0 : index
    %43 = vector.load %arg18[%c0_45, %c0_46] : memref<256x72xbf16, #tpu.memory_space<vmem>>, vector<256x72xbf16>
    %c0_47 = arith.constant 0 : index
    %c0_48 = arith.constant 0 : index
    %44 = vector.load %arg6[%c0_47, %c0_48] : memref<72x8xbf16, #tpu.memory_space<vmem>>, vector<72x8xbf16>
    %cst_49 = arith.constant dense<0.000000e+00> : vector<256x8xf32>
    %45 = tpu.matmul %43, %44, %cst_49 {dimension_numbers = #tpu.dot_dimension_numbers<[1], [0], [0], [1], [0, 0, 1, 1], [], []>} : vector<256x72xbf16>, vector<72x8xbf16>, vector<256x8xf32> -> vector<256x8xf32>
    %c0_50 = arith.constant 0 : index
    %c0_51 = arith.constant 0 : index
    %46 = vector.load %arg8[%c0_50, %c0_51] : memref<1x8xf32, #tpu.memory_space<vmem>>, vector<1x8xf32>
    %47 = vector.broadcast %46 : vector<1x8xf32> to vector<256x8xf32>
    %48 = arith.addf %45, %47 : vector<256x8xf32>
    %cst_52 = arith.constant 0.000000e+00 : f32
    %49 = vector.broadcast %cst_52 : f32 to vector<256x8xf32>
    %50 = arith.maximumf %48, %49 : vector<256x8xf32>
    %51 = vector.shape_cast %50 : vector<256x8xf32> to vector<16x16x8xf32>
    %c1_53 = arith.constant 1 : index
    %c1_54 = arith.constant 1 : index
    %c0_55 = arith.constant 0 : index
    %52 = vector.load %arg17[%c1_53, %c1_54, %c0_55] : memref<18x18x8xf32, #tpu.memory_space<vmem>>, vector<16x16x8xf32>
    tpu.vector_store %arg17[%c1_53, %c1_54, %c0_55], %51 {strides = array<i32>} : memref<18x18x8xf32, #tpu.memory_space<vmem>>, vector<16x16x8xf32>,
    %c0_56 = arith.constant 0 : index
    %c0_57 = arith.constant 0 : index
    %c0_58 = arith.constant 0 : index
    %53 = vector.load %arg17[%c0_56, %c0_57, %c0_58] : memref<18x18x8xf32, #tpu.memory_space<vmem>>, vector<16x16x8xf32>
    %54 = vector.shape_cast %53 : vector<16x16x8xf32> to vector<256x8xf32>
    %55 = arith.truncf %54 : vector<256x8xf32> to vector<256x8xbf16>
    %c0_59 = arith.constant 0 : index
    %c0_60 = arith.constant 0 : index
    %56 = vector.load %arg18[%c0_59, %c0_60] : memref<256x72xbf16, #tpu.memory_space<vmem>>, vector<256x8xbf16>
    tpu.vector_store %arg18[%c0_59, %c0_60], %55 {strides = array<i32>} : memref<256x72xbf16, #tpu.memory_space<vmem>>, vector<256x8xbf16>,
    %c0_61 = arith.constant 0 : index
    %c1_62 = arith.constant 1 : index
    %c0_63 = arith.constant 0 : index
    %57 = vector.load %arg17[%c0_61, %c1_62, %c0_63] : memref<18x18x8xf32, #tpu.memory_space<vmem>>, vector<16x16x8xf32>
    %58 = vector.shape_cast %57 : vector<16x16x8xf32> to vector<256x8xf32>
    %59 = arith.truncf %58 : vector<256x8xf32> to vector<256x8xbf16>
    %c0_64 = arith.constant 0 : index
    %c8_65 = arith.constant 8 : index
    %60 = vector.load %arg18[%c0_64, %c8_65] : memref<256x72xbf16, #tpu.memory_space<vmem>>, vector<256x8xbf16>
    tpu.vector_store %arg18[%c0_64, %c8_65], %59 {strides = array<i32>} : memref<256x72xbf16, #tpu.memory_space<vmem>>, vector<256x8xbf16>,
    %c0_66 = arith.constant 0 : index
    %c2_67 = arith.constant 2 : index
    %c0_68 = arith.constant 0 : index
    %61 = vector.load %arg17[%c0_66, %c2_67, %c0_68] : memref<18x18x8xf32, #tpu.memory_space<vmem>>, vector<16x16x8xf32>
    %62 = vector.shape_cast %61 : vector<16x16x8xf32> to vector<256x8xf32>
    %63 = arith.truncf %62 : vector<256x8xf32> to vector<256x8xbf16>
    %c0_69 = arith.constant 0 : index
    %c16_70 = arith.constant 16 : index
    %64 = vector.load %arg18[%c0_69, %c16_70] : memref<256x72xbf16, #tpu.memory_space<vmem>>, vector<256x8xbf16>
    tpu.vector_store %arg18[%c0_69, %c16_70], %63 {strides = array<i32>} : memref<256x72xbf16, #tpu.memory_space<vmem>>, vector<256x8xbf16>,
    %c1_71 = arith.constant 1 : index
    %c0_72 = arith.constant 0 : index
    %c0_73 = arith.constant 0 : index
    %65 = vector.load %arg17[%c1_71, %c0_72, %c0_73] : memref<18x18x8xf32, #tpu.memory_space<vmem>>, vector<16x16x8xf32>
    %66 = vector.shape_cast %65 : vector<16x16x8xf32> to vector<256x8xf32>
    %67 = arith.truncf %66 : vector<256x8xf32> to vector<256x8xbf16>
    %c0_74 = arith.constant 0 : index
    %c24_75 = arith.constant 24 : index
    %68 = vector.load %arg18[%c0_74, %c24_75] : memref<256x72xbf16, #tpu.memory_space<vmem>>, vector<256x8xbf16>
    tpu.vector_store %arg18[%c0_74, %c24_75], %67 {strides = array<i32>} : memref<256x72xbf16, #tpu.memory_space<vmem>>, vector<256x8xbf16>,
    %c1_76 = arith.constant 1 : index
    %c1_77 = arith.constant 1 : index
    %c0_78 = arith.constant 0 : index
    %69 = vector.load %arg17[%c1_76, %c1_77, %c0_78] : memref<18x18x8xf32, #tpu.memory_space<vmem>>, vector<16x16x8xf32>
    %70 = vector.shape_cast %69 : vector<16x16x8xf32> to vector<256x8xf32>
    %71 = arith.truncf %70 : vector<256x8xf32> to vector<256x8xbf16>
    %c0_79 = arith.constant 0 : index
    %c32_80 = arith.constant 32 : index
    %72 = vector.load %arg18[%c0_79, %c32_80] : memref<256x72xbf16, #tpu.memory_space<vmem>>, vector<256x8xbf16>
    tpu.vector_store %arg18[%c0_79, %c32_80], %71 {strides = array<i32>} : memref<256x72xbf16, #tpu.memory_space<vmem>>, vector<256x8xbf16>,
    %c1_81 = arith.constant 1 : index
    %c2_82 = arith.constant 2 : index
    %c0_83 = arith.constant 0 : index
    %73 = vector.load %arg17[%c1_81, %c2_82, %c0_83] : memref<18x18x8xf32, #tpu.memory_space<vmem>>, vector<16x16x8xf32>
    %74 = vector.shape_cast %73 : vector<16x16x8xf32> to vector<256x8xf32>
    %75 = arith.truncf %74 : vector<256x8xf32> to vector<256x8xbf16>
    %c0_84 = arith.constant 0 : index
    %c40_85 = arith.constant 40 : index
    %76 = vector.load %arg18[%c0_84, %c40_85] : memref<256x72xbf16, #tpu.memory_space<vmem>>, vector<256x8xbf16>
    tpu.vector_store %arg18[%c0_84, %c40_85], %75 {strides = array<i32>} : memref<256x72xbf16, #tpu.memory_space<vmem>>, vector<256x8xbf16>,
    %c2_86 = arith.constant 2 : index
    %c0_87 = arith.constant 0 : index
    %c0_88 = arith.constant 0 : index
    %77 = vector.load %arg17[%c2_86, %c0_87, %c0_88] : memref<18x18x8xf32, #tpu.memory_space<vmem>>, vector<16x16x8xf32>
    %78 = vector.shape_cast %77 : vector<16x16x8xf32> to vector<256x8xf32>
    %79 = arith.truncf %78 : vector<256x8xf32> to vector<256x8xbf16>
    %c0_89 = arith.constant 0 : index
    %c48_90 = arith.constant 48 : index
    %80 = vector.load %arg18[%c0_89, %c48_90] : memref<256x72xbf16, #tpu.memory_space<vmem>>, vector<256x8xbf16>
    tpu.vector_store %arg18[%c0_89, %c48_90], %79 {strides = array<i32>} : memref<256x72xbf16, #tpu.memory_space<vmem>>, vector<256x8xbf16>,
    %c2_91 = arith.constant 2 : index
    %c1_92 = arith.constant 1 : index
    %c0_93 = arith.constant 0 : index
    %81 = vector.load %arg17[%c2_91, %c1_92, %c0_93] : memref<18x18x8xf32, #tpu.memory_space<vmem>>, vector<16x16x8xf32>
    %82 = vector.shape_cast %81 : vector<16x16x8xf32> to vector<256x8xf32>
    %83 = arith.truncf %82 : vector<256x8xf32> to vector<256x8xbf16>
    %c0_94 = arith.constant 0 : index
    %c56_95 = arith.constant 56 : index
    %84 = vector.load %arg18[%c0_94, %c56_95] : memref<256x72xbf16, #tpu.memory_space<vmem>>, vector<256x8xbf16>
    tpu.vector_store %arg18[%c0_94, %c56_95], %83 {strides = array<i32>} : memref<256x72xbf16, #tpu.memory_space<vmem>>, vector<256x8xbf16>,
    %c2_96 = arith.constant 2 : index
    %c2_97 = arith.constant 2 : index
    %c0_98 = arith.constant 0 : index
    %85 = vector.load %arg17[%c2_96, %c2_97, %c0_98] : memref<18x18x8xf32, #tpu.memory_space<vmem>>, vector<16x16x8xf32>
    %86 = vector.shape_cast %85 : vector<16x16x8xf32> to vector<256x8xf32>
    %87 = arith.truncf %86 : vector<256x8xf32> to vector<256x8xbf16>
    %c0_99 = arith.constant 0 : index
    %c64_100 = arith.constant 64 : index
    %88 = vector.load %arg18[%c0_99, %c64_100] : memref<256x72xbf16, #tpu.memory_space<vmem>>, vector<256x8xbf16>
    tpu.vector_store %arg18[%c0_99, %c64_100], %87 {strides = array<i32>} : memref<256x72xbf16, #tpu.memory_space<vmem>>, vector<256x8xbf16>,
    %c0_101 = arith.constant 0 : index
    %c0_102 = arith.constant 0 : index
    %89 = vector.load %arg18[%c0_101, %c0_102] : memref<256x72xbf16, #tpu.memory_space<vmem>>, vector<256x72xbf16>
    %c0_103 = arith.constant 0 : index
    %c0_104 = arith.constant 0 : index
    %90 = vector.load %arg7[%c0_103, %c0_104] : memref<72x8xbf16, #tpu.memory_space<vmem>>, vector<72x8xbf16>
    %cst_105 = arith.constant dense<0.000000e+00> : vector<256x8xf32>
    %91 = tpu.matmul %89, %90, %cst_105 {dimension_numbers = #tpu.dot_dimension_numbers<[1], [0], [0], [1], [0, 0, 1, 1], [], []>} : vector<256x72xbf16>, vector<72x8xbf16>, vector<256x8xf32> -> vector<256x8xf32>
    %c0_106 = arith.constant 0 : index
    %c0_107 = arith.constant 0 : index
    %92 = vector.load %arg9[%c0_106, %c0_107] : memref<1x8xf32, #tpu.memory_space<vmem>>, vector<1x8xf32>
    %93 = vector.broadcast %92 : vector<1x8xf32> to vector<256x8xf32>
    %94 = arith.addf %91, %93 : vector<256x8xf32>
    %cst_108 = arith.constant 0.000000e+00 : f32
    %95 = vector.broadcast %cst_108 : f32 to vector<256x8xf32>
    %96 = arith.maximumf %94, %95 : vector<256x8xf32>
    %97 = vector.shape_cast %96 : vector<256x8xf32> to vector<16x16x8xf32>
    %c0_109 = arith.constant 0 : index
    %c0_110 = arith.constant 0 : index
    %98 = vector.load %arg10[%c0_109, %c0_110] : memref<1x8xf32, #tpu.memory_space<vmem>>, vector<1x8xf32>
    %99 = vector.shape_cast %98 : vector<1x8xf32> to vector<1x1x8xf32>
    %100 = vector.broadcast %99 : vector<1x1x8xf32> to vector<16x16x8xf32>
    %101 = arith.mulf %97, %100 : vector<16x16x8xf32>
    %cst_111 = arith.constant dense<0.000000e+00> : vector<16x16xf32>
    %102 = vector.multi_reduction <add>, %101, %cst_111 [2] : vector<16x16x8xf32> to vector<16x16xf32>
    %c0_112 = arith.constant 0 : index
    %c0_113 = arith.constant 0 : index
    %103 = vector.load %arg12[%c0_112, %c0_113] : memref<16x16xf32, #tpu.memory_space<vmem>>, vector<16x16xf32>
    %cst_114 = arith.constant dense<0.000000e+00> : vector<16x16xf32>
    %104 = tpu.matmul %103, %102, %cst_114 {dimension_numbers = #tpu.dot_dimension_numbers<[1], [0], [0], [1], [0, 0, 1, 1], [], []>} : vector<16x16xf32>, vector<16x16xf32>, vector<16x16xf32> -> vector<16x16xf32>
    %c0_115 = arith.constant 0 : index
    %c0_116 = arith.constant 0 : index
    %105 = vector.load %arg14[%c0_115, %c0_116] : memref<16x16xf32, #tpu.memory_space<vmem>>, vector<16x16xf32>
    %cst_117 = arith.constant dense<0.000000e+00> : vector<16x16xf32>
    %106 = tpu.matmul %104, %105, %cst_117 {dimension_numbers = #tpu.dot_dimension_numbers<[1], [0], [0], [1], [0, 0, 1, 1], [], []>} : vector<16x16xf32>, vector<16x16xf32>, vector<16x16xf32> -> vector<16x16xf32>
    %c0_118 = arith.constant 0 : index
    %107 = memref.load %arg1[%c0_118] : memref<2xf32, #tpu.memory_space<smem>>
    %108 = vector.broadcast %107 : f32 to vector<16x16xf32>
    %109 = arith.addf %106, %108 : vector<16x16xf32>
    %c0_119 = arith.constant 0 : index
    %c0_120 = arith.constant 0 : index
    %c0_121 = arith.constant 0 : index
    %c0_122 = arith.constant 0 : index
    %110 = vector.load %arg16[%c0_119, %c0_120, %c0_121, %c0_122] : memref<1x3x16x16xf32, #tpu.memory_space<vmem>>, vector<1x1x16x16xf32>
    %111 = vector.shape_cast %110 : vector<1x1x16x16xf32> to vector<16x16xf32>
    %112 = vector.shape_cast %109 : vector<16x16xf32> to vector<1x1x16x16xf32>
    tpu.vector_store %arg16[%c0_119, %c0_120, %c0_121, %c0_122], %112 {strides = array<i32>} : memref<1x3x16x16xf32, #tpu.memory_space<vmem>>, vector<1x1x16x16xf32>,
    %c0_123 = arith.constant 0 : index
    %113 = memref.load %arg2[%c0_123] : memref<2xf32, #tpu.memory_space<smem>>
    %114 = vector.broadcast %113 : f32 to vector<16x16xf32>
    %115 = arith.mulf %109, %114 : vector<16x16xf32>
    %116 = arith.addf %0, %115 : vector<16x16xf32>
    %cst_124 = arith.constant 0.000000e+00 : f32
    %117 = vector.broadcast %cst_124 : f32 to vector<18x18x8xf32>
    %c0_125 = arith.constant 0 : index
    %c0_126 = arith.constant 0 : index
    %c0_127 = arith.constant 0 : index
    %118 = vector.load %arg17[%c0_125, %c0_126, %c0_127] : memref<18x18x8xf32, #tpu.memory_space<vmem>>, vector<18x18x8xf32>
    tpu.vector_store %arg17[%c0_125, %c0_126, %c0_127], %117 {strides = array<i32>} : memref<18x18x8xf32, #tpu.memory_space<vmem>>, vector<18x18x8xf32>,
    %c0_128 = arith.constant 0 : index
    %c0_129 = arith.constant 0 : index
    %c0_130 = arith.constant 0 : index
    %c0_131 = arith.constant 0 : index
    %119 = vector.load %arg5[%c0_128, %c0_129, %c0_130, %c0_131] : memref<1x8x8x8xbf16, #tpu.memory_space<vmem>>, vector<1x8x8x8xbf16>
    %120 = vector.shape_cast %119 : vector<1x8x8x8xbf16> to vector<8x8x8xbf16>
    %121 = arith.extf %120 : vector<8x8x8xbf16> to vector<8x8x8xf32>
    %c1_132 = arith.constant 1 : index
    %c1_133 = arith.constant 1 : index
    %c0_134 = arith.constant 0 : index
    %122 = vector.load %arg17[%c1_132, %c1_133, %c0_134] : memref<18x18x8xf32, #tpu.memory_space<vmem>>, vector<8x8x8xf32>
    tpu.vector_store %arg17[%c1_132, %c1_133, %c0_134], %121 {strides = array<i32>} : memref<18x18x8xf32, #tpu.memory_space<vmem>>, vector<8x8x8xf32>,
    %c0_135 = arith.constant 0 : index
    %c0_136 = arith.constant 0 : index
    %c0_137 = arith.constant 0 : index
    %123 = vector.load %arg17[%c0_135, %c0_136, %c0_137] : memref<18x18x8xf32, #tpu.memory_space<vmem>>, vector<8x8x8xf32>
    %124 = vector.shape_cast %123 : vector<8x8x8xf32> to vector<64x8xf32>
    %125 = arith.truncf %124 : vector<64x8xf32> to vector<64x8xbf16>
    %c0_138 = arith.constant 0 : index
    %c0_139 = arith.constant 0 : index
    %126 = vector.load %arg18[%c0_138, %c0_139] : memref<256x72xbf16, #tpu.memory_space<vmem>>, vector<64x8xbf16>
    tpu.vector_store %arg18[%c0_138, %c0_139], %125 {strides = array<i32>} : memref<256x72xbf16, #tpu.memory_space<vmem>>, vector<64x8xbf16>,
    %c0_140 = arith.constant 0 : index
    %c1_141 = arith.constant 1 : index
    %c0_142 = arith.constant 0 : index
    %127 = vector.load %arg17[%c0_140, %c1_141, %c0_142] : memref<18x18x8xf32, #tpu.memory_space<vmem>>, vector<8x8x8xf32>
    %128 = vector.shape_cast %127 : vector<8x8x8xf32> to vector<64x8xf32>
    %129 = arith.truncf %128 : vector<64x8xf32> to vector<64x8xbf16>
    %c0_143 = arith.constant 0 : index
    %c8_144 = arith.constant 8 : index
    %130 = vector.load %arg18[%c0_143, %c8_144] : memref<256x72xbf16, #tpu.memory_space<vmem>>, vector<64x8xbf16>
    tpu.vector_store %arg18[%c0_143, %c8_144], %129 {strides = array<i32>} : memref<256x72xbf16, #tpu.memory_space<vmem>>, vector<64x8xbf16>,
    %c0_145 = arith.constant 0 : index
    %c2_146 = arith.constant 2 : index
    %c0_147 = arith.constant 0 : index
    %131 = vector.load %arg17[%c0_145, %c2_146, %c0_147] : memref<18x18x8xf32, #tpu.memory_space<vmem>>, vector<8x8x8xf32>
    %132 = vector.shape_cast %131 : vector<8x8x8xf32> to vector<64x8xf32>
    %133 = arith.truncf %132 : vector<64x8xf32> to vector<64x8xbf16>
    %c0_148 = arith.constant 0 : index
    %c16_149 = arith.constant 16 : index
    %134 = vector.load %arg18[%c0_148, %c16_149] : memref<256x72xbf16, #tpu.memory_space<vmem>>, vector<64x8xbf16>
    tpu.vector_store %arg18[%c0_148, %c16_149], %133 {strides = array<i32>} : memref<256x72xbf16, #tpu.memory_space<vmem>>, vector<64x8xbf16>,
    %c1_150 = arith.constant 1 : index
    %c0_151 = arith.constant 0 : index
    %c0_152 = arith.constant 0 : index
    %135 = vector.load %arg17[%c1_150, %c0_151, %c0_152] : memref<18x18x8xf32, #tpu.memory_space<vmem>>, vector<8x8x8xf32>
    %136 = vector.shape_cast %135 : vector<8x8x8xf32> to vector<64x8xf32>
    %137 = arith.truncf %136 : vector<64x8xf32> to vector<64x8xbf16>
    %c0_153 = arith.constant 0 : index
    %c24_154 = arith.constant 24 : index
    %138 = vector.load %arg18[%c0_153, %c24_154] : memref<256x72xbf16, #tpu.memory_space<vmem>>, vector<64x8xbf16>
    tpu.vector_store %arg18[%c0_153, %c24_154], %137 {strides = array<i32>} : memref<256x72xbf16, #tpu.memory_space<vmem>>, vector<64x8xbf16>,
    %c1_155 = arith.constant 1 : index
    %c1_156 = arith.constant 1 : index
    %c0_157 = arith.constant 0 : index
    %139 = vector.load %arg17[%c1_155, %c1_156, %c0_157] : memref<18x18x8xf32, #tpu.memory_space<vmem>>, vector<8x8x8xf32>
    %140 = vector.shape_cast %139 : vector<8x8x8xf32> to vector<64x8xf32>
    %141 = arith.truncf %140 : vector<64x8xf32> to vector<64x8xbf16>
    %c0_158 = arith.constant 0 : index
    %c32_159 = arith.constant 32 : index
    %142 = vector.load %arg18[%c0_158, %c32_159] : memref<256x72xbf16, #tpu.memory_space<vmem>>, vector<64x8xbf16>
    tpu.vector_store %arg18[%c0_158, %c32_159], %141 {strides = array<i32>} : memref<256x72xbf16, #tpu.memory_space<vmem>>, vector<64x8xbf16>,
    %c1_160 = arith.constant 1 : index
    %c2_161 = arith.constant 2 : index
    %c0_162 = arith.constant 0 : index
    %143 = vector.load %arg17[%c1_160, %c2_161, %c0_162] : memref<18x18x8xf32, #tpu.memory_space<vmem>>, vector<8x8x8xf32>
    %144 = vector.shape_cast %143 : vector<8x8x8xf32> to vector<64x8xf32>
    %145 = arith.truncf %144 : vector<64x8xf32> to vector<64x8xbf16>
    %c0_163 = arith.constant 0 : index
    %c40_164 = arith.constant 40 : index
    %146 = vector.load %arg18[%c0_163, %c40_164] : memref<256x72xbf16, #tpu.memory_space<vmem>>, vector<64x8xbf16>
    tpu.vector_store %arg18[%c0_163, %c40_164], %145 {strides = array<i32>} : memref<256x72xbf16, #tpu.memory_space<vmem>>, vector<64x8xbf16>,
    %c2_165 = arith.constant 2 : index
    %c0_166 = arith.constant 0 : index
    %c0_167 = arith.constant 0 : index
    %147 = vector.load %arg17[%c2_165, %c0_166, %c0_167] : memref<18x18x8xf32, #tpu.memory_space<vmem>>, vector<8x8x8xf32>
    %148 = vector.shape_cast %147 : vector<8x8x8xf32> to vector<64x8xf32>
    %149 = arith.truncf %148 : vector<64x8xf32> to vector<64x8xbf16>
    %c0_168 = arith.constant 0 : index
    %c48_169 = arith.constant 48 : index
    %150 = vector.load %arg18[%c0_168, %c48_169] : memref<256x72xbf16, #tpu.memory_space<vmem>>, vector<64x8xbf16>
    tpu.vector_store %arg18[%c0_168, %c48_169], %149 {strides = array<i32>} : memref<256x72xbf16, #tpu.memory_space<vmem>>, vector<64x8xbf16>,
    %c2_170 = arith.constant 2 : index
    %c1_171 = arith.constant 1 : index
    %c0_172 = arith.constant 0 : index
    %151 = vector.load %arg17[%c2_170, %c1_171, %c0_172] : memref<18x18x8xf32, #tpu.memory_space<vmem>>, vector<8x8x8xf32>
    %152 = vector.shape_cast %151 : vector<8x8x8xf32> to vector<64x8xf32>
    %153 = arith.truncf %152 : vector<64x8xf32> to vector<64x8xbf16>
    %c0_173 = arith.constant 0 : index
    %c56_174 = arith.constant 56 : index
    %154 = vector.load %arg18[%c0_173, %c56_174] : memref<256x72xbf16, #tpu.memory_space<vmem>>, vector<64x8xbf16>
    tpu.vector_store %arg18[%c0_173, %c56_174], %153 {strides = array<i32>} : memref<256x72xbf16, #tpu.memory_space<vmem>>, vector<64x8xbf16>,
    %c2_175 = arith.constant 2 : index
    %c2_176 = arith.constant 2 : index
    %c0_177 = arith.constant 0 : index
    %155 = vector.load %arg17[%c2_175, %c2_176, %c0_177] : memref<18x18x8xf32, #tpu.memory_space<vmem>>, vector<8x8x8xf32>
    %156 = vector.shape_cast %155 : vector<8x8x8xf32> to vector<64x8xf32>
    %157 = arith.truncf %156 : vector<64x8xf32> to vector<64x8xbf16>
    %c0_178 = arith.constant 0 : index
    %c64_179 = arith.constant 64 : index
    %158 = vector.load %arg18[%c0_178, %c64_179] : memref<256x72xbf16, #tpu.memory_space<vmem>>, vector<64x8xbf16>
    tpu.vector_store %arg18[%c0_178, %c64_179], %157 {strides = array<i32>} : memref<256x72xbf16, #tpu.memory_space<vmem>>, vector<64x8xbf16>,
    %c0_180 = arith.constant 0 : index
    %c0_181 = arith.constant 0 : index
    %159 = vector.load %arg18[%c0_180, %c0_181] : memref<256x72xbf16, #tpu.memory_space<vmem>>, vector<64x72xbf16>
    %c0_182 = arith.constant 0 : index
    %c0_183 = arith.constant 0 : index
    %160 = vector.load %arg6[%c0_182, %c0_183] : memref<72x8xbf16, #tpu.memory_space<vmem>>, vector<72x8xbf16>
    %cst_184 = arith.constant dense<0.000000e+00> : vector<64x8xf32>
    %161 = tpu.matmul %159, %160, %cst_184 {dimension_numbers = #tpu.dot_dimension_numbers<[1], [0], [0], [1], [0, 0, 1, 1], [], []>} : vector<64x72xbf16>, vector<72x8xbf16>, vector<64x8xf32> -> vector<64x8xf32>
    %c0_185 = arith.constant 0 : index
    %c0_186 = arith.constant 0 : index
    %162 = vector.load %arg8[%c0_185, %c0_186] : memref<1x8xf32, #tpu.memory_space<vmem>>, vector<1x8xf32>
    %163 = vector.broadcast %162 : vector<1x8xf32> to vector<64x8xf32>
    %164 = arith.addf %161, %163 : vector<64x8xf32>
    %cst_187 = arith.constant 0.000000e+00 : f32
    %165 = vector.broadcast %cst_187 : f32 to vector<64x8xf32>
    %166 = arith.maximumf %164, %165 : vector<64x8xf32>
    %167 = vector.shape_cast %166 : vector<64x8xf32> to vector<8x8x8xf32>
    %c1_188 = arith.constant 1 : index
    %c1_189 = arith.constant 1 : index
    %c0_190 = arith.constant 0 : index
    %168 = vector.load %arg17[%c1_188, %c1_189, %c0_190] : memref<18x18x8xf32, #tpu.memory_space<vmem>>, vector<8x8x8xf32>
    tpu.vector_store %arg17[%c1_188, %c1_189, %c0_190], %167 {strides = array<i32>} : memref<18x18x8xf32, #tpu.memory_space<vmem>>, vector<8x8x8xf32>,
    %c0_191 = arith.constant 0 : index
    %c0_192 = arith.constant 0 : index
    %c0_193 = arith.constant 0 : index
    %169 = vector.load %arg17[%c0_191, %c0_192, %c0_193] : memref<18x18x8xf32, #tpu.memory_space<vmem>>, vector<8x8x8xf32>
    %170 = vector.shape_cast %169 : vector<8x8x8xf32> to vector<64x8xf32>
    %171 = arith.truncf %170 : vector<64x8xf32> to vector<64x8xbf16>
    %c0_194 = arith.constant 0 : index
    %c0_195 = arith.constant 0 : index
    %172 = vector.load %arg18[%c0_194, %c0_195] : memref<256x72xbf16, #tpu.memory_space<vmem>>, vector<64x8xbf16>
    tpu.vector_store %arg18[%c0_194, %c0_195], %171 {strides = array<i32>} : memref<256x72xbf16, #tpu.memory_space<vmem>>, vector<64x8xbf16>,
    %c0_196 = arith.constant 0 : index
    %c1_197 = arith.constant 1 : index
    %c0_198 = arith.constant 0 : index
    %173 = vector.load %arg17[%c0_196, %c1_197, %c0_198] : memref<18x18x8xf32, #tpu.memory_space<vmem>>, vector<8x8x8xf32>
    %174 = vector.shape_cast %173 : vector<8x8x8xf32> to vector<64x8xf32>
    %175 = arith.truncf %174 : vector<64x8xf32> to vector<64x8xbf16>
    %c0_199 = arith.constant 0 : index
    %c8_200 = arith.constant 8 : index
    %176 = vector.load %arg18[%c0_199, %c8_200] : memref<256x72xbf16, #tpu.memory_space<vmem>>, vector<64x8xbf16>
    tpu.vector_store %arg18[%c0_199, %c8_200], %175 {strides = array<i32>} : memref<256x72xbf16, #tpu.memory_space<vmem>>, vector<64x8xbf16>,
    %c0_201 = arith.constant 0 : index
    %c2_202 = arith.constant 2 : index
    %c0_203 = arith.constant 0 : index
    %177 = vector.load %arg17[%c0_201, %c2_202, %c0_203] : memref<18x18x8xf32, #tpu.memory_space<vmem>>, vector<8x8x8xf32>
    %178 = vector.shape_cast %177 : vector<8x8x8xf32> to vector<64x8xf32>
    %179 = arith.truncf %178 : vector<64x8xf32> to vector<64x8xbf16>
    %c0_204 = arith.constant 0 : index
    %c16_205 = arith.constant 16 : index
    %180 = vector.load %arg18[%c0_204, %c16_205] : memref<256x72xbf16, #tpu.memory_space<vmem>>, vector<64x8xbf16>
    tpu.vector_store %arg18[%c0_204, %c16_205], %179 {strides = array<i32>} : memref<256x72xbf16, #tpu.memory_space<vmem>>, vector<64x8xbf16>,
    %c1_206 = arith.constant 1 : index
    %c0_207 = arith.constant 0 : index
    %c0_208 = arith.constant 0 : index
    %181 = vector.load %arg17[%c1_206, %c0_207, %c0_208] : memref<18x18x8xf32, #tpu.memory_space<vmem>>, vector<8x8x8xf32>
    %182 = vector.shape_cast %181 : vector<8x8x8xf32> to vector<64x8xf32>
    %183 = arith.truncf %182 : vector<64x8xf32> to vector<64x8xbf16>
    %c0_209 = arith.constant 0 : index
    %c24_210 = arith.constant 24 : index
    %184 = vector.load %arg18[%c0_209, %c24_210] : memref<256x72xbf16, #tpu.memory_space<vmem>>, vector<64x8xbf16>
    tpu.vector_store %arg18[%c0_209, %c24_210], %183 {strides = array<i32>} : memref<256x72xbf16, #tpu.memory_space<vmem>>, vector<64x8xbf16>,
    %c1_211 = arith.constant 1 : index
    %c1_212 = arith.constant 1 : index
    %c0_213 = arith.constant 0 : index
    %185 = vector.load %arg17[%c1_211, %c1_212, %c0_213] : memref<18x18x8xf32, #tpu.memory_space<vmem>>, vector<8x8x8xf32>
    %186 = vector.shape_cast %185 : vector<8x8x8xf32> to vector<64x8xf32>
    %187 = arith.truncf %186 : vector<64x8xf32> to vector<64x8xbf16>
    %c0_214 = arith.constant 0 : index
    %c32_215 = arith.constant 32 : index
    %188 = vector.load %arg18[%c0_214, %c32_215] : memref<256x72xbf16, #tpu.memory_space<vmem>>, vector<64x8xbf16>
    tpu.vector_store %arg18[%c0_214, %c32_215], %187 {strides = array<i32>} : memref<256x72xbf16, #tpu.memory_space<vmem>>, vector<64x8xbf16>,
    %c1_216 = arith.constant 1 : index
    %c2_217 = arith.constant 2 : index
    %c0_218 = arith.constant 0 : index
    %189 = vector.load %arg17[%c1_216, %c2_217, %c0_218] : memref<18x18x8xf32, #tpu.memory_space<vmem>>, vector<8x8x8xf32>
    %190 = vector.shape_cast %189 : vector<8x8x8xf32> to vector<64x8xf32>
    %191 = arith.truncf %190 : vector<64x8xf32> to vector<64x8xbf16>
    %c0_219 = arith.constant 0 : index
    %c40_220 = arith.constant 40 : index
    %192 = vector.load %arg18[%c0_219, %c40_220] : memref<256x72xbf16, #tpu.memory_space<vmem>>, vector<64x8xbf16>
    tpu.vector_store %arg18[%c0_219, %c40_220], %191 {strides = array<i32>} : memref<256x72xbf16, #tpu.memory_space<vmem>>, vector<64x8xbf16>,
    %c2_221 = arith.constant 2 : index
    %c0_222 = arith.constant 0 : index
    %c0_223 = arith.constant 0 : index
    %193 = vector.load %arg17[%c2_221, %c0_222, %c0_223] : memref<18x18x8xf32, #tpu.memory_space<vmem>>, vector<8x8x8xf32>
    %194 = vector.shape_cast %193 : vector<8x8x8xf32> to vector<64x8xf32>
    %195 = arith.truncf %194 : vector<64x8xf32> to vector<64x8xbf16>
    %c0_224 = arith.constant 0 : index
    %c48_225 = arith.constant 48 : index
    %196 = vector.load %arg18[%c0_224, %c48_225] : memref<256x72xbf16, #tpu.memory_space<vmem>>, vector<64x8xbf16>
    tpu.vector_store %arg18[%c0_224, %c48_225], %195 {strides = array<i32>} : memref<256x72xbf16, #tpu.memory_space<vmem>>, vector<64x8xbf16>,
    %c2_226 = arith.constant 2 : index
    %c1_227 = arith.constant 1 : index
    %c0_228 = arith.constant 0 : index
    %197 = vector.load %arg17[%c2_226, %c1_227, %c0_228] : memref<18x18x8xf32, #tpu.memory_space<vmem>>, vector<8x8x8xf32>
    %198 = vector.shape_cast %197 : vector<8x8x8xf32> to vector<64x8xf32>
    %199 = arith.truncf %198 : vector<64x8xf32> to vector<64x8xbf16>
    %c0_229 = arith.constant 0 : index
    %c56_230 = arith.constant 56 : index
    %200 = vector.load %arg18[%c0_229, %c56_230] : memref<256x72xbf16, #tpu.memory_space<vmem>>, vector<64x8xbf16>
    tpu.vector_store %arg18[%c0_229, %c56_230], %199 {strides = array<i32>} : memref<256x72xbf16, #tpu.memory_space<vmem>>, vector<64x8xbf16>,
    %c2_231 = arith.constant 2 : index
    %c2_232 = arith.constant 2 : index
    %c0_233 = arith.constant 0 : index
    %201 = vector.load %arg17[%c2_231, %c2_232, %c0_233] : memref<18x18x8xf32, #tpu.memory_space<vmem>>, vector<8x8x8xf32>
    %202 = vector.shape_cast %201 : vector<8x8x8xf32> to vector<64x8xf32>
    %203 = arith.truncf %202 : vector<64x8xf32> to vector<64x8xbf16>
    %c0_234 = arith.constant 0 : index
    %c64_235 = arith.constant 64 : index
    %204 = vector.load %arg18[%c0_234, %c64_235] : memref<256x72xbf16, #tpu.memory_space<vmem>>, vector<64x8xbf16>
    tpu.vector_store %arg18[%c0_234, %c64_235], %203 {strides = array<i32>} : memref<256x72xbf16, #tpu.memory_space<vmem>>, vector<64x8xbf16>,
    %c0_236 = arith.constant 0 : index
    %c0_237 = arith.constant 0 : index
    %205 = vector.load %arg18[%c0_236, %c0_237] : memref<256x72xbf16, #tpu.memory_space<vmem>>, vector<64x72xbf16>
    %c0_238 = arith.constant 0 : index
    %c0_239 = arith.constant 0 : index
    %206 = vector.load %arg7[%c0_238, %c0_239] : memref<72x8xbf16, #tpu.memory_space<vmem>>, vector<72x8xbf16>
    %cst_240 = arith.constant dense<0.000000e+00> : vector<64x8xf32>
    %207 = tpu.matmul %205, %206, %cst_240 {dimension_numbers = #tpu.dot_dimension_numbers<[1], [0], [0], [1], [0, 0, 1, 1], [], []>} : vector<64x72xbf16>, vector<72x8xbf16>, vector<64x8xf32> -> vector<64x8xf32>
    %c0_241 = arith.constant 0 : index
    %c0_242 = arith.constant 0 : index
    %208 = vector.load %arg9[%c0_241, %c0_242] : memref<1x8xf32, #tpu.memory_space<vmem>>, vector<1x8xf32>
    %209 = vector.broadcast %208 : vector<1x8xf32> to vector<64x8xf32>
    %210 = arith.addf %207, %209 : vector<64x8xf32>
    %cst_243 = arith.constant 0.000000e+00 : f32
    %211 = vector.broadcast %cst_243 : f32 to vector<64x8xf32>
    %212 = arith.maximumf %210, %211 : vector<64x8xf32>
    %213 = vector.shape_cast %212 : vector<64x8xf32> to vector<8x8x8xf32>
    %c0_244 = arith.constant 0 : index
    %c0_245 = arith.constant 0 : index
    %214 = vector.load %arg11[%c0_244, %c0_245] : memref<1x8xf32, #tpu.memory_space<vmem>>, vector<1x8xf32>
    %215 = vector.shape_cast %214 : vector<1x8xf32> to vector<1x1x8xf32>
    %216 = vector.broadcast %215 : vector<1x1x8xf32> to vector<8x8x8xf32>
    %217 = arith.mulf %213, %216 : vector<8x8x8xf32>
    %cst_246 = arith.constant dense<0.000000e+00> : vector<8x8xf32>
    %218 = vector.multi_reduction <add>, %217, %cst_246 [2] : vector<8x8x8xf32> to vector<8x8xf32>
    %c0_247 = arith.constant 0 : index
    %c0_248 = arith.constant 0 : index
    %219 = vector.load %arg13[%c0_247, %c0_248] : memref<16x8xf32, #tpu.memory_space<vmem>>, vector<16x8xf32>
    %cst_249 = arith.constant dense<0.000000e+00> : vector<16x8xf32>
    %220 = tpu.matmul %219, %218, %cst_249 {dimension_numbers = #tpu.dot_dimension_numbers<[1], [0], [0], [1], [0, 0, 1, 1], [], []>} : vector<16x8xf32>, vector<8x8xf32>, vector<16x8xf32> -> vector<16x8xf32>
    %c0_250 = arith.constant 0 : index
    %c0_251 = arith.constant 0 : index
    %221 = vector.load %arg15[%c0_250, %c0_251] : memref<8x16xf32, #tpu.memory_space<vmem>>, vector<8x16xf32>
    %cst_252 = arith.constant dense<0.000000e+00> : vector<16x16xf32>
    %222 = tpu.matmul %220, %221, %cst_252 {dimension_numbers = #tpu.dot_dimension_numbers<[1], [0], [0], [1], [0, 0, 1, 1], [], []>} : vector<16x8xf32>, vector<8x16xf32>, vector<16x16xf32> -> vector<16x16xf32>
    %c1_253 = arith.constant 1 : index
    %223 = memref.load %arg1[%c1_253] : memref<2xf32, #tpu.memory_space<smem>>
    %224 = vector.broadcast %223 : f32 to vector<16x16xf32>
    %225 = arith.addf %222, %224 : vector<16x16xf32>
    %c0_254 = arith.constant 0 : index
    %c1_255 = arith.constant 1 : index
    %c0_256 = arith.constant 0 : index
    %c0_257 = arith.constant 0 : index
    %226 = vector.load %arg16[%c0_254, %c1_255, %c0_256, %c0_257] : memref<1x3x16x16xf32, #tpu.memory_space<vmem>>, vector<1x1x16x16xf32>
    %227 = vector.shape_cast %226 : vector<1x1x16x16xf32> to vector<16x16xf32>
    %228 = vector.shape_cast %225 : vector<16x16xf32> to vector<1x1x16x16xf32>
    tpu.vector_store %arg16[%c0_254, %c1_255, %c0_256, %c0_257], %228 {strides = array<i32>} : memref<1x3x16x16xf32, #tpu.memory_space<vmem>>, vector<1x1x16x16xf32>,
    %c1_258 = arith.constant 1 : index
    %229 = memref.load %arg2[%c1_258] : memref<2xf32, #tpu.memory_space<smem>>
    %230 = vector.broadcast %229 : f32 to vector<16x16xf32>
    %231 = arith.mulf %225, %230 : vector<16x16xf32>
    %232 = arith.addf %116, %231 : vector<16x16xf32>
    %c0_259 = arith.constant 0 : index
    %233 = memref.load %arg3[%c0_259] : memref<1xf32, #tpu.memory_space<smem>>
    %234 = vector.broadcast %233 : f32 to vector<16x16xf32>
    %235 = arith.addf %232, %234 : vector<16x16xf32>
    %c0_260 = arith.constant 0 : index
    %c2_261 = arith.constant 2 : index
    %c0_262 = arith.constant 0 : index
    %c0_263 = arith.constant 0 : index
    %236 = vector.load %arg16[%c0_260, %c2_261, %c0_262, %c0_263] : memref<1x3x16x16xf32, #tpu.memory_space<vmem>>, vector<1x1x16x16xf32>
    %237 = vector.shape_cast %236 : vector<1x1x16x16xf32> to vector<16x16xf32>
    %238 = vector.shape_cast %235 : vector<16x16xf32> to vector<1x1x16x16xf32>
    tpu.vector_store %arg16[%c0_260, %c2_261, %c0_262, %c0_263], %238 {strides = array<i32>} : memref<1x3x16x16xf32, #tpu.memory_space<vmem>>, vector<1x1x16x16xf32>,
    return
  }
  func.func @transform_0(%arg0: i32) -> i32 {
    %c0_i32 = arith.constant 0 : i32
    %c0_i32_0 = arith.constant 0 : i32
    return %c0_i32 : i32
  }
  func.func @transform_1(%arg0: i32) -> i32 {
    %c0_i32 = arith.constant 0 : i32
    %c0_i32_0 = arith.constant 0 : i32
    return %c0_i32 : i32
  }
  func.func @transform_2(%arg0: i32) -> i32 {
    %c0_i32 = arith.constant 0 : i32
    %c0_i32_0 = arith.constant 0 : i32
    return %c0_i32 : i32
  }
  func.func @transform_3(%arg0: i32) -> (i32, i32, i32, i32) {
    %c0_i32 = arith.constant 0 : i32
    %c0_i32_0 = arith.constant 0 : i32
    %c0_i32_1 = arith.constant 0 : i32
    %c0_i32_2 = arith.constant 0 : i32
    return %arg0, %c0_i32, %c0_i32_0, %c0_i32_1 : i32, i32, i32, i32
  }
  func.func @transform_4(%arg0: i32) -> (i32, i32, i32, i32) {
    %c0_i32 = arith.constant 0 : i32
    %c0_i32_0 = arith.constant 0 : i32
    %c0_i32_1 = arith.constant 0 : i32
    %c0_i32_2 = arith.constant 0 : i32
    return %arg0, %c0_i32, %c0_i32_0, %c0_i32_1 : i32, i32, i32, i32
  }
  func.func @transform_5(%arg0: i32) -> (i32, i32) {
    %c0_i32 = arith.constant 0 : i32
    %c0_i32_0 = arith.constant 0 : i32
    %c0_i32_1 = arith.constant 0 : i32
    return %c0_i32, %c0_i32_0 : i32, i32
  }
  func.func @transform_6(%arg0: i32) -> (i32, i32) {
    %c0_i32 = arith.constant 0 : i32
    %c0_i32_0 = arith.constant 0 : i32
    %c0_i32_1 = arith.constant 0 : i32
    return %c0_i32, %c0_i32_0 : i32, i32
  }
  func.func @transform_7(%arg0: i32) -> (i32, i32) {
    %c0_i32 = arith.constant 0 : i32
    %c0_i32_0 = arith.constant 0 : i32
    %c0_i32_1 = arith.constant 0 : i32
    return %c0_i32, %c0_i32_0 : i32, i32
  }
  func.func @transform_8(%arg0: i32) -> (i32, i32) {
    %c0_i32 = arith.constant 0 : i32
    %c0_i32_0 = arith.constant 0 : i32
    %c0_i32_1 = arith.constant 0 : i32
    return %c0_i32, %c0_i32_0 : i32, i32
  }
  func.func @transform_9(%arg0: i32) -> (i32, i32) {
    %c0_i32 = arith.constant 0 : i32
    %c0_i32_0 = arith.constant 0 : i32
    %c0_i32_1 = arith.constant 0 : i32
    return %c0_i32, %c0_i32_0 : i32, i32
  }
  func.func @transform_10(%arg0: i32) -> (i32, i32) {
    %c0_i32 = arith.constant 0 : i32
    %c0_i32_0 = arith.constant 0 : i32
    %c0_i32_1 = arith.constant 0 : i32
    return %c0_i32, %c0_i32_0 : i32, i32
  }
  func.func @transform_11(%arg0: i32) -> (i32, i32) {
    %c0_i32 = arith.constant 0 : i32
    %c0_i32_0 = arith.constant 0 : i32
    %c0_i32_1 = arith.constant 0 : i32
    return %c0_i32, %c0_i32_0 : i32, i32
  }
  func.func @transform_12(%arg0: i32) -> (i32, i32) {
    %c0_i32 = arith.constant 0 : i32
    %c0_i32_0 = arith.constant 0 : i32
    %c0_i32_1 = arith.constant 0 : i32
    return %c0_i32, %c0_i32_0 : i32, i32
  }
  func.func @transform_13(%arg0: i32) -> (i32, i32) {
    %c0_i32 = arith.constant 0 : i32
    %c0_i32_0 = arith.constant 0 : i32
    %c0_i32_1 = arith.constant 0 : i32
    return %c0_i32, %c0_i32_0 : i32, i32
  }
  func.func @transform_14(%arg0: i32) -> (i32, i32) {
    %c0_i32 = arith.constant 0 : i32
    %c0_i32_0 = arith.constant 0 : i32
    %c0_i32_1 = arith.constant 0 : i32
    return %c0_i32, %c0_i32_0 : i32, i32
  }
  func.func @transform_15(%arg0: i32) -> (i32, i32, i32, i32) {
    %c0_i32 = arith.constant 0 : i32
    %c0_i32_0 = arith.constant 0 : i32
    %c0_i32_1 = arith.constant 0 : i32
    %c0_i32_2 = arith.constant 0 : i32
    return %arg0, %c0_i32, %c0_i32_0, %c0_i32_1 : i32, i32, i32, i32
  }
}

</mosaic_0001>

<bundles_post_ra>
// kernel: tpu_custom_call.1
= control target key start
LH: loop header
LB: loop body
LE: loop exit
PB: predicated region body
PF: predicated region fallthrough
CT: control target
= control target key end

     0   :  { %s11121_s0 = inlined_call_operand.vmem [shape: f32[2], index: 0, kind: input, shape index: {}]   ;;  %s11122_s1 = inlined_call_operand.vmem [shape: f32[2], index: 1, kind: input, shape index: {}]   ;;  %s11123_s2 = inlined_call_operand.<no memory space> [shape: f32[1], index: 2, kind: input, shape index: {}]   ;;  %s11124_s3 = inlined_call_operand.vmem [shape: bf16[2,16,16,8], index: 3, kind: input, shape index: {}]   ;;  %s11125_s4 = inlined_call_operand.vmem [shape: bf16[2,8,8,8], index: 4, kind: input, shape index: {}]   ;;  %s11126_s5 = inlined_call_operand.vmem [shape: bf16[72,8], index: 5, kind: input, shape index: {}]   ;;  %s11127_s6 = inlined_call_operand.vmem [shape: bf16[72,8], index: 6, kind: input, shape index: {}]   ;;  %s11128_s7 = inlined_call_operand.vmem [shape: f32[1,8], index: 7, kind: input, shape index: {}]   ;;  %s11129_s8 = inlined_call_operand.vmem [shape: f32[1,8], index: 8, kind: input, shape index: {}]   ;;  %s11130_s9 = inlined_call_operand.vmem [shape: f32[1,8], index: 9, kind: input, shape index: {}]   ;;  %s11131_s10 = inlined_call_operand.vmem [shape: f32[1,8], index: 10, kind: input, shape index: {}]   ;;  %s11132_s11 = inlined_call_operand.vmem [shape: f32[16,16], index: 11, kind: input, shape index: {}]   ;;  %s11133_s12 = inlined_call_operand.vmem [shape: f32[16,8], index: 12, kind: input, shape index: {}]   ;;  %s11134_s13 = inlined_call_operand.vmem [shape: f32[16,16], index: 13, kind: input, shape index: {}]   ;;  %s11135_s14 = inlined_call_operand.vmem [shape: f32[8,16], index: 14, kind: input, shape index: {}]   ;;  %s11136_s15 = inlined_call_operand.hbm [shape: f32[2,3,16,16], index: 15, kind: output, shape index: {}]  }
   0x1   :  { %11167 = sst [smem:[#allocation66_spill]] %s11121_s0 }
   0x2   :  { %11168 = sst [smem:[#allocation67_spill]] %s11122_s1 }
   0x3   :  { %11169 = sst [smem:[#allocation68_spill]] %s11124_s3 }
   0x4   :  { %11170 = sst [smem:[#allocation69_spill]] %s11125_s4 }
   0x5   :  { %11171 = sst [smem:[#allocation70_spill]] %s11130_s9 }
   0x6   :  { %20 = sst [smem:[#allocation4]] %s11123_s2 }
   0x7   :  { %21 = vsyncpa [#allocation7], 0 }
   0x8   :  { %22 = vsyncpa [#allocation9], 0 }
   0x9   :  { %23 = vsyncpa [#allocation6], 0 }
   0xa   :  { %25 = vsyncpa [#allocation6 + $0x1], 0  ;;  %s7731_s20 = smov 0   ;;  %s7733_s21 = smov 0  }
   0xb   :  { %s7735_s22 = smov 0   ;;  %s7737_s23 = smov 0  }
   0xc LB: > { %11172 = sst [smem:[#allocation14_spill]] %s7630_s22  ;;  %s7752_s2 = sadd.s32 4294967295, %s7634_s23   ;;  %s7634_s23 = sphi %s7737_s23, %s11343_s23   ;;  %s7630_s22 = sphi %s7735_s22, %s11340_s22   ;;  %s7626_s21 = sphi %s7733_s21, %s11342_s21   ;;  %s7622_s20 = sphi %s7731_s20, %s11341_s20  }
   0xd   : > { %s6996_s24 = sadd.s32 4294967294, %s7634_s23   ;;  %s7756_s25 = sadd.s32 1, %s7634_s23  }
   0xe   : > { %s363_s26 = sadd.s32 1, %s7630_s22  ;;  %s360_s27 = ssub.s32 %s7634_s23, %s7756_s25 }
   0xf   : > { %p373_p0 = scmp.ne.s32.totalorder %s7630_s22, %s7626_s21  ;;  %p361_p1 = scmp.eq.s32.totalorder %s360_s27, 0 }
  0x10   : > { %p374_p2 = scmp.eq.s32.totalorder %s7752_s2, 1  ;;  %p379_p3 = scmp.ne.s32.totalorder %s7626_s21, %s7622_s20 }
  0x11   : > { %p380_p4 = scmp.eq.s32.totalorder %s6996_s24, 1  ;;  %p6997_p7 = scmp.ge.s32.totalorder %s7634_s23, 1 }
  0x12   : > { %s7767_s28 = scalar_select %p361_p1, %s7630_s22, %s363_s26  }
  0x13   : > { %p7769_p5 = por %p374_p2, %p373_p0  ;;  %p7773_p6 = por %p380_p4, %p379_p3 }
  0x14   : > { %11173 = sst [smem:[#allocation15_spill]] %s7767_s28  ;;  %p387_p8 = scmp.lt.s32.totalorder %s7634_s23, 3 }
  0x15   : > { %p7478_p9 = scmp.eq.s32.totalorder %s7752_s2, 0  ;;  %s11176_s0 = sld [smem:[#allocation66_spill]] }
  0x16   : > { %p388_p10 = pnand %p6997_p7, %p387_p8  ;;  %s11177_s1 = sld [smem:[#allocation67_spill]] }
  0x17   : > { %s7636_s27 = smov [#allocation5]   ;;  %s7637_s28 = smov [#allocation8]  }
  0x18   : > { %p7467_p11 = pneg %p388_p10 }
  0x1a   : > { %p7468_p12 = pnand %p7478_p9, %p7467_p11  ;;  %471 = sbr.rel (%p388_p10) target bundleno = 3270 (0xcc6), region = 80 }
  0x1b   : > { %s399_s18 = sshll.u32 %s11176_s0, 4  ;;  %s400_s18 = int_to_ptr.vmem [resolvable:$true] %s399_s18 }
  0x1c   : > { %s409_s26 = sshll.u32 %s11177_s1, 4  ;;  %s410_s26 = int_to_ptr.vmem [resolvable:$true] %s409_s26 }
  0x1d   : > { %7470 = dma.vmem_to_smem (!%p7468_p12), %s400_s18, 16, %s7636_s27, [#allocation7]  }
  0x1e   : > { %7473 = dma.vmem_to_smem (!%p7468_p12), %s410_s26, 16, %s7637_s28, [#allocation9]  }
  0x1f   : > { %7609 = dma.done.wait (%p7478_p9), [#allocation7], 16  }
  0x20   : > { %7611 = vsyncadd (%p7478_p9), [#allocation7], 4294967280 }
  0x21   : > { %7613 = dma.done.wait (%p7478_p9), [#allocation9], 16  }
  0x22   : > { %7615 = vsyncadd (%p7478_p9), [#allocation9], 4294967280 }
  0x23   : > { %483 = sfence }
  0x24   : > { %vm11158_vm0 = vcmask 64512   ;;  %v11147_v0 = vmov 0.0   ;;  %s11152_s28 = smov 8   ;;  %vm545_vm1 = vcmask 58368   ;;  %p531_p13 = scmp.lt.s32.totalorder %s7752_s2, 1  ;;  %vm11160_vm2 = vcmask 60416  }
  0x25   : > { %543 = vst.msk [vmem:[#allocation2] sm:$0xff] %vm11158_vm0, %v11147_v0  ;;  %s11178_s3 = sld [smem:[#allocation68_spill]]  ;;  %vm984_vm3 = vcmask 126016   ;;  %s11154_s26 = smov 16   ;;  %vm1209_vm4 = vcmask 191616   ;;  %vm1434_vm5 = vcmask 257216  }
  0x26   : > { %544 = vst.msk [vmem:[#allocation2 + $0x8] sm:$0xff] %vm11158_vm0, %v11147_v0  ;;  %s7875_s16 = scalar_select %p531_p13, %s7752_s2, 1  ;;  %vm1659_vm6 = vcmask 322816   ;;  %vm1884_vm7 = vcmask 388416   ;;  %vm2110_vm8 = vcmask 454016   ;;  %vm2335_vm9 = vcmask 519616  }
  0x27   : > { %547 = vst.msk [vmem:[#allocation2 + $0x18] sm:$0xff] %vm11158_vm0, %v11147_v0  ;;  %s11143_s27 = smov 24   ;;  %s11141_s18 = smov 40   ;;  %vm2794_vm10 = vcmask 1043456   ;;  %vm11161_vm11 = vcmask 585216   ;;  %vm11159_vm12 = vcmask 588800  }
  0x28   : > { %548 = vst.msk [vmem:[#allocation2 + $0x20] sm:$0xff] %vm11158_vm0, %v11147_v0  ;;  %s7289_s17 = sshll.u32 %s7875_s16, 7  ;;  %s11137_s19 = smov 48   ;;  %vm5334_vm13 = vcmask 130112   ;;  %vm5381_vm14 = vcmask 1041409   ;;  %vm5383_vm15 = vcmask 1042434  }
  0x29   : > { %550 = vst.msk [vmem:[#allocation2 + $0x30] sm:$0xff] %vm11158_vm0, %v11147_v0  ;;  %s11230_s4 = sld [smem:[#allocation69_spill]]  ;;  %s11236_s1 = smov 64  }
  0x2a   : > { %551 = vst.msk [vmem:[#allocation2 + $0x38] sm:$0xff] %vm11158_vm0, %v11147_v0  ;;  %s11288_s9 = sld [smem:[#allocation70_spill]]  ;;  %s528_s22 = sand.u32 1, %s7626_s21  }
  0x2b   : > { %553 = vst.msk [vmem:[#allocation2 + $0x48] sm:$0xff] %vm11158_vm0, %v11147_v0  ;;  %s7895_s24 = scalar_lea.vmem %s11178_s3, %s7289_s17  ;;  %s11145_s17 = smov 32  }
  0x2c   : > { %554 = vst.msk [vmem:[#allocation2 + $0x50] sm:$0xff] %vm11158_vm0, %v11147_v0  ;;  %v7428_v5 = vld [vmem:[%s7895_s24 + $0x10] sm:$0xff]   ;;  %v7348_v6 = vld [vmem:[%s7895_s24] sm:$0xff]   ;;  %v7429_v8 = vld [vmem:[%s7895_s24 + $0x18] sm:$0xff]   ;;  %s11289_s3 = smov 8   ;;  %s7455_s0 = smul.u32 48, %s528_s22 }
  0x2d   : > { %v792_v1 = vld [vmem:[#allocation2 + $0x1] sm:$0xff]  ;;  %556 = vst.msk [vmem:[#allocation2 + $0x60] sm:$0xff] %vm11158_vm0, %v11147_v0  ;;  %v7357_v7 = vunpack.c.l.bf16 %v7428_v5  ;;  %v7349_v9 = vunpack.c.l.bf16 %v7348_v6  ;;  %v7350_v11 = vunpack.c.h.bf16 %v7348_v6  ;;  %v7362_v13 = vunpack.c.h.bf16 %v7429_v8  ;;  %v7432_v16 = vld [vmem:[%s7895_s24 + $0x30] sm:$0xff]   ;;  %v7433_v30 = vld [vmem:[%s7895_s24 + $0x38] sm:$0xff]  }
  0x2e   : > { %v824_v2 = vpack.c.bf16 %v792_v1, %v792_v1  ;;  %557 = vst.msk [vmem:[#allocation2 + $0x68] sm:$0xff] %vm11158_vm0, %v11147_v0  ;;  %v7431_v10 = vld [vmem:[%s7895_s24 + $0x28] sm:$0xff]   ;;  %v7430_v18 = vld [vmem:[%s7895_s24 + $0x20] sm:$0xff]   ;;  %v7358_v19 = vunpack.c.h.bf16 %v7428_v5  ;;  %v7374_v21 = vunpack.c.h.bf16 %v7432_v16  ;;  %v7361_v26 = vunpack.c.l.bf16 %v7429_v8  ;;  %v7437_v40 = vld [vmem:[%s7895_s24 + $0x58] sm:$0xff]  }
  0x2f   : > { %559 = vst.msk [vmem:[#allocation2 + $0x78] sm:$0xff] %vm11158_vm0, %v11147_v0  ;;  %v7427_v12 = vld [vmem:[%s7895_s24 + $0x8] sm:$0xff]   ;;  %v7369_v14 = vunpack.c.l.bf16 %v7431_v10  ;;  %v7434_v20 = vld [vmem:[%s7895_s24 + $0x40] sm:$0xff]   ;;  %v7365_v22 = vunpack.c.l.bf16 %v7430_v18  ;;  %v7370_v29 = vunpack.c.h.bf16 %v7431_v10  ;;  %v7366_v33 = vunpack.c.h.bf16 %v7430_v18  ;;  %v7436_v51 = vld [vmem:[%s7895_s24 + $0x50] sm:$0xff]  }
  0x30   : > { %888 = vrot.lane.b32.xlu0 %v824_v2, %s11152_s28  ;;  %560 = vst.msk [vmem:[#allocation2 + $0x80] sm:$0xff] %vm11158_vm0, %v11147_v0  ;;  %v7353_v15 = vunpack.c.l.bf16 %v7427_v12  ;;  %v7354_v17 = vunpack.c.h.bf16 %v7427_v12  ;;  %v7381_v23 = vunpack.c.l.bf16 %v7434_v20  ;;  %v7932_v24 = vld [vmem:[%s7895_s24 + $0x48] sm:$0xff]   ;;  %v7377_v35 = vunpack.c.l.bf16 %v7433_v30  ;;  %v7438_v50 = vld [vmem:[%s7895_s24 + $0x60] sm:$0xff]   ;;  %v7440_v61 = vld [vmem:[%s7895_s24 + $0x70] sm:$0xff]  }
  0x31   : > { %562 = vst.msk [vmem:[#allocation2 + $0x90] sm:$0xff] %vm11158_vm0, %v11147_v0  ;;  %v7386_v32 = vunpack.c.h.bf16 %v7932_v24  ;;  %v7393_v42 = vunpack.c.l.bf16 %v7437_v40  ;;  %v7373_v43 = vunpack.c.l.bf16 %v7432_v16  ;;  %v7382_v44 = vunpack.c.h.bf16 %v7434_v20  ;;  %v7439_v8 = vld [vmem:[%s7895_s24 + $0x68] sm:$0xff]  }
  0x32   : > { %563 = vst.msk [vmem:[#allocation2 + $0x98] sm:$0xff] %vm11158_vm0, %v11147_v0  ;;  %v7398_v53 = vunpack.c.h.bf16 %v7438_v50  ;;  %v7378_v54 = vunpack.c.h.bf16 %v7433_v30  ;;  %v7389_v55 = vunpack.c.l.bf16 %v7436_v51  ;;  %v7405_v63 = vunpack.c.l.bf16 %v7440_v61 }
  0x33   : > { %565 = vst.msk [vmem:[#allocation2 + $0xa8] sm:$0xff] %vm11158_vm0, %v11147_v0  ;;  %v7385_v1 = vunpack.c.l.bf16 %v7932_v24  ;;  %v7394_v2 = vunpack.c.h.bf16 %v7437_v40  ;;  %v7390_v10 = vunpack.c.h.bf16 %v7436_v51  ;;  %v7397_v18 = vunpack.c.l.bf16 %v7438_v50  ;;  %v695_v40 = vld [vmem:[#allocation2] sm:$0xff]  ;;  %v696_v50 = vld [vmem:[#allocation2 + $0x8] sm:$0xff] }
  0x34   : > { %566 = vst.msk [vmem:[#allocation2 + $0xb0] sm:$0xff] %vm11158_vm0, %v11147_v0 }
  0x35   : > { %568 = vst.msk [vmem:[#allocation2 + $0xc0] sm:$0xff] %vm11158_vm0, %v11147_v0 }
  0x36   : > { %569 = vst.msk [vmem:[#allocation2 + $0xc8] sm:$0xff] %vm11158_vm0, %v11147_v0 }
  0x37   : > { %571 = vst.msk [vmem:[#allocation2 + $0xd8] sm:$0xff] %vm11158_vm0, %v11147_v0 }
  0x38   : > { %572 = vst.msk [vmem:[#allocation2 + $0xe0] sm:$0xff] %vm11158_vm0, %v11147_v0 }
  0x39   : > { %574 = vst.msk [vmem:[#allocation2 + $0xf0] sm:$0xff] %vm11158_vm0, %v11147_v0 }
  0x3a   : > { %575 = vst.msk [vmem:[#allocation2 + $0xf8] sm:$0xff] %vm11158_vm0, %v11147_v0 }
  0x3b   : > { %577 = vst.msk [vmem:[#allocation2 + $0x108] sm:$0xff] %vm11158_vm0, %v11147_v0 }
  0x3c   : > { %578 = vst.msk [vmem:[#allocation2 + $0x110] sm:$0xff] %vm11158_vm0, %v11147_v0 }
  0x3d   : > { %580 = vst.msk [vmem:[#allocation2 + $0x120] sm:$0xff] %vm11158_vm0, %v11147_v0 }
  0x3e   : > { %581 = vst.msk [vmem:[#allocation2 + $0x128] sm:$0xff] %vm11158_vm0, %v11147_v0 }
  0x3f   : > { %583 = vst.msk [vmem:[#allocation2 + $0x138] sm:$0xff] %vm11158_vm0, %v11147_v0 }
  0x40   : > { %584 = vst.msk [vmem:[#allocation2 + $0x140] sm:$0xff] %vm11158_vm0, %v11147_v0 }
  0x41   : > { %586 = vst.msk [vmem:[#allocation2 + $0x150] sm:$0xff] %vm11158_vm0, %v11147_v0 }
  0x42   : > { %587 = vst.msk [vmem:[#allocation2 + $0x158] sm:$0xff] %vm11158_vm0, %v11147_v0 }
  0x43   : > { %589 = vst.msk [vmem:[#allocation2 + $0x168] sm:$0xff] %vm11158_vm0, %v11147_v0 }
  0x44   : > { %590 = vst.msk [vmem:[#allocation2 + $0x170] sm:$0xff] %vm11158_vm0, %v11147_v0 }
  0x45   : > { %592 = vst.msk [vmem:[#allocation2 + $0x180] sm:$0xff] %vm11158_vm0, %v11147_v0 }
  0x46   : > { %593 = vst.msk [vmem:[#allocation2 + $0x188] sm:$0xff] %vm11158_vm0, %v11147_v0 }
  0x47   : > { %595 = vst.msk [vmem:[#allocation2 + $0x198] sm:$0xff] %vm11158_vm0, %v11147_v0 }
  0x48   : > { %596 = vst.msk [vmem:[#allocation2 + $0x1a0] sm:$0xff] %vm11158_vm0, %v11147_v0 }
  0x49   : > { %546 = vst.msk [vmem:[#allocation2 + $0x10] sm:$0x3] %vm545_vm1, %v11147_v0 }
  0x4a   : > { %549 = vst.msk [vmem:[#allocation2 + $0x28] sm:$0x3] %vm545_vm1, %v11147_v0 }
  0x4b   : > { %552 = vst.msk [vmem:[#allocation2 + $0x40] sm:$0x3] %vm545_vm1, %v11147_v0 }
  0x4c   : > { %555 = vst.msk [vmem:[#allocation2 + $0x58] sm:$0x3] %vm545_vm1, %v11147_v0 }
  0x4d   : > { %558 = vst.msk [vmem:[#allocation2 + $0x70] sm:$0x3] %vm545_vm1, %v11147_v0 }
  0x4e   : > { %561 = vst.msk [vmem:[#allocation2 + $0x88] sm:$0x3] %vm545_vm1, %v11147_v0 }
  0x4f   : > { %564 = vst.msk [vmem:[#allocation2 + $0xa0] sm:$0x3] %vm545_vm1, %v11147_v0 }
  0x50   : > { %v793_v3 = vld [vmem:[#allocation2 + $0x9] sm:$0xff]  ;;  %567 = vst.msk [vmem:[#allocation2 + $0xb8] sm:$0x3] %vm545_vm1, %v11147_v0 }
  0x51   : > { %v825_v4 = vpack.c.bf16 %v793_v3, %v793_v3  ;;  %570 = vst.msk [vmem:[#allocation2 + $0xd0] sm:$0x3] %vm545_vm1, %v11147_v0 }
  0x52   : > { %573 = vst.msk [vmem:[#allocation2 + $0xe8] sm:$0x3] %vm545_vm1, %v11147_v0 }
  0x53   : > { %890 = vrot.lane.b32.xlu0 %v825_v4, %s11152_s28  ;;  %576 = vst.msk [vmem:[#allocation2 + $0x100] sm:$0x3] %vm545_vm1, %v11147_v0 }
  0x54   : > { %579 = vst.msk [vmem:[#allocation2 + $0x118] sm:$0x3] %vm545_vm1, %v11147_v0 }
  0x55   : > { %582 = vst.msk [vmem:[#allocation2 + $0x130] sm:$0x3] %vm545_vm1, %v11147_v0 }
  0x56   : > { %585 = vst.msk [vmem:[#allocation2 + $0x148] sm:$0x3] %vm545_vm1, %v11147_v0 }
  0x57   : > { %588 = vst.msk [vmem:[#allocation2 + $0x160] sm:$0x3] %vm545_vm1, %v11147_v0 }
  0x58   : > { %591 = vst.msk [vmem:[#allocation2 + $0x178] sm:$0x3] %vm545_vm1, %v11147_v0 }
  0x59   : > { %594 = vst.msk [vmem:[#allocation2 + $0x190] sm:$0x3] %vm545_vm1, %v11147_v0 }
  0x5a   : > { %597 = vst.msk [vmem:[#allocation2 + $0x1a8] sm:$0x3] %vm545_vm1, %v11147_v0 }
  0x5b   : > { %667 = vst.msk [vmem:[#allocation2 + $0x49] sm:$0xff] %vm11158_vm0, %v7357_v7 }
  0x5c   : > { %663 = vst.msk [vmem:[#allocation2 + $0x19] sm:$0xff] %vm11158_vm0, %v7349_v9 }
  0x5d   : > { %664 = vst.msk [vmem:[#allocation2 + $0x21] sm:$0xff] %vm11158_vm0, %v7350_v11  ;;  %v7401_v11 = vunpack.c.l.bf16 %v7439_v8 }
  0x5e   : > { %670 = vst.msk [vmem:[#allocation2 + $0x69] sm:$0xff] %vm11158_vm0, %v7362_v13 }
  0x5f   : > { %673 = vst.msk [vmem:[#allocation2 + $0x91] sm:$0xff] %vm11158_vm0, %v7369_v14 }
  0x60   : > { %665 = vst.msk [vmem:[#allocation2 + $0x31] sm:$0xff] %vm11158_vm0, %v7353_v15 }
  0x61   : > { %666 = vst.msk [vmem:[#allocation2 + $0x39] sm:$0xff] %vm11158_vm0, %v7354_v17 }
  0x62   : > { %v798_v25 = vld [vmem:[#allocation2 + $0x49] sm:$0xff]  ;;  %668 = vst.msk [vmem:[#allocation2 + $0x51] sm:$0xff] %vm11158_vm0, %v7358_v19  ;;  %v7406_v19 = vunpack.c.h.bf16 %v7440_v61 }
  0x63   : > { %v830_v27 = vpack.c.bf16 %v798_v25, %v798_v25  ;;  %v794_v28 = vld [vmem:[#allocation2 + $0x19] sm:$0xff]  ;;  %676 = vst.msk [vmem:[#allocation2 + $0xb1] sm:$0xff] %vm11158_vm0, %v7374_v21  ;;  %v701_v61 = vld [vmem:[#allocation2 + $0x48] sm:$0xff] }
  0x64   : > { %v826_v31 = vpack.c.bf16 %v794_v28, %v794_v28  ;;  %671 = vst.msk [vmem:[#allocation2 + $0x79] sm:$0xff] %vm11158_vm0, %v7365_v22  ;;  %v795_v36 = vld [vmem:[#allocation2 + $0x21] sm:$0xff] }
  0x65   : > { %900 = vrot.lane.b32.xlu0 %v830_v27, %s11152_s28  ;;  %679 = vst.msk [vmem:[#allocation2 + $0xd9] sm:$0xff] %vm11158_vm0, %v7381_v23  ;;  %v801_v34 = vld [vmem:[#allocation2 + $0x69] sm:$0xff]  ;;  %v827_v41 = vpack.c.bf16 %v795_v36, %v795_v36 }
  0x66   : > { %892 = vrot.lane.b32.xlu1 %v826_v31, %s11152_s28  ;;  %669 = vst.msk [vmem:[#allocation2 + $0x61] sm:$0xff] %vm11158_vm0, %v7361_v26  ;;  %v833_v39 = vpack.c.bf16 %v801_v34, %v801_v34  ;;  %v804_v46 = vld [vmem:[#allocation2 + $0x91] sm:$0xff]  ;;  %v7402_v26 = vunpack.c.h.bf16 %v7439_v8 }
  0x67   : > { %v796_v37 = vld [vmem:[#allocation2 + $0x31] sm:$0xff]  ;;  %674 = vst.msk [vmem:[#allocation2 + $0x99] sm:$0xff] %vm11158_vm0, %v7370_v29  ;;  %v836_v49 = vpack.c.bf16 %v804_v46, %v804_v46 }
  0x68   : > { %v828_v38 = vpack.c.bf16 %v796_v37, %v796_v37  ;;  %682 = vst.msk [vmem:[#allocation2 + $0xf9] sm:$0xff] %vm11158_vm0, %v7386_v32  ;;  %v797_v45 = vld [vmem:[#allocation2 + $0x39] sm:$0xff]  ;;  %v699_v51 = vld [vmem:[#allocation2 + $0x30] sm:$0xff] }
  0x69   : > { %672 = vst.msk [vmem:[#allocation2 + $0x81] sm:$0xff] %vm11158_vm0, %v7366_v33  ;;  %v7953_v47 = vpack.c.bf16 %v797_v45, %v797_v45  ;;  %v799_v48 = vld [vmem:[#allocation2 + $0x51] sm:$0xff] }
  0x6a   : > { %896 = vrot.lane.b32.xlu2 %v828_v38, %s11152_s28  ;;  %677 = vst.msk [vmem:[#allocation2 + $0xc1] sm:$0xff] %vm11158_vm0, %v7377_v35  ;;  %v831_v52 = vpack.c.bf16 %v799_v48, %v799_v48  ;;  %v807_v57 = vld [vmem:[#allocation2 + $0xb1] sm:$0xff] }
  0x6b   : > { %685 = vst.msk [vmem:[#allocation2 + $0x121] sm:$0xff] %vm11158_vm0, %v7393_v42  ;;  %v802_v59 = vld [vmem:[#allocation2 + $0x79] sm:$0xff]  ;;  %v839_v60 = vpack.c.bf16 %v807_v57, %v807_v57 }
  0x6c   : > { %675 = vst.msk [vmem:[#allocation2 + $0xa9] sm:$0xff] %vm11158_vm0, %v7373_v43  ;;  %v834_v62 = vpack.c.bf16 %v802_v59, %v802_v59  ;;  %v810_v4 = vld [vmem:[#allocation2 + $0xd9] sm:$0xff] }
  0x6d   : > { %906 = vrot.lane.b32.xlu0 %v833_v39, %s11152_s28  ;;  %680 = vst.msk [vmem:[#allocation2 + $0xe1] sm:$0xff] %vm11158_vm0, %v7382_v44  ;;  %v800_v56 = vld [vmem:[#allocation2 + $0x61] sm:$0xff]  ;;  %v842_v7 = vpack.c.bf16 %v810_v4, %v810_v4  ;;  %v727_v44 = vpack.c.bf16 %v695_v40, %v695_v40  ;;  %v1026_v40 = vld [vmem:[#allocation2 + $0x6a] sm:$0xff] }
  0x6e   : > { %894 = vrot.lane.b32.xlu1 %v827_v41, %s11152_s28  ;;  %688 = vst.msk [vmem:[#allocation2 + $0x141] sm:$0xff] %vm11158_vm0, %v7398_v53  ;;  %v7964_v58 = vpack.c.bf16 %v800_v56, %v800_v56  ;;  %v805_v6 = vld [vmem:[#allocation2 + $0x99] sm:$0xff]  ;;  %v1018_v41 = vld [vmem:[#allocation2 + $0xa] sm:$0xff] }
  0x6f   : > { %678 = vst.msk [vmem:[#allocation2 + $0xc9] sm:$0xff] %vm11158_vm0, %v7378_v54  ;;  %v837_v9 = vpack.c.bf16 %v805_v6, %v805_v6  ;;  %v813_v13 = vld [vmem:[#allocation2 + $0xf9] sm:$0xff]  ;;  %v1050_v46 = vpack.c.bf16 %v1018_v41, %v1018_v41  ;;  %v728_v54 = vpack.c.bf16 %v696_v50, %v696_v50 }
  0x70   : > { %683 = vst.msk [vmem:[#allocation2 + $0x109] sm:$0xff] %vm11158_vm0, %v7389_v55  ;;  %v803_v3 = vld [vmem:[#allocation2 + $0x81] sm:$0xff]  ;;  %v845_v16 = vpack.c.bf16 %v813_v13, %v813_v13  ;;  %v8022_v55 = vpack.c.bf16 %v699_v51, %v699_v51 }
  0x71   : > { %691 = vst.msk [vmem:[#allocation2 + $0x169] sm:$0xff] %vm11158_vm0, %v7405_v63  ;;  %v7975_v5 = vpack.c.bf16 %v803_v3, %v803_v3  ;;  %v808_v15 = vld [vmem:[#allocation2 + $0xc1] sm:$0xff]  ;;  %v697_v63 = vld [vmem:[#allocation2 + $0x18] sm:$0xff]  ;;  %v8031_v3 = vpack.c.bf16 %v701_v61, %v701_v61 }
  0x72   : > { %898 = vrot.lane.b32.xlu2 %v7953_v47, %s11152_s28  ;;  %681 = vst.msk [vmem:[#allocation2 + $0xf1] sm:$0xff] %vm11158_vm0, %v7385_v1  ;;  %v840_v17 = vpack.c.bf16 %v808_v15, %v808_v15  ;;  %v816_v21 = vld [vmem:[#allocation2 + $0x121] sm:$0xff]  ;;  %v1024_v1 = vld [vmem:[#allocation2 + $0x52] sm:$0xff]  ;;  %v8035_v6 = vpack.c.bf16 %v697_v63, %v697_v63 }
  0x73   : > { %686 = vst.msk [vmem:[#allocation2 + $0x129] sm:$0xff] %vm11158_vm0, %v7394_v2  ;;  %v806_v12 = vld [vmem:[#allocation2 + $0xa9] sm:$0xff]  ;;  %v848_v24 = vpack.c.bf16 %v816_v21, %v816_v21  ;;  %v1056_v8 = vpack.c.bf16 %v1024_v1, %v1024_v1  ;;  %v698_v13 = vld [vmem:[#allocation2 + $0x20] sm:$0xff] }
  0x74   : > { %684 = vst.msk [vmem:[#allocation2 + $0x111] sm:$0xff] %vm11158_vm0, %v7390_v10  ;;  %v7985_v14 = vpack.c.bf16 %v806_v12, %v806_v12  ;;  %v811_v23 = vld [vmem:[#allocation2 + $0xe1] sm:$0xff] }
  0x75   : > { %912 = vrot.lane.b32.xlu0 %v836_v49, %s11152_s28  ;;  %689 = vst.msk [vmem:[#allocation2 + $0x151] sm:$0xff] %vm11158_vm0, %v7401_v11  ;;  %v843_v25 = vpack.c.bf16 %v811_v23, %v811_v23  ;;  %v819_v28 = vld [vmem:[#allocation2 + $0x141] sm:$0xff] }
  0x76   : > { %902 = vrot.lane.b32.xlu1 %v831_v52, %s11152_s28  ;;  %v809_v20 = vld [vmem:[#allocation2 + $0xc9] sm:$0xff]  ;;  %687 = vst.msk [vmem:[#allocation2 + $0x139] sm:$0xff] %vm11158_vm0, %v7397_v18  ;;  %v851_v31 = vpack.c.bf16 %v819_v28, %v819_v28  ;;  %v1021_v52 = vld [vmem:[#allocation2 + $0x32] sm:$0xff]  ;;  %v703_v12 = vld [vmem:[#allocation2 + $0x60] sm:$0xff] }
  0x77   : > { %692 = vst.msk [vmem:[#allocation2 + $0x171] sm:$0xff] %vm11158_vm0, %v7406_v19  ;;  %v7993_v22 = vpack.c.bf16 %v809_v20, %v809_v20  ;;  %v814_v30 = vld [vmem:[#allocation2 + $0x109] sm:$0xff]  ;;  %v1053_v57 = vpack.c.bf16 %v1021_v52, %v1021_v52  ;;  %v1027_v15 = vld [vmem:[#allocation2 + $0x7a] sm:$0xff]  ;;  %v8048_v18 = vpack.c.bf16 %v703_v12, %v703_v12  ;;  %v8050_v19 = vpack.c.bf16 %v698_v13, %v698_v13 }
  0x78   : > { %690 = vst.msk [vmem:[#allocation2 + $0x159] sm:$0xff] %vm11158_vm0, %v7402_v26  ;;  %v846_v32 = vpack.c.bf16 %v814_v30, %v814_v30  ;;  %v822_v34 = vld [vmem:[#allocation2 + $0x169] sm:$0xff]  ;;  %v1022_v20 = vld [vmem:[#allocation2 + $0x3a] sm:$0xff]  ;;  %v1059_v21 = vpack.c.bf16 %v1027_v15, %v1027_v15  ;;  %v1032_v15 = vld [vmem:[#allocation2 + $0xb2] sm:$0xff] }
  0x79   : > { %v812_v27 = vld [vmem:[#allocation2 + $0xf1] sm:$0xff]  ;;  %v854_v37 = vpack.c.bf16 %v822_v34, %v822_v34  ;;  %760 = vst.msk [vmem:[#allocation3] sm:$0xf] %vm11160_vm2, %v727_v44  ;;  %v1020_v10 = vld [vmem:[#allocation2 + $0x22] sm:$0xff]  ;;  %v1054_v23 = vpack.c.bf16 %v1022_v20, %v1022_v20 }
  0x7a   : > { %904 = vrot.lane.b32.xlu2 %v7964_v58, %s11152_s28  ;;  %v8000_v29 = vpack.c.bf16 %v812_v27, %v812_v27  ;;  %v817_v36 = vld [vmem:[#allocation2 + $0x129] sm:$0xff]  ;;  %761 = vst.msk [vmem:[#allocation3 + $0x4] sm:$0xf] %vm11160_vm2, %v728_v54  ;;  %v706_v30 = vld [vmem:[#allocation2 + $0x80] sm:$0xff]  ;;  %v716_v20 = vld [vmem:[#allocation2 + $0xf8] sm:$0xff] }
  0x7b   : > { %v815_v33 = vld [vmem:[#allocation2 + $0x111] sm:$0xff]  ;;  %v849_v38 = vpack.c.bf16 %v817_v36, %v817_v36  ;;  %764 = vst.msk [vmem:[#allocation3 + $0x10] sm:$0xf] %vm11160_vm2, %v8022_v55  ;;  %v704_v11 = vld [vmem:[#allocation2 + $0x68] sm:$0xff]  ;;  %v8065_v34 = vpack.c.bf16 %v706_v30, %v706_v30 }
  0x7c   : > { %v8006_v35 = vpack.c.bf16 %v815_v33, %v815_v33  ;;  %v820_v45 = vld [vmem:[#allocation2 + $0x151] sm:$0xff]  ;;  %766 = vst.msk [vmem:[#allocation3 + $0x18] sm:$0xf] %vm11160_vm2, %v8031_v3  ;;  %v709_v44 = vld [vmem:[#allocation2 + $0xa8] sm:$0xff] }
  0x7d   : > { %918 = vrot.lane.b32.xlu0 %v839_v60, %s11152_s28  ;;  %v818_v39 = vld [vmem:[#allocation2 + $0x139] sm:$0xff]  ;;  %v852_v48 = vpack.c.bf16 %v820_v45, %v820_v45  ;;  %v1017_v60 = vld [vmem:[#allocation2 + $0x2] sm:$0xff]  ;;  %762 = vst.msk [vmem:[#allocation3 + $0x8] sm:$0xf] %vm11160_vm2, %v8035_v6  ;;  %v707_v28 = vld [vmem:[#allocation2 + $0x90] sm:$0xff]  ;;  %v8083_v50 = vpack.c.bf16 %v709_v44, %v709_v44 }
  0x7e   : > { %908 = vrot.lane.b32.xlu1 %v834_v62, %s11152_s28  ;;  %v8012_v42 = vpack.c.bf16 %v818_v39, %v818_v39  ;;  %v823_v56 = vld [vmem:[#allocation2 + $0x171] sm:$0xff]  ;;  %v1049_v2 = vpack.c.bf16 %v1017_v60, %v1017_v60  ;;  %768 = vst.msk [vmem:[#allocation3 + $0x20] sm:$0xf] %vm11160_vm2, %v8048_v18  ;;  %v8063_v33 = vpack.c.bf16 %v707_v28, %v707_v28  ;;  %v1028_v52 = vld [vmem:[#allocation2 + $0x82] sm:$0xff] }
  0x7f   : > { %v821_v49 = vld [vmem:[#allocation2 + $0x159] sm:$0xff]  ;;  %v855_v59 = vpack.c.bf16 %v823_v56, %v823_v56  ;;  %763 = vst.msk [vmem:[#allocation3 + $0xc] sm:$0xf] %vm11160_vm2, %v8050_v19  ;;  %v1060_v56 = vpack.c.bf16 %v1028_v52, %v1028_v52  ;;  %v712_v61 = vld [vmem:[#allocation2 + $0xc8] sm:$0xff] }
  0x80   : > { %v8020_v53 = vpack.c.bf16 %v821_v49, %v821_v49  ;;  %v700_v62 = vld [vmem:[#allocation2 + $0x38] sm:$0xff]  ;;  %772 = vst.msk [vmem:[#allocation3 + $0x30] sm:$0xf] %vm11160_vm2, %v8063_v33  ;;  %v1036_v63 = vld [vmem:[#allocation2 + $0xe2] sm:$0xff]  ;;  %v1034_v28 = vld [vmem:[#allocation2 + $0xca] sm:$0xff] }
  0x81   : > { %v8033_v4 = vpack.c.bf16 %v700_v62, %v700_v62  ;;  %771 = vst.msk [vmem:[#allocation3 + $0x2c] sm:$0xf] %vm11160_vm2, %v8065_v34  ;;  %v705_v45 = vld [vmem:[#allocation2 + $0x78] sm:$0xff]  ;;  %v1068_v12 = vpack.c.bf16 %v1036_v63, %v1036_v63  ;;  %v714_v44 = vld [vmem:[#allocation2 + $0xe0] sm:$0xff] }
  0x82   : > { %910 = vrot.lane.b32.xlu2 %v7975_v5, %s11152_s28  ;;  %v8085_v51 = vpack.c.bf16 %v705_v45, %v705_v45  ;;  %774 = vst.msk [vmem:[#allocation3 + $0x38] sm:$0xf] %vm11160_vm2, %v8083_v50  ;;  %v713_v60 = vld [vmem:[#allocation2 + $0xd8] sm:$0xff]  ;;  %v1042_v45 = vld [vmem:[#allocation2 + $0x12a] sm:$0xff] }
  0x83   : > { %765 = vst.msk [vmem:[#allocation3 + $0x14] sm:$0xf] %vm11160_vm2, %v8033_v4  ;;  %v708_v62 = vld [vmem:[#allocation2 + $0x98] sm:$0xff] }
  0x84   : > { %770 = vst.msk [vmem:[#allocation3 + $0x28] sm:$0xf] %vm11160_vm2, %v8085_v51  ;;  %v1038_v63 = vld [vmem:[#allocation2 + $0xfa] sm:$0xff] }
  0x85   : > { %924 = vrot.lane.b32.xlu0 %v842_v7, %s11152_s28  ;;  %v1019_v7 = vld [vmem:[#allocation2 + $0x1a] sm:$0xff] }
  0x86   : > { %914 = vrot.lane.b32.xlu1 %v837_v9, %s11152_s28  ;;  %v1051_v9 = vpack.c.bf16 %v1019_v7, %v1019_v7 }
  0x8a   : > { %916 = vrot.lane.b32.xlu2 %v7985_v14, %s11152_s28 }
  0x8d   : > { %930 = vrot.lane.b32.xlu0 %v845_v16, %s11152_s28  ;;  %v1052_v16 = vpack.c.bf16 %v1020_v10, %v1020_v10 }
  0x8e   : > { %920 = vrot.lane.b32.xlu1 %v840_v17, %s11152_s28  ;;  %v8046_v17 = vpack.c.bf16 %v704_v11, %v704_v11  ;;  %v8105_v11 = vpack.c.bf16 %v708_v62, %v708_v62 }
  0x90   : > { %769 = vst.msk [vmem:[#allocation3 + $0x24] sm:$0xf] %vm11160_vm2, %v8046_v17 }
  0x91   : > { %773 = vst.msk [vmem:[#allocation3 + $0x34] sm:$0xf] %vm11160_vm2, %v8105_v11 }
  0x92   : > { %922 = vrot.lane.b32.xlu2 %v7993_v22, %s11152_s28 }
  0x95   : > { %936 = vrot.lane.b32.xlu0 %v848_v24, %s11152_s28  ;;  %v1023_v24 = vld [vmem:[#allocation2 + $0x4a] sm:$0xff] }
  0x96   : > { %926 = vrot.lane.b32.xlu1 %v843_v25, %s11152_s28  ;;  %v1055_v27 = vpack.c.bf16 %v1023_v24, %v1023_v24  ;;  %v1039_v24 = vld [vmem:[#allocation2 + $0x10a] sm:$0xff] }
  0x9a   : > { %928 = vrot.lane.b32.xlu2 %v8000_v29, %s11152_s28 }
  0x9d   : > { %942 = vrot.lane.b32.xlu0 %v851_v31, %s11152_s28  ;;  %v702_v31 = vld [vmem:[#allocation2 + $0x50] sm:$0xff] }
  0x9e   : > { %932 = vrot.lane.b32.xlu1 %v846_v32, %s11152_s28  ;;  %v1030_v32 = vld [vmem:[#allocation2 + $0x9a] sm:$0xff]  ;;  %v8067_v36 = vpack.c.bf16 %v702_v31, %v702_v31 }
  0xa0   : > { %767 = vst.msk [vmem:[#allocation3 + $0x1c] sm:$0xf] %vm11160_vm2, %v8067_v36 }
  0xa2   : > { %934 = vrot.lane.b32.xlu2 %v8006_v35, %s11152_s28  ;;  %v889_v43 = vpop.permute.xlu0 %888 }
  0xa3   : > { %985 = vst.msk [vmem:[#allocation3] sm:$0xf] %vm984_vm3, %v889_v43  ;;  %v710_v43 = vld [vmem:[#allocation2 + $0xb0] sm:$0xff] }
  0xa4   : > { %v8081_v49 = vpack.c.bf16 %v710_v43, %v710_v43  ;;  %v718_v43 = vld [vmem:[#allocation2 + $0x110] sm:$0xff] }
  0xa5   : > { %948 = vrot.lane.b32.xlu0 %v854_v37, %s11152_s28  ;;  %v1025_v37 = vld [vmem:[#allocation2 + $0x62] sm:$0xff] }
  0xa6   : > { %938 = vrot.lane.b32.xlu1 %v849_v38, %s11152_s28  ;;  %v1062_v38 = vpack.c.bf16 %v1030_v32, %v1030_v32  ;;  %v1057_v39 = vpack.c.bf16 %v1025_v37, %v1025_v37  ;;  %775 = vst.msk [vmem:[#allocation3 + $0x3c] sm:$0xf] %vm11160_vm2, %v8081_v49  ;;  %v1071_v37 = vpack.c.bf16 %v1039_v24, %v1039_v24 }
  0xaa   : > { %940 = vrot.lane.b32.xlu2 %v8012_v42, %s11152_s28 }
  0xad   : > { %1115 = vrot.lane.b32.xlu0 %v1050_v46, %s11154_s26  ;;  %v1033_v46 = vld [vmem:[#allocation2 + $0xc2] sm:$0xff] }
  0xae   : > { %944 = vrot.lane.b32.xlu1 %v852_v48, %s11152_s28  ;;  %v8079_v48 = vpack.c.bf16 %v1026_v40, %v1026_v40  ;;  %v1065_v54 = vpack.c.bf16 %v1033_v46, %v1033_v46 }
  0xb2   : > { %946 = vrot.lane.b32.xlu2 %v8020_v53, %s11152_s28 }
  0xb5   : > { %1121 = vrot.lane.b32.xlu0 %v1053_v57, %s11154_s26  ;;  %v1029_v57 = vld [vmem:[#allocation2 + $0x92] sm:$0xff] }
  0xb6   : > { %950 = vrot.lane.b32.xlu1 %v855_v59, %s11152_s28  ;;  %v8098_v1 = vpack.c.bf16 %v1029_v57, %v1029_v57  ;;  %v8144_v57 = vpack.c.bf16 %v718_v43, %v718_v43  ;;  %v1048_v43 = vld [vmem:[#allocation2 + $0x172] sm:$0xff] }
  0xb8   : > { %783 = vst.msk [vmem:[#allocation3 + $0x5c] sm:$0xf] %vm11160_vm2, %v8144_v57 }
  0xba   : > { %1113 = vrot.lane.b32.xlu2 %v1049_v2, %s11154_s26  ;;  %v8100_v2 = vpack.c.bf16 %v713_v60, %v713_v60  ;;  %v8147_v60 = vpack.c.bf16 %v714_v44, %v714_v44 }
  0xbc   : > { %778 = vst.msk [vmem:[#allocation3 + $0x48] sm:$0xf] %vm11160_vm2, %v8100_v2 }
  0xbd   : > { %1127 = vrot.lane.b32.xlu0 %v1056_v8, %s11154_s26  ;;  %v1031_v8 = vld [vmem:[#allocation2 + $0xaa] sm:$0xff]  ;;  %779 = vst.msk [vmem:[#allocation3 + $0x4c] sm:$0xf] %vm11160_vm2, %v8147_v60 }
  0xbe   : > { %1117 = vrot.lane.b32.xlu1 %v1051_v9, %s11154_s26  ;;  %v8102_v9 = vpack.c.bf16 %v712_v61, %v712_v61  ;;  %v1063_v13 = vpack.c.bf16 %v1031_v8, %v1031_v8  ;;  %v1074_v61 = vpack.c.bf16 %v1042_v45, %v1042_v45  ;;  %v722_v8 = vld [vmem:[#allocation2 + $0x140] sm:$0xff] }
  0xc0   : > { %777 = vst.msk [vmem:[#allocation3 + $0x44] sm:$0xf] %vm11160_vm2, %v8102_v9 }
  0xc2   : > { %1119 = vrot.lane.b32.xlu2 %v1052_v16, %s11154_s26 }
  0xc4   : > { %v897_v25 = vpop.permute.xlu2 %896 }
  0xc5   : > { %1133 = vrot.lane.b32.xlu0 %v1059_v21, %s11154_s26  ;;  %v891_v26 = vpop.permute.xlu0 %890  ;;  %989 = vst.msk [vmem:[#allocation3 + $0x10] sm:$0xf] %vm984_vm3, %v897_v25  ;;  %v715_v21 = vld [vmem:[#allocation2 + $0xf0] sm:$0xff]  ;;  %v8119_v25 = vpack.c.bf16 %v1032_v15, %v1032_v15  ;;  %v8161_v15 = vpack.c.bf16 %v1038_v63, %v1038_v63  ;;  %v1080_v63 = vpack.c.bf16 %v1048_v43, %v1048_v43 }
  0xc6   : > { %1123 = vrot.lane.b32.xlu1 %v1054_v23, %s11154_s26  ;;  %986 = vst.msk [vmem:[#allocation3 + $0x4] sm:$0xf] %vm984_vm3, %v891_v26  ;;  %v711_v23 = vld [vmem:[#allocation2 + $0xc0] sm:$0xff]  ;;  %v8121_v26 = vpack.c.bf16 %v716_v20, %v716_v20  ;;  %v8123_v30 = vpack.c.bf16 %v715_v21, %v715_v21  ;;  %v1040_v21 = vld [vmem:[#allocation2 + $0x112] sm:$0xff] }
  0xc7   : > { %v8126_v32 = vpack.c.bf16 %v711_v23, %v711_v23 }
  0xc8   : > { %781 = vst.msk [vmem:[#allocation3 + $0x54] sm:$0xf] %vm11160_vm2, %v8121_v26 }
  0xc9   : > { %780 = vst.msk [vmem:[#allocation3 + $0x50] sm:$0xf] %vm11160_vm2, %v8123_v30 }
  0xca   : > { %1125 = vrot.lane.b32.xlu2 %v1055_v27, %s11154_s26  ;;  %776 = vst.msk [vmem:[#allocation3 + $0x40] sm:$0xf] %vm11160_vm2, %v8126_v32 }
  0xcc   : > { %v899_v41 = vpop.permute.xlu2 %898 }
  0xcd   : > { %1139 = vrot.lane.b32.xlu0 %v1062_v38, %s11154_s26  ;;  %990 = vst.msk [vmem:[#allocation3 + $0x14] sm:$0xf] %vm984_vm3, %v899_v41  ;;  %v1066_v38 = vpack.c.bf16 %v1034_v28, %v1034_v28  ;;  %v719_v41 = vld [vmem:[#allocation2 + $0x120] sm:$0xff] }
  0xce   : > { %1129 = vrot.lane.b32.xlu1 %v1057_v39, %s11154_s26  ;;  %v1035_v39 = vld [vmem:[#allocation2 + $0xda] sm:$0xff]  ;;  %v8142_v52 = vpack.c.bf16 %v719_v41, %v719_v41  ;;  %v720_v41 = vld [vmem:[#allocation2 + $0x128] sm:$0xff] }
  0xcf   : > { %v8140_v46 = vpack.c.bf16 %v1035_v39, %v1035_v39  ;;  %v725_v39 = vld [vmem:[#allocation2 + $0x168] sm:$0xff] }
  0xd0   : > { %784 = vst.msk [vmem:[#allocation3 + $0x60] sm:$0xf] %vm11160_vm2, %v8142_v52  ;;  %v8184_v45 = vpack.c.bf16 %v725_v39, %v725_v39  ;;  %v726_v39 = vld [vmem:[#allocation2 + $0x170] sm:$0xff] }
  0xd2   : > { %1131 = vrot.lane.b32.xlu2 %v8079_v48, %s11154_s26  ;;  %790 = vst.msk [vmem:[#allocation3 + $0x78] sm:$0xf] %vm11160_vm2, %v8184_v45 }
  0xd4   : > { %v905_v59 = vpop.permute.xlu2 %904 }
  0xd5   : > { %1145 = vrot.lane.b32.xlu0 %v1065_v54, %s11154_s26  ;;  %993 = vst.msk [vmem:[#allocation3 + $0x20] sm:$0xf] %vm984_vm3, %v905_v59 }
  0xd6   : > { %1135 = vrot.lane.b32.xlu1 %v1060_v56, %s11154_s26  ;;  %v1037_v56 = vld [vmem:[#allocation2 + $0xf2] sm:$0xff] }
  0xd7   : > { %v901_v7 = vpop.permute.xlu0 %900  ;;  %v1069_v62 = vpack.c.bf16 %v1037_v56, %v1037_v56  ;;  %v1043_v56 = vld [vmem:[#allocation2 + $0x13a] sm:$0xff] }
  0xd8   : > { %991 = vst.msk [vmem:[#allocation3 + $0x18] sm:$0xf] %vm984_vm3, %v901_v7  ;;  %v893_v10 = vpop.permute.xlu1 %892 }
  0xd9   : > { %987 = vst.msk [vmem:[#allocation3 + $0x8] sm:$0xf] %vm984_vm3, %v893_v10  ;;  %v721_v10 = vld [vmem:[#allocation2 + $0x138] sm:$0xff] }
  0xda   : > { %1137 = vrot.lane.b32.xlu2 %v8098_v1, %s11154_s26  ;;  %v8165_v23 = vpack.c.bf16 %v721_v10, %v721_v10 }
  0xdc   : > { %v911_v16 = vpop.permute.xlu2 %910  ;;  %786 = vst.msk [vmem:[#allocation3 + $0x68] sm:$0xf] %vm11160_vm2, %v8165_v23 }
  0xdd   : > { %1151 = vrot.lane.b32.xlu0 %v1068_v12, %s11154_s26  ;;  %996 = vst.msk [vmem:[#allocation3 + $0x2c] sm:$0xf] %vm984_vm3, %v911_v16  ;;  %v717_v12 = vld [vmem:[#allocation2 + $0x108] sm:$0xff]  ;;  %v8163_v16 = vpack.c.bf16 %v722_v8, %v722_v8 }
  0xde   : > { %1141 = vrot.lane.b32.xlu1 %v1063_v13, %s11154_s26  ;;  %v1045_v13 = vld [vmem:[#allocation2 + $0x152] sm:$0xff]  ;;  %v1044_v8 = vld [vmem:[#allocation2 + $0x142] sm:$0xff] }
  0xdf   : > { %v907_v27 = vpop.permute.xlu0 %906  ;;  %v1077_v28 = vpack.c.bf16 %v1045_v13, %v1045_v13  ;;  %787 = vst.msk [vmem:[#allocation3 + $0x6c] sm:$0xf] %vm11160_vm2, %v8163_v16  ;;  %v8203_v13 = vpack.c.bf16 %v1044_v8, %v1044_v8 }
  0xe0   : > { %994 = vst.msk [vmem:[#allocation3 + $0x24] sm:$0xf] %vm984_vm3, %v907_v27  ;;  %v895_v31 = vpop.permute.xlu1 %894  ;;  %v8168_v27 = vpack.c.bf16 %v717_v12, %v717_v12  ;;  %v723_v12 = vld [vmem:[#allocation2 + $0x150] sm:$0xff] }
  0xe1   : > { %988 = vst.msk [vmem:[#allocation3 + $0xc] sm:$0xf] %vm984_vm3, %v895_v31  ;;  %v1072_v31 = vpack.c.bf16 %v1040_v21, %v1040_v21 }
  0xe2   : > { %1143 = vrot.lane.b32.xlu2 %v8119_v25, %s11154_s26  ;;  %782 = vst.msk [vmem:[#allocation3 + $0x58] sm:$0xf] %vm11160_vm2, %v8168_v27 }
  0xe4   : > { %v917_v40 = vpop.permute.xlu2 %916 }
  0xe5   : > { %1157 = vrot.lane.b32.xlu0 %v1071_v37, %s11154_s26  ;;  %999 = vst.msk [vmem:[#allocation3 + $0x38] sm:$0xf] %vm984_vm3, %v917_v40  ;;  %v1041_v37 = vld [vmem:[#allocation2 + $0x122] sm:$0xff]  ;;  %v724_v40 = vld [vmem:[#allocation2 + $0x158] sm:$0xff] }
  0xe6   : > { %1147 = vrot.lane.b32.xlu1 %v1066_v38, %s11154_s26  ;;  %v8182_v44 = vpack.c.bf16 %v1041_v37, %v1041_v37  ;;  %v1047_v37 = vld [vmem:[#allocation2 + $0x16a] sm:$0xff] }
  0xe7   : > { %v913_v54 = vpop.permute.xlu0 %912 }
  0xe8   : > { %997 = vst.msk [vmem:[#allocation3 + $0x30] sm:$0xf] %vm984_vm3, %v913_v54  ;;  %v903_v59 = vpop.permute.xlu1 %902 }
  0xe9   : > { %992 = vst.msk [vmem:[#allocation3 + $0x1c] sm:$0xf] %vm984_vm3, %v903_v59  ;;  %v8186_v59 = vpack.c.bf16 %v724_v40, %v724_v40  ;;  %v8217_v40 = vpack.c.bf16 %v1047_v37, %v1047_v37 }
  0xea   : > { %1149 = vrot.lane.b32.xlu2 %v8140_v46, %s11154_s26 }
  0xeb   : > { %789 = vst.msk [vmem:[#allocation3 + $0x74] sm:$0xf] %vm11160_vm2, %v8186_v59 }
  0xec   : > { %v923_v7 = vpop.permute.xlu2 %922 }
  0xed   : > { %1163 = vrot.lane.b32.xlu0 %v1074_v61, %s11154_s26  ;;  %1002 = vst.msk [vmem:[#allocation3 + $0x44] sm:$0xf] %vm984_vm3, %v923_v7  ;;  %v1075_v7 = vpack.c.bf16 %v1043_v56, %v1043_v56 }
  0xee   : > { %1153 = vrot.lane.b32.xlu1 %v1069_v62, %s11154_s26  ;;  %v8189_v62 = vpack.c.bf16 %v720_v41, %v720_v41  ;;  %v8219_v41 = vpack.c.bf16 %v726_v39, %v726_v39  ;;  %v1468_v39 = vld [vmem:[#allocation2 + $0x21] sm:$0xff] }
  0xef   : > { %v919_v20 = vpop.permute.xlu0 %918 }
  0xf0   : > { %1000 = vst.msk [vmem:[#allocation3 + $0x3c] sm:$0xf] %vm984_vm3, %v919_v20  ;;  %v909_v24 = vpop.permute.xlu1 %908  ;;  %v8205_v20 = vpack.c.bf16 %v723_v12, %v723_v12  ;;  %v1467_v12 = vld [vmem:[#allocation2 + $0x19] sm:$0xff] }
  0xf1   : > { %995 = vst.msk [vmem:[#allocation3 + $0x28] sm:$0xf] %vm984_vm3, %v909_v24  ;;  %v1046_v24 = vld [vmem:[#allocation2 + $0x15a] sm:$0xff] }
  0xf2   : > { %1155 = vrot.lane.b32.xlu2 %v8161_v15, %s11154_s26  ;;  %785 = vst.msk [vmem:[#allocation3 + $0x64] sm:$0xf] %vm11160_vm2, %v8189_v62 }
  0xf3   : > { %788 = vst.msk [vmem:[#allocation3 + $0x70] sm:$0xf] %vm11160_vm2, %v8205_v20 }
  0xf4   : > { %v929_v38 = vpop.permute.xlu2 %928  ;;  %791 = vst.msk [vmem:[#allocation3 + $0x7c] sm:$0xf] %vm11160_vm2, %v8219_v41 }
  0xf5   : > { %1169 = vrot.lane.b32.xlu0 %v1077_v28, %s11154_s26  ;;  %1005 = vst.msk [vmem:[#allocation3 + $0x50] sm:$0xf] %vm984_vm3, %v929_v38 }
  0xf6   : > { %1159 = vrot.lane.b32.xlu1 %v1072_v31, %s11154_s26  ;;  %v1078_v31 = vpack.c.bf16 %v1046_v24, %v1046_v24 }
  0xf7   : > { %v925_v54 = vpop.permute.xlu0 %924 }
  0xf8   : > { %1003 = vst.msk [vmem:[#allocation3 + $0x48] sm:$0xf] %vm984_vm3, %v925_v54  ;;  %v915_v61 = vpop.permute.xlu1 %914 }
  0xf9   : > { %998 = vst.msk [vmem:[#allocation3 + $0x34] sm:$0xf] %vm984_vm3, %v915_v61 }
  0xfa   : > { %1161 = vrot.lane.b32.xlu2 %v8182_v44, %s11154_s26 }
  0xfc   : > { %v935_v10 = vpop.permute.xlu2 %934 }
  0xfd   : > { %1175 = vrot.lane.b32.xlu0 %v1080_v63, %s11154_s26  ;;  %1008 = vst.msk [vmem:[#allocation3 + $0x5c] sm:$0xf] %vm984_vm3, %v935_v10 }
  0xfe   : > { %1165 = vrot.lane.b32.xlu1 %v1075_v7, %s11154_s26 }
  0xff   : > { %v931_v21 = vpop.permute.xlu0 %930 }
 0x100   : > { %1006 = vst.msk [vmem:[#allocation3 + $0x54] sm:$0xf] %vm984_vm3, %v931_v21  ;;  %v921_v28 = vpop.permute.xlu1 %920  ;;  %v1499_v21 = vpack.c.bf16 %v1467_v12, %v1467_v12 }
 0x101   : > { %1001 = vst.msk [vmem:[#allocation3 + $0x40] sm:$0xf] %vm984_vm3, %v921_v28 }
 0x102   : > { %1167 = vrot.lane.b32.xlu2 %v8203_v13, %s11154_s26 }
 0x104   : > { %v941_v38 = vpop.permute.xlu2 %940 }
 0x105   : > { %1342 = vrot.lane.b32.xlu0 %v8022_v55, %s11143_s27  ;;  %1011 = vst.msk [vmem:[#allocation3 + $0x68] sm:$0xf] %vm984_vm3, %v941_v38 }
 0x106   : > { %1171 = vrot.lane.b32.xlu1 %v1078_v31, %s11154_s26 }
 0x107   : > { %v937_v43 = vpop.permute.xlu0 %936 }
 0x108   : > { %1009 = vst.msk [vmem:[#allocation3 + $0x60] sm:$0xf] %vm984_vm3, %v937_v43  ;;  %v927_v54 = vpop.permute.xlu1 %926  ;;  %v1469_v43 = vld [vmem:[#allocation2 + $0x31] sm:$0xff] }
 0x109   : > { %1004 = vst.msk [vmem:[#allocation3 + $0x4c] sm:$0xf] %vm984_vm3, %v927_v54  ;;  %v8336_v54 = vpack.c.bf16 %v1469_v43, %v1469_v43 }
 0x10a   : > { %1173 = vrot.lane.b32.xlu2 %v8217_v40, %s11154_s26 }
 0x10c   : > { %v947_v55 = vpop.permute.xlu2 %946 }
 0x10d   : > { %1348 = vrot.lane.b32.xlu0 %v8067_v36, %s11143_s27  ;;  %1014 = vst.msk [vmem:[#allocation3 + $0x74] sm:$0xf] %vm984_vm3, %v947_v55 }
 0x10e   : > { %1338 = vrot.lane.b32.xlu1 %v8035_v6, %s11143_s27 }
 0x10f   : > { %v943_v56 = vpop.permute.xlu0 %942 }
 0x110   : > { %1012 = vst.msk [vmem:[#allocation3 + $0x6c] sm:$0xf] %vm984_vm3, %v943_v56  ;;  %v933_v61 = vpop.permute.xlu1 %932  ;;  %v1471_v56 = vld [vmem:[#allocation2 + $0x49] sm:$0xff] }
 0x111   : > { %1007 = vst.msk [vmem:[#allocation3 + $0x58] sm:$0xf] %vm984_vm3, %v933_v61 }
 0x112   : > { %1340 = vrot.lane.b32.xlu2 %v8050_v19, %s11143_s27 }
 0x114   : > { %v1114_v63 = vpop.permute.xlu2 %1113 }
 0x115   : > { %1354 = vrot.lane.b32.xlu0 %v8085_v51, %s11143_s27  ;;  %1210 = vst.msk [vmem:[#allocation3] sm:$0xf] %vm1209_vm4, %v1114_v63  ;;  %v8340_v63 = vpack.c.bf16 %v1471_v56, %v1471_v56 }
 0x116   : > { %1344 = vrot.lane.b32.xlu1 %v8033_v4, %s11143_s27 }
 0x117   : > { %v949_v6 = vpop.permute.xlu0 %948 }
 0x118   : > { %1015 = vst.msk [vmem:[#allocation3 + $0x78] sm:$0xf] %vm984_vm3, %v949_v6  ;;  %v939_v36 = vpop.permute.xlu1 %938 }
 0x119   : > { %1010 = vst.msk [vmem:[#allocation3 + $0x64] sm:$0xf] %vm984_vm3, %v939_v36 }
 0x11a   : > { %1346 = vrot.lane.b32.xlu2 %v8031_v3, %s11143_s27 }
 0x11c   : > { %v1120_v19 = vpop.permute.xlu2 %1119 }
 0x11d   : > { %1360 = vrot.lane.b32.xlu0 %v8105_v11, %s11143_s27  ;;  %1213 = vst.msk [vmem:[#allocation3 + $0xc] sm:$0xf] %vm1209_vm4, %v1120_v19 }
 0x11e   : > { %1350 = vrot.lane.b32.xlu1 %v8048_v18, %s11143_s27 }
 0x11f   : > { %v1116_v51 = vpop.permute.xlu0 %1115 }
 0x120   : > { %1211 = vst.msk [vmem:[#allocation3 + $0x4] sm:$0xf] %vm1209_vm4, %v1116_v51  ;;  %v945_v4 = vpop.permute.xlu1 %944  ;;  %v1474_v51 = vld [vmem:[#allocation2 + $0x69] sm:$0xff] }
 0x121   : > { %1013 = vst.msk [vmem:[#allocation3 + $0x70] sm:$0xf] %vm984_vm3, %v945_v4 }
 0x122   : > { %1352 = vrot.lane.b32.xlu2 %v8046_v17, %s11143_s27 }
 0x124   : > { %v1126_v7 = vpop.permute.xlu2 %1125 }
 0x125   : > { %1366 = vrot.lane.b32.xlu0 %v8126_v32, %s11143_s27  ;;  %1216 = vst.msk [vmem:[#allocation3 + $0x18] sm:$0xf] %vm1209_vm4, %v1126_v7  ;;  %v7441_v32 = vld [vmem:[%s7895_s24 + $0x78] sm:$0xff]   ;;  %v8353_v7 = vpack.c.bf16 %v1474_v51, %v1474_v51  ;;  %s11139_s24 = smov 56  }
 0x126   : > { %1356 = vrot.lane.b32.xlu1 %v8065_v34, %s11143_s27  ;;  %v7410_v10 = vunpack.c.h.bf16 %v7441_v32 }
 0x127   : > { %v1122_v3 = vpop.permute.xlu0 %1121 }
 0x128   : > { %1214 = vst.msk [vmem:[#allocation3 + $0x10] sm:$0xf] %vm1209_vm4, %v1122_v3  ;;  %v951_v18 = vpop.permute.xlu1 %950 }
 0x129   : > { %1016 = vst.msk [vmem:[#allocation3 + $0x7c] sm:$0xf] %vm984_vm3, %v951_v18 }
 0x12a   : > { %1358 = vrot.lane.b32.xlu2 %v8063_v33, %s11143_s27  ;;  %v7409_v33 = vunpack.c.l.bf16 %v7441_v32  ;;  %694 = vst.msk [vmem:[#allocation2 + $0x189] sm:$0xff] %vm11158_vm0, %v7410_v10 }
 0x12c   : > { %v1132_v17 = vpop.permute.xlu2 %1131  ;;  %693 = vst.msk [vmem:[#allocation2 + $0x181] sm:$0xff] %vm11158_vm0, %v7409_v33 }
 0x12d   : > { %1372 = vrot.lane.b32.xlu0 %v8147_v60, %s11143_s27  ;;  %1219 = vst.msk [vmem:[#allocation3 + $0x24] sm:$0xf] %vm1209_vm4, %v1132_v17 }
 0x12e   : > { %1362 = vrot.lane.b32.xlu1 %v8083_v50, %s11143_s27 }
 0x12f   : > { %v1128_v11 = vpop.permute.xlu0 %1127 }
 0x130   : > { %1217 = vst.msk [vmem:[#allocation3 + $0x1c] sm:$0xf] %vm1209_vm4, %v1128_v11  ;;  %v1118_v34 = vpop.permute.xlu1 %1117  ;;  %v1477_v11 = vld [vmem:[#allocation2 + $0x91] sm:$0xff] }
 0x131   : > { %1212 = vst.msk [vmem:[#allocation3 + $0x8] sm:$0xf] %vm1209_vm4, %v1118_v34  ;;  %v8366_v32 = vpack.c.bf16 %v1477_v11, %v1477_v11 }
 0x132   : > { %1364 = vrot.lane.b32.xlu2 %v8081_v49, %s11143_s27 }
 0x133   : > { %v1272_v24 = vld [vmem:[#allocation2 + $0x180] sm:$0xff] }
 0x134   : > { %v1138_v8 = vpop.permute.xlu2 %1137  ;;  %v8317_v31 = vpack.c.bf16 %v1272_v24, %v1272_v24 }
 0x135   : > { %1378 = vrot.lane.b32.xlu0 %v8168_v27, %s11143_s27  ;;  %1222 = vst.msk [vmem:[#allocation3 + $0x30] sm:$0xf] %vm1209_vm4, %v1138_v8 }
 0x136   : > { %1368 = vrot.lane.b32.xlu1 %v8102_v9, %s11143_s27 }
 0x137   : > { %v1134_v50 = vpop.permute.xlu0 %1133 }
 0x138   : > { %1220 = vst.msk [vmem:[#allocation3 + $0x28] sm:$0xf] %vm1209_vm4, %v1134_v50  ;;  %v1124_v60 = vpop.permute.xlu1 %1123 }
 0x139   : > { %1215 = vst.msk [vmem:[#allocation3 + $0x14] sm:$0xf] %vm1209_vm4, %v1124_v60  ;;  %v1480_v60 = vld [vmem:[#allocation2 + $0xb1] sm:$0xff] }
 0x13a   : > { %1370 = vrot.lane.b32.xlu2 %v8100_v2, %s11143_s27 }
 0x13c   : > { %v1144_v49 = vpop.permute.xlu2 %1143 }
 0x13d   : > { %1384 = vrot.lane.b32.xlu0 %v8189_v62, %s11143_s27  ;;  %1225 = vst.msk [vmem:[#allocation3 + $0x3c] sm:$0xf] %vm1209_vm4, %v1144_v49 }
 0x13e   : > { %1374 = vrot.lane.b32.xlu1 %v8123_v30, %s11143_s27 }
 0x13f   : > { %v1140_v27 = vpop.permute.xlu0 %1139 }
 0x140   : > { %1223 = vst.msk [vmem:[#allocation3 + $0x34] sm:$0xf] %vm1209_vm4, %v1140_v27  ;;  %v1130_v9 = vpop.permute.xlu1 %1129  ;;  %v8379_v27 = vpack.c.bf16 %v1480_v60, %v1480_v60 }
 0x141   : > { %1218 = vst.msk [vmem:[#allocation3 + $0x20] sm:$0xf] %vm1209_vm4, %v1130_v9 }
 0x142   : > { %1376 = vrot.lane.b32.xlu2 %v8121_v26, %s11143_s27 }
 0x144   : > { %v1150_v2 = vpop.permute.xlu2 %1149 }
 0x145   : > { %1390 = vrot.lane.b32.xlu0 %v8205_v20, %s11143_s27  ;;  %1228 = vst.msk [vmem:[#allocation3 + $0x48] sm:$0xf] %vm1209_vm4, %v1150_v2 }
 0x146   : > { %1380 = vrot.lane.b32.xlu1 %v8144_v57, %s11143_s27 }
 0x147   : > { %v1146_v30 = vpop.permute.xlu0 %1145 }
 0x148   : > { %1226 = vst.msk [vmem:[#allocation3 + $0x40] sm:$0xf] %vm1209_vm4, %v1146_v30  ;;  %v1136_v62 = vpop.permute.xlu1 %1135  ;;  %v1483_v30 = vld [vmem:[#allocation2 + $0xd9] sm:$0xff] }
 0x149   : > { %1221 = vst.msk [vmem:[#allocation3 + $0x2c] sm:$0xf] %vm1209_vm4, %v1136_v62 }
 0x14a   : > { %1382 = vrot.lane.b32.xlu2 %v8142_v52, %s11143_s27 }
 0x14c   : > { %v1156_v26 = vpop.permute.xlu2 %1155 }
 0x14d   : > { %1396 = vrot.lane.b32.xlu0 %v8219_v41, %s11143_s27  ;;  %1231 = vst.msk [vmem:[#allocation3 + $0x54] sm:$0xf] %vm1209_vm4, %v1156_v26  ;;  %v8392_v26 = vpack.c.bf16 %v1483_v30, %v1483_v30  ;;  %v1692_v30 = vld [vmem:[#allocation2 + $0x1a] sm:$0xff] }
 0x14e   : > { %1386 = vrot.lane.b32.xlu1 %v8165_v23, %s11143_s27 }
 0x14f   : > { %v1152_v57 = vpop.permute.xlu0 %1151 }
 0x150   : > { %1229 = vst.msk [vmem:[#allocation3 + $0x4c] sm:$0xf] %vm1209_vm4, %v1152_v57  ;;  %v1142_v20 = vpop.permute.xlu1 %1141 }
 0x151   : > { %1224 = vst.msk [vmem:[#allocation3 + $0x38] sm:$0xf] %vm1209_vm4, %v1142_v20 }
 0x152   : > { %1388 = vrot.lane.b32.xlu2 %v8163_v16, %s11143_s27  ;;  %v1273_v16 = vld [vmem:[#allocation2 + $0x188] sm:$0xff] }
 0x154   : > { %v1162_v52 = vpop.permute.xlu2 %1161 }
 0x155   : > { %1563 = vrot.lane.b32.xlu0 %v1499_v21, %s11145_s17  ;;  %1234 = vst.msk [vmem:[#allocation3 + $0x60] sm:$0xf] %vm1209_vm4, %v1162_v52  ;;  %v1486_v21 = vld [vmem:[#allocation2 + $0xf9] sm:$0xff] }
 0x156   : > { %1392 = vrot.lane.b32.xlu1 %v8186_v59, %s11143_s27  ;;  %v8326_v59 = vpack.c.bf16 %v1273_v16, %v1273_v16 }
 0x157   : > { %v1158_v23 = vpop.permute.xlu0 %1157 }
 0x158   : > { %1232 = vst.msk [vmem:[#allocation3 + $0x58] sm:$0xf] %vm1209_vm4, %v1158_v23  ;;  %v1148_v28 = vpop.permute.xlu1 %1147  ;;  %v8405_v23 = vpack.c.bf16 %v1486_v21, %v1486_v21 }
 0x159   : > { %1227 = vst.msk [vmem:[#allocation3 + $0x44] sm:$0xf] %vm1209_vm4, %v1148_v28 }
 0x15a   : > { %1394 = vrot.lane.b32.xlu2 %v8184_v45, %s11143_s27  ;;  %v1500_v45 = vpack.c.bf16 %v1468_v39, %v1468_v39 }
 0x15c   : > { %v1168_v37 = vpop.permute.xlu2 %1167 }
 0x15d   : > { %1569 = vrot.lane.b32.xlu0 %v7953_v47, %s11145_s17  ;;  %1237 = vst.msk [vmem:[#allocation3 + $0x6c] sm:$0xf] %vm1209_vm4, %v1168_v37  ;;  %v1489_v37 = vld [vmem:[#allocation2 + $0x121] sm:$0xff] }
 0x15e   : > { %1398 = vrot.lane.b32.xlu1 %v8317_v31, %s11143_s27  ;;  %v8418_v39 = vpack.c.bf16 %v1489_v37, %v1489_v37 }
 0x15f   : > { %v1164_v38 = vpop.permute.xlu0 %1163 }
 0x160   : > { %1235 = vst.msk [vmem:[#allocation3 + $0x64] sm:$0xf] %vm1209_vm4, %v1164_v38  ;;  %v1154_v41 = vpop.permute.xlu1 %1153 }
 0x161   : > { %1230 = vst.msk [vmem:[#allocation3 + $0x50] sm:$0xf] %vm1209_vm4, %v1154_v41 }
 0x162   : > { %1400 = vrot.lane.b32.xlu2 %v8326_v59, %s11143_s27  ;;  %s7290_s27 = sshll.u32 %s7875_s16, 5  ;;  %s11231_s16 = smov 32  }
 0x164   : > { %v1174_v47 = vpop.permute.xlu2 %1173 }
 0x165   : > { %1575 = vrot.lane.b32.xlu0 %v7964_v58, %s11145_s17  ;;  %1240 = vst.msk [vmem:[#allocation3 + $0x78] sm:$0xf] %vm1209_vm4, %v1174_v47  ;;  %v1472_v58 = vld [vmem:[#allocation2 + $0x51] sm:$0xff] }
 0x166   : > { %1565 = vrot.lane.b32.xlu1 %v1500_v45, %s11145_s17  ;;  %v8349_v36 = vpack.c.bf16 %v1472_v58, %v1472_v58  ;;  %v1497_v45 = vld [vmem:[#allocation2 + $0x181] sm:$0xff] }
 0x167   : > { %v1170_v55 = vpop.permute.xlu0 %1169 }
 0x168   : > { %1238 = vst.msk [vmem:[#allocation3 + $0x70] sm:$0xf] %vm1209_vm4, %v1170_v55  ;;  %v1160_v61 = vpop.permute.xlu1 %1159  ;;  %v1492_v55 = vld [vmem:[#allocation2 + $0x141] sm:$0xff] }
 0x169   : > { %1233 = vst.msk [vmem:[#allocation3 + $0x5c] sm:$0xf] %vm1209_vm4, %v1160_v61  ;;  %v8431_v61 = vpack.c.bf16 %v1497_v45, %v1497_v45  ;;  %v8433_v58 = vpack.c.bf16 %v1492_v55, %v1492_v55 }
 0x16a   : > { %1567 = vrot.lane.b32.xlu2 %v8336_v54, %s11145_s17 }
 0x16c   : > { %v1341_v6 = vpop.permute.xlu2 %1340 }
 0x16d   : > { %1581 = vrot.lane.b32.xlu0 %v7975_v5, %s11145_s17  ;;  %1436 = vst.msk [vmem:[#allocation3 + $0x4] sm:$0xf] %vm1434_vm5, %v1341_v6  ;;  %v1475_v5 = vld [vmem:[#allocation2 + $0x79] sm:$0xff] }
 0x16e   : > { %1571 = vrot.lane.b32.xlu1 %v8340_v63, %s11145_s17  ;;  %v8362_v18 = vpack.c.bf16 %v1475_v5, %v1475_v5  ;;  %v1495_v5 = vld [vmem:[#allocation2 + $0x169] sm:$0xff] }
 0x16f   : > { %v1176_v19 = vpop.permute.xlu0 %1175  ;;  %v8446_v11 = vpack.c.bf16 %v1495_v5, %v1495_v5 }
 0x170   : > { %1241 = vst.msk [vmem:[#allocation3 + $0x7c] sm:$0xf] %vm1209_vm4, %v1176_v19  ;;  %v1166_v4 = vpop.permute.xlu1 %1165  ;;  %v1693_v19 = vld [vmem:[#allocation2 + $0x22] sm:$0xff] }
 0x171   : > { %1236 = vst.msk [vmem:[#allocation3 + $0x68] sm:$0xf] %vm1209_vm4, %v1166_v4 }
 0x172   : > { %1573 = vrot.lane.b32.xlu2 %v8349_v36, %s11145_s17 }
 0x174   : > { %v1347_v3 = vpop.permute.xlu2 %1346 }
 0x175   : > { %1587 = vrot.lane.b32.xlu0 %v7985_v14, %s11145_s17  ;;  %1439 = vst.msk [vmem:[#allocation3 + $0x10] sm:$0xf] %vm1434_vm5, %v1347_v3  ;;  %v1478_v14 = vld [vmem:[#allocation2 + $0x99] sm:$0xff] }
 0x176   : > { %1577 = vrot.lane.b32.xlu1 %v8353_v7, %s11145_s17  ;;  %v8375_v8 = vpack.c.bf16 %v1478_v14, %v1478_v14 }
 0x177   : > { %v1343_v17 = vpop.permute.xlu0 %1342 }
 0x178   : > { %1437 = vst.msk [vmem:[#allocation3 + $0x8] sm:$0xf] %vm1434_vm5, %v1343_v17  ;;  %v1172_v34 = vpop.permute.xlu1 %1171  ;;  %v1725_v17 = vpack.c.bf16 %v1693_v19, %v1693_v19  ;;  %v1701_v19 = vld [vmem:[#allocation2 + $0x82] sm:$0xff] }
 0x179   : > { %1239 = vst.msk [vmem:[#allocation3 + $0x74] sm:$0xf] %vm1209_vm4, %v1172_v34  ;;  %v1496_v34 = vld [vmem:[#allocation2 + $0x171] sm:$0xff] }
 0x17a   : > { %1579 = vrot.lane.b32.xlu2 %v8362_v18, %s11145_s17 }
 0x17c   : > { %v1353_v33 = vpop.permute.xlu2 %1352 }
 0x17d   : > { %1593 = vrot.lane.b32.xlu0 %v7993_v22, %s11145_s17  ;;  %1442 = vst.msk [vmem:[#allocation3 + $0x1c] sm:$0xf] %vm1434_vm5, %v1353_v33  ;;  %v1481_v22 = vld [vmem:[#allocation2 + $0xc1] sm:$0xff]  ;;  %v1696_v33 = vld [vmem:[#allocation2 + $0x4a] sm:$0xff] }
 0x17e   : > { %1583 = vrot.lane.b32.xlu1 %v8366_v32, %s11145_s17  ;;  %v8388_v10 = vpack.c.bf16 %v1481_v22, %v1481_v22 }
 0x17f   : > { %v1349_v50 = vpop.permute.xlu0 %1348 }
 0x180   : > { %1440 = vst.msk [vmem:[#allocation3 + $0x14] sm:$0xf] %vm1434_vm5, %v1349_v50  ;;  %v1339_v49 = vpop.permute.xlu1 %1338  ;;  %v8454_v50 = vpack.c.bf16 %v1496_v34, %v1496_v34 }
 0x181   : > { %1435 = vst.msk [vmem:[#allocation3] sm:$0xf] %vm1434_vm5, %v1339_v49  ;;  %v1498_v49 = vld [vmem:[#allocation2 + $0x189] sm:$0xff] }
 0x182   : > { %1585 = vrot.lane.b32.xlu2 %v8375_v8, %s11145_s17 }
 0x184   : > { %v1359_v9 = vpop.permute.xlu2 %1358 }
 0x185   : > { %1599 = vrot.lane.b32.xlu0 %v8000_v29, %s11145_s17  ;;  %1445 = vst.msk [vmem:[#allocation3 + $0x28] sm:$0xf] %vm1434_vm5, %v1359_v9  ;;  %v1484_v29 = vld [vmem:[#allocation2 + $0xe1] sm:$0xff]  ;;  %v8458_v9 = vpack.c.bf16 %v1696_v33, %v1696_v33 }
 0x186   : > { %1589 = vrot.lane.b32.xlu1 %v8379_v27, %s11145_s17  ;;  %v8401_v57 = vpack.c.bf16 %v1484_v29, %v1484_v29  ;;  %v1724_v29 = vpack.c.bf16 %v1692_v30, %v1692_v30 }
 0x187   : > { %v1355_v2 = vpop.permute.xlu0 %1354 }
 0x188   : > { %1443 = vst.msk [vmem:[#allocation3 + $0x20] sm:$0xf] %vm1434_vm5, %v1355_v2  ;;  %v1345_v62 = vpop.permute.xlu1 %1344  ;;  %v8460_v2 = vpack.c.bf16 %v1498_v49, %v1498_v49  ;;  %v1706_v49 = vld [vmem:[#allocation2 + $0xc2] sm:$0xff] }
 0x189   : > { %1438 = vst.msk [vmem:[#allocation3 + $0xc] sm:$0xf] %vm1434_vm5, %v1345_v62  ;;  %v1738_v30 = vpack.c.bf16 %v1706_v49, %v1706_v49 }
 0x18a   : > { %1591 = vrot.lane.b32.xlu2 %v8388_v10, %s11145_s17 }
 0x18c   : > { %v1365_v12 = vpop.permute.xlu2 %1364 }
 0x18d   : > { %1605 = vrot.lane.b32.xlu0 %v8006_v35, %s11145_s17  ;;  %1448 = vst.msk [vmem:[#allocation3 + $0x34] sm:$0xf] %vm1434_vm5, %v1365_v12  ;;  %v1487_v35 = vld [vmem:[#allocation2 + $0x109] sm:$0xff] }
 0x18e   : > { %1595 = vrot.lane.b32.xlu1 %v8392_v26, %s11145_s17  ;;  %v8414_v28 = vpack.c.bf16 %v1487_v35, %v1487_v35  ;;  %v1695_v35 = vld [vmem:[#allocation2 + $0x3a] sm:$0xff] }
 0x18f   : > { %v1361_v20 = vpop.permute.xlu0 %1360 }
 0x190   : > { %1446 = vst.msk [vmem:[#allocation3 + $0x2c] sm:$0xf] %vm1434_vm5, %v1361_v20  ;;  %v1351_v52 = vpop.permute.xlu1 %1350  ;;  %v1694_v20 = vld [vmem:[#allocation2 + $0x32] sm:$0xff] }
 0x191   : > { %1441 = vst.msk [vmem:[#allocation3 + $0x18] sm:$0xf] %vm1434_vm5, %v1351_v52  ;;  %v8471_v52 = vpack.c.bf16 %v1694_v20, %v1694_v20  ;;  %v1709_v20 = vld [vmem:[#allocation2 + $0xe2] sm:$0xff] }
 0x192   : > { %1597 = vrot.lane.b32.xlu2 %v8401_v57, %s11145_s17 }
 0x194   : > { %v1371_v24 = vpop.permute.xlu2 %1370 }
 0x195   : > { %1611 = vrot.lane.b32.xlu0 %v8012_v42, %s11145_s17  ;;  %1451 = vst.msk [vmem:[#allocation3 + $0x40] sm:$0xf] %vm1434_vm5, %v1371_v24  ;;  %v1490_v42 = vld [vmem:[#allocation2 + $0x129] sm:$0xff] }
 0x196   : > { %1601 = vrot.lane.b32.xlu1 %v8405_v23, %s11145_s17  ;;  %v8427_v43 = vpack.c.bf16 %v1490_v42, %v1490_v42 }
 0x197   : > { %v1367_v16 = vpop.permute.xlu0 %1366 }
 0x198   : > { %1449 = vst.msk [vmem:[#allocation3 + $0x38] sm:$0xf] %vm1434_vm5, %v1367_v16  ;;  %v1357_v38 = vpop.permute.xlu1 %1356  ;;  %v8479_v16 = vpack.c.bf16 %v1695_v35, %v1695_v35  ;;  %v1741_v35 = vpack.c.bf16 %v1709_v20, %v1709_v20 }
 0x199   : > { %1444 = vst.msk [vmem:[#allocation3 + $0x24] sm:$0xf] %vm1434_vm5, %v1357_v38  ;;  %v1697_v38 = vld [vmem:[#allocation2 + $0x52] sm:$0xff] }
 0x19a   : > { %1603 = vrot.lane.b32.xlu2 %v8414_v28, %s11145_s17 }
 0x19c   : > { %v1377_v41 = vpop.permute.xlu2 %1376 }
 0x19d   : > { %1617 = vrot.lane.b32.xlu0 %v8020_v53, %s11145_s17  ;;  %1454 = vst.msk [vmem:[#allocation3 + $0x4c] sm:$0xf] %vm1434_vm5, %v1377_v41  ;;  %v1493_v53 = vld [vmem:[#allocation2 + $0x151] sm:$0xff]  ;;  %v8483_v41 = vpack.c.bf16 %v1697_v38, %v1697_v38 }
 0x19e   : > { %1607 = vrot.lane.b32.xlu1 %v8418_v39, %s11145_s17  ;;  %v8442_v51 = vpack.c.bf16 %v1493_v53, %v1493_v53 }
 0x19f   : > { %v1373_v47 = vpop.permute.xlu0 %1372 }
 0x1a0   : > { %1452 = vst.msk [vmem:[#allocation3 + $0x44] sm:$0xf] %vm1434_vm5, %v1373_v47  ;;  %v1363_v56 = vpop.permute.xlu1 %1362 }
 0x1a1   : > { %1447 = vst.msk [vmem:[#allocation3 + $0x30] sm:$0xf] %vm1434_vm5, %v1363_v56  ;;  %v1700_v56 = vld [vmem:[#allocation2 + $0x7a] sm:$0xff] }
 0x1a2   : > { %1609 = vrot.lane.b32.xlu2 %v8427_v43, %s11145_s17 }
 0x1a4   : > { %v1383_v6 = vpop.permute.xlu2 %1382 }
 0x1a5   : > { %1623 = vrot.lane.b32.xlu0 %v8431_v61, %s11145_s17  ;;  %1457 = vst.msk [vmem:[#allocation3 + $0x58] sm:$0xf] %vm1434_vm5, %v1383_v6  ;;  %v1732_v6 = vpack.c.bf16 %v1700_v56, %v1700_v56 }
 0x1a6   : > { %1613 = vrot.lane.b32.xlu1 %v8433_v58, %s11145_s17 }
 0x1a7   : > { %v1379_v4 = vpop.permute.xlu0 %1378 }
 0x1a8   : > { %1455 = vst.msk [vmem:[#allocation3 + $0x50] sm:$0xf] %vm1434_vm5, %v1379_v4  ;;  %v1369_v3 = vpop.permute.xlu1 %1368  ;;  %v8502_v4 = vpack.c.bf16 %v1701_v19, %v1701_v19 }
 0x1a9   : > { %1450 = vst.msk [vmem:[#allocation3 + $0x3c] sm:$0xf] %vm1434_vm5, %v1369_v3  ;;  %v1703_v3 = vld [vmem:[#allocation2 + $0x9a] sm:$0xff] }
 0x1aa   : > { %1615 = vrot.lane.b32.xlu2 %v8442_v51, %s11145_s17  ;;  %v1735_v34 = vpack.c.bf16 %v1703_v3, %v1703_v3 }
 0x1ac   : > { %v1389_v14 = vpop.permute.xlu2 %1388 }
 0x1ad   : > { %1790 = vrot.lane.b32.xlu0 %v1725_v17, %s11141_s18  ;;  %1460 = vst.msk [vmem:[#allocation3 + $0x64] sm:$0xf] %vm1434_vm5, %v1389_v14  ;;  %v1704_v14 = vld [vmem:[#allocation2 + $0xaa] sm:$0xff] }
 0x1ae   : > { %1619 = vrot.lane.b32.xlu1 %v8446_v11, %s11145_s17 }
 0x1af   : > { %v1385_v60 = vpop.permute.xlu0 %1384 }
 0x1b0   : > { %1458 = vst.msk [vmem:[#allocation3 + $0x5c] sm:$0xf] %vm1434_vm5, %v1385_v60  ;;  %v1375_v22 = vpop.permute.xlu1 %1374 }
 0x1b1   : > { %1453 = vst.msk [vmem:[#allocation3 + $0x48] sm:$0xf] %vm1434_vm5, %v1375_v22 }
 0x1b2   : > { %1621 = vrot.lane.b32.xlu2 %v8454_v50, %s11145_s17 }
 0x1b4   : > { %v1395_v62 = vpop.permute.xlu2 %1394 }
 0x1b5   : > { %1796 = vrot.lane.b32.xlu0 %v8458_v9, %s11141_s18  ;;  %1463 = vst.msk [vmem:[#allocation3 + $0x70] sm:$0xf] %vm1434_vm5, %v1395_v62  ;;  %v1707_v62 = vld [vmem:[#allocation2 + $0xca] sm:$0xff] }
 0x1b6   : > { %1625 = vrot.lane.b32.xlu1 %v8460_v2, %s11145_s17  ;;  %s11233_s17 = smov 40  }
 0x1b7   : > { %v1391_v12 = vpop.permute.xlu0 %1390 }
 0x1b8   : > { %1461 = vst.msk [vmem:[#allocation3 + $0x68] sm:$0xf] %vm1434_vm5, %v1391_v12  ;;  %v1381_v21 = vpop.permute.xlu1 %1380 }
 0x1b9   : > { %1456 = vst.msk [vmem:[#allocation3 + $0x54] sm:$0xf] %vm1434_vm5, %v1381_v21 }
 0x1ba   : > { %1788 = vrot.lane.b32.xlu2 %v1724_v29, %s11141_s18 }
 0x1bc   : > { %v1401_v24 = vpop.permute.xlu2 %1400 }
 0x1bd   : > { %1802 = vrot.lane.b32.xlu0 %v8079_v48, %s11141_s18  ;;  %1466 = vst.msk [vmem:[#allocation3 + $0x7c] sm:$0xf] %vm1434_vm5, %v1401_v24  ;;  %v1698_v48 = vld [vmem:[#allocation2 + $0x62] sm:$0xff]  ;;  %v1710_v24 = vld [vmem:[#allocation2 + $0xf2] sm:$0xff] }
 0x1be   : > { %1792 = vrot.lane.b32.xlu1 %v8471_v52, %s11141_s18  ;;  %v8492_v47 = vpack.c.bf16 %v1698_v48, %v1698_v48 }
 0x1bf   : > { %v1397_v37 = vpop.permute.xlu0 %1396 }
 0x1c0   : > { %1464 = vst.msk [vmem:[#allocation3 + $0x74] sm:$0xf] %vm1434_vm5, %v1397_v37  ;;  %v1387_v42 = vpop.permute.xlu1 %1386 }
 0x1c1   : > { %1459 = vst.msk [vmem:[#allocation3 + $0x60] sm:$0xf] %vm1434_vm5, %v1387_v42  ;;  %v1712_v42 = vld [vmem:[#allocation2 + $0x10a] sm:$0xff] }
 0x1c2   : > { %1794 = vrot.lane.b32.xlu2 %v8479_v16, %s11141_s18 }
 0x1c4   : > { %v1568_v45 = vpop.permute.xlu2 %1567 }
 0x1c5   : > { %1808 = vrot.lane.b32.xlu0 %v8098_v1, %s11141_s18  ;;  %1662 = vst.msk [vmem:[#allocation3 + $0x8] sm:$0xf] %vm1659_vm6, %v1568_v45  ;;  %v1744_v45 = vpack.c.bf16 %v1712_v42, %v1712_v42 }
 0x1c6   : > { %1798 = vrot.lane.b32.xlu1 %v8483_v41, %s11141_s18 }
 0x1c7   : > { %v1564_v55 = vpop.permute.xlu0 %1563 }
 0x1c8   : > { %1660 = vst.msk [vmem:[#allocation3] sm:$0xf] %vm1659_vm6, %v1564_v55  ;;  %v1393_v53 = vpop.permute.xlu1 %1392  ;;  %v1713_v55 = vld [vmem:[#allocation2 + $0x112] sm:$0xff] }
 0x1c9   : > { %1462 = vst.msk [vmem:[#allocation3 + $0x6c] sm:$0xf] %vm1434_vm5, %v1393_v53 }
 0x1ca   : > { %1800 = vrot.lane.b32.xlu2 %v8492_v47, %s11141_s18 }
 0x1cc   : > { %v1574_v1 = vpop.permute.xlu2 %1573 }
 0x1cd   : > { %1814 = vrot.lane.b32.xlu0 %v8119_v25, %s11141_s18  ;;  %1665 = vst.msk [vmem:[#allocation3 + $0x14] sm:$0xf] %vm1659_vm6, %v1574_v1  ;;  %v8512_v25 = vpack.c.bf16 %v1704_v14, %v1704_v14  ;;  %v1718_v14 = vld [vmem:[#allocation2 + $0x152] sm:$0xff] }
 0x1ce   : > { %1804 = vrot.lane.b32.xlu1 %v1732_v6, %s11141_s18  ;;  %v1715_v6 = vld [vmem:[#allocation2 + $0x12a] sm:$0xff]  ;;  %v1750_v49 = vpack.c.bf16 %v1718_v14, %v1718_v14 }
 0x1cf   : > { %v1570_v5 = vpop.permute.xlu0 %1569  ;;  %v1747_v1 = vpack.c.bf16 %v1715_v6, %v1715_v6  ;;  %v1919_v6 = vld [vmem:[#allocation2 + $0x38] sm:$0xff] }
 0x1d0   : > { %1663 = vst.msk [vmem:[#allocation3 + $0xc] sm:$0xf] %vm1659_vm6, %v1570_v5  ;;  %v1399_v17 = vpop.permute.xlu1 %1398  ;;  %v1716_v5 = vld [vmem:[#allocation2 + $0x13a] sm:$0xff] }
 0x1d1   : > { %1465 = vst.msk [vmem:[#allocation3 + $0x78] sm:$0xf] %vm1434_vm5, %v1399_v17  ;;  %v8552_v17 = vpack.c.bf16 %v1716_v5, %v1716_v5  ;;  %v1951_v5 = vpack.c.bf16 %v1919_v6, %v1919_v6  ;;  %v1935_v6 = vld [vmem:[#allocation2 + $0xf8] sm:$0xff] }
 0x1d2   : > { %1806 = vrot.lane.b32.xlu2 %v8502_v4, %s11141_s18 }
 0x1d4   : > { %v1580_v33 = vpop.permute.xlu2 %1579 }
 0x1d5   : > { %1820 = vrot.lane.b32.xlu0 %v8140_v46, %s11141_s18  ;;  %1668 = vst.msk [vmem:[#allocation3 + $0x20] sm:$0xf] %vm1659_vm6, %v1580_v33  ;;  %v8522_v46 = vpack.c.bf16 %v1707_v62, %v1707_v62 }
 0x1d6   : > { %1810 = vrot.lane.b32.xlu1 %v1735_v34, %s11141_s18 }
 0x1d7   : > { %v1576_v60 = vpop.permute.xlu0 %1575 }
 0x1d8   : > { %1666 = vst.msk [vmem:[#allocation3 + $0x18] sm:$0xf] %vm1659_vm6, %v1576_v60  ;;  %v1566_v22 = vpop.permute.xlu1 %1565 }
 0x1d9   : > { %1661 = vst.msk [vmem:[#allocation3 + $0x4] sm:$0xf] %vm1659_vm6, %v1566_v22 }
 0x1da   : > { %1812 = vrot.lane.b32.xlu2 %v8512_v25, %s11141_s18 }
 0x1dc   : > { %v1586_v29 = vpop.permute.xlu2 %1585 }
 0x1dd   : > { %1826 = vrot.lane.b32.xlu0 %v8161_v15, %s11141_s18  ;;  %1671 = vst.msk [vmem:[#allocation3 + $0x2c] sm:$0xf] %vm1659_vm6, %v1586_v29  ;;  %v8532_v15 = vpack.c.bf16 %v1710_v24, %v1710_v24  ;;  %v1722_v24 = vld [vmem:[#allocation2 + $0x182] sm:$0xff] }
 0x1de   : > { %1816 = vrot.lane.b32.xlu1 %v1738_v30, %s11141_s18  ;;  %v1920_v30 = vld [vmem:[#allocation2 + $0x48] sm:$0xff]  ;;  %v1754_v42 = vpack.c.bf16 %v1722_v24, %v1722_v24  ;;  %v1932_v24 = vld [vmem:[#allocation2 + $0xd8] sm:$0xff] }
 0x1df   : > { %v1582_v12 = vpop.permute.xlu0 %1581 }
 0x1e0   : > { %1669 = vst.msk [vmem:[#allocation3 + $0x24] sm:$0xf] %vm1659_vm6, %v1582_v12  ;;  %v1572_v21 = vpop.permute.xlu1 %1571  ;;  %v1721_v12 = vld [vmem:[#allocation2 + $0x172] sm:$0xff] }
 0x1e1   : > { %1664 = vst.msk [vmem:[#allocation3 + $0x10] sm:$0xf] %vm1659_vm6, %v1572_v21  ;;  %v1952_v21 = vpack.c.bf16 %v1920_v30, %v1920_v30 }
 0x1e2   : > { %1818 = vrot.lane.b32.xlu2 %v8522_v46, %s11141_s18 }
 0x1e4   : > { %v1592_v37 = vpop.permute.xlu2 %1591 }
 0x1e5   : > { %1832 = vrot.lane.b32.xlu0 %v8182_v44, %s11141_s18  ;;  %1674 = vst.msk [vmem:[#allocation3 + $0x38] sm:$0xf] %vm1659_vm6, %v1592_v37  ;;  %v8542_v44 = vpack.c.bf16 %v1713_v55, %v1713_v55 }
 0x1e6   : > { %1822 = vrot.lane.b32.xlu1 %v1741_v35, %s11141_s18  ;;  %v1753_v35 = vpack.c.bf16 %v1721_v12, %v1721_v12 }
 0x1e7   : > { %v1588_v38 = vpop.permute.xlu0 %1587 }
 0x1e8   : > { %1672 = vst.msk [vmem:[#allocation3 + $0x30] sm:$0xf] %vm1659_vm6, %v1588_v38  ;;  %v1578_v48 = vpop.permute.xlu1 %1577  ;;  %v1923_v38 = vld [vmem:[#allocation2 + $0x68] sm:$0xff] }
 0x1e9   : > { %1667 = vst.msk [vmem:[#allocation3 + $0x1c] sm:$0xf] %vm1659_vm6, %v1578_v48 }
 0x1ea   : > { %1824 = vrot.lane.b32.xlu2 %v8532_v15, %s11141_s18 }
 0x1ec   : > { %v1598_v56 = vpop.permute.xlu2 %1597 }
 0x1ed   : > { %1838 = vrot.lane.b32.xlu0 %v8203_v13, %s11141_s18  ;;  %1677 = vst.msk [vmem:[#allocation3 + $0x44] sm:$0xf] %vm1659_vm6, %v1598_v56  ;;  %v1723_v13 = vld [vmem:[#allocation2 + $0x18a] sm:$0xff]  ;;  %v1955_v56 = vpack.c.bf16 %v1923_v38, %v1923_v38 }
 0x1ee   : > { %1828 = vrot.lane.b32.xlu1 %v1744_v45, %s11141_s18  ;;  %v1755_v60 = vpack.c.bf16 %v1723_v13, %v1723_v13  ;;  %v1918_v45 = vld [vmem:[#allocation2 + $0x30] sm:$0xff] }
 0x1ef   : > { %v1594_v53 = vpop.permute.xlu0 %1593  ;;  %v1921_v13 = vld [vmem:[#allocation2 + $0x50] sm:$0xff] }
 0x1f0   : > { %1675 = vst.msk [vmem:[#allocation3 + $0x3c] sm:$0xf] %vm1659_vm6, %v1594_v53  ;;  %v1584_v19 = vpop.permute.xlu1 %1583  ;;  %v1950_v53 = vpack.c.bf16 %v1918_v45, %v1918_v45  ;;  %v1964_v45 = vpack.c.bf16 %v1932_v24, %v1932_v24 }
 0x1f1   : > { %1670 = vst.msk [vmem:[#allocation3 + $0x28] sm:$0xf] %vm1659_vm6, %v1584_v19 }
 0x1f2   : > { %1830 = vrot.lane.b32.xlu2 %v8542_v44, %s11141_s18 }
 0x1f4   : > { %v1604_v3 = vpop.permute.xlu2 %1603 }
 0x1f5   : > { %1844 = vrot.lane.b32.xlu0 %v8217_v40, %s11141_s18  ;;  %1680 = vst.msk [vmem:[#allocation3 + $0x50] sm:$0xf] %vm1659_vm6, %v1604_v3  ;;  %v1719_v40 = vld [vmem:[#allocation2 + $0x15a] sm:$0xff] }
 0x1f6   : > { %1834 = vrot.lane.b32.xlu1 %v1747_v1, %s11141_s18  ;;  %v1751_v62 = vpack.c.bf16 %v1719_v40, %v1719_v40  ;;  %v1926_v1 = vld [vmem:[#allocation2 + $0x90] sm:$0xff] }
 0x1f7   : > { %v1600_v34 = vpop.permute.xlu0 %1599  ;;  %v1958_v14 = vpack.c.bf16 %v1926_v1, %v1926_v1  ;;  %v1929_v40 = vld [vmem:[#allocation2 + $0xb0] sm:$0xff] }
 0x1f8   : > { %1678 = vst.msk [vmem:[#allocation3 + $0x48] sm:$0xf] %vm1659_vm6, %v1600_v34  ;;  %v1590_v33 = vpop.permute.xlu1 %1589  ;;  %v1961_v12 = vpack.c.bf16 %v1929_v40, %v1929_v40 }
 0x1f9   : > { %1673 = vst.msk [vmem:[#allocation3 + $0x34] sm:$0xf] %vm1659_vm6, %v1590_v33  ;;  %v1953_v33 = vpack.c.bf16 %v1921_v13, %v1921_v13  ;;  %v1967_v13 = vpack.c.bf16 %v1935_v6, %v1935_v6 }
 0x1fa   : > { %1836 = vrot.lane.b32.xlu2 %v8552_v17, %s11141_s18 }
 0x1fc   : > { %v1610_v22 = vpop.permute.xlu2 %1609 }
 0x1fd   : > { %1850 = vrot.lane.b32.xlu0 %v1755_v60, %s11141_s18  ;;  %1683 = vst.msk [vmem:[#allocation3 + $0x5c] sm:$0xf] %vm1659_vm6, %v1610_v22  ;;  %v1922_v60 = vld [vmem:[#allocation2 + $0x60] sm:$0xff] }
 0x1fe   : > { %1840 = vrot.lane.b32.xlu1 %v1750_v49, %s11141_s18  ;;  %v1954_v22 = vpack.c.bf16 %v1922_v60, %v1922_v60  ;;  %v1938_v60 = vld [vmem:[#allocation2 + $0x120] sm:$0xff] }
 0x1ff   : > { %v1606_v29 = vpop.permute.xlu0 %1605 }
 0x200   : > { %1681 = vst.msk [vmem:[#allocation3 + $0x54] sm:$0xf] %vm1659_vm6, %v1606_v29  ;;  %v1596_v20 = vpop.permute.xlu1 %1595 }
 0x201   : > { %1676 = vst.msk [vmem:[#allocation3 + $0x40] sm:$0xf] %vm1659_vm6, %v1596_v20 }
 0x202   : > { %1842 = vrot.lane.b32.xlu2 %v1751_v62, %s11141_s18  ;;  %v1924_v62 = vld [vmem:[#allocation2 + $0x78] sm:$0xff] }
 0x203   : > { %v1956_v20 = vpack.c.bf16 %v1924_v62, %v1924_v62  ;;  %v1970_v62 = vpack.c.bf16 %v1938_v60, %v1938_v60  ;;  %v1942_v60 = vld [vmem:[#allocation2 + $0x150] sm:$0xff] }
 0x204   : > { %v1616_v37 = vpop.permute.xlu2 %1615 }
 0x205   : > { %2018 = vrot.lane.b32.xlu0 %v1952_v21, %s11137_s19  ;;  %1686 = vst.msk [vmem:[#allocation3 + $0x68] sm:$0xf] %vm1659_vm6, %v1616_v37  ;;  %v1925_v21 = vld [vmem:[#allocation2 + $0x80] sm:$0xff] }
 0x206   : > { %1846 = vrot.lane.b32.xlu1 %v1753_v35, %s11141_s18  ;;  %v1957_v37 = vpack.c.bf16 %v1925_v21, %v1925_v21  ;;  %v1941_v21 = vld [vmem:[#allocation2 + $0x140] sm:$0xff] }
 0x207   : > { %v1612_v48 = vpop.permute.xlu0 %1611 }
 0x208   : > { %1684 = vst.msk [vmem:[#allocation3 + $0x60] sm:$0xf] %vm1659_vm6, %v1612_v48  ;;  %v1602_v55 = vpop.permute.xlu1 %1601 }
 0x209   : > { %1679 = vst.msk [vmem:[#allocation3 + $0x4c] sm:$0xf] %vm1659_vm6, %v1602_v55 }
 0x20a   : > { %1848 = vrot.lane.b32.xlu2 %v1754_v42, %s11141_s18  ;;  %v1927_v42 = vld [vmem:[#allocation2 + $0x98] sm:$0xff]  ;;  %s11234_s18 = smov 56  }
 0x20b   : > { %v1959_v55 = vpack.c.bf16 %v1927_v42, %v1927_v42  ;;  %v1973_v42 = vpack.c.bf16 %v1941_v21, %v1941_v21 }
 0x20c   : > { %v1622_v19 = vpop.permute.xlu2 %1621 }
 0x20d   : > { %2024 = vrot.lane.b32.xlu0 %v1955_v56, %s11137_s19  ;;  %1689 = vst.msk [vmem:[#allocation3 + $0x74] sm:$0xf] %vm1659_vm6, %v1622_v19  ;;  %v1928_v56 = vld [vmem:[#allocation2 + $0xa8] sm:$0xff] }
 0x20e   : > { %2014 = vrot.lane.b32.xlu1 %v1950_v53, %s11137_s19  ;;  %v1960_v19 = vpack.c.bf16 %v1928_v56, %v1928_v56  ;;  %v1944_v56 = vld [vmem:[#allocation2 + $0x168] sm:$0xff] }
 0x20f   : > { %v1618_v3 = vpop.permute.xlu0 %1617 }
 0x210   : > { %1687 = vst.msk [vmem:[#allocation3 + $0x6c] sm:$0xf] %vm1659_vm6, %v1618_v3  ;;  %v1608_v34 = vpop.permute.xlu1 %1607 }
 0x211   : > { %1682 = vst.msk [vmem:[#allocation3 + $0x58] sm:$0xf] %vm1659_vm6, %v1608_v34 }
 0x212   : > { %2016 = vrot.lane.b32.xlu2 %v1951_v5, %s11137_s19  ;;  %v1930_v5 = vld [vmem:[#allocation2 + $0xc0] sm:$0xff] }
 0x213   : > { %v1962_v34 = vpack.c.bf16 %v1930_v5, %v1930_v5  ;;  %v1976_v5 = vpack.c.bf16 %v1944_v56, %v1944_v56 }
 0x214   : > { %v1789_v49 = vpop.permute.xlu2 %1788 }
 0x215   : > { %2030 = vrot.lane.b32.xlu0 %v1958_v14, %s11137_s19  ;;  %1885 = vst.msk [vmem:[#allocation3] sm:$0xf] %vm1884_vm7, %v1789_v49  ;;  %v1931_v14 = vld [vmem:[#allocation2 + $0xc8] sm:$0xff] }
 0x216   : > { %2020 = vrot.lane.b32.xlu1 %v1953_v33, %s11137_s19  ;;  %v1963_v49 = vpack.c.bf16 %v1931_v14, %v1931_v14 }
 0x217   : > { %v1624_v30 = vpop.permute.xlu0 %1623 }
 0x218   : > { %1690 = vst.msk [vmem:[#allocation3 + $0x78] sm:$0xf] %vm1659_vm6, %v1624_v30  ;;  %v1614_v29 = vpop.permute.xlu1 %1613 }
 0x219   : > { %1685 = vst.msk [vmem:[#allocation3 + $0x64] sm:$0xf] %vm1659_vm6, %v1614_v29 }
 0x21a   : > { %2022 = vrot.lane.b32.xlu2 %v1954_v22, %s11137_s19  ;;  %v1933_v22 = vld [vmem:[#allocation2 + $0xe0] sm:$0xff] }
 0x21b   : > { %v1965_v29 = vpack.c.bf16 %v1933_v22, %v1933_v22  ;;  %v1943_v22 = vld [vmem:[#allocation2 + $0x158] sm:$0xff] }
 0x21c   : > { %v1795_v35 = vpop.permute.xlu2 %1794 }
 0x21d   : > { %2036 = vrot.lane.b32.xlu0 %v1961_v12, %s11137_s19  ;;  %1888 = vst.msk [vmem:[#allocation3 + $0xc] sm:$0xf] %vm1884_vm7, %v1795_v35  ;;  %v1934_v12 = vld [vmem:[#allocation2 + $0xf0] sm:$0xff] }
 0x21e   : > { %2026 = vrot.lane.b32.xlu1 %v1956_v20, %s11137_s19  ;;  %v1966_v35 = vpack.c.bf16 %v1934_v12, %v1934_v12  ;;  %v1945_v12 = vld [vmem:[#allocation2 + $0x170] sm:$0xff] }
 0x21f   : > { %v1791_v38 = vpop.permute.xlu0 %1790  ;;  %v1977_v21 = vpack.c.bf16 %v1945_v12, %v1945_v12  ;;  %v2162_v12 = vld [vmem:[#allocation2 + $0x111] sm:$0xff] }
 0x220   : > { %1886 = vst.msk [vmem:[#allocation3 + $0x4] sm:$0xf] %vm1884_vm7, %v1791_v38  ;;  %v1620_v48 = vpop.permute.xlu1 %1619 }
 0x221   : > { %1688 = vst.msk [vmem:[#allocation3 + $0x70] sm:$0xf] %vm1659_vm6, %v1620_v48 }
 0x222   : > { %2028 = vrot.lane.b32.xlu2 %v1957_v37, %s11137_s19  ;;  %v1936_v37 = vld [vmem:[#allocation2 + $0x108] sm:$0xff] }
 0x223   : > { %v1968_v48 = vpack.c.bf16 %v1936_v37, %v1936_v37 }
 0x224   : > { %v1801_v53 = vpop.permute.xlu2 %1800 }
 0x225   : > { %2042 = vrot.lane.b32.xlu0 %v1964_v45, %s11137_s19  ;;  %1891 = vst.msk [vmem:[#allocation3 + $0x18] sm:$0xf] %vm1884_vm7, %v1801_v53  ;;  %v1937_v45 = vld [vmem:[#allocation2 + $0x110] sm:$0xff] }
 0x226   : > { %2032 = vrot.lane.b32.xlu1 %v1959_v55, %s11137_s19  ;;  %v1969_v53 = vpack.c.bf16 %v1937_v45, %v1937_v45 }
 0x227   : > { %v1797_v1 = vpop.permute.xlu0 %1796 }
 0x228   : > { %1889 = vst.msk [vmem:[#allocation3 + $0x10] sm:$0xf] %vm1884_vm7, %v1797_v1  ;;  %v1626_v3 = vpop.permute.xlu1 %1625 }
 0x229   : > { %1691 = vst.msk [vmem:[#allocation3 + $0x7c] sm:$0xf] %vm1659_vm6, %v1626_v3 }
 0x22a   : > { %2034 = vrot.lane.b32.xlu2 %v1960_v19, %s11137_s19  ;;  %v1939_v19 = vld [vmem:[#allocation2 + $0x128] sm:$0xff] }
 0x22b   : > { %v1971_v3 = vpack.c.bf16 %v1939_v19, %v1939_v19 }
 0x22c   : > { %v1807_v33 = vpop.permute.xlu2 %1806 }
 0x22d   : > { %2048 = vrot.lane.b32.xlu0 %v1967_v13, %s11137_s19  ;;  %1894 = vst.msk [vmem:[#allocation3 + $0x24] sm:$0xf] %vm1884_vm7, %v1807_v33  ;;  %v1940_v13 = vld [vmem:[#allocation2 + $0x138] sm:$0xff] }
 0x22e   : > { %2038 = vrot.lane.b32.xlu1 %v1962_v34, %s11137_s19  ;;  %v1972_v14 = vpack.c.bf16 %v1940_v13, %v1940_v13 }
 0x22f   : > { %v1803_v40 = vpop.permute.xlu0 %1802 }
 0x230   : > { %1892 = vst.msk [vmem:[#allocation3 + $0x1c] sm:$0xf] %vm1884_vm7, %v1803_v40  ;;  %v1793_v30 = vpop.permute.xlu1 %1792  ;;  %v1974_v40 = vpack.c.bf16 %v1942_v60, %v1942_v60 }
 0x231   : > { %1887 = vst.msk [vmem:[#allocation3 + $0x8] sm:$0xf] %vm1884_vm7, %v1793_v30 }
 0x232   : > { %2040 = vrot.lane.b32.xlu2 %v1963_v49, %s11137_s19 }
 0x234   : > { %v1813_v20 = vpop.permute.xlu2 %1812 }
 0x235   : > { %2054 = vrot.lane.b32.xlu0 %v1970_v62, %s11137_s19  ;;  %1897 = vst.msk [vmem:[#allocation3 + $0x30] sm:$0xf] %vm1884_vm7, %v1813_v20  ;;  %v1975_v62 = vpack.c.bf16 %v1943_v22, %v1943_v22 }
 0x236   : > { %2044 = vrot.lane.b32.xlu1 %v1965_v29, %s11137_s19 }
 0x237   : > { %v1809_v24 = vpop.permute.xlu0 %1808 }
 0x238   : > { %1895 = vst.msk [vmem:[#allocation3 + $0x28] sm:$0xf] %vm1884_vm7, %v1809_v24  ;;  %v1799_v38 = vpop.permute.xlu1 %1798  ;;  %v1948_v24 = vld [vmem:[#allocation2 + $0x198] sm:$0xff] }
 0x239   : > { %1890 = vst.msk [vmem:[#allocation3 + $0x14] sm:$0xf] %vm1884_vm7, %v1799_v38  ;;  %v1980_v38 = vpack.c.bf16 %v1948_v24, %v1948_v24 }
 0x23a   : > { %2046 = vrot.lane.b32.xlu2 %v1966_v35, %s11137_s19 }
 0x23c   : > { %v1819_v55 = vpop.permute.xlu2 %1818 }
 0x23d   : > { %2060 = vrot.lane.b32.xlu0 %v1973_v42, %s11137_s19  ;;  %1900 = vst.msk [vmem:[#allocation3 + $0x3c] sm:$0xf] %vm1884_vm7, %v1819_v55  ;;  %v1949_v42 = vld [vmem:[#allocation2 + $0x1a0] sm:$0xff] }
 0x23e   : > { %2050 = vrot.lane.b32.xlu1 %v1968_v48, %s11137_s19  ;;  %v2144_v55 = vld [vmem:[#allocation2 + $0x39] sm:$0xff] }
 0x23f   : > { %v1815_v6 = vpop.permute.xlu0 %1814 }
 0x240   : > { %1898 = vst.msk [vmem:[#allocation3 + $0x34] sm:$0xf] %vm1884_vm7, %v1815_v6  ;;  %v1805_v1 = vpop.permute.xlu1 %1804  ;;  %v2147_v6 = vld [vmem:[#allocation2 + $0x61] sm:$0xff] }
 0x241   : > { %1893 = vst.msk [vmem:[#allocation3 + $0x20] sm:$0xf] %vm1884_vm7, %v1805_v1  ;;  %v2179_v1 = vpack.c.bf16 %v2147_v6, %v2147_v6 }
 0x242   : > { %2052 = vrot.lane.b32.xlu2 %v1969_v53, %s11137_s19  ;;  %v2176_v53 = vpack.c.bf16 %v2144_v55, %v2144_v55 }
 0x244   : > { %v1825_v34 = vpop.permute.xlu2 %1824 }
 0x245   : > { %2066 = vrot.lane.b32.xlu0 %v1976_v5, %s11137_s19  ;;  %1903 = vst.msk [vmem:[#allocation3 + $0x48] sm:$0xf] %vm1884_vm7, %v1825_v34 }
 0x246   : > { %2056 = vrot.lane.b32.xlu1 %v1971_v3, %s11137_s19  ;;  %v2150_v3 = vld [vmem:[#allocation2 + $0x81] sm:$0xff] }
 0x247   : > { %v1821_v33 = vpop.permute.xlu0 %1820  ;;  %v2182_v34 = vpack.c.bf16 %v2150_v3, %v2150_v3  ;;  %v2374_v3 = vld [vmem:[#allocation2 + $0x7a] sm:$0xff] }
 0x248   : > { %1901 = vst.msk [vmem:[#allocation3 + $0x40] sm:$0xf] %vm1884_vm7, %v1821_v33  ;;  %v1811_v49 = vpop.permute.xlu1 %1810 }
 0x249   : > { %1896 = vst.msk [vmem:[#allocation3 + $0x2c] sm:$0xf] %vm1884_vm7, %v1811_v49  ;;  %v2156_v49 = vld [vmem:[#allocation2 + $0xc9] sm:$0xff] }
 0x24a   : > { %2058 = vrot.lane.b32.xlu2 %v1972_v14, %s11137_s19  ;;  %v2153_v14 = vld [vmem:[#allocation2 + $0xa9] sm:$0xff]  ;;  %v2188_v22 = vpack.c.bf16 %v2156_v49, %v2156_v49 }
 0x24b   : > { %v2185_v60 = vpack.c.bf16 %v2153_v14, %v2153_v14 }
 0x24c   : > { %v1831_v30 = vpop.permute.xlu2 %1830 }
 0x24d   : > { %2072 = vrot.lane.b32.xlu0 %v8326_v59, %s11137_s19  ;;  %1906 = vst.msk [vmem:[#allocation3 + $0x54] sm:$0xf] %vm1884_vm7, %v1831_v30  ;;  %v2159_v30 = vld [vmem:[#allocation2 + $0xf1] sm:$0xff] }
 0x24e   : > { %2062 = vrot.lane.b32.xlu1 %v1974_v40, %s11137_s19 }
 0x24f   : > { %v1827_v29 = vpop.permute.xlu0 %1826 }
 0x250   : > { %1904 = vst.msk [vmem:[#allocation3 + $0x4c] sm:$0xf] %vm1884_vm7, %v1827_v29  ;;  %v1817_v20 = vpop.permute.xlu1 %1816  ;;  %v2191_v29 = vpack.c.bf16 %v2159_v30, %v2159_v30 }
 0x251   : > { %1899 = vst.msk [vmem:[#allocation3 + $0x38] sm:$0xf] %vm1884_vm7, %v1817_v20 }
 0x252   : > { %2064 = vrot.lane.b32.xlu2 %v1975_v62, %s11137_s19 }
 0x254   : > { %v1837_v35 = vpop.permute.xlu2 %1836 }
 0x255   : > { %2239 = vrot.lane.b32.xlu0 %v8336_v54, %s11139_s24  ;;  %1909 = vst.msk [vmem:[#allocation3 + $0x60] sm:$0xf] %vm1884_vm7, %v1837_v35  ;;  %v1981_v54 = vpack.c.bf16 %v1949_v42, %v1949_v42  ;;  %v2165_v35 = vld [vmem:[#allocation2 + $0x139] sm:$0xff] }
 0x256   : > { %2068 = vrot.lane.b32.xlu1 %v1977_v21, %s11137_s19  ;;  %v2194_v21 = vpack.c.bf16 %v2162_v12, %v2162_v12  ;;  %v2197_v24 = vpack.c.bf16 %v2165_v35, %v2165_v35  ;;  %v7310_v35 = vld [vmem:[%s11126_s5 + $0x18] sm:$0xff] }
 0x257   : > { %v1833_v59 = vpop.permute.xlu0 %1832 }
 0x258   : > { %1907 = vst.msk [vmem:[#allocation3 + $0x58] sm:$0xf] %vm1884_vm7, %v1833_v59  ;;  %v1823_v37 = vpop.permute.xlu1 %1822 }
 0x259   : > { %1902 = vst.msk [vmem:[#allocation3 + $0x44] sm:$0xf] %vm1884_vm7, %v1823_v37 }
 0x25a   : > { %2070 = vrot.lane.b32.xlu2 %v8317_v31, %s11137_s19 }
 0x25c   : > { %v1843_v48 = vpop.permute.xlu2 %1842 }
 0x25d   : > { %2245 = vrot.lane.b32.xlu0 %v8349_v36, %s11139_s24  ;;  %1912 = vst.msk [vmem:[#allocation3 + $0x6c] sm:$0xf] %vm1884_vm7, %v1843_v48 }
 0x25e   : > { %2074 = vrot.lane.b32.xlu1 %v1980_v38, %s11137_s19  ;;  %v2168_v38 = vld [vmem:[#allocation2 + $0x159] sm:$0xff] }
 0x25f   : > { %v1839_v45 = vpop.permute.xlu0 %1838 }
 0x260   : > { %1910 = vst.msk [vmem:[#allocation3 + $0x64] sm:$0xf] %vm1884_vm7, %v1839_v45  ;;  %v1829_v56 = vpop.permute.xlu1 %1828 }
 0x261   : > { %1905 = vst.msk [vmem:[#allocation3 + $0x50] sm:$0xf] %vm1884_vm7, %v1829_v56  ;;  %v2174_v56 = vld [vmem:[#allocation2 + $0x1a1] sm:$0xff] }
 0x262   : > { %2076 = vrot.lane.b32.xlu2 %v1981_v54, %s11137_s19  ;;  %v2200_v54 = vpack.c.bf16 %v2168_v38, %v2168_v38  ;;  %s11156_s19 = smov 64  }
 0x264   : > { %v1849_v31 = vpop.permute.xlu2 %1848 }
 0x265   : > { %2251 = vrot.lane.b32.xlu0 %v8362_v18, %s11139_s24  ;;  %1915 = vst.msk [vmem:[#allocation3 + $0x78] sm:$0xf] %vm1884_vm7, %v1849_v31  ;;  %v2206_v31 = vpack.c.bf16 %v2174_v56, %v2174_v56 }
 0x266   : > { %2241 = vrot.lane.b32.xlu1 %v2176_v53, %s11139_s24 }
 0x267   : > { %v1845_v36 = vpop.permute.xlu0 %1844 }
 0x268   : > { %1913 = vst.msk [vmem:[#allocation3 + $0x70] sm:$0xf] %vm1884_vm7, %v1845_v36  ;;  %v1835_v19 = vpop.permute.xlu1 %1834 }
 0x269   : > { %1908 = vst.msk [vmem:[#allocation3 + $0x5c] sm:$0xf] %vm1884_vm7, %v1835_v19 }
 0x26a   : > { %2243 = vrot.lane.b32.xlu2 %v8340_v63, %s11139_s24 }
 0x26c   : > { %v2017_v5 = vpop.permute.xlu2 %2016 }
 0x26d   : > { %2257 = vrot.lane.b32.xlu0 %v8375_v8, %s11139_s24  ;;  %2112 = vst.msk [vmem:[#allocation3 + $0x4] sm:$0xf] %vm2110_vm8, %v2017_v5 }
 0x26e   : > { %2247 = vrot.lane.b32.xlu1 %v2179_v1, %s11139_s24  ;;  %v2376_v1 = vld [vmem:[#allocation2 + $0x92] sm:$0xff] }
 0x26f   : > { %v1851_v18 = vpop.permute.xlu0 %1850  ;;  %v2408_v5 = vpack.c.bf16 %v2376_v1, %v2376_v1 }
 0x270   : > { %1916 = vst.msk [vmem:[#allocation3 + $0x7c] sm:$0xf] %vm1884_vm7, %v1851_v18  ;;  %v1841_v13 = vpop.permute.xlu1 %1840 }
 0x271   : > { %1911 = vst.msk [vmem:[#allocation3 + $0x68] sm:$0xf] %vm1884_vm7, %v1841_v13  ;;  %v2406_v13 = vpack.c.bf16 %v2374_v3, %v2374_v3 }
 0x272   : > { %2249 = vrot.lane.b32.xlu2 %v8353_v7, %s11139_s24 }
 0x274   : > { %v2023_v63 = vpop.permute.xlu2 %2022 }
 0x275   : > { %2263 = vrot.lane.b32.xlu0 %v8388_v10, %s11139_s24  ;;  %2115 = vst.msk [vmem:[#allocation3 + $0x10] sm:$0xf] %vm2110_vm8, %v2023_v63 }
 0x276   : > { %2253 = vrot.lane.b32.xlu1 %v2182_v34, %s11139_s24 }
 0x277   : > { %v2019_v8 = vpop.permute.xlu0 %2018 }
 0x278   : > { %2113 = vst.msk [vmem:[#allocation3 + $0x8] sm:$0xf] %vm2110_vm8, %v2019_v8  ;;  %v1847_v33 = vpop.permute.xlu1 %1846  ;;  %v2379_v8 = vld [vmem:[#allocation2 + $0xb2] sm:$0xff] }
 0x279   : > { %1914 = vst.msk [vmem:[#allocation3 + $0x74] sm:$0xf] %vm1884_vm7, %v1847_v33  ;;  %v2411_v14 = vpack.c.bf16 %v2379_v8, %v2379_v8 }
 0x27a   : > { %2255 = vrot.lane.b32.xlu2 %v8366_v32, %s11139_s24 }
 0x27c   : > { %v2029_v7 = vpop.permute.xlu2 %2028 }
 0x27d   : > { %2269 = vrot.lane.b32.xlu0 %v8401_v57, %s11139_s24  ;;  %2118 = vst.msk [vmem:[#allocation3 + $0x1c] sm:$0xf] %vm2110_vm8, %v2029_v7  ;;  %v2377_v7 = vld [vmem:[#allocation2 + $0x9a] sm:$0xff] }
 0x27e   : > { %2259 = vrot.lane.b32.xlu1 %v2185_v60, %s11139_s24 }
 0x27f   : > { %v2025_v10 = vpop.permute.xlu0 %2024 }
 0x280   : > { %2116 = vst.msk [vmem:[#allocation3 + $0x14] sm:$0xf] %vm2110_vm8, %v2025_v10  ;;  %v2015_v40 = vpop.permute.xlu1 %2014  ;;  %v2409_v10 = vpack.c.bf16 %v2377_v7, %v2377_v7  ;;  %v2392_v7 = vld [vmem:[#allocation2 + $0x152] sm:$0xff] }
 0x281   : > { %2111 = vst.msk [vmem:[#allocation3] sm:$0xf] %vm2110_vm8, %v2015_v40 }
 0x282   : > { %2261 = vrot.lane.b32.xlu2 %v8379_v27, %s11139_s24 }
 0x284   : > { %v2035_v32 = vpop.permute.xlu2 %2034 }
 0x285   : > { %2275 = vrot.lane.b32.xlu0 %v8414_v28, %s11139_s24  ;;  %2121 = vst.msk [vmem:[#allocation3 + $0x28] sm:$0xf] %vm2110_vm8, %v2035_v32  ;;  %v2382_v32 = vld [vmem:[#allocation2 + $0xda] sm:$0xff] }
 0x286   : > { %2265 = vrot.lane.b32.xlu1 %v2188_v22, %s11139_s24  ;;  %v2414_v30 = vpack.c.bf16 %v2382_v32, %v2382_v32 }
 0x287   : > { %v2031_v57 = vpop.permute.xlu0 %2030 }
 0x288   : > { %2119 = vst.msk [vmem:[#allocation3 + $0x20] sm:$0xf] %vm2110_vm8, %v2031_v57  ;;  %v2021_v62 = vpop.permute.xlu1 %2020 }
 0x289   : > { %2114 = vst.msk [vmem:[#allocation3 + $0xc] sm:$0xf] %vm2110_vm8, %v2021_v62 }
 0x28a   : > { %2267 = vrot.lane.b32.xlu2 %v8392_v26, %s11139_s24 }
 0x28c   : > { %v2041_v27 = vpop.permute.xlu2 %2040 }
 0x28d   : > { %2281 = vrot.lane.b32.xlu0 %v8427_v43, %s11139_s24  ;;  %2124 = vst.msk [vmem:[#allocation3 + $0x34] sm:$0xf] %vm2110_vm8, %v2041_v27 }
 0x28e   : > { %2271 = vrot.lane.b32.xlu1 %v2191_v29, %s11139_s24 }
 0x28f   : > { %v2037_v28 = vpop.permute.xlu0 %2036 }
 0x290   : > { %2122 = vst.msk [vmem:[#allocation3 + $0x2c] sm:$0xf] %vm2110_vm8, %v2037_v28  ;;  %v2027_v20 = vpop.permute.xlu1 %2026 }
 0x291   : > { %2117 = vst.msk [vmem:[#allocation3 + $0x18] sm:$0xf] %vm2110_vm8, %v2027_v20  ;;  %v2385_v20 = vld [vmem:[#allocation2 + $0xfa] sm:$0xff] }
 0x292   : > { %2273 = vrot.lane.b32.xlu2 %v8405_v23, %s11139_s24 }
 0x294   : > { %v2047_v26 = vpop.permute.xlu2 %2046 }
 0x295   : > { %2287 = vrot.lane.b32.xlu0 %v8442_v51, %s11139_s24  ;;  %2127 = vst.msk [vmem:[#allocation3 + $0x40] sm:$0xf] %vm2110_vm8, %v2047_v26  ;;  %v2173_v51 = vld [vmem:[#allocation2 + $0x199] sm:$0xff]  ;;  %v2417_v26 = vpack.c.bf16 %v2385_v20, %v2385_v20 }
 0x296   : > { %2277 = vrot.lane.b32.xlu1 %v2194_v21, %s11139_s24  ;;  %v2205_v48 = vpack.c.bf16 %v2173_v51, %v2173_v51 }
 0x297   : > { %v2043_v43 = vpop.permute.xlu0 %2042 }
 0x298   : > { %2125 = vst.msk [vmem:[#allocation3 + $0x38] sm:$0xf] %vm2110_vm8, %v2043_v43  ;;  %v2033_v59 = vpop.permute.xlu1 %2032 }
 0x299   : > { %2120 = vst.msk [vmem:[#allocation3 + $0x24] sm:$0xf] %vm2110_vm8, %v2033_v59  ;;  %v7309_v59 = vld [vmem:[%s11126_s5 + $0x10] sm:$0xff] }
 0x29a   : > { %2279 = vrot.lane.b32.xlu2 %v8418_v39, %s11139_s24 }
 0x29c   : > { %v2053_v23 = vpop.permute.xlu2 %2052 }
 0x29d   : > { %2293 = vrot.lane.b32.xlu0 %v8454_v50, %s11139_s24  ;;  %2130 = vst.msk [vmem:[#allocation3 + $0x4c] sm:$0xf] %vm2110_vm8, %v2053_v23  ;;  %v2388_v23 = vld [vmem:[#allocation2 + $0x122] sm:$0xff] }
 0x29e   : > { %2283 = vrot.lane.b32.xlu1 %v2197_v24, %s11139_s24 }
 0x29f   : > { %v2049_v37 = vpop.permute.xlu0 %2048 }
 0x2a0   : > { %2128 = vst.msk [vmem:[#allocation3 + $0x44] sm:$0xf] %vm2110_vm8, %v2049_v37  ;;  %v2039_v42 = vpop.permute.xlu1 %2038  ;;  %v2420_v37 = vpack.c.bf16 %v2388_v23, %v2388_v23 }
 0x2a1   : > { %2123 = vst.msk [vmem:[#allocation3 + $0x30] sm:$0xf] %vm2110_vm8, %v2039_v42  ;;  %v7308_v42 = vld [vmem:[%s11126_s5 + $0x8] sm:$0xff] }
 0x2a2   : > { %2285 = vrot.lane.b32.xlu2 %v8433_v58, %s11139_s24 }
 0x2a4   : > { %v2059_v39 = vpop.permute.xlu2 %2058 }
 0x2a5   : > { %2299 = vrot.lane.b32.xlu0 %v2205_v48, %s11139_s24  ;;  %2133 = vst.msk [vmem:[#allocation3 + $0x58] sm:$0xf] %vm2110_vm8, %v2059_v39 }
 0x2a6   : > { %2289 = vrot.lane.b32.xlu1 %v2200_v54, %s11139_s24  ;;  %v2380_v54 = vld [vmem:[#allocation2 + $0xc2] sm:$0xff] }
 0x2a7   : > { %v2055_v50 = vpop.permute.xlu0 %2054  ;;  %v2412_v39 = vpack.c.bf16 %v2380_v54, %v2380_v54 }
 0x2a8   : > { %2131 = vst.msk [vmem:[#allocation3 + $0x50] sm:$0xf] %vm2110_vm8, %v2055_v50  ;;  %v2045_v45 = vpop.permute.xlu1 %2044  ;;  %v7307_v50 = vld [vmem:[%s11126_s5] sm:$0xff] }
 0x2a9   : > { %2126 = vst.msk [vmem:[#allocation3 + $0x3c] sm:$0xf] %vm2110_vm8, %v2045_v45  ;;  %v2391_v45 = vld [vmem:[#allocation2 + $0x142] sm:$0xff] }
 0x2aa   : > { %2291 = vrot.lane.b32.xlu2 %v8446_v11, %s11139_s24 }
 0x2ac   : > { %v2065_v55 = vpop.permute.xlu2 %2064 }
 0x2ad   : > { %2466 = vrot.lane.b32.xlu0 %v8479_v16, %s11156_s19  ;;  %2136 = vst.msk [vmem:[#allocation3 + $0x64] sm:$0xf] %vm2110_vm8, %v2065_v55 }
 0x2ae   : > { %2295 = vrot.lane.b32.xlu1 %v8431_v61, %s11139_s24 }
 0x2af   : > { %v2061_v58 = vpop.permute.xlu0 %2060 }
 0x2b0   : > { %2134 = vst.msk [vmem:[#allocation3 + $0x5c] sm:$0xf] %vm2110_vm8, %v2061_v58  ;;  %v2051_v53 = vpop.permute.xlu1 %2050  ;;  %v2423_v58 = vpack.c.bf16 %v2391_v45, %v2391_v45 }
 0x2b1   : > { %2129 = vst.msk [vmem:[#allocation3 + $0x48] sm:$0xf] %vm2110_vm8, %v2051_v53  ;;  %v2383_v53 = vld [vmem:[#allocation2 + $0xe2] sm:$0xff] }
 0x2b2   : > { %2297 = vrot.lane.b32.xlu2 %v8460_v2, %s11139_s24 }
 0x2b4   : > { %v2071_v11 = vpop.permute.xlu2 %2070 }
 0x2b5   : > { %2139 = vst.msk [vmem:[#allocation3 + $0x70] sm:$0xf] %vm2110_vm8, %v2071_v11  ;;  %2472 = vrot.lane.b32.xlu0 %v8492_v47, %s11156_s19  ;;  %v2373_v47 = vld [vmem:[#allocation2 + $0x6a] sm:$0xff] }
 0x2b6   : > { %2301 = vrot.lane.b32.xlu1 %v2206_v31, %s11139_s24  ;;  %v2405_v19 = vpack.c.bf16 %v2373_v47, %v2373_v47  ;;  %v2415_v31 = vpack.c.bf16 %v2383_v53, %v2383_v53  ;;  %v2393_v47 = vld [vmem:[#allocation2 + $0x15a] sm:$0xff]  ;;  %s9375_s24 = scalar_lea.vmem %s11230_s4, %s7290_s27  ;;  %s11232_s27 = smov 24  }
 0x2b7   : > { %v2067_v61 = vpop.permute.xlu0 %2066 }
 0x2b8   : > { %2137 = vst.msk [vmem:[#allocation3 + $0x68] sm:$0xf] %vm2110_vm8, %v2067_v61  ;;  %v2057_v16 = vpop.permute.xlu1 %2056 }
 0x2b9   : > { %2132 = vst.msk [vmem:[#allocation3 + $0x54] sm:$0xf] %vm2110_vm8, %v2057_v16 }
 0x2ba   : > { %2464 = vrot.lane.b32.xlu2 %v8471_v52, %s11156_s19 }
 0x2bc   : > { %v2077_v36 = vpop.permute.xlu2 %2076 }
 0x2bd   : > { %2142 = vst.msk [vmem:[#allocation3 + $0x7c] sm:$0xf] %vm2110_vm8, %v2077_v36  ;;  %2478 = vrot.lane.b32.xlu0 %v8502_v4, %s11156_s19 }
 0x2be   : > { %2468 = vrot.lane.b32.xlu1 %v8458_v9, %s11156_s19 }
 0x2bf   : > { %v2073_v2 = vpop.permute.xlu0 %2072 }
 0x2c0   : > { %2140 = vst.msk [vmem:[#allocation3 + $0x74] sm:$0xf] %vm2110_vm8, %v2073_v2  ;;  %v2063_v6 = vpop.permute.xlu1 %2062  ;;  %v2951_v2 = vld [vmem:[#allocation2] sm:$0xff] }
 0x2c1   : > { %2135 = vst.msk [vmem:[#allocation3 + $0x60] sm:$0xf] %vm2110_vm8, %v2063_v6  ;;  %v2386_v6 = vld [vmem:[#allocation2 + $0x10a] sm:$0xff]  ;;  %v2983_v1 = vpack.c.bf16 %v2951_v2, %v2951_v2 }
 0x2c2   : > { %2470 = vrot.lane.b32.xlu2 %v8483_v41, %s11156_s19 }
 0x2c4   : > { %v2244_v52 = vpop.permute.xlu2 %2243 }
 0x2c5   : > { %2338 = vst.msk [vmem:[#allocation3 + $0x8] sm:$0xf] %vm2335_vm9, %v2244_v52  ;;  %2484 = vrot.lane.b32.xlu0 %v8512_v25, %s11156_s19  ;;  %v2425_v52 = vpack.c.bf16 %v2393_v47, %v2393_v47 }
 0x2c6   : > { %2474 = vrot.lane.b32.xlu1 %v2405_v19, %s11156_s19 }
 0x2c7   : > { %v2240_v9 = vpop.permute.xlu0 %2239 }
 0x2c8   : > { %2336 = vst.msk [vmem:[#allocation3] sm:$0xf] %vm2335_vm9, %v2240_v9  ;;  %v2069_v4 = vpop.permute.xlu1 %2068  ;;  %v2418_v9 = vpack.c.bf16 %v2386_v6, %v2386_v6  ;;  %v2399_v6 = vld [vmem:[#allocation2 + $0x1a2] sm:$0xff] }
 0x2c9   : > { %2138 = vst.msk [vmem:[#allocation3 + $0x6c] sm:$0xf] %vm2110_vm8, %v2069_v4 }
 0x2ca   : > { %2476 = vrot.lane.b32.xlu2 %v2406_v13, %s11156_s19 }
 0x2cc   : > { %v2250_v18 = vpop.permute.xlu2 %2249 }
 0x2cd   : > { %2341 = vst.msk [vmem:[#allocation3 + $0x14] sm:$0xf] %vm2335_vm9, %v2250_v18  ;;  %2490 = vrot.lane.b32.xlu0 %v8522_v46, %s11156_s19 }
 0x2ce   : > { %2480 = vrot.lane.b32.xlu1 %v2408_v5, %s11156_s19  ;;  %v2389_v5 = vld [vmem:[#allocation2 + $0x12a] sm:$0xff] }
 0x2cf   : > { %v2246_v41 = vpop.permute.xlu0 %2245 }
 0x2d0   : > { %2339 = vst.msk [vmem:[#allocation3 + $0xc] sm:$0xf] %vm2335_vm9, %v2246_v41  ;;  %v2075_v25 = vpop.permute.xlu1 %2074 }
 0x2d1   : > { %2141 = vst.msk [vmem:[#allocation3 + $0x78] sm:$0xf] %vm2110_vm8, %v2075_v25  ;;  %v2421_v25 = vpack.c.bf16 %v2389_v5, %v2389_v5 }
 0x2d2   : > { %2482 = vrot.lane.b32.xlu2 %v2409_v10, %s11156_s19  ;;  %v2396_v10 = vld [vmem:[#allocation2 + $0x182] sm:$0xff] }
 0x2d4   : > { %v2256_v34 = vpop.permute.xlu2 %2255 }
 0x2d5   : > { %2344 = vst.msk [vmem:[#allocation3 + $0x20] sm:$0xf] %vm2335_vm9, %v2256_v34  ;;  %2496 = vrot.lane.b32.xlu0 %v8532_v15, %s11156_s19  ;;  %v2394_v34 = vld [vmem:[#allocation2 + $0x16a] sm:$0xff] }
 0x2d6   : > { %2486 = vrot.lane.b32.xlu1 %v2411_v14, %s11156_s19 }
 0x2d7   : > { %v2252_v63 = vpop.permute.xlu0 %2251 }
 0x2d8   : > { %2342 = vst.msk [vmem:[#allocation3 + $0x18] sm:$0xf] %vm2335_vm9, %v2252_v63  ;;  %v2242_v46 = vpop.permute.xlu1 %2241  ;;  %v2952_v63 = vld [vmem:[#allocation2 + $0x8] sm:$0xff] }
 0x2d9   : > { %2337 = vst.msk [vmem:[#allocation3 + $0x4] sm:$0xf] %vm2335_vm9, %v2242_v46  ;;  %v2426_v46 = vpack.c.bf16 %v2394_v34, %v2394_v34  ;;  %v2984_v8 = vpack.c.bf16 %v2952_v63, %v2952_v63  ;;  %v8863_v34 = vld [vmem:[%s11128_s7] ss:$0 sm:$0xff] }
 0x2da   : > { %2488 = vrot.lane.b32.xlu2 %v2412_v39, %s11156_s19 }
 0x2dc   : > { %v2262_v33 = vpop.permute.xlu2 %2261 }
 0x2dd   : > { %2347 = vst.msk [vmem:[#allocation3 + $0x2c] sm:$0xf] %vm2335_vm9, %v2262_v33  ;;  %2502 = vrot.lane.b32.xlu0 %v8542_v44, %s11156_s19 }
 0x2de   : > { %2492 = vrot.lane.b32.xlu1 %v2414_v30, %s11156_s19 }
 0x2df   : > { %v2258_v60 = vpop.permute.xlu0 %2257 }
 0x2e0   : > { %2345 = vst.msk [vmem:[#allocation3 + $0x24] sm:$0xf] %vm2335_vm9, %v2258_v60  ;;  %v2248_v15 = vpop.permute.xlu1 %2247 }
 0x2e1   : > { %2340 = vst.msk [vmem:[#allocation3 + $0x10] sm:$0xf] %vm2335_vm9, %v2248_v15 }
 0x2e2   : > { %2494 = vrot.lane.b32.xlu2 %v2415_v31, %s11156_s19 }
 0x2e4   : > { %v2268_v49 = vpop.permute.xlu2 %2267 }
 0x2e5   : > { %2350 = vst.msk [vmem:[#allocation3 + $0x38] sm:$0xf] %vm2335_vm9, %v2268_v49  ;;  %2508 = vrot.lane.b32.xlu0 %v8552_v17, %s11156_s19  ;;  %v2633_v17 = vld [vmem:[%s11126_s5 + $0x20] sm:$0xf]  ;;  %v2397_v49 = vld [vmem:[#allocation2 + $0x18a] sm:$0xff] }
 0x2e6   : > { %v2735_v29 = vunpack.c.l.b16 %v2633_v17  ;;  %2498 = vrot.lane.b32.xlu1 %v2417_v26, %s11156_s19 }
 0x2e7   : > { %v2264_v40 = vpop.permute.xlu0 %2263 }
 0x2e8   : > { %2348 = vst.msk [vmem:[#allocation3 + $0x30] sm:$0xf] %vm2335_vm9, %v2264_v40  ;;  %v2254_v44 = vpop.permute.xlu1 %2253  ;;  %v2740_v28 = vpack.c.b16 %v2735_v29, %v2735_v29  ;;  %v2424_v40 = vpack.c.bf16 %v2392_v7, %v2392_v7 }
 0x2e9   : > { %2343 = vst.msk [vmem:[#allocation3 + $0x1c] sm:$0xf] %vm2335_vm9, %v2254_v44  ;;  %v2428_v44 = vpack.c.bf16 %v2396_v10, %v2396_v10 }
 0x2ea   : > { %v2796_v12 = vsel %vm2794_vm10, %v2740_v28, 0  ;;  %2500 = vrot.lane.b32.xlu2 %v2418_v9, %s11156_s19  ;;  %v2395_v28 = vld [vmem:[#allocation2 + $0x172] sm:$0xff]  ;;  %v2398_v9 = vld [vmem:[#allocation2 + $0x19a] sm:$0xff] }
 0x2eb   : > { %2801 = vmatpush.bf16.msra.mxu0 %v2796_v12  ;;  %7445 = vmatpush.bf16.msra.mxu2 %v2796_v12  ;;  %v2427_v12 = vpack.c.bf16 %v2395_v28, %v2395_v28 }
 0x2ec   : > { %v2274_v22 = vpop.permute.xlu2 %2273 }
 0x2ed   : > { %2353 = vst.msk [vmem:[#allocation3 + $0x44] sm:$0xf] %vm2335_vm9, %v2274_v22  ;;  %2514 = vrot.lane.b32.xlu0 %v2425_v52, %s11156_s19  ;;  %v2429_v22 = vpack.c.bf16 %v2397_v49, %v2397_v49 }
 0x2ee   : > { %2504 = vrot.lane.b32.xlu1 %v2420_v37, %s11156_s19 }
 0x2ef   : > { %v2270_v57 = vpop.permute.xlu0 %2269  ;;  %2802 = vmatpush.bf16.msra.mxu0 %v7310_v35  ;;  %7446 = vmatpush.bf16.msra.mxu2 %v7310_v35 }
 0x2f0   : > { %2351 = vst.msk [vmem:[#allocation3 + $0x3c] sm:$0xf] %vm2335_vm9, %v2270_v57  ;;  %v2260_v62 = vpop.permute.xlu1 %2259 }
 0x2f1   : > { %2346 = vst.msk [vmem:[#allocation3 + $0x28] sm:$0xf] %vm2335_vm9, %v2260_v62 }
 0x2f2   : > { %2506 = vrot.lane.b32.xlu2 %v2421_v25, %s11156_s19 }
 0x2f3   : > { %2803 = vmatpush.bf16.msra.mxu0 %v7309_v59  ;;  %7447 = vmatpush.bf16.msra.mxu2 %v7309_v59 }
 0x2f4   : > { %v2280_v27 = vpop.permute.xlu2 %2279 }
 0x2f5   : > { %2356 = vst.msk [vmem:[#allocation3 + $0x50] sm:$0xf] %vm2335_vm9, %v2280_v27  ;;  %2520 = vrot.lane.b32.xlu0 %v2428_v44, %s11156_s19 }
 0x2f6   : > { %2510 = vrot.lane.b32.xlu1 %v2423_v58, %s11156_s19 }
 0x2f7   : > { %v2276_v21 = vpop.permute.xlu0 %2275  ;;  %2804 = vmatpush.bf16.msra.mxu0 %v7308_v42  ;;  %7448 = vmatpush.bf16.msra.mxu2 %v7308_v42 }
 0x2f8   : > { %2354 = vst.msk [vmem:[#allocation3 + $0x48] sm:$0xf] %vm2335_vm9, %v2276_v21  ;;  %v2266_v43 = vpop.permute.xlu1 %2265 }
 0x2f9   : > { %2349 = vst.msk [vmem:[#allocation3 + $0x34] sm:$0xf] %vm2335_vm9, %v2266_v43 }
 0x2fa   : > { %2512 = vrot.lane.b32.xlu2 %v2424_v40, %s11156_s19 }
 0x2fb   : > { %2805 = vmatpush.bf16.msra.mxu0 %v7307_v50  ;;  %7449 = vmatpush.bf16.msra.mxu2 %v7307_v50 }
 0x2fc   : > { %v2286_v24 = vpop.permute.xlu2 %2285 }
 0x2fd   : > { %2359 = vst.msk [vmem:[#allocation3 + $0x5c] sm:$0xf] %vm2335_vm9, %v2286_v24 }
 0x2fe   : > { %2516 = vrot.lane.b32.xlu1 %v2426_v46, %s11156_s19 }
 0x2ff   : > { %v2282_v51 = vpop.permute.xlu0 %2281 }
 0x300   : > { %2357 = vst.msk [vmem:[#allocation3 + $0x54] sm:$0xf] %vm2335_vm9, %v2282_v51  ;;  %v2272_v38 = vpop.permute.xlu1 %2271 }
 0x301   : > { %2352 = vst.msk [vmem:[#allocation3 + $0x40] sm:$0xf] %vm2335_vm9, %v2272_v38 }
 0x302   : > { %2518 = vrot.lane.b32.xlu2 %v2427_v12, %s11156_s19 }
 0x304   : > { %v2292_v48 = vpop.permute.xlu2 %2291 }
 0x305   : > { %2362 = vst.msk [vmem:[#allocation3 + $0x68] sm:$0xf] %vm2335_vm9, %v2292_v48 }
 0x306   : > { %2522 = vrot.lane.b32.xlu1 %v2429_v22, %s11156_s19 }
 0x307   : > { %v2288_v55 = vpop.permute.xlu0 %2287 }
 0x308   : > { %2360 = vst.msk [vmem:[#allocation3 + $0x60] sm:$0xf] %vm2335_vm9, %v2288_v55  ;;  %v2278_v56 = vpop.permute.xlu1 %2277 }
 0x309   : > { %2355 = vst.msk [vmem:[#allocation3 + $0x4c] sm:$0xf] %vm2335_vm9, %v2278_v56 }
 0x30c   : > { %v2298_v11 = vpop.permute.xlu2 %2297 }
 0x30d   : > { %2365 = vst.msk [vmem:[#allocation3 + $0x74] sm:$0xf] %vm2335_vm9, %v2298_v11 }
 0x30f   : > { %v2294_v61 = vpop.permute.xlu0 %2293 }
 0x310   : > { %2363 = vst.msk [vmem:[#allocation3 + $0x6c] sm:$0xf] %vm2335_vm9, %v2294_v61  ;;  %v2284_v16 = vpop.permute.xlu1 %2283 }
 0x311   : > { %2358 = vst.msk [vmem:[#allocation3 + $0x58] sm:$0xf] %vm2335_vm9, %v2284_v16 }
 0x314   : > { %v2465_v36 = vpop.permute.xlu2 %2464 }
 0x315   : > { %2561 = vst.msk [vmem:[#allocation3] sm:$0xf] %vm11161_vm11, %v2465_v36 }
 0x317   : > { %v2300_v19 = vpop.permute.xlu0 %2299 }
 0x318   : > { %2366 = vst.msk [vmem:[#allocation3 + $0x78] sm:$0xf] %vm2335_vm9, %v2300_v19  ;;  %v2290_v4 = vpop.permute.xlu1 %2289  ;;  %v2431_v19 = vpack.c.bf16 %v2399_v6, %v2399_v6 }
 0x319   : > { %2361 = vst.msk [vmem:[#allocation3 + $0x64] sm:$0xf] %vm2335_vm9, %v2290_v4  ;;  %v3047_v4 = vld [vmem:[#allocation2 + $0x1] sm:$0xff] }
 0x31a   : > { %2526 = vrot.lane.b32.xlu0 %v2431_v19, %s11156_s19  ;;  %v3079_v5 = vpack.c.bf16 %v3047_v4, %v3047_v4 }
 0x31c   : > { %v7010_v18 = vld [vmem:[#allocation3] sm:$0xf]  ;;  %v2471_v41 = vpop.permute.xlu2 %2470  ;;  %3143 = vrot.lane.b32.xlu1 %v3079_v5, %s11152_s28 }
 0x31d   : > { %3015 = vst.msk [vmem:[#allocation3] sm:$0xf] %vm11160_vm2, %v2983_v1  ;;  %v2430_v1 = vpack.c.bf16 %v2398_v9, %v2398_v9 }
 0x31e   : > { %2564 = vst.msk [vmem:[#allocation3 + $0xc] sm:$0xf] %vm11161_vm11, %v2471_v41 }
 0x31f   : > { %v2467_v3 = vpop.permute.xlu0 %2466  ;;  %2524 = vrot.lane.b32.xlu2 %v2430_v1, %s11156_s19 }
 0x320   : > { %2562 = vst.msk [vmem:[#allocation3 + $0x4] sm:$0xf] %vm11161_vm11, %v2467_v3  ;;  %v2296_v13 = vpop.permute.xlu1 %2295  ;;  %v3048_v3 = vld [vmem:[#allocation2 + $0x9] sm:$0xff] }
 0x321   : > { %2364 = vst.msk [vmem:[#allocation3 + $0x70] sm:$0xf] %vm2335_vm9, %v2296_v13  ;;  %v3080_v13 = vpack.c.bf16 %v3048_v3, %v3048_v3 }
 0x324   : > { %v2477_v32 = vpop.permute.xlu2 %2476 }
 0x325   : > { %2567 = vst.msk [vmem:[#allocation3 + $0x18] sm:$0xf] %vm11161_vm11, %v2477_v32  ;;  %v7292_v62 = vld [vmem:[#allocation3 + $0x8] sm:$0xf0] }
 0x327   : > { %v7291_v14 = vld [vmem:[#allocation3] sm:$0xf0]  ;;  %v2473_v33 = vpop.permute.xlu0 %2472  ;;  %3145 = vrot.lane.b32.xlu2 %v3080_v13, %s11152_s28 }
 0x328   : > { %3016 = vst.msk [vmem:[#allocation3 + $0x4] sm:$0xf] %vm11160_vm2, %v2984_v8  ;;  %v2302_v60 = vpop.permute.xlu1 %2301  ;;  %v7011_v15 = vor.u32 %v7291_v14, %v7010_v18 }
 0x329   : > { %2367 = vst.msk [vmem:[#allocation3 + $0x7c] sm:$0xf] %vm2335_vm9, %v2302_v60 }
 0x32a   : > { %7088 = vmatmul.msk.bf16.vlgmr.msra.gmra.mxu0 %vm11159_vm12, %v7011_v15  ;;  %2565 = vst.msk [vmem:[#allocation3 + $0x10] sm:$0xf] %vm11161_vm11, %v2473_v33 }
 0x32c   : > { %v2483_v20 = vpop.permute.xlu2 %2482  ;;  %v7022_v51 = vld [vmem:[#allocation3 + $0x18] sm:$0xf] }
 0x32d   : > { %2570 = vst.msk [vmem:[#allocation3 + $0x24] sm:$0xf] %vm11161_vm11, %v2483_v20 }
 0x32f   : > { %v2479_v57 = vpop.permute.xlu0 %2478 }
 0x330   : > { %v2469_v30 = vpop.permute.xlu1 %2468  ;;  %2568 = vst.msk [vmem:[#allocation3 + $0x1c] sm:$0xf] %vm11161_vm11, %v2479_v57 }
 0x331   : > { %2563 = vst.msk [vmem:[#allocation3 + $0x8] sm:$0xf] %vm11161_vm11, %v2469_v30  ;;  %v7018_v26 = vld [vmem:[#allocation3 + $0x10] sm:$0xf] }
 0x334   : > { %v2489_v42 = vpop.permute.xlu2 %2488 }
 0x335   : > { %2573 = vst.msk [vmem:[#allocation3 + $0x30] sm:$0xf] %vm11161_vm11, %v2489_v42 }
 0x337   : > { %v2485_v59 = vpop.permute.xlu0 %2484  ;;  %v7294_v23 = vld [vmem:[#allocation3 + $0x18] sm:$0xf0] }
 0x338   : > { %v7014_v17 = vld [vmem:[#allocation3 + $0x8] sm:$0xf]  ;;  %v2475_v29 = vpop.permute.xlu1 %2474  ;;  %2571 = vst.msk [vmem:[#allocation3 + $0x28] sm:$0xf] %vm11161_vm11, %v2485_v59  ;;  %v7023_v37 = vor.u32 %v7294_v23, %v7022_v51 }
 0x339   : > { %v7015_v27 = vor.u32 %v7292_v62, %v7014_v17  ;;  %2566 = vst.msk [vmem:[#allocation3 + $0x14] sm:$0xf] %vm11161_vm11, %v2475_v29 }
 0x33b   : > { %7089 = vmatmul.msk.bf16.gmra.mxu0 %vm11159_vm12, %v7015_v27 }
 0x33c   : > { %v2495_v50 = vpop.permute.xlu2 %2494 }
 0x33d   : > { %2576 = vst.msk [vmem:[#allocation3 + $0x3c] sm:$0xf] %vm11161_vm11, %v2495_v50 }
 0x33f   : > { %v2491_v38 = vpop.permute.xlu0 %2490 }
 0x340   : > { %v2481_v21 = vpop.permute.xlu1 %2480  ;;  %v7293_v43 = vld [vmem:[#allocation3 + $0x10] sm:$0xf0]  ;;  %2574 = vst.msk [vmem:[#allocation3 + $0x34] sm:$0xf] %vm11161_vm11, %v2491_v38 }
 0x341   : > { %2569 = vst.msk [vmem:[#allocation3 + $0x20] sm:$0xf] %vm11161_vm11, %v2481_v21  ;;  %v7019_v35 = vor.u32 %v7293_v43, %v7018_v26 }
 0x344   : > { %v2501_v58 = vpop.permute.xlu2 %2500 }
 0x345   : > { %2579 = vst.msk [vmem:[#allocation3 + $0x48] sm:$0xf] %vm11161_vm11, %v2501_v58 }
 0x347   : > { %v2497_v54 = vpop.permute.xlu0 %2496  ;;  %v7297_v36 = vld [vmem:[#allocation3 + $0x30] sm:$0xff] }
 0x348   : > { %v2487_v24 = vpop.permute.xlu1 %2486  ;;  %2577 = vst.msk [vmem:[#allocation3 + $0x40] sm:$0xf] %vm11161_vm11, %v2497_v54  ;;  %v7295_v39 = vld [vmem:[#allocation3 + $0x20] sm:$0xff] }
 0x349   : > { %2572 = vst.msk [vmem:[#allocation3 + $0x2c] sm:$0xf] %vm11161_vm11, %v2487_v24 }
 0x34b   : > { %7090 = vmatmul.msk.bf16.gmra.mxu0 %vm11159_vm12, %v7019_v35 }
 0x34c   : > { %v2507_v11 = vpop.permute.xlu2 %2506 }
 0x34d   : > { %2582 = vst.msk [vmem:[#allocation3 + $0x54] sm:$0xf] %vm11161_vm11, %v2507_v11 }
 0x34f   : > { %v2503_v55 = vpop.permute.xlu0 %2502 }
 0x350   : > { %v2493_v48 = vpop.permute.xlu1 %2492  ;;  %2580 = vst.msk [vmem:[#allocation3 + $0x4c] sm:$0xf] %vm11161_vm11, %v2503_v55  ;;  %v7296_v31 = vld [vmem:[#allocation3 + $0x28] sm:$0xff] }
 0x351   : > { %2575 = vst.msk [vmem:[#allocation3 + $0x38] sm:$0xf] %vm11161_vm11, %v2493_v48 }
 0x354   : > { %v2513_v47 = vpop.permute.xlu2 %2512 }
 0x355   : > { %2585 = vst.msk [vmem:[#allocation3 + $0x60] sm:$0xf] %vm11161_vm11, %v2513_v47 }
 0x357   : > { %v2509_v53 = vpop.permute.xlu0 %2508  ;;  %v7300_v17 = vld [vmem:[#allocation3 + $0x48] sm:$0xff] }
 0x358   : > { %v2499_v45 = vpop.permute.xlu1 %2498  ;;  %2583 = vst.msk [vmem:[#allocation3 + $0x58] sm:$0xf] %vm11161_vm11, %v2509_v53  ;;  %v7298_v18 = vld [vmem:[#allocation3 + $0x38] sm:$0xff] }
 0x359   : > { %2578 = vst.msk [vmem:[#allocation3 + $0x44] sm:$0xf] %vm11161_vm11, %v2499_v45 }
 0x35b   : > { %7091 = vmatmul.msk.bf16.gmra.mxu0 %vm11159_vm12, %v7023_v37 }
 0x35c   : > { %v2519_v41 = vpop.permute.xlu2 %2518 }
 0x35d   : > { %2588 = vst.msk [vmem:[#allocation3 + $0x6c] sm:$0xf] %vm11161_vm11, %v2519_v41 }
 0x35f   : > { %v2515_v2 = vpop.permute.xlu0 %2514 }
 0x360   : > { %v2505_v56 = vpop.permute.xlu1 %2504  ;;  %2586 = vst.msk [vmem:[#allocation3 + $0x64] sm:$0xf] %vm11161_vm11, %v2515_v2  ;;  %v7299_v14 = vld [vmem:[#allocation3 + $0x40] sm:$0xff] }
 0x361   : > { %2581 = vst.msk [vmem:[#allocation3 + $0x50] sm:$0xf] %vm11161_vm11, %v2505_v56 }
 0x367   : > { %v7303_v52 = vld [vmem:[#allocation3 + $0x60] sm:$0xff]  ;;  %v2521_v60 = vpop.permute.xlu0 %2520 }
 0x368   : > { %v2511_v61 = vpop.permute.xlu1 %2510  ;;  %2589 = vst.msk [vmem:[#allocation3 + $0x70] sm:$0xf] %vm11161_vm11, %v2521_v60  ;;  %v7301_v48 = vld [vmem:[#allocation3 + $0x50] sm:$0xff] }
 0x369   : > { %2584 = vst.msk [vmem:[#allocation3 + $0x5c] sm:$0xf] %vm11161_vm11, %v2511_v61 }
 0x36b   : > { %7092 = vmatmul.msk.bf16.gmra.mxu0 %vm11159_vm12, %v7295_v39 }
 0x370   : > { %v7302_v16 = vld [vmem:[#allocation3 + $0x58] sm:$0xff]  ;;  %v2517_v25 = vpop.permute.xlu1 %2516 }
 0x371   : > { %7099 = vmatmul.msk.bf16.vlgmr.msra.gmra.mxu2 %vm11159_vm12, %v7302_v16  ;;  %2587 = vst.msk [vmem:[#allocation3 + $0x68] sm:$0xf] %vm11161_vm11, %v2517_v25 }
 0x378   : > { %v7304_v63 = vld [vmem:[#allocation3 + $0x68] sm:$0xff]  ;;  %v2523_v15 = vpop.permute.xlu1 %2522 }
 0x379   : > { %2590 = vst.msk [vmem:[#allocation3 + $0x74] sm:$0xf] %vm11161_vm11, %v2523_v15 }
 0x37b   : > { %7093 = vmatmul.msk.bf16.gmra.mxu0 %vm11159_vm12, %v7296_v31 }
 0x380   : > { %v7305_v57 = vld [vmem:[#allocation3 + $0x70] sm:$0xff] }
 0x381   : > { %7100 = vmatmul.msk.bf16.gmra.mxu2 %vm11159_vm12, %v7303_v52 }
 0x38b   : > { %7094 = vmatmul.msk.bf16.gmra.mxu0 %vm11159_vm12, %v7297_v36 }
 0x391   : > { %7101 = vmatmul.msk.bf16.gmra.mxu2 %vm11159_vm12, %v7304_v63 }
 0x39b   : > { %7095 = vmatmul.msk.bf16.gmra.mxu0 %vm11159_vm12, %v7298_v18 }
 0x3a1   : > { %7102 = vmatmul.msk.bf16.gmra.mxu2 %vm11159_vm12, %v7305_v57 }
 0x3a7   : > { %v2807_v46 = vpop.f32.mrf.mxu0 }
 0x3a8   : > { %v2808_v8 = vadd.f32 %v8863_v34, %v2807_v46 }
 0x3aa   : > { %v2887_v33 = vmax.f32 %v2808_v8, 0.0 }
 0x3ab   : > { %7096 = vmatmul.msk.bf16.gmra.mxu0 %vm11159_vm12, %v7299_v14 }
 0x3ac   : > { %2919 = vst.msk [vmem:[#allocation2 + $0x19] sm:$0xff] %vm11158_vm0, %v2887_v33 }
 0x3af   : > { %v2809_v7 = vpop.f32.mrf.mxu0 }
 0x3b0   : > { %v2810_v10 = vadd.f32 %v8863_v34, %v2809_v7 }
 0x3b2   : > { %v2888_v49 = vmax.f32 %v2810_v10, 0.0 }
 0x3b3   : > { %v3049_v40 = vld [vmem:[#allocation2 + $0x19] sm:$0xff] }
 0x3b4   : > { %v2953_v44 = vld [vmem:[#allocation2 + $0x18] sm:$0xff]  ;;  %2920 = vst.msk [vmem:[#allocation2 + $0x21] sm:$0xff] %vm11158_vm0, %v2888_v49  ;;  %v8873_v22 = vpack.c.bf16 %v3049_v40, %v3049_v40 }
 0x3b5   : > { %v8875_v32 = vpack.c.bf16 %v2953_v44, %v2953_v44 }
 0x3b6   : > { %3147 = vrot.lane.b32.xlu0 %v8873_v22, %s11152_s28 }
 0x3b7   : > { %3017 = vst.msk [vmem:[#allocation3 + $0x8] sm:$0xf] %vm11160_vm2, %v8875_v32 }
 0x3b8   : > { %v2812_v30 = vpop.f32.mrf.mxu0 }
 0x3b9   : > { %v2813_v62 = vadd.f32 %v8863_v34, %v2812_v30 }
 0x3bb   : > { %v2889_v29 = vmax.f32 %v2813_v62, 0.0  ;;  %7097 = vmatmul.msk.bf16.gmra.mxu0 %vm11159_vm12, %v7300_v17  ;;  %v3050_v27 = vld [vmem:[#allocation2 + $0x21] sm:$0xff]  ;;  %v2525_v62 = vpop.permute.xlu2 %2524 }
 0x3bc   : > { %v2954_v28 = vld [vmem:[#allocation2 + $0x20] sm:$0xff]  ;;  %v8886_v20 = vpack.c.bf16 %v3050_v27, %v3050_v27  ;;  %2591 = vst.msk [vmem:[#allocation3 + $0x78] sm:$0xf] %vm11161_vm11, %v2525_v62 }
 0x3bd   : > { %v8884_v12 = vld [vmem:[#allocation2 + $0x1a] sm:$0xff]  ;;  %v8888_v21 = vpack.c.bf16 %v2954_v28, %v2954_v28  ;;  %2921 = vst.msk [vmem:[#allocation2 + $0x31] sm:$0xff] %vm11158_vm0, %v2889_v29  ;;  %v8897_v26 = vld [vmem:[#allocation2 + $0x22] sm:$0xff] }
 0x3be   : > { %5478 = vst.msk [vmem:[#allocation2 + $0x18] sm:$0xff] %vm11158_vm0, %v11147_v0  ;;  %3149 = vrot.lane.b32.xlu1 %v8886_v20, %s11152_s28 }
 0x3bf   : > { %3018 = vst.msk [vmem:[#allocation3 + $0xc] sm:$0xf] %vm11160_vm2, %v8888_v21 }
 0x3c0   : > { %5480 = vst.msk [vmem:[#allocation2 + $0x28] sm:$0x3] %vm545_vm1, %v11147_v0  ;;  %v2814_v43 = vpop.f32.mrf.mxu0 }
 0x3c1   : > { %5479 = vst.msk [vmem:[#allocation2 + $0x20] sm:$0xff] %vm11158_vm0, %v11147_v0  ;;  %v2815_v35 = vadd.f32 %v8863_v34, %v2814_v43 }
 0x3c3   : > { %v2890_v59 = vmax.f32 %v2815_v35, 0.0 }
 0x3c4   : > { %v3051_v24 = vld [vmem:[#allocation2 + $0x31] sm:$0xff] }
 0x3c5   : > { %v2955_v23 = vld [vmem:[#allocation2 + $0x30] sm:$0xff]  ;;  %2922 = vst.msk [vmem:[#allocation2 + $0x39] sm:$0xff] %vm11158_vm0, %v2890_v59  ;;  %v8905_v51 = vpack.c.bf16 %v3051_v24, %v3051_v24  ;;  %v3146_v24 = vpop.permute.xlu2 %3145 }
 0x3c6   : > { %v8907_v37 = vpack.c.bf16 %v2955_v23, %v2955_v23  ;;  %3240 = vst.msk [vmem:[#allocation3 + $0x4] sm:$0xf] %vm984_vm3, %v3146_v24 }
 0x3c7   : > { %3151 = vrot.lane.b32.xlu2 %v8905_v51, %s11152_s28 }
 0x3c8   : > { %3019 = vst.msk [vmem:[#allocation3 + $0x10] sm:$0xf] %vm11160_vm2, %v8907_v37  ;;  %v2817_v38 = vpop.f32.mrf.mxu0 }
 0x3c9   : > { %v2818_v42 = vadd.f32 %v8863_v34, %v2817_v38 }
 0x3cb   : > { %v2891_v54 = vmax.f32 %v2818_v42, 0.0  ;;  %7098 = vmatmul.msk.bf16.gmra.mxu0 %vm11159_vm12, %v7301_v48 }
 0x3cc   : > { %v3052_v39 = vld [vmem:[#allocation2 + $0x39] sm:$0xff] }
 0x3cd   : > { %v2956_v50 = vld [vmem:[#allocation2 + $0x38] sm:$0xff]  ;;  %2923 = vst.msk [vmem:[#allocation2 + $0x49] sm:$0xff] %vm11158_vm0, %v2891_v54  ;;  %v8916_v45 = vpack.c.bf16 %v3052_v39, %v3052_v39 }
 0x3ce   : > { %v8918_v55 = vpack.c.bf16 %v2956_v50, %v2956_v50  ;;  %v8920_v58 = vld [vmem:[#allocation2 + $0x3a] sm:$0xff]  ;;  %v8928_v56 = vld [vmem:[#allocation2 + $0x32] sm:$0xff] }
 0x3cf   : > { %5483 = vst.msk [vmem:[#allocation2 + $0x40] sm:$0x3] %vm545_vm1, %v11147_v0  ;;  %3153 = vrot.lane.b32.xlu0 %v8916_v45, %s11152_s28 }
 0x3d0   : > { %3020 = vst.msk [vmem:[#allocation3 + $0x14] sm:$0xf] %vm11160_vm2, %v8918_v55  ;;  %v2819_v53 = vpop.f32.mrf.mxu0 }
 0x3d1   : > { %5481 = vst.msk [vmem:[#allocation2 + $0x30] sm:$0xff] %vm11158_vm0, %v11147_v0  ;;  %v2820_v31 = vadd.f32 %v8863_v34, %v2819_v53 }
 0x3d2   : > { %5482 = vst.msk [vmem:[#allocation2 + $0x38] sm:$0xff] %vm11158_vm0, %v11147_v0 }
 0x3d3   : > { %v2892_v11 = vmax.f32 %v2820_v31, 0.0 }
 0x3d4   : > { %v3053_v61 = vld [vmem:[#allocation2 + $0x49] sm:$0xff] }
 0x3d5   : > { %v2957_v16 = vld [vmem:[#allocation2 + $0x48] sm:$0xff]  ;;  %2924 = vst.msk [vmem:[#allocation2 + $0x51] sm:$0xff] %vm11158_vm0, %v2892_v11  ;;  %v8936_v36 = vpack.c.bf16 %v3053_v61, %v3053_v61 }
 0x3d6   : > { %v8938_v2 = vpack.c.bf16 %v2957_v16, %v2957_v16  ;;  %v2527_v16 = vpop.permute.xlu0 %2526 }
 0x3d7   : > { %3155 = vrot.lane.b32.xlu1 %v8936_v36, %s11152_s28  ;;  %2592 = vst.msk [vmem:[#allocation3 + $0x7c] sm:$0xf] %vm11161_vm11, %v2527_v16 }
 0x3d8   : > { %3021 = vst.msk [vmem:[#allocation3 + $0x18] sm:$0xf] %vm11160_vm2, %v8938_v2  ;;  %v2822_v47 = vpop.f32.mrf.mxu0 }
 0x3d9   : > { %v2823_v6 = vadd.f32 %v8863_v34, %v2822_v47 }
 0x3db   : > { %v2893_v19 = vmax.f32 %v2823_v6, 0.0 }
 0x3dc   : > { %v3054_v52 = vld [vmem:[#allocation2 + $0x51] sm:$0xff] }
 0x3dd   : > { %v2958_v9 = vld [vmem:[#allocation2 + $0x50] sm:$0xff]  ;;  %2925 = vst.msk [vmem:[#allocation2 + $0x61] sm:$0xff] %vm11158_vm0, %v2893_v19  ;;  %v8946_v4 = vpack.c.bf16 %v3054_v52, %v3054_v52 }
 0x3de   : > { %v8948_v1 = vpack.c.bf16 %v2958_v9, %v2958_v9  ;;  %v8950_v5 = vld [vmem:[#allocation2 + $0x52] sm:$0xff]  ;;  %v8958_v18 = vld [vmem:[#allocation2 + $0x4a] sm:$0xff] }
 0x3df   : > { %5486 = vst.msk [vmem:[#allocation2 + $0x58] sm:$0x3] %vm545_vm1, %v11147_v0  ;;  %3157 = vrot.lane.b32.xlu2 %v8946_v4, %s11152_s28 }
 0x3e0   : > { %3022 = vst.msk [vmem:[#allocation3 + $0x1c] sm:$0xf] %vm11160_vm2, %v8948_v1  ;;  %v2824_v41 = vpop.f32.mrf.mxu0 }
 0x3e1   : > { %5484 = vst.msk [vmem:[#allocation2 + $0x48] sm:$0xff] %vm11158_vm0, %v11147_v0  ;;  %v2825_v25 = vadd.f32 %v8863_v34, %v2824_v41 }
 0x3e2   : > { %5485 = vst.msk [vmem:[#allocation2 + $0x50] sm:$0xff] %vm11158_vm0, %v11147_v0 }
 0x3e3   : > { %v2894_v3 = vmax.f32 %v2825_v25, 0.0 }
 0x3e4   : > { %v3055_v13 = vld [vmem:[#allocation2 + $0x61] sm:$0xff] }
 0x3e5   : > { %v2959_v63 = vld [vmem:[#allocation2 + $0x60] sm:$0xff]  ;;  %2926 = vst.msk [vmem:[#allocation2 + $0x69] sm:$0xff] %vm11158_vm0, %v2894_v3  ;;  %v8966_v46 = vpack.c.bf16 %v3055_v13, %v3055_v13  ;;  %v3144_v13 = vpop.permute.xlu1 %3143 }
 0x3e6   : > { %v8968_v8 = vpack.c.bf16 %v2959_v63, %v2959_v63  ;;  %3239 = vst.msk [vmem:[#allocation3] sm:$0xf] %vm984_vm3, %v3144_v13 }
 0x3e7   : > { %3159 = vrot.lane.b32.xlu0 %v8966_v46, %s11152_s28 }
 0x3e8   : > { %3023 = vst.msk [vmem:[#allocation3 + $0x20] sm:$0xf] %vm11160_vm2, %v8968_v8  ;;  %v2827_v14 = vpop.f32.mrf.mxu0 }
 0x3e9   : > { %v2828_v33 = vadd.f32 %v8863_v34, %v2827_v14 }
 0x3eb   : > { %v2895_v60 = vmax.f32 %v2828_v33, 0.0 }
 0x3ec   : > { %v3056_v15 = vld [vmem:[#allocation2 + $0x69] sm:$0xff] }
 0x3ed   : > { %v2960_v7 = vld [vmem:[#allocation2 + $0x68] sm:$0xff]  ;;  %2927 = vst.msk [vmem:[#allocation2 + $0x79] sm:$0xff] %vm11158_vm0, %v2895_v60  ;;  %v8976_v10 = vpack.c.bf16 %v3056_v15, %v3056_v15 }
 0x3ee   : > { %v8978_v49 = vpack.c.bf16 %v2960_v7, %v2960_v7  ;;  %v8980_v40 = vld [vmem:[#allocation2 + $0x6a] sm:$0xff]  ;;  %v8988_v44 = vld [vmem:[#allocation2 + $0x62] sm:$0xff] }
 0x3ef   : > { %5489 = vst.msk [vmem:[#allocation2 + $0x70] sm:$0x3] %vm545_vm1, %v11147_v0  ;;  %3161 = vrot.lane.b32.xlu1 %v8976_v10, %s11152_s28 }
 0x3f0   : > { %3024 = vst.msk [vmem:[#allocation3 + $0x24] sm:$0xf] %vm11160_vm2, %v8978_v49  ;;  %v2829_v57 = vpop.f32.mrf.mxu0 }
 0x3f1   : > { %5487 = vst.msk [vmem:[#allocation2 + $0x60] sm:$0xff] %vm11158_vm0, %v11147_v0  ;;  %v2830_v30 = vadd.f32 %v8863_v34, %v2829_v57 }
 0x3f2   : > { %5488 = vst.msk [vmem:[#allocation2 + $0x68] sm:$0xff] %vm11158_vm0, %v11147_v0 }
 0x3f3   : > { %v2896_v17 = vmax.f32 %v2830_v30, 0.0 }
 0x3f4   : > { %v3057_v29 = vld [vmem:[#allocation2 + $0x79] sm:$0xff]  ;;  %v2862_v3 = vpop.f32.mrf.mxu2 }
 0x3f5   : > { %v2961_v27 = vld [vmem:[#allocation2 + $0x78] sm:$0xff]  ;;  %2928 = vst.msk [vmem:[#allocation2 + $0x81] sm:$0xff] %vm11158_vm0, %v2896_v17  ;;  %v8997_v28 = vpack.c.bf16 %v3057_v29, %v3057_v29  ;;  %v2863_v15 = vadd.f32 %v8863_v34, %v2862_v3 }
 0x3f6   : > { %v8999_v43 = vpack.c.bf16 %v2961_v27, %v2961_v27  ;;  %v9012_v50 = vld [vmem:[#allocation2 + $0x79] sm:$0xff] }
 0x3f7   : > { %3163 = vrot.lane.b32.xlu2 %v8997_v28, %s11152_s28  ;;  %v2909_v62 = vmax.f32 %v2863_v15, 0.0 }
 0x3f8   : > { %3025 = vst.msk [vmem:[#allocation3 + $0x28] sm:$0xf] %vm11160_vm2, %v8999_v43  ;;  %v2832_v35 = vpop.f32.mrf.mxu0 }
 0x3f9   : > { %v2833_v59 = vadd.f32 %v8863_v34, %v2832_v35  ;;  %2941 = vst.msk [vmem:[#allocation2 + $0x121] sm:$0xff] %vm11158_vm0, %v2909_v62 }
 0x3fb   : > { %v2897_v23 = vmax.f32 %v2833_v59, 0.0 }
 0x3fc   : > { %v3058_v38 = vld [vmem:[#allocation2 + $0x81] sm:$0xff]  ;;  %v2864_v59 = vpop.f32.mrf.mxu2 }
 0x3fd   : > { %v2962_v42 = vld [vmem:[#allocation2 + $0x80] sm:$0xff]  ;;  %2929 = vst.msk [vmem:[#allocation2 + $0x91] sm:$0xff] %vm11158_vm0, %v2897_v23  ;;  %v3090_v48 = vpack.c.bf16 %v3058_v38, %v3058_v38  ;;  %v2865_v24 = vadd.f32 %v8863_v34, %v2864_v59 }
 0x3fe   : > { %v9008_v54 = vpack.c.bf16 %v2962_v42, %v2962_v42  ;;  %v9010_v39 = vld [vmem:[#allocation2 + $0x7a] sm:$0xff]  ;;  %v9019_v53 = vld [vmem:[#allocation2 + $0x82] sm:$0xff] }
 0x3ff   : > { %5490 = vst.msk [vmem:[#allocation2 + $0x78] sm:$0xff] %vm11158_vm0, %v11147_v0  ;;  %3165 = vrot.lane.b32.xlu0 %v3090_v48, %s11152_s28  ;;  %v9021_v31 = vld [vmem:[#allocation2 + $0x81] sm:$0xff]  ;;  %v2910_v42 = vmax.f32 %v2865_v24, 0.0 }
 0x400   : > { %3026 = vst.msk [vmem:[#allocation3 + $0x2c] sm:$0xf] %vm11160_vm2, %v9008_v54  ;;  %v2834_v11 = vpop.f32.mrf.mxu0 }
 0x401   : > { %5492 = vst.msk [vmem:[#allocation2 + $0x88] sm:$0x3] %vm545_vm1, %v11147_v0  ;;  %v2835_v61 = vadd.f32 %v8863_v34, %v2834_v11 }
 0x402   : > { %5491 = vst.msk [vmem:[#allocation2 + $0x80] sm:$0xff] %vm11158_vm0, %v11147_v0 }
 0x403   : > { %v2898_v47 = vmax.f32 %v2835_v61, 0.0  ;;  %2942 = vst.msk [vmem:[#allocation2 + $0x129] sm:$0xff] %vm11158_vm0, %v2910_v42 }
 0x404   : > { %v3059_v6 = vld [vmem:[#allocation2 + $0x91] sm:$0xff] }
 0x405   : > { %v2963_v19 = vld [vmem:[#allocation2 + $0x90] sm:$0xff]  ;;  %2930 = vst.msk [vmem:[#allocation2 + $0x99] sm:$0xff] %vm11158_vm0, %v2898_v47  ;;  %v3091_v52 = vpack.c.bf16 %v3059_v6, %v3059_v6  ;;  %v2867_v6 = vpop.f32.mrf.mxu2 }
 0x406   : > { %v9030_v9 = vpack.c.bf16 %v2963_v19, %v2963_v19  ;;  %v9050_v17 = vld [vmem:[#allocation2 + $0x91] sm:$0xff] }
 0x407   : > { %3167 = vrot.lane.b32.xlu1 %v3091_v52, %s11152_s28 }
 0x408   : > { %3027 = vst.msk [vmem:[#allocation3 + $0x30] sm:$0xf] %vm11160_vm2, %v9030_v9  ;;  %v2837_v41 = vpop.f32.mrf.mxu0 }
 0x409   : > { %v2838_v25 = vadd.f32 %v8863_v34, %v2837_v41 }
 0x40a   : > { %v2976_v13 = vld [vmem:[#allocation2 + $0x128] sm:$0xff] }
 0x40b   : > { %v2899_v63 = vmax.f32 %v2838_v25, 0.0  ;;  %v2868_v25 = vadd.f32 %v8863_v34, %v2867_v6  ;;  %v3008_v62 = vpack.c.bf16 %v2976_v13, %v2976_v13  ;;  %v9098_v13 = vld [vmem:[#allocation2 + $0x121] sm:$0xff] }
 0x40c   : > { %v3060_v14 = vld [vmem:[#allocation2 + $0x99] sm:$0xff] }
 0x40d   : > { %v2964_v33 = vld [vmem:[#allocation2 + $0x98] sm:$0xff]  ;;  %2931 = vst.msk [vmem:[#allocation2 + $0xa9] sm:$0xff] %vm11158_vm0, %v2899_v63  ;;  %v3092_v60 = vpack.c.bf16 %v3060_v14, %v3060_v14  ;;  %v2975_v14 = vld [vmem:[#allocation2 + $0x120] sm:$0xff]  ;;  %v2911_v15 = vmax.f32 %v2868_v25, 0.0 }
 0x40e   : > { %v9039_v7 = vpack.c.bf16 %v2964_v33, %v2964_v33  ;;  %v9041_v57 = vld [vmem:[#allocation2 + $0x9a] sm:$0xff]  ;;  %v9052_v29 = vld [vmem:[#allocation2 + $0x92] sm:$0xff]  ;;  %3040 = vst.msk [vmem:[#allocation3 + $0x64] sm:$0xf] %vm11160_vm2, %v3008_v62  ;;  %v9104_v62 = vld [vmem:[#allocation2 + $0x129] sm:$0xff] }
 0x40f   : > { %v9043_v30 = vld [vmem:[#allocation2 + $0x99] sm:$0xff]  ;;  %3169 = vrot.lane.b32.xlu2 %v3092_v60, %s11152_s28  ;;  %5493 = vst.msk [vmem:[#allocation2 + $0x90] sm:$0xff] %vm11158_vm0, %v11147_v0 }
 0x410   : > { %5495 = vst.msk [vmem:[#allocation2 + $0xa0] sm:$0x3] %vm545_vm1, %v11147_v0  ;;  %v2839_v27 = vpop.f32.mrf.mxu0 }
 0x411   : > { %3028 = vst.msk [vmem:[#allocation3 + $0x34] sm:$0xf] %vm11160_vm2, %v9039_v7  ;;  %v2840_v35 = vadd.f32 %v8863_v34, %v2839_v27 }
 0x412   : > { %5494 = vst.msk [vmem:[#allocation2 + $0x98] sm:$0xff] %vm11158_vm0, %v11147_v0 }
 0x413   : > { %v2900_v23 = vmax.f32 %v2840_v35, 0.0  ;;  %v3007_v35 = vpack.c.bf16 %v2975_v14, %v2975_v14  ;;  %2943 = vst.msk [vmem:[#allocation2 + $0x139] sm:$0xff] %vm11158_vm0, %v2911_v15 }
 0x414   : > { %v3061_v38 = vld [vmem:[#allocation2 + $0xa9] sm:$0xff] }
 0x415   : > { %v2965_v48 = vld [vmem:[#allocation2 + $0xa8] sm:$0xff]  ;;  %2932 = vst.msk [vmem:[#allocation2 + $0xb1] sm:$0xff] %vm11158_vm0, %v2900_v23  ;;  %v3093_v11 = vpack.c.bf16 %v3061_v38, %v3061_v38  ;;  %v2869_v23 = vpop.f32.mrf.mxu2 }
 0x416   : > { %v9062_v61 = vpack.c.bf16 %v2965_v48, %v2965_v48  ;;  %v9075_v60 = vld [vmem:[#allocation2 + $0xa9] sm:$0xff]  ;;  %v2870_v38 = vadd.f32 %v8863_v34, %v2869_v23  ;;  %3039 = vst.msk [vmem:[#allocation3 + $0x60] sm:$0xf] %vm11160_vm2, %v3007_v35 }
 0x417   : > { %3171 = vrot.lane.b32.xlu0 %v3093_v11, %s11152_s28  ;;  %v9108_v35 = vld [vmem:[#allocation2 + $0x12a] sm:$0xff]  ;;  %v9116_v23 = vld [vmem:[#allocation2 + $0x122] sm:$0xff] }
 0x418   : > { %3029 = vst.msk [vmem:[#allocation3 + $0x38] sm:$0xf] %vm11160_vm2, %v9062_v61  ;;  %v2842_v16 = vpop.f32.mrf.mxu0  ;;  %v2912_v11 = vmax.f32 %v2870_v38, 0.0 }
 0x419   : > { %v2843_v47 = vadd.f32 %v8863_v34, %v2842_v16  ;;  %11181 = vst [vmem:[#allocation18_spill] sm:$0xff] %v9108_v35 }
 0x41a   : > { %2944 = vst.msk [vmem:[#allocation2 + $0x141] sm:$0xff] %vm11158_vm0, %v2912_v11  ;;  %v9122_v11 = vld [vmem:[#allocation2 + $0x12a] sm:$0xff] }
 0x41b   : > { %v2901_v19 = vmax.f32 %v2843_v47, 0.0  ;;  %11184 = vst [vmem:[#allocation21_spill] sm:$0xff] %v9116_v23 }
 0x41c   : > { %v3062_v52 = vld [vmem:[#allocation2 + $0xb1] sm:$0xff]  ;;  %11187 = vst [vmem:[#allocation24_spill] sm:$0xff] %v9122_v11 }
 0x41d   : > { %2933 = vst.msk [vmem:[#allocation2 + $0xc1] sm:$0xff] %vm11158_vm0, %v2901_v19  ;;  %v3094_v41 = vpack.c.bf16 %v3062_v52, %v3062_v52  ;;  %v2966_v3 = vld [vmem:[#allocation2 + $0xb0] sm:$0xff]  ;;  %v2872_v15 = vpop.f32.mrf.mxu2 }
 0x41e   : > { %v9071_v63 = vpack.c.bf16 %v2966_v3, %v2966_v3  ;;  %v9073_v33 = vld [vmem:[#allocation2 + $0xaa] sm:$0xff]  ;;  %v9090_v19 = vld [vmem:[#allocation2 + $0xb2] sm:$0xff] }
 0x41f   : > { %3173 = vrot.lane.b32.xlu1 %v3094_v41, %s11152_s28  ;;  %5496 = vst.msk [vmem:[#allocation2 + $0xa8] sm:$0xff] %vm11158_vm0, %v11147_v0  ;;  %v9094_v52 = vld [vmem:[#allocation2 + $0xb1] sm:$0xff] }
 0x420   : > { %v2844_v27 = vpop.f32.mrf.mxu0  ;;  %3030 = vst.msk [vmem:[#allocation3 + $0x3c] sm:$0xf] %vm11160_vm2, %v9071_v63  ;;  %v9096_v41 = vld [vmem:[#allocation2 + $0xb2] sm:$0xff] }
 0x421   : > { %v2845_v59 = vadd.f32 %v8863_v34, %v2844_v27  ;;  %v3152_v24 = vpop.permute.xlu2 %3151  ;;  %11179 = vst [vmem:[#allocation16_spill] sm:$0xff] %v9090_v19  ;;  %v9106_v27 = vld [vmem:[#allocation2 + $0x122] sm:$0xff] }
 0x422   : > { %3243 = vst.msk [vmem:[#allocation3 + $0x10] sm:$0xf] %vm984_vm3, %v3152_v24  ;;  %v9114_v24 = vld [vmem:[#allocation2 + $0x121] sm:$0xff] }
 0x423   : > { %v2902_v42 = vmax.f32 %v2845_v59, 0.0  ;;  %5498 = vst.msk [vmem:[#allocation2 + $0xb8] sm:$0x3] %vm545_vm1, %v11147_v0  ;;  %v9112_v59 = vld [vmem:[#allocation2 + $0x120] sm:$0xff] }
 0x424   : > { %v3063_v48 = vld [vmem:[#allocation2 + $0xc1] sm:$0xff]  ;;  %11180 = vst [vmem:[#allocation17_spill] sm:$0xff] %v9106_v27 }
 0x425   : > { %v2967_v16 = vld [vmem:[#allocation2 + $0xc0] sm:$0xff]  ;;  %2934 = vst.msk [vmem:[#allocation2 + $0xc9] sm:$0xff] %vm11158_vm0, %v2902_v42  ;;  %v3095_v47 = vpack.c.bf16 %v3063_v48, %v3063_v48  ;;  %v9118_v42 = vld [vmem:[#allocation2 + $0x128] sm:$0xff] }
 0x426   : > { %v2999_v6 = vpack.c.bf16 %v2967_v16, %v2967_v16  ;;  %5497 = vst.msk [vmem:[#allocation2 + $0xb0] sm:$0xff] %vm11158_vm0, %v11147_v0  ;;  %v9120_v48 = vld [vmem:[#allocation2 + $0x129] sm:$0xff] }
 0x427   : > { %3175 = vrot.lane.b32.xlu2 %v3095_v47, %s11152_s28  ;;  %11182 = vst [vmem:[#allocation19_spill] sm:$0xff] %v9112_v59  ;;  %v9185_v19 = vld [vmem:[#allocation2 + $0x142] sm:$0xff] }
 0x428   : > { %3031 = vst.msk [vmem:[#allocation3 + $0x40] sm:$0xf] %vm11160_vm2, %v2999_v6  ;;  %v2847_v25 = vpop.f32.mrf.mxu0  ;;  %v3148_v3 = vpop.permute.xlu0 %3147 }
 0x429   : > { %v2848_v14 = vadd.f32 %v8863_v34, %v2847_v25  ;;  %3241 = vst.msk [vmem:[#allocation3 + $0x8] sm:$0xf] %vm984_vm3, %v3148_v3  ;;  %v2873_v25 = vadd.f32 %v8863_v34, %v2872_v15 }
 0x42a   : > { %11183 = vst [vmem:[#allocation20_spill] sm:$0xff] %v9114_v24  ;;  %v2977_v24 = vld [vmem:[#allocation2 + $0x138] sm:$0xff] }
 0x42b   : > { %v2903_v38 = vmax.f32 %v2848_v14, 0.0  ;;  %11185 = vst [vmem:[#allocation22_spill] sm:$0xff] %v9118_v42  ;;  %v2978_v14 = vld [vmem:[#allocation2 + $0x140] sm:$0xff]  ;;  %v2913_v11 = vmax.f32 %v2873_v25, 0.0 }
 0x42c   : > { %11186 = vst [vmem:[#allocation23_spill] sm:$0xff] %v9120_v48  ;;  %v3064_v16 = vld [vmem:[#allocation2 + $0xc9] sm:$0xff]  ;;  %v9132_v23 = vpack.c.bf16 %v2978_v14, %v2978_v14  ;;  %v9139_v48 = vpack.c.bf16 %v2977_v24, %v2977_v24  ;;  %v9149_v24 = vld [vmem:[#allocation2 + $0xc1] sm:$0xff] }
 0x42d   : > { %5511 = vst.msk [vmem:[#allocation2 + $0x120] sm:$0xff] %vm11158_vm0, %v11147_v0  ;;  %v2968_v47 = vld [vmem:[#allocation2 + $0xc8] sm:$0xff]  ;;  %v3096_v6 = vpack.c.bf16 %v3064_v16, %v3064_v16  ;;  %v9151_v14 = vld [vmem:[#allocation2 + $0xc0] sm:$0xff] }
 0x42e   : > { %5512 = vst.msk [vmem:[#allocation2 + $0x128] sm:$0xff] %vm11158_vm0, %v11147_v0  ;;  %v9130_v3 = vpack.c.bf16 %v2968_v47, %v2968_v47  ;;  %v2874_v47 = vpop.f32.mrf.mxu2  ;;  %v9167_v35 = vld [vmem:[#allocation2 + $0xc8] sm:$0xff] }
 0x42f   : > { %2935 = vst.msk [vmem:[#allocation2 + $0xd9] sm:$0xff] %vm11158_vm0, %v2903_v38  ;;  %3177 = vrot.lane.b32.xlu0 %v3096_v6, %s11152_s28  ;;  %v2875_v6 = vadd.f32 %v8863_v34, %v2874_v47  ;;  %v9163_v47 = vld [vmem:[#allocation2 + $0xc9] sm:$0xff] }
 0x430   : > { %11188 = vst [vmem:[#allocation25_spill] sm:$0xff] %v9130_v3  ;;  %v2849_v38 = vpop.f32.mrf.mxu0  ;;  %v3150_v16 = vpop.permute.xlu1 %3149 }
 0x431   : > { %11189 = vst [vmem:[#allocation26_spill] sm:$0xff] %v9132_v23  ;;  %v2850_v15 = vadd.f32 %v8863_v34, %v2849_v38  ;;  %v2914_v59 = vmax.f32 %v2875_v6, 0.0  ;;  %v9165_v6 = vld [vmem:[#allocation2 + $0x141] sm:$0xff] }
 0x432   : > { %5513 = vst.msk [vmem:[#allocation2 + $0x130] sm:$0x3] %vm545_vm1, %v11147_v0  ;;  %v9153_v0 = vld [vmem:[#allocation2 + $0xc2] sm:$0xff] }
 0x433   : > { %3032 = vst.msk [vmem:[#allocation3 + $0x44] sm:$0xf] %vm11160_vm2, %v9130_v3  ;;  %v2904_v25 = vmax.f32 %v2850_v15, 0.0  ;;  %v9161_v15 = vld [vmem:[#allocation2 + $0xca] sm:$0xff] }
 0x434   : > { %11190 = vst [vmem:[#allocation27_spill] sm:$0xff] %v9139_v48 }
 0x435   : > { %3042 = vst.msk [vmem:[#allocation3 + $0x6c] sm:$0xf] %vm11160_vm2, %v9132_v23  ;;  %v11194_v23 = vmov 0.0  }
 0x436   : > { %3242 = vst.msk [vmem:[#allocation3 + $0xc] sm:$0xf] %vm984_vm3, %v3150_v16  ;;  %v3065_v42 = vld [vmem:[#allocation2 + $0xd9] sm:$0xff]  ;;  %v2877_v27 = vpop.f32.mrf.mxu2 }
 0x437   : > { %2945 = vst.msk [vmem:[#allocation2 + $0x151] sm:$0xff] %vm11158_vm0, %v2913_v11  ;;  %v2969_v38 = vld [vmem:[#allocation2 + $0xd8] sm:$0xff]  ;;  %v3097_v11 = vpack.c.bf16 %v3065_v42, %v3065_v42  ;;  %v2878_v3 = vadd.f32 %v8863_v34, %v2877_v27 }
 0x438   : > { %3041 = vst.msk [vmem:[#allocation3 + $0x68] sm:$0xf] %vm11160_vm2, %v9139_v48  ;;  %v3001_v16 = vpack.c.bf16 %v2969_v38, %v2969_v38  ;;  %v2852_v48 = vpop.f32.mrf.mxu0  ;;  %v9174_v38 = vld [vmem:[#allocation2 + $0x139] sm:$0xff] }
 0x439   : > { %11191 = vst [vmem:[#allocation28_spill] sm:$0xff] %v9149_v24  ;;  %3179 = vrot.lane.b32.xlu1 %v3097_v11, %s11152_s28  ;;  %v2853_v42 = vadd.f32 %v8863_v34, %v2852_v48  ;;  %v9178_v11 = vld [vmem:[#allocation2 + $0x141] sm:$0xff] }
 0x43a   : > { %11192 = vst [vmem:[#allocation29_spill] sm:$0xff] %v9151_v14  ;;  %v9187_v48 = vld [vmem:[#allocation2 + $0x141] sm:$0xff] }
 0x43b   : > { %11193 = vst [vmem:[#allocation30_spill] sm:$0xff] %v9153_v0  ;;  %v2905_v0 = vmax.f32 %v2853_v42, 0.0  ;;  %v2915_v42 = vmax.f32 %v2878_v3, 0.0 }
 0x43c   : > { %5499 = vst.msk [vmem:[#allocation2 + $0xc0] sm:$0xff] %vm11158_vm0, %v11194_v23 }
 0x43d   : > { %2936 = vst.msk [vmem:[#allocation2 + $0xe1] sm:$0xff] %vm11158_vm0, %v2904_v25  ;;  %v3158_v25 = vpop.permute.xlu2 %3157 }
 0x43e   : > { %2946 = vst.msk [vmem:[#allocation2 + $0x159] sm:$0xff] %vm11158_vm0, %v2914_v59  ;;  %v9172_v59 = vld [vmem:[#allocation2 + $0x139] sm:$0xff]  ;;  %v2979_v27 = vld [vmem:[#allocation2 + $0x150] sm:$0xff] }
 0x43f   : > { %3033 = vst.msk [vmem:[#allocation3 + $0x48] sm:$0xf] %vm11160_vm2, %v3001_v16  ;;  %v9180_v16 = vld [vmem:[#allocation2 + $0x13a] sm:$0xff] }
 0x440   : > { %11195 = vst [vmem:[#allocation31_spill] sm:$0xff] %v9161_v15  ;;  %v2854_v15 = vpop.f32.mrf.mxu0 }
 0x441   : > { %11196 = vst [vmem:[#allocation32_spill] sm:$0xff] %v9163_v47  ;;  %v9192_v47 = vld [vmem:[#allocation2 + $0x139] sm:$0xff]  ;;  %v3154_v3 = vpop.permute.xlu0 %3153 }
 0x442   : > { %11197 = vst [vmem:[#allocation33_spill] sm:$0xff] %v9167_v35  ;;  %v9183_v35 = vld [vmem:[#allocation2 + $0x142] sm:$0xff] }
 0x443   : > { %5501 = vst.msk [vmem:[#allocation2 + $0xd0] sm:$0x3] %vm545_vm1, %v11194_v23 }
 0x444   : > { %11198 = vst [vmem:[#allocation34_spill] sm:$0xff] %v9174_v38  ;;  %v9190_v38 = vld [vmem:[#allocation2 + $0x138] sm:$0xff] }
 0x445   : > { %5500 = vst.msk [vmem:[#allocation2 + $0xc8] sm:$0xff] %vm11158_vm0, %v11194_v23 }
 0x446   : > { %11199 = vst [vmem:[#allocation35_spill] sm:$0xff] %v9178_v11  ;;  %v2970_v11 = vld [vmem:[#allocation2 + $0xe0] sm:$0xff] }
 0x447   : > { %11200 = vst [vmem:[#allocation36_spill] sm:$0xff] %v9180_v16  ;;  %v9196_v16 = vld [vmem:[#allocation2 + $0x13a] sm:$0xff] }
 0x448   : > { %3246 = vst.msk [vmem:[#allocation3 + $0x1c] sm:$0xf] %vm984_vm3, %v3158_v25  ;;  %v3066_v25 = vld [vmem:[#allocation2 + $0xe1] sm:$0xff] }
 0x449   : > { %11201 = vst [vmem:[#allocation37_spill] sm:$0xff] %v9183_v35  ;;  %v9201_v35 = vld [vmem:[#allocation2 + $0x140] sm:$0xff] }
 0x44a   : > { %11202 = vst [vmem:[#allocation38_spill] sm:$0xff] %v9185_v19  ;;  %v3002_v19 = vpack.c.bf16 %v2970_v11, %v2970_v11  ;;  %v2879_v11 = vpop.f32.mrf.mxu2 }
 0x44b   : > { %11203 = vst [vmem:[#allocation39_spill] sm:$0xff] %v9187_v48  ;;  %v3098_v48 = vpack.c.bf16 %v3066_v25, %v3066_v25 }
 0x44c   : > { %11204 = vst [vmem:[#allocation40_spill] sm:$0xff] %v9190_v38  ;;  %v3011_v38 = vpack.c.bf16 %v2979_v27, %v2979_v27  ;;  %v2880_v27 = vadd.f32 %v8863_v34, %v2879_v11  ;;  %v9224_v11 = vld [vmem:[#allocation2 + $0xda] sm:$0xff] }
 0x44d   : > { %11205 = vst [vmem:[#allocation41_spill] sm:$0xff] %v9192_v47  ;;  %v2980_v47 = vld [vmem:[#allocation2 + $0x158] sm:$0xff]  ;;  %3181 = vrot.lane.b32.xlu2 %v3098_v48, %s11152_s28  ;;  %v9213_v48 = vld [vmem:[#allocation2 + $0xe1] sm:$0xff] }
 0x44e   : > { %5516 = vst.msk [vmem:[#allocation2 + $0x148] sm:$0x3] %vm545_vm1, %v11194_v23 }
 0x44f   : > { %11206 = vst [vmem:[#allocation42_spill] sm:$0xff] %v9196_v16  ;;  %v3012_v16 = vpack.c.bf16 %v2980_v47, %v2980_v47 }
 0x450   : > { %5514 = vst.msk [vmem:[#allocation2 + $0x138] sm:$0xff] %vm11158_vm0, %v11194_v23 }
 0x451   : > { %2937 = vst.msk [vmem:[#allocation2 + $0xf1] sm:$0xff] %vm11158_vm0, %v2905_v0  ;;  %v2855_v0 = vadd.f32 %v8863_v34, %v2854_v15  ;;  %v2916_v15 = vmax.f32 %v2880_v27, 0.0  ;;  %v3156_v27 = vpop.permute.xlu1 %3155 }
 0x452   : > { %11207 = vst [vmem:[#allocation43_spill] sm:$0xff] %v9201_v35 }
 0x453   : > { %5515 = vst.msk [vmem:[#allocation2 + $0x140] sm:$0xff] %vm11158_vm0, %v11194_v23  ;;  %v2906_v25 = vmax.f32 %v2855_v0, 0.0  ;;  %v9222_v0 = vld [vmem:[#allocation2 + $0xd9] sm:$0xff] }
 0x454   : > { %2947 = vst.msk [vmem:[#allocation2 + $0x169] sm:$0xff] %vm11158_vm0, %v2915_v42  ;;  %v9215_v42 = vld [vmem:[#allocation2 + $0xe2] sm:$0xff] }
 0x455   : > { %3034 = vst.msk [vmem:[#allocation3 + $0x4c] sm:$0xf] %vm11160_vm2, %v3002_v19 }
 0x456   : > { %3043 = vst.msk [vmem:[#allocation3 + $0x70] sm:$0xf] %vm11160_vm2, %v3011_v38 }
 0x457   : > { %3244 = vst.msk [vmem:[#allocation3 + $0x14] sm:$0xf] %vm984_vm3, %v3154_v3  ;;  %v9220_v3 = vld [vmem:[#allocation2 + $0xd8] sm:$0xff] }
 0x458   : > { %3044 = vst.msk [vmem:[#allocation3 + $0x74] sm:$0xf] %vm11160_vm2, %v3012_v16  ;;  %v3067_v47 = vld [vmem:[#allocation2 + $0xf1] sm:$0xff]  ;;  %v2857_v16 = vpop.f32.mrf.mxu0 }
 0x459   : > { %11208 = vst [vmem:[#allocation44_spill] sm:$0xff] %v9213_v48  ;;  %v2971_v35 = vld [vmem:[#allocation2 + $0xf0] sm:$0xff]  ;;  %v3099_v19 = vpack.c.bf16 %v3067_v47, %v3067_v47 }
 0x45a   : > { %11209 = vst [vmem:[#allocation45_spill] sm:$0xff] %v9215_v42  ;;  %v3003_v38 = vpack.c.bf16 %v2971_v35, %v2971_v35  ;;  %v2858_v35 = vadd.f32 %v8863_v34, %v2857_v16  ;;  %v9237_v47 = vld [vmem:[#allocation2 + $0xa] sm:$0xff] }
 0x45b   : > { %5504 = vst.msk [vmem:[#allocation2 + $0xe8] sm:$0x3] %vm545_vm1, %v11194_v23  ;;  %3183 = vrot.lane.b32.xlu0 %v3099_v19, %s11152_s28  ;;  %v9241_v19 = vld [vmem:[#allocation2 + $0x159] sm:$0xff]  ;;  %v9247_v16 = vld [vmem:[#allocation2 + $0x151] sm:$0xff]  ;;  %v2981_v24 = vld [vmem:[#allocation2 + $0x168] sm:$0xff] }
 0x45c   : > { %2938 = vst.msk [vmem:[#allocation2 + $0xf9] sm:$0xff] %vm11158_vm0, %v2906_v25  ;;  %v9231_v25 = vld [vmem:[#allocation2 + $0xe0] sm:$0xff]  ;;  %v2907_v42 = vmax.f32 %v2858_v35, 0.0  ;;  %v9254_v48 = vld [vmem:[#allocation2 + $0x151] sm:$0xff] }
 0x45d   : > { %11210 = vst [vmem:[#allocation46_spill] sm:$0xff] %v9220_v3  ;;  %v9256_v3 = vld [vmem:[#allocation2 + $0x152] sm:$0xff] }
 0x45e   : > { %11211 = vst [vmem:[#allocation47_spill] sm:$0xff] %v9222_v0 }
 0x45f   : > { %11212 = vst [vmem:[#allocation48_spill] sm:$0xff] %v9224_v11 }
 0x460   : > { %5502 = vst.msk [vmem:[#allocation2 + $0xd8] sm:$0xff] %vm11158_vm0, %v11194_v23 }
 0x461   : > { %2948 = vst.msk [vmem:[#allocation2 + $0x171] sm:$0xff] %vm11158_vm0, %v2916_v15  ;;  %v9243_v15 = vld [vmem:[#allocation2 + $0x159] sm:$0xff] }
 0x462   : > { %3035 = vst.msk [vmem:[#allocation3 + $0x50] sm:$0xf] %vm11160_vm2, %v3003_v38  ;;  %v9245_v38 = vld [vmem:[#allocation2 + $0x15a] sm:$0xff] }
 0x463   : > { %11213 = vst [vmem:[#allocation49_spill] sm:$0xff] %v9231_v25  ;;  %v3068_v11 = vld [vmem:[#allocation2 + $0xf9] sm:$0xff]  ;;  %v9252_v25 = vld [vmem:[#allocation2 + $0x150] sm:$0xff] }
 0x464   : > { %5503 = vst.msk [vmem:[#allocation2 + $0xe0] sm:$0xff] %vm11158_vm0, %v11194_v23  ;;  %v2972_v0 = vld [vmem:[#allocation2 + $0xf8] sm:$0xff] }
 0x465   : > { %3245 = vst.msk [vmem:[#allocation3 + $0x18] sm:$0xf] %vm984_vm3, %v3156_v27  ;;  %v3100_v27 = vpack.c.bf16 %v3068_v11, %v3068_v11  ;;  %v3004_v35 = vpack.c.bf16 %v2972_v0, %v2972_v0  ;;  %v2859_v0 = vpop.f32.mrf.mxu0 }
 0x466   : > { %5477 = vst.msk [vmem:[#allocation2 + $0x10] sm:$0x3] %vm545_vm1, %v11194_v23  ;;  %v2860_v11 = vadd.f32 %v8863_v34, %v2859_v0  ;;  %v3103_v34 = vpack.c.bf16 %v9098_v13, %v9098_v13  ;;  %v9287_v0 = vld [vmem:[#allocation2 + $0xf2] sm:$0xff] }
 0x467   : > { %11214 = vst [vmem:[#allocation50_spill] sm:$0xff] %v9243_v15  ;;  %3185 = vrot.lane.b32.xlu1 %v3100_v27, %s11152_s28  ;;  %v9270_v27 = vld [vmem:[#allocation2 + $0x2] sm:$0xff]  ;;  %v9293_v13 = vld [vmem:[#allocation2 + $0xf9] sm:$0xff] }
 0x468   : > { %11215 = vst [vmem:[#allocation51_spill] sm:$0xff] %v9245_v38  ;;  %v2982_v15 = vld [vmem:[#allocation2 + $0x170] sm:$0xff]  ;;  %v7306_v38 = vld [vmem:[#allocation3 + $0x78] sm:$0xff] }
 0x469   : > { %5519 = vst.msk [vmem:[#allocation2 + $0x160] sm:$0x3] %vm545_vm1, %v11194_v23  ;;  %v3014_v14 = vpack.c.bf16 %v2982_v15, %v2982_v15  ;;  %7103 = vmatmul.msk.bf16.gmra.mxu2 %vm11159_vm12, %v7306_v38  ;;  %v2908_v15 = vmax.f32 %v2860_v11, 0.0  ;;  %v9289_v11 = vld [vmem:[#allocation2 + $0xf8] sm:$0xff] }
 0x46a   : > { %2939 = vst.msk [vmem:[#allocation2 + $0x109] sm:$0xff] %vm11158_vm0, %v2907_v42  ;;  %v9262_v42 = vld [vmem:[#allocation2 + $0x158] sm:$0xff] }
 0x46b   : > { %11216 = vst [vmem:[#allocation52_spill] sm:$0xff] %v9252_v25 }
 0x46c   : > { %11217 = vst [vmem:[#allocation53_spill] sm:$0xff] %v9254_v48 }
 0x46d   : > { %11218 = vst [vmem:[#allocation54_spill] sm:$0xff] %v9256_v3  ;;  %v3164_v3 = vpop.permute.xlu2 %3163 }
 0x46e   : > { %5517 = vst.msk [vmem:[#allocation2 + $0x150] sm:$0xff] %vm11158_vm0, %v11194_v23 }
 0x46f   : > { %3036 = vst.msk [vmem:[#allocation3 + $0x54] sm:$0xf] %vm11160_vm2, %v3004_v35  ;;  %v3013_v35 = vpack.c.bf16 %v2981_v24, %v2981_v24  ;;  %3191 = vrot.lane.b32.xlu1 %v3103_v34, %s11152_s28  ;;  %v9283_v24 = vld [vmem:[#allocation2 + $0xf0] sm:$0xff]  ;;  %v9300_v34 = vld [vmem:[#allocation2 + $0x168] sm:$0xff] }
 0x470   : > { %5518 = vst.msk [vmem:[#allocation2 + $0x158] sm:$0xff] %vm11158_vm0, %v11194_v23 }
 0x471   : > { %3046 = vst.msk [vmem:[#allocation3 + $0x7c] sm:$0xf] %vm11160_vm2, %v3014_v14  ;;  %v3069_v48 = vld [vmem:[#allocation2 + $0x109] sm:$0xff] }
 0x472   : > { %3249 = vst.msk [vmem:[#allocation3 + $0x28] sm:$0xf] %vm984_vm3, %v3164_v3  ;;  %v2973_v25 = vld [vmem:[#allocation2 + $0x108] sm:$0xff]  ;;  %v3101_v14 = vpack.c.bf16 %v3069_v48, %v3069_v48  ;;  %v9285_v3 = vld [vmem:[#allocation2 + $0xf1] sm:$0xff]  ;;  %v3160_v48 = vpop.permute.xlu0 %3159 }
 0x473   : > { %5475 = vst.msk [vmem:[#allocation2] sm:$0xff] %vm11158_vm0, %v11194_v23  ;;  %v3005_v38 = vpack.c.bf16 %v2973_v25, %v2973_v25  ;;  %v3077_v25 = vld [vmem:[#allocation2 + $0x169] sm:$0xff] }
 0x474   : > { %5476 = vst.msk [vmem:[#allocation2 + $0x8] sm:$0xff] %vm11158_vm0, %v11194_v23  ;;  %3187 = vrot.lane.b32.xlu2 %v3101_v14, %s11152_s28  ;;  %v9302_v14 = vld [vmem:[#allocation2 + $0x170] sm:$0xff] }
 0x475   : > { %2940 = vst.msk [vmem:[#allocation2 + $0x111] sm:$0xff] %vm11158_vm0, %v2908_v15  ;;  %v9291_v15 = vld [vmem:[#allocation2 + $0xfa] sm:$0xff] }
 0x476   : > { %3045 = vst.msk [vmem:[#allocation3 + $0x78] sm:$0xf] %vm11160_vm2, %v3013_v35  ;;  %v3078_v35 = vld [vmem:[#allocation2 + $0x171] sm:$0xff] }
 0x477   : > { %3037 = vst.msk [vmem:[#allocation3 + $0x58] sm:$0xf] %vm11160_vm2, %v3005_v38  ;;  %v9304_v38 = vld [vmem:[#allocation2 + $0x169] sm:$0xff] }
 0x478   : > { %11219 = vst [vmem:[#allocation55_spill] sm:$0xff] %v9283_v24  ;;  %v9312_v24 = vld [vmem:[#allocation2 + $0x172] sm:$0xff] }
 0x479   : > { %11220 = vst [vmem:[#allocation56_spill] sm:$0xff] %v9285_v3 }
 0x47a   : > { %11221 = vst [vmem:[#allocation57_spill] sm:$0xff] %v9287_v0  ;;  %v9306_v0 = vld [vmem:[#allocation2 + $0x171] sm:$0xff] }
 0x47b   : > { %11222 = vst [vmem:[#allocation58_spill] sm:$0xff] %v9291_v15 }
 0x47c   : > { %11223 = vst [vmem:[#allocation59_spill] sm:$0xff] %v9293_v13  ;;  %v9308_v13 = vld [vmem:[#allocation2 + $0x16a] sm:$0xff] }
 0x47d   : > { %5505 = vst.msk [vmem:[#allocation2 + $0xf0] sm:$0xff] %vm11158_vm0, %v11194_v23  ;;  %v3070_v15 = vld [vmem:[#allocation2 + $0x111] sm:$0xff] }
 0x47e   : > { %5506 = vst.msk [vmem:[#allocation2 + $0xf8] sm:$0xff] %vm11158_vm0, %v11194_v23  ;;  %v2974_v3 = vld [vmem:[#allocation2 + $0x110] sm:$0xff] }
 0x47f   : > { %3247 = vst.msk [vmem:[#allocation3 + $0x20] sm:$0xf] %vm984_vm3, %v3160_v48  ;;  %v3106_v48 = vpack.c.bf16 %v9165_v6, %v9165_v6  ;;  %v9329_v6 = vld [vmem:[#allocation2 + $0x10a] sm:$0xff] }
 0x480   : > { %11224 = vst [vmem:[#allocation60_spill] sm:$0xff] %v9300_v34  ;;  %v3006_v34 = vpack.c.bf16 %v2974_v3, %v2974_v3  ;;  %v9331_v3 = vld [vmem:[#allocation2 + $0x109] sm:$0xff] }
 0x481   : > { %11225 = vst [vmem:[#allocation61_spill] sm:$0xff] %v9302_v14  ;;  %v3102_v14 = vpack.c.bf16 %v3070_v15, %v3070_v15  ;;  %3197 = vrot.lane.b32.xlu1 %v3106_v48, %s11152_s28  ;;  %v9334_v15 = vld [vmem:[#allocation2 + $0x110] sm:$0xff]  ;;  %v3107_v48 = vpack.c.bf16 %v9247_v16, %v9247_v16  ;;  %v3166_v16 = vpop.permute.xlu0 %3165 }
 0x482   : > { %11226 = vst [vmem:[#allocation62_spill] sm:$0xff] %v9306_v0  ;;  %v9338_v0 = vld [vmem:[#allocation2 + $0x112] sm:$0xff] }
 0x483   : > { %11227 = vst [vmem:[#allocation63_spill] sm:$0xff] %v9308_v13  ;;  %v3104_v13 = vpack.c.bf16 %v9104_v62, %v9104_v62  ;;  %3189 = vrot.lane.b32.xlu0 %v3102_v14, %s11152_s28  ;;  %v9336_v62 = vld [vmem:[#allocation2 + $0x111] sm:$0xff]  ;;  %v3162_v14 = vpop.permute.xlu1 %3161 }
 0x484   : > { %5507 = vst.msk [vmem:[#allocation2 + $0x100] sm:$0x3] %vm545_vm1, %v11194_v23 }
 0x485   : > { %11228 = vst [vmem:[#allocation64_spill] sm:$0xff] %v9312_v24  ;;  %v9327_v24 = vld [vmem:[#allocation2 + $0x108] sm:$0xff]  ;;  %3193 = vrot.lane.b32.xlu2 %v3104_v13, %s11152_s28  ;;  %v3105_v13 = vpack.c.bf16 %v9172_v59, %v9172_v59  ;;  %v3108_v59 = vpack.c.bf16 %v9241_v19, %v9241_v19 }
 0x486   : > { %5520 = vst.msk [vmem:[#allocation2 + $0x168] sm:$0xff] %vm11158_vm0, %v11194_v23 }
 0x487   : > { %5521 = vst.msk [vmem:[#allocation2 + $0x170] sm:$0xff] %vm11158_vm0, %v11194_v23 }
 0x488   : > { %5522 = vst.msk [vmem:[#allocation2 + $0x178] sm:$0x3] %vm545_vm1, %v11194_v23 }
 0x489   : > { %3038 = vst.msk [vmem:[#allocation3 + $0x5c] sm:$0xf] %vm11160_vm2, %v3006_v34  ;;  %v3109_v34 = vpack.c.bf16 %v3077_v25, %v3077_v25  ;;  %v3304_v25 = vpack.c.bf16 %v9237_v47, %v9237_v47  ;;  %v3307_v47 = vpack.c.bf16 %v8928_v56, %v8928_v56 }
 0x48a   : > { %11229 = vst [vmem:[#allocation65_spill] sm:$0xff] %v9338_v0  ;;  %v3170_v0 = vpop.permute.xlu2 %3169 }
 0x48b   : > { %5508 = vst.msk [vmem:[#allocation2 + $0x108] sm:$0xff] %vm11158_vm0, %v11194_v23  ;;  %3203 = vrot.lane.b32.xlu1 %v3109_v34, %s11152_s28  ;;  %3195 = vrot.lane.b32.xlu0 %v3105_v13, %s11152_s28  ;;  %v3303_v34 = vpack.c.bf16 %v9270_v27, %v9270_v27  ;;  %v3168_v19 = vpop.permute.xlu1 %3167  ;;  %v9380_v27 = vld [vmem:[%s9375_s24] sm:$0xff]   ;;  %v3308_v13 = vpack.c.bf16 %v8920_v58, %v8920_v58 }
 0x48c   : > { %5509 = vst.msk [vmem:[#allocation2 + $0x110] sm:$0xff] %vm11158_vm0, %v11194_v23  ;;  %v7413_v56 = vunpack.c.l.bf16 %v9380_v27  ;;  %v9407_v58 = vpack.c.bf16 %v8988_v44, %v8988_v44 }
 0x48d   : > { %3248 = vst.msk [vmem:[#allocation3 + $0x24] sm:$0xf] %vm984_vm3, %v3162_v14  ;;  %3199 = vrot.lane.b32.xlu2 %v3107_v48, %s11152_s28  ;;  %v3110_v14 = vpack.c.bf16 %v3078_v35, %v3078_v35  ;;  %v9387_v35 = vpack.c.bf16 %v8950_v5, %v8950_v5  ;;  %v9403_v5 = vpack.c.bf16 %v9010_v39, %v9010_v39 }
 0x48e   : > { %5510 = vst.msk [vmem:[#allocation2 + $0x118] sm:$0x3] %vm545_vm1, %v11194_v23 }
 0x48f   : > { %3252 = vst.msk [vmem:[#allocation3 + $0x34] sm:$0xf] %vm984_vm3, %v3170_v0  ;;  %v3305_v0 = vpack.c.bf16 %v8884_v12, %v8884_v12  ;;  %v3306_v12 = vpack.c.bf16 %v8897_v26, %v8897_v26  ;;  %v9399_v26 = vpack.c.bf16 %v8958_v18, %v8958_v18  ;;  %v9418_v18 = vpack.c.bf16 %v8980_v40, %v8980_v40 }
 0x490   : > { %3250 = vst.msk [vmem:[#allocation3 + $0x2c] sm:$0xf] %vm984_vm3, %v3166_v16 }
 0x491   : > { %3251 = vst.msk [vmem:[#allocation3 + $0x30] sm:$0xf] %vm984_vm3, %v3168_v19 }
 0x492   : > { %5545 = vst.msk [vmem:[#allocation2 + $0x19] sm:$0xff] %vm11158_vm0, %v7413_v56  ;;  %v3176_v48 = vpop.permute.xlu2 %3175 }
 0x493   : > { %3369 = vrot.lane.b32.xlu1 %v3304_v25, %s11154_s26  ;;  %3201 = vrot.lane.b32.xlu0 %v3108_v59, %s11152_s28  ;;  %3255 = vst.msk [vmem:[#allocation3 + $0x40] sm:$0xf] %vm984_vm3, %v3176_v48  ;;  %v3172_v25 = vpop.permute.xlu0 %3171  ;;  %v3174_v44 = vpop.permute.xlu1 %3173 }
 0x494   : > { %3253 = vst.msk [vmem:[#allocation3 + $0x38] sm:$0xf] %vm984_vm3, %v3172_v25 }
 0x495   : > { %3205 = vrot.lane.b32.xlu2 %v3110_v14, %s11152_s28  ;;  %3254 = vst.msk [vmem:[#allocation3 + $0x3c] sm:$0xf] %vm984_vm3, %v3174_v44  ;;  %s11235_s28 = smov 48  }
 0x49b   : > { %3367 = vrot.lane.b32.xlu0 %v3303_v34, %s11154_s26  ;;  %3375 = vrot.lane.b32.xlu1 %v3307_v47, %s11154_s26 }
 0x49d   : > { %3371 = vrot.lane.b32.xlu2 %v3305_v0, %s11154_s26 }
 0x4a3   : > { %3373 = vrot.lane.b32.xlu0 %v3306_v12, %s11154_s26  ;;  %3381 = vrot.lane.b32.xlu1 %v9387_v35, %s11154_s26 }
 0x4a5   : > { %3377 = vrot.lane.b32.xlu2 %v3308_v13, %s11154_s26 }
 0x4a7   : > { %v3182_v40 = vpop.permute.xlu2 %3181 }
 0x4a8   : > { %3258 = vst.msk [vmem:[#allocation3 + $0x4c] sm:$0xf] %vm984_vm3, %v3182_v40 }
 0x4ab   : > { %3379 = vrot.lane.b32.xlu0 %v9399_v26, %s11154_s26  ;;  %3387 = vrot.lane.b32.xlu1 %v9403_v5, %s11154_s26 }
 0x4ad   : > { %3383 = vrot.lane.b32.xlu2 %v9407_v58, %s11154_s26 }
 0x4b3   : > { %3385 = vrot.lane.b32.xlu0 %v9418_v18, %s11154_s26  ;;  %3815 = vrot.lane.b32.xlu1 %v8873_v22, %s11231_s16  ;;  %v3178_v22 = vpop.permute.xlu0 %3177  ;;  %s10904_s26 = scalar_lea.vmem [#allocation10], %s7455_s0 }
 0x4b4   : > { %3256 = vst.msk [vmem:[#allocation3 + $0x44] sm:$0xf] %vm984_vm3, %v3178_v22 }
 0x4b5   : > { %3591 = vrot.lane.b32.xlu2 %v8875_v32, %s11232_s27  ;;  %v3180_v32 = vpop.permute.xlu1 %3179 }
 0x4b6   : > { %3257 = vst.msk [vmem:[#allocation3 + $0x48] sm:$0xf] %vm984_vm3, %v3180_v32 }
 0x4bb   : > { %3593 = vrot.lane.b32.xlu0 %v8888_v21, %s11232_s27  ;;  %4041 = vrot.lane.b32.xlu1 %v3306_v12, %s11233_s17 }
 0x4bd   : > { %3817 = vrot.lane.b32.xlu2 %v8886_v20, %s11231_s16 }
 0x4c3   : > { %4039 = vrot.lane.b32.xlu0 %v3305_v0, %s11233_s17  ;;  %4487 = vrot.lane.b32.xlu1 %v8905_v51, %s11234_s18 }
 0x4c5   : > { %4263 = vrot.lane.b32.xlu2 %v8907_v37, %s11235_s28 }
 0x4cb   : > { %4265 = vrot.lane.b32.xlu0 %v8918_v55, %s11235_s28  ;;  %4713 = vrot.lane.b32.xlu1 %v3308_v13, %s11156_s19 }
 0x4cd   : > { %4489 = vrot.lane.b32.xlu2 %v8916_v45, %s11234_s18  ;;  %v3184_v21 = vpop.permute.xlu0 %3183 }
 0x4ce   : > { %v3188_v20 = vpop.permute.xlu2 %3187  ;;  %3259 = vst.msk [vmem:[#allocation3 + $0x50] sm:$0xf] %vm984_vm3, %v3184_v21  ;;  %v7442_v21 = vld [vmem:[%s9375_s24 + $0x8] sm:$0xff]  }
 0x4cf   : > { %3261 = vst.msk [vmem:[#allocation3 + $0x58] sm:$0xf] %vm984_vm3, %v3188_v20 }
 0x4d3   : > { %4711 = vrot.lane.b32.xlu0 %v3307_v47, %s11156_s19  ;;  %3819 = vrot.lane.b32.xlu1 %v8905_v51, %s11231_s16 }
 0x4d5   : > { %3595 = vrot.lane.b32.xlu2 %v8907_v37, %s11232_s27 }
 0x4d9   : > { %v3186_v51 = vpop.permute.xlu1 %3185 }
 0x4da   : > { %3260 = vst.msk [vmem:[#allocation3 + $0x54] sm:$0xf] %vm984_vm3, %v3186_v51  ;;  %v7418_v51 = vunpack.c.h.bf16 %v7442_v21 }
 0x4db   : > { %3597 = vrot.lane.b32.xlu0 %v8918_v55, %s11232_s27  ;;  %4045 = vrot.lane.b32.xlu1 %v3308_v13, %s11233_s17 }
 0x4dc   : > { %5548 = vst.msk [vmem:[#allocation2 + $0x61] sm:$0xff] %vm11158_vm0, %v7418_v51  ;;  %v4432_v51 = vpack.c.bf16 %v9043_v30, %v9043_v30  ;;  %v4655_v30 = vpack.c.bf16 %v9052_v29, %v9052_v29 }
 0x4dd   : > { %3821 = vrot.lane.b32.xlu2 %v8916_v45, %s11231_s16 }
 0x4df   : > { %v3194_v39 = vpop.permute.xlu2 %3193 }
 0x4e0   : > { %3264 = vst.msk [vmem:[#allocation3 + $0x64] sm:$0xf] %vm984_vm3, %v3194_v39  ;;  %v7443_v39 = vld [vmem:[%s9375_s24 + $0x10] sm:$0xff]  }
 0x4e1   : > { %v3192_v45 = vpop.permute.xlu1 %3191 }
 0x4e2   : > { %3263 = vst.msk [vmem:[#allocation3 + $0x60] sm:$0xf] %vm984_vm3, %v3192_v45  ;;  %v7422_v45 = vunpack.c.h.bf16 %v7443_v39 }
 0x4e3   : > { %4043 = vrot.lane.b32.xlu0 %v3307_v47, %s11233_s17  ;;  %4491 = vrot.lane.b32.xlu1 %v8936_v36, %s11234_s18 }
 0x4e4   : > { %5550 = vst.msk [vmem:[#allocation2 + $0x91] sm:$0xff] %vm11158_vm0, %v7422_v45 }
 0x4e5   : > { %4267 = vrot.lane.b32.xlu2 %v8938_v2, %s11235_s28 }
 0x4e7   : > { %v3200_v37 = vpop.permute.xlu2 %3199 }
 0x4e8   : > { %3267 = vst.msk [vmem:[#allocation3 + $0x70] sm:$0xf] %vm984_vm3, %v3200_v37  ;;  %v7421_v37 = vunpack.c.l.bf16 %v7443_v39 }
 0x4ea   : > { %5549 = vst.msk [vmem:[#allocation2 + $0x79] sm:$0xff] %vm11158_vm0, %v7421_v37 }
 0x4eb   : > { %4269 = vrot.lane.b32.xlu0 %v8948_v1, %s11235_s28  ;;  %4717 = vrot.lane.b32.xlu1 %v9387_v35, %s11156_s19 }
 0x4ec   : > { %v2882_v48 = vpop.f32.mrf.mxu2 }
 0x4ed   : > { %4493 = vrot.lane.b32.xlu2 %v8946_v4, %s11234_s18 }
 0x4ef   : > { %v3206_v55 = vpop.permute.xlu2 %3205 }
 0x4f0   : > { %3270 = vst.msk [vmem:[#allocation3 + $0x7c] sm:$0xf] %vm984_vm3, %v3206_v55  ;;  %v7444_v55 = vld [vmem:[%s9375_s24 + $0x18] sm:$0xff]   ;;  %s11237_s24 = smov 16  }
 0x4f3   : > { %4715 = vrot.lane.b32.xlu0 %v9399_v26, %s11156_s19  ;;  %3823 = vrot.lane.b32.xlu1 %v8936_v36, %s11231_s16  ;;  %v3198_v14 = vpop.permute.xlu1 %3197 }
 0x4f4   : > { %3266 = vst.msk [vmem:[#allocation3 + $0x6c] sm:$0xf] %vm984_vm3, %v3198_v14  ;;  %v7330_v14 = vld [vmem:[%s11127_s6 + $0x18] sm:$0xff] }
 0x4f5   : > { %3599 = vrot.lane.b32.xlu2 %v8938_v2, %s11232_s27  ;;  %v3190_v59 = vpop.permute.xlu0 %3189 }
 0x4f6   : > { %3262 = vst.msk [vmem:[#allocation3 + $0x5c] sm:$0xf] %vm984_vm3, %v3190_v59  ;;  %v2884_v59 = vpop.f32.mrf.mxu2 }
 0x4f7   : > { %v3372_v16 = vpop.permute.xlu2 %3371 }
 0x4f8   : > { %3465 = vst.msk [vmem:[#allocation3 + $0x8] sm:$0xf] %vm1209_vm4, %v3372_v16 }
 0x4fb   : > { %3601 = vrot.lane.b32.xlu0 %v8948_v1, %s11232_s27  ;;  %4049 = vrot.lane.b32.xlu1 %v9387_v35, %s11233_s17 }
 0x4fd   : > { %3825 = vrot.lane.b32.xlu2 %v8946_v4, %s11231_s16  ;;  %v3204_v36 = vpop.permute.xlu1 %3203  ;;  %v3196_v2 = vpop.permute.xlu0 %3195 }
 0x4fe   : > { %3269 = vst.msk [vmem:[#allocation3 + $0x78] sm:$0xf] %vm984_vm3, %v3204_v36 }
 0x4ff   : > { %v3378_v34 = vpop.permute.xlu2 %3377  ;;  %3265 = vst.msk [vmem:[#allocation3 + $0x68] sm:$0xf] %vm984_vm3, %v3196_v2 }
 0x500   : > { %3468 = vst.msk [vmem:[#allocation3 + $0x14] sm:$0xf] %vm1209_vm4, %v3378_v34  ;;  %v7329_v34 = vld [vmem:[%s11127_s6 + $0x10] sm:$0xff] }
 0x503   : > { %4047 = vrot.lane.b32.xlu0 %v9399_v26, %s11233_s17  ;;  %4495 = vrot.lane.b32.xlu1 %v8966_v46, %s11234_s18  ;;  %v7533_v26 = vld [vmem:[%s11128_s7] ss:$0 sm:$0xff] }
 0x504   : > { %v2883_v25 = vadd.f32 %v7533_v26, %v2882_v48  ;;  %v2885_v2 = vadd.f32 %v7533_v26, %v2884_v59 }
 0x505   : > { %4271 = vrot.lane.b32.xlu2 %v8968_v8, %s11235_s28  ;;  %v3370_v1 = vpop.permute.xlu1 %3369  ;;  %v3202_v4 = vpop.permute.xlu0 %3201 }
 0x506   : > { %3464 = vst.msk [vmem:[#allocation3 + $0x4] sm:$0xf] %vm1209_vm4, %v3370_v1  ;;  %v2918_v1 = vmax.f32 %v2885_v2, 0.0 }
 0x507   : > { %v3384_v47 = vpop.permute.xlu2 %3383  ;;  %3268 = vst.msk [vmem:[#allocation3 + $0x74] sm:$0xf] %vm984_vm3, %v3202_v4  ;;  %v9563_v4 = vpack.c.bf16 %v9019_v53, %v9019_v53 }
 0x508   : > { %3471 = vst.msk [vmem:[#allocation3 + $0x20] sm:$0xf] %vm1209_vm4, %v3384_v47  ;;  %v4430_v47 = vpack.c.bf16 %v9021_v31, %v9021_v31 }
 0x509   : > { %2950 = vst.msk [vmem:[#allocation2 + $0x189] sm:$0xff] %vm11158_vm0, %v2918_v1 }
 0x50b   : > { %4273 = vrot.lane.b32.xlu0 %v8978_v49, %s11235_s28  ;;  %4721 = vrot.lane.b32.xlu1 %v9418_v18, %s11156_s19 }
 0x50d   : > { %4497 = vrot.lane.b32.xlu2 %v8976_v10, %s11234_s18  ;;  %v3368_v0 = vpop.permute.xlu0 %3367  ;;  %v3376_v19 = vpop.permute.xlu1 %3375 }
 0x50e   : > { %3463 = vst.msk [vmem:[#allocation3] sm:$0xf] %vm1209_vm4, %v3368_v0  ;;  %v7328_v0 = vld [vmem:[%s11127_s6 + $0x8] sm:$0xff] }
 0x50f   : > { %v3592_v56 = vpop.permute.xlu2 %3591  ;;  %3467 = vst.msk [vmem:[#allocation3 + $0x10] sm:$0xf] %vm1209_vm4, %v3376_v19 }
 0x510   : > { %3687 = vst.msk [vmem:[#allocation3] sm:$0xf] %vm1434_vm5, %v3592_v56  ;;  %v7327_v56 = vld [vmem:[%s11127_s6] sm:$0xff] }
 0x513   : > { %4719 = vrot.lane.b32.xlu0 %v9407_v58, %s11156_s19  ;;  %3827 = vrot.lane.b32.xlu1 %v8966_v46, %s11231_s16  ;;  %v4879_v46 = vld [vmem:[%s11127_s6 + $0x20] sm:$0xf]  ;;  %s7278_s19 = sld [smem:[#allocation5 + $0x1]] }
 0x514   : > { %v4981_v44 = vunpack.c.l.b16 %v4879_v46  ;;  %v9600_v46 = vld [vmem:[#allocation2 + $0x18a] sm:$0xff] }
 0x515   : > { %3603 = vrot.lane.b32.xlu2 %v8968_v8, %s11232_s27  ;;  %v3374_v12 = vpop.permute.xlu0 %3373  ;;  %v3382_v35 = vpop.permute.xlu1 %3381  ;;  %v2917_v8 = vmax.f32 %v2883_v25, 0.0  ;;  %v9598_v25 = vld [vmem:[#allocation2 + $0x189] sm:$0xff] }
 0x516   : > { %3466 = vst.msk [vmem:[#allocation3 + $0xc] sm:$0xf] %vm1209_vm4, %v3374_v12  ;;  %v4986_v32 = vpack.c.b16 %v4981_v44, %v4981_v44  ;;  %v3759_v12 = vpack.c.bf16 %v9012_v50, %v9012_v50 }
 0x517   : > { %v9516_v13 = vpop.permute.xlu2 %3817  ;;  %3470 = vst.msk [vmem:[#allocation3 + $0x1c] sm:$0xf] %vm1209_vm4, %v3382_v35 }
 0x518   : > { %2949 = vst.msk [vmem:[#allocation2 + $0x181] sm:$0xff] %vm11158_vm0, %v2917_v8 }
 0x519   : > { %5525 = vst.msk [vmem:[#allocation2 + $0x190] sm:$0x3] %vm545_vm1, %v11194_v23 }
 0x51b   : > { %3605 = vrot.lane.b32.xlu0 %v8978_v49, %s11232_s27  ;;  %4053 = vrot.lane.b32.xlu1 %v9418_v18, %s11233_s17  ;;  %v5040_v49 = vsel %vm2794_vm10, %v4986_v32, 0  ;;  %v7414_v18 = vunpack.c.h.bf16 %v9380_v27  ;;  %v7425_v27 = vunpack.c.l.bf16 %v7444_v55  ;;  %v5554_v32 = vld [vmem:[#allocation2 + $0x18] sm:$0xff] }
 0x51c   : > { %5045 = vmatpush.bf16.msra.mxu1 %v5040_v49  ;;  %7450 = vmatpush.bf16.msra.mxu3 %v5040_v49 }
 0x51d   : > { %3829 = vrot.lane.b32.xlu2 %v8976_v10, %s11231_s16  ;;  %v3380_v40 = vpop.permute.xlu0 %3379  ;;  %v3388_v22 = vpop.permute.xlu1 %3387  ;;  %v7417_v10 = vunpack.c.l.bf16 %v7442_v21  ;;  %5546 = vst.msk [vmem:[#allocation2 + $0x31] sm:$0xff] %vm11158_vm0, %v7414_v18 }
 0x51e   : > { %3469 = vst.msk [vmem:[#allocation3 + $0x18] sm:$0xf] %vm1209_vm4, %v3380_v40 }
 0x51f   : > { %v9533_v20 = vpop.permute.xlu2 %4263  ;;  %3473 = vst.msk [vmem:[#allocation3 + $0x28] sm:$0xf] %vm1209_vm4, %v3388_v22  ;;  %v9587_v35 = vld [vmem:[#allocation2 + $0x180] sm:$0xff] }
 0x520   : > { %5547 = vst.msk [vmem:[#allocation2 + $0x49] sm:$0xff] %vm11158_vm0, %v7417_v10  ;;  %5046 = vmatpush.bf16.msra.mxu1 %v7330_v14  ;;  %7451 = vmatpush.bf16.msra.mxu3 %v7330_v14  ;;  %v9589_v48 = vld [vmem:[#allocation2 + $0x181] sm:$0xff] }
 0x521   : > { %5551 = vst.msk [vmem:[#allocation2 + $0xa9] sm:$0xff] %vm11158_vm0, %v7425_v27  ;;  %v9591_v26 = vld [vmem:[#allocation2 + $0x182] sm:$0xff] }
 0x522   : > { %5523 = vst.msk [vmem:[#allocation2 + $0x180] sm:$0xff] %vm11158_vm0, %v11194_v23  ;;  %v5553_v10 = vld [vmem:[#allocation2] sm:$0xff] }
 0x523   : > { %4051 = vrot.lane.b32.xlu0 %v9407_v58, %s11233_s17  ;;  %4499 = vrot.lane.b32.xlu1 %v8997_v28, %s11234_s18  ;;  %v7426_v28 = vunpack.c.h.bf16 %v7444_v55 }
 0x524   : > { %5047 = vmatpush.bf16.msra.mxu1 %v7329_v34  ;;  %7452 = vmatpush.bf16.msra.mxu3 %v7329_v34 }
 0x525   : > { %4275 = vrot.lane.b32.xlu2 %v8999_v43, %s11235_s28  ;;  %v3386_v16 = vpop.permute.xlu0 %3385  ;;  %v3816_v36 = vpop.permute.xlu1 %3815  ;;  %5552 = vst.msk [vmem:[#allocation2 + $0xc1] sm:$0xff] %vm11158_vm0, %v7426_v28 }
 0x526   : > { %3472 = vst.msk [vmem:[#allocation3 + $0x24] sm:$0xf] %vm1209_vm4, %v3386_v16 }
 0x527   : > { %v4490_v58 = vpop.permute.xlu2 %4489  ;;  %3911 = vst.msk [vmem:[#allocation3] sm:$0xf] %vm1659_vm6, %v3816_v36  ;;  %v5556_v2 = vld [vmem:[#allocation2 + $0x48] sm:$0xff] }
 0x528   : > { %5048 = vmatpush.bf16.msra.mxu1 %v7328_v0  ;;  %7453 = vmatpush.bf16.msra.mxu3 %v7328_v0 }
 0x52b   : > { %4277 = vrot.lane.b32.xlu0 %v9008_v54, %s11235_s28  ;;  %4725 = vrot.lane.b32.xlu1 %v9563_v4, %s11236_s1 }
 0x52c   : > { %5049 = vmatpush.bf16.msra.mxu1 %v7327_v56  ;;  %7454 = vmatpush.bf16.msra.mxu3 %v7327_v56 }
 0x52d   : > { %4501 = vrot.lane.b32.xlu2 %v4430_v47, %s11234_s18  ;;  %v3594_v53 = vpop.permute.xlu0 %3593  ;;  %v4042_v19 = vpop.permute.xlu1 %4041 }
 0x52e   : > { %3688 = vst.msk [vmem:[#allocation3 + $0x4] sm:$0xf] %vm1434_vm5, %v3594_v53  ;;  %v4433_v53 = vpack.c.bf16 %v9075_v60, %v9075_v60  ;;  %v4434_v60 = vpack.c.bf16 %v9094_v52, %v9094_v52 }
 0x52f   : > { %v3596_v31 = vpop.permute.xlu2 %3595  ;;  %3912 = vst.msk [vmem:[#allocation3 + $0x4] sm:$0xf] %vm1659_vm6, %v9516_v13  ;;  %v9596_v13 = vld [vmem:[#allocation2 + $0x188] sm:$0xff] }
 0x530   : > { %4136 = vst.msk [vmem:[#allocation3 + $0x4] sm:$0xf] %vm1884_vm7, %v4042_v19 }
 0x531   : > { %3689 = vst.msk [vmem:[#allocation3 + $0x8] sm:$0xf] %vm1434_vm5, %v3596_v31 }
 0x532   : > { %5524 = vst.msk [vmem:[#allocation2 + $0x188] sm:$0xff] %vm11158_vm0, %v11194_v23 }
 0x533   : > { %4723 = vrot.lane.b32.xlu0 %v9403_v5, %s11236_s1  ;;  %3831 = vrot.lane.b32.xlu1 %v3759_v12, %s11231_s16 }
 0x535   : > { %3607 = vrot.lane.b32.xlu2 %v8999_v43, %s11232_s27  ;;  %v4040_v50 = vpop.permute.xlu0 %4039  ;;  %v4488_v8 = vpop.permute.xlu1 %4487 }
 0x536   : > { %4135 = vst.msk [vmem:[#allocation3] sm:$0xf] %vm1884_vm7, %v4040_v50  ;;  %v4658_v50 = vpack.c.bf16 %v9096_v41, %v9096_v41 }
 0x537   : > { %v3822_v44 = vpop.permute.xlu2 %3821  ;;  %4359 = vst.msk [vmem:[#allocation3] sm:$0xf] %vm2110_vm8, %v9533_v20  ;;  %v4431_v20 = vpack.c.bf16 %v9050_v17, %v9050_v17  ;;  %v9634_v17 = vpack.c.bf16 %v9041_v57, %v9041_v57 }
 0x538   : > { %4583 = vst.msk [vmem:[#allocation3] sm:$0xf] %vm2335_vm9, %v4488_v8 }
 0x53b   : > { %3609 = vrot.lane.b32.xlu0 %v9008_v54, %s11232_s27  ;;  %4057 = vrot.lane.b32.xlu1 %v9563_v4, %s11233_s17  ;;  %v5562_v54 = vpack.c.bf16 %v5554_v32, %v5554_v32 }
 0x53d   : > { %3833 = vrot.lane.b32.xlu2 %v4430_v47, %s11231_s16  ;;  %v4266_v43 = vpop.permute.xlu0 %4265  ;;  %v4714_v40 = vpop.permute.xlu1 %4713  ;;  %v9676_v47 = vpack.c.bf16 %v9073_v33, %v9073_v33 }
 0x53e   : > { %4360 = vst.msk [vmem:[#allocation3 + $0x4] sm:$0xf] %vm2110_vm8, %v4266_v43 }
 0x53f   : > { %v4268_v22 = vpop.permute.xlu2 %4267  ;;  %4584 = vst.msk [vmem:[#allocation3 + $0x4] sm:$0xf] %vm2335_vm9, %v4490_v58 }
 0x540   : > { %4808 = vst.msk [vmem:[#allocation3 + $0x4] sm:$0xf] %vm11161_vm11, %v4714_v40 }
 0x543   : > { %4055 = vrot.lane.b32.xlu0 %v9403_v5, %s11233_s17  ;;  %4503 = vrot.lane.b32.xlu1 %v4431_v20, %s11234_s18  ;;  %v5561_v5 = vpack.c.bf16 %v5553_v10, %v5553_v10  ;;  %v11239_v10 = vld [vmem:[#allocation29_spill] sm:$0xff] }
 0x545   : > { %4279 = vrot.lane.b32.xlu2 %v9030_v9, %s11235_s28  ;;  %v4712_v49 = vpop.permute.xlu0 %4711  ;;  %v3820_v18 = vpop.permute.xlu1 %3819 }
 0x546   : > { %4807 = vst.msk [vmem:[#allocation3] sm:$0xf] %vm11161_vm11, %v4712_v49 }
 0x547   : > { %v4494_v21 = vpop.permute.xlu2 %4493  ;;  %v7311_v39 = vld [vmem:[#allocation3] sm:$0xf0]  ;;  %3913 = vst.msk [vmem:[#allocation3 + $0x8] sm:$0xf] %vm1659_vm6, %v3820_v18  ;;  %v5557_v18 = vld [vmem:[#allocation2 + $0x60] sm:$0xff] }
 0x548   : > { %5570 = vst.msk [vmem:[#allocation3 + $0x4] sm:$0xf] %vm11160_vm2, %v5562_v54 }
 0x54b   : > { %4281 = vrot.lane.b32.xlu0 %v9039_v7, %s11235_s28  ;;  %4729 = vrot.lane.b32.xlu1 %v9634_v17, %s11236_s1 }
 0x54d   : > { %4505 = vrot.lane.b32.xlu2 %v4432_v51, %s11234_s18  ;;  %v7106_v37 = vld [vmem:[#allocation3] sm:$0xf]  ;;  %v3598_v45 = vpop.permute.xlu0 %3597  ;;  %v4046_v55 = vpop.permute.xlu1 %4045 }
 0x54e   : > { %5569 = vst.msk [vmem:[#allocation3] sm:$0xf] %vm11160_vm2, %v5561_v5  ;;  %v7107_v57 = vor.u32 %v7311_v39, %v7106_v37 }
 0x54f   : > { %v3600_v14 = vpop.permute.xlu2 %3599  ;;  %3690 = vst.msk [vmem:[#allocation3 + $0xc] sm:$0xf] %vm1434_vm5, %v3598_v45 }
 0x550   : > { %3914 = vst.msk [vmem:[#allocation3 + $0xc] sm:$0xf] %vm1659_vm6, %v3822_v44  ;;  %7184 = vmatmul.msk.bf16.vlgmr.msra.gmra.mxu1 %vm11159_vm12, %v7107_v57 }
 0x551   : > { %4138 = vst.msk [vmem:[#allocation3 + $0xc] sm:$0xf] %vm1884_vm7, %v4046_v55 }
 0x552   : > { %3691 = vst.msk [vmem:[#allocation3 + $0x10] sm:$0xf] %vm1434_vm5, %v3600_v14  ;;  %v11240_v14 = vld [vmem:[#allocation31_spill] sm:$0xff] }
 0x553   : > { %4727 = vrot.lane.b32.xlu0 %v4655_v30, %s11236_s1  ;;  %3613 = vrot.lane.b32.xlu1 %v9039_v7, %s11232_s27  ;;  %v9731_v57 = vpack.c.bf16 %v11240_v14, %v11240_v14 }
 0x555   : > { %3389 = vrot.lane.b32.xlu2 %v9563_v4, %s11237_s24  ;;  %v4044_v27 = vpop.permute.xlu0 %4043  ;;  %v4492_v59 = vpop.permute.xlu1 %4491  ;;  %v5555_v4 = vld [vmem:[#allocation2 + $0x30] sm:$0xff] }
 0x556   : > { %4137 = vst.msk [vmem:[#allocation3 + $0x8] sm:$0xf] %vm1884_vm7, %v4044_v27  ;;  %v5563_v0 = vpack.c.bf16 %v5555_v4, %v5555_v4 }
 0x557   : > { %v3826_v16 = vpop.permute.xlu2 %3825  ;;  %4361 = vst.msk [vmem:[#allocation3 + $0x8] sm:$0xf] %vm2110_vm8, %v4268_v22  ;;  %v5558_v22 = vld [vmem:[#allocation2 + $0x78] sm:$0xff] }
 0x558   : > { %4585 = vst.msk [vmem:[#allocation3 + $0x8] sm:$0xf] %vm2335_vm9, %v4492_v59  ;;  %v5566_v32 = vpack.c.bf16 %v5558_v22, %v5558_v22  ;;  %v11242_v59 = vld [vmem:[#allocation25_spill] sm:$0xff]  ;;  %v11247_v22 = vld [vmem:[#allocation44_spill] sm:$0xff] }
 0x55b   : > { %3611 = vrot.lane.b32.xlu0 %v9030_v9, %s11232_s27  ;;  %4059 = vrot.lane.b32.xlu1 %v4655_v30, %s11233_s17  ;;  %v5564_v9 = vpack.c.bf16 %v5556_v2, %v5556_v2 }
 0x55d   : > { %3835 = vrot.lane.b32.xlu2 %v4431_v20, %s11231_s16  ;;  %v4270_v7 = vpop.permute.xlu0 %4269  ;;  %v4718_v29 = vpop.permute.xlu1 %4717 }
 0x55e   : > { %4362 = vst.msk [vmem:[#allocation3 + $0xc] sm:$0xf] %vm2110_vm8, %v4270_v7 }
 0x55f   : > { %v4272_v36 = vpop.permute.xlu2 %4271  ;;  %4586 = vst.msk [vmem:[#allocation3 + $0xc] sm:$0xf] %vm2335_vm9, %v4494_v21  ;;  %v11238_v21 = vld [vmem:[#allocation28_spill] sm:$0xff] }
 0x560   : > { %4810 = vst.msk [vmem:[#allocation3 + $0xc] sm:$0xf] %vm11161_vm11, %v4718_v29  ;;  %v4435_v39 = vpack.c.bf16 %v11238_v21, %v11238_v21  ;;  %v11249_v21 = vld [vmem:[#allocation47_spill] sm:$0xff] }
 0x563   : > { %3837 = vrot.lane.b32.xlu0 %v4432_v51, %s11231_s16  ;;  %4285 = vrot.lane.b32.xlu1 %v9071_v63, %s11235_s28 }
 0x565   : > { %4061 = vrot.lane.b32.xlu2 %v9634_v17, %s11233_s17  ;;  %v4716_v58 = vpop.permute.xlu0 %4715  ;;  %v3824_v28 = vpop.permute.xlu1 %3823 }
 0x566   : > { %4809 = vst.msk [vmem:[#allocation3 + $0x8] sm:$0xf] %vm11161_vm11, %v4716_v58 }
 0x567   : > { %v4498_v34 = vpop.permute.xlu2 %4497  ;;  %v7312_v1 = vld [vmem:[#allocation3 + $0x8] sm:$0xf0]  ;;  %3915 = vst.msk [vmem:[#allocation3 + $0x10] sm:$0xf] %vm1659_vm6, %v3824_v28 }
 0x568   : > { %5572 = vst.msk [vmem:[#allocation3 + $0xc] sm:$0xf] %vm11160_vm2, %v5564_v9 }
 0x56b   : > { %4283 = vrot.lane.b32.xlu0 %v9062_v61, %s11235_s28  ;;  %4731 = vrot.lane.b32.xlu1 %v9676_v47, %s11236_s1 }
 0x56d   : > { %4507 = vrot.lane.b32.xlu2 %v4433_v53, %s11234_s18  ;;  %v7110_v19 = vld [vmem:[#allocation3 + $0x8] sm:$0xf]  ;;  %v3602_v31 = vpop.permute.xlu0 %3601  ;;  %v4050_v56 = vpop.permute.xlu1 %4049 }
 0x56e   : > { %5571 = vst.msk [vmem:[#allocation3 + $0x8] sm:$0xf] %vm11160_vm2, %v5563_v0  ;;  %v7111_v33 = vor.u32 %v7312_v1, %v7110_v19  ;;  %v11244_v1 = vld [vmem:[#allocation16_spill] sm:$0xff]  ;;  %v11245_v0 = vld [vmem:[#allocation33_spill] sm:$0xff] }
 0x56f   : > { %v3604_v12 = vpop.permute.xlu2 %3603  ;;  %3692 = vst.msk [vmem:[#allocation3 + $0x14] sm:$0xf] %vm1434_vm5, %v3602_v31  ;;  %v3318_v4 = vpack.c.bf16 %v11244_v1, %v11244_v1 }
 0x570   : > { %3916 = vst.msk [vmem:[#allocation3 + $0x14] sm:$0xf] %vm1659_vm6, %v3826_v16  ;;  %7185 = vmatmul.msk.bf16.gmra.mxu1 %vm11159_vm12, %v7111_v33  ;;  %v5559_v33 = vld [vmem:[#allocation2 + $0x90] sm:$0xff] }
 0x571   : > { %4140 = vst.msk [vmem:[#allocation3 + $0x14] sm:$0xf] %vm1884_vm7, %v4050_v56 }
 0x572   : > { %3693 = vst.msk [vmem:[#allocation3 + $0x18] sm:$0xf] %vm1434_vm5, %v3604_v12 }
 0x573   : > { %4509 = vrot.lane.b32.xlu0 %v4434_v60, %s11234_s18  ;;  %3393 = vrot.lane.b32.xlu1 %v9634_v17, %s11237_s24  ;;  %v4211_v17 = vpack.c.bf16 %v11239_v10, %v11239_v10 }
 0x575   : > { %4733 = vrot.lane.b32.xlu2 %v4658_v50, %s11236_s1  ;;  %v4048_v8 = vpop.permute.xlu0 %4047  ;;  %v4496_v44 = vpop.permute.xlu1 %4495 }
 0x576   : > { %4139 = vst.msk [vmem:[#allocation3 + $0x10] sm:$0xf] %vm1884_vm7, %v4048_v8  ;;  %v5567_v8 = vpack.c.bf16 %v5559_v33, %v5559_v33 }
 0x577   : > { %v3830_v43 = vpop.permute.xlu2 %3829  ;;  %4363 = vst.msk [vmem:[#allocation3 + $0x10] sm:$0xf] %vm2110_vm8, %v4272_v36  ;;  %v11243_v36 = vld [vmem:[#allocation30_spill] sm:$0xff] }
 0x578   : > { %4587 = vst.msk [vmem:[#allocation3 + $0x10] sm:$0xf] %vm2335_vm9, %v4496_v44  ;;  %v9746_v2 = vpack.c.bf16 %v11243_v36, %v11243_v36  ;;  %v11255_v36 = vld [vmem:[#allocation34_spill] sm:$0xff] }
 0x57b   : > { %3391 = vrot.lane.b32.xlu0 %v4655_v30, %s11237_s24  ;;  %3839 = vrot.lane.b32.xlu1 %v4433_v53, %s11231_s16  ;;  %v11241_v30 = vld [vmem:[#allocation32_spill] sm:$0xff]  ;;  %v3542_v53 = vpack.c.bf16 %v11245_v0, %v11245_v0  ;;  %v11257_v0 = vld [vmem:[#allocation35_spill] sm:$0xff] }
 0x57c   : > { %v4436_v27 = vpack.c.bf16 %v11241_v30, %v11241_v30  ;;  %v11253_v30 = vld [vmem:[#allocation18_spill] sm:$0xff] }
 0x57d   : > { %3615 = vrot.lane.b32.xlu2 %v9062_v61, %s11232_s27  ;;  %v4274_v52 = vpop.permute.xlu0 %4273  ;;  %v4722_v41 = vpop.permute.xlu1 %4721 }
 0x57e   : > { %4364 = vst.msk [vmem:[#allocation3 + $0x14] sm:$0xf] %vm2110_vm8, %v4274_v52 }
 0x57f   : > { %v4276_v40 = vpop.permute.xlu2 %4275  ;;  %4588 = vst.msk [vmem:[#allocation3 + $0x14] sm:$0xf] %vm2335_vm9, %v4498_v34  ;;  %v5560_v34 = vld [vmem:[#allocation2 + $0xa8] sm:$0xff] }
 0x580   : > { %4812 = vst.msk [vmem:[#allocation3 + $0x14] sm:$0xf] %vm11161_vm11, %v4722_v41 }
 0x583   : > { %3617 = vrot.lane.b32.xlu0 %v9071_v63, %s11232_s27  ;;  %4065 = vrot.lane.b32.xlu1 %v4658_v50, %s11233_s17  ;;  %v5565_v63 = vpack.c.bf16 %v5557_v18, %v5557_v18 }
 0x585   : > { %3841 = vrot.lane.b32.xlu2 %v4434_v60, %s11231_s16  ;;  %v4720_v20 = vpop.permute.xlu0 %4719  ;;  %v3828_v61 = vpop.permute.xlu1 %3827  ;;  %v11246_v60 = vld [vmem:[#allocation46_spill] sm:$0xff] }
 0x586   : > { %4811 = vst.msk [vmem:[#allocation3 + $0x10] sm:$0xf] %vm11161_vm11, %v4720_v20  ;;  %v9768_v50 = vpack.c.bf16 %v11246_v60, %v11246_v60  ;;  %v11248_v20 = vld [vmem:[#allocation49_spill] sm:$0xff] }
 0x587   : > { %v4502_v54 = vpop.permute.xlu2 %4501  ;;  %v7313_v49 = vld [vmem:[#allocation3 + $0x10] sm:$0xf0]  ;;  %3917 = vst.msk [vmem:[#allocation3 + $0x18] sm:$0xf] %vm1659_vm6, %v3828_v61  ;;  %v4214_v61 = vpack.c.bf16 %v11248_v20, %v11248_v20  ;;  %v11259_v60 = vld [vmem:[#allocation37_spill] sm:$0xff] }
 0x588   : > { %5574 = vst.msk [vmem:[#allocation3 + $0x14] sm:$0xf] %vm11160_vm2, %v5566_v32  ;;  %v9782_v32 = vpack.c.bf16 %v11247_v22, %v11247_v22 }
 0x58b   : > { %4063 = vrot.lane.b32.xlu0 %v9676_v47, %s11233_s17  ;;  %4511 = vrot.lane.b32.xlu1 %v4435_v39, %s11234_s18 }
 0x58d   : > { %4287 = vrot.lane.b32.xlu2 %v4211_v17, %s11235_s28  ;;  %v7114_v5 = vld [vmem:[#allocation3 + $0x10] sm:$0xf]  ;;  %v3606_v51 = vpop.permute.xlu0 %3605  ;;  %v4054_v37 = vpop.permute.xlu1 %4053 }
 0x58e   : > { %5573 = vst.msk [vmem:[#allocation3 + $0x10] sm:$0xf] %vm11160_vm2, %v5565_v63  ;;  %v7115_v55 = vor.u32 %v7313_v49, %v7114_v5  ;;  %v11250_v63 = vld [vmem:[#allocation17_spill] sm:$0xff] }
 0x58f   : > { %v3608_v45 = vpop.permute.xlu2 %3607  ;;  %3694 = vst.msk [vmem:[#allocation3 + $0x1c] sm:$0xf] %vm1434_vm5, %v3606_v51  ;;  %v3327_v10 = vpack.c.bf16 %v11250_v63, %v11250_v63 }
 0x590   : > { %3918 = vst.msk [vmem:[#allocation3 + $0x1c] sm:$0xf] %vm1659_vm6, %v3830_v43  ;;  %7186 = vmatmul.msk.bf16.gmra.mxu1 %vm11159_vm12, %v7115_v55  ;;  %v11252_v55 = vld [vmem:[#allocation45_spill] sm:$0xff] }
 0x591   : > { %4142 = vst.msk [vmem:[#allocation3 + $0x1c] sm:$0xf] %vm1884_vm7, %v4054_v37  ;;  %v9812_v14 = vpack.c.bf16 %v11252_v55, %v11252_v55 }
 0x592   : > { %3695 = vst.msk [vmem:[#allocation3 + $0x20] sm:$0xf] %vm1434_vm5, %v3608_v45 }
 0x593   : > { %4289 = vrot.lane.b32.xlu0 %v11242_v59, %s11235_s28  ;;  %4737 = vrot.lane.b32.xlu1 %v9731_v57, %s11236_s1  ;;  %v11254_v59 = vld [vmem:[#allocation26_spill] sm:$0xff] }
 0x595   : > { %4513 = vrot.lane.b32.xlu2 %v4436_v27, %s11234_s18  ;;  %v4052_v16 = vpop.permute.xlu0 %4051  ;;  %v4500_v7 = vpop.permute.xlu1 %4499 }
 0x596   : > { %4141 = vst.msk [vmem:[#allocation3 + $0x18] sm:$0xf] %vm1884_vm7, %v4052_v16 }
 0x597   : > { %v3834_v29 = vpop.permute.xlu2 %3833  ;;  %4365 = vst.msk [vmem:[#allocation3 + $0x18] sm:$0xf] %vm2110_vm8, %v4276_v40 }
 0x598   : > { %4589 = vst.msk [vmem:[#allocation3 + $0x18] sm:$0xf] %vm2335_vm9, %v4500_v7 }
 0x59b   : > { %4735 = vrot.lane.b32.xlu0 %v9746_v2, %s11236_s1  ;;  %3619 = vrot.lane.b32.xlu1 %v4211_v17, %s11232_s27  ;;  %v11251_v17 = vld [vmem:[#allocation48_spill] sm:$0xff] }
 0x59c   : > { %v9801_v5 = vpack.c.bf16 %v11251_v17, %v11251_v17 }
 0x59d   : > { %3395 = vrot.lane.b32.xlu2 %v9676_v47, %s11237_s24  ;;  %v4278_v9 = vpop.permute.xlu0 %4277  ;;  %v4726_v58 = vpop.permute.xlu1 %4725  ;;  %v5568_v47 = vpack.c.bf16 %v5560_v34, %v5560_v34 }
 0x59e   : > { %4366 = vst.msk [vmem:[#allocation3 + $0x1c] sm:$0xf] %vm2110_vm8, %v4278_v9  ;;  %v3775_v9 = vpack.c.bf16 %v11255_v36, %v11255_v36 }
 0x59f   : > { %v4280_v28 = vpop.permute.xlu2 %4279  ;;  %4590 = vst.msk [vmem:[#allocation3 + $0x1c] sm:$0xf] %vm2335_vm9, %v4502_v54 }
 0x5a0   : > { %4814 = vst.msk [vmem:[#allocation3 + $0x1c] sm:$0xf] %vm11161_vm11, %v4726_v58  ;;  %v11256_v58 = vld [vmem:[#allocation27_spill] sm:$0xff] }
 0x5a3   : > { %3397 = vrot.lane.b32.xlu0 %v3318_v4, %s11237_s24  ;;  %3845 = vrot.lane.b32.xlu1 %v4436_v27, %s11231_s16  ;;  %v3328_v27 = vpack.c.bf16 %v11253_v30, %v11253_v30 }
 0x5a5   : > { %3621 = vrot.lane.b32.xlu2 %v3542_v53, %s11232_s27  ;;  %v4724_v19 = vpop.permute.xlu0 %4723  ;;  %v3832_v31 = vpop.permute.xlu1 %3831  ;;  %v3776_v53 = vpack.c.bf16 %v11257_v0, %v11257_v0 }
 0x5a6   : > { %4813 = vst.msk [vmem:[#allocation3 + $0x18] sm:$0xf] %vm11161_vm11, %v4724_v19 }
 0x5a7   : > { %v4506_v56 = vpop.permute.xlu2 %4505  ;;  %v7314_v12 = vld [vmem:[#allocation3 + $0x18] sm:$0xf0]  ;;  %3919 = vst.msk [vmem:[#allocation3 + $0x20] sm:$0xf] %vm1659_vm6, %v3832_v31  ;;  %v11258_v31 = vld [vmem:[#allocation36_spill] sm:$0xff] }
 0x5a8   : > { %5576 = vst.msk [vmem:[#allocation3 + $0x1c] sm:$0xf] %vm11160_vm2, %v5568_v47 }
 0x5ab   : > { %3843 = vrot.lane.b32.xlu0 %v4435_v39, %s11231_s16  ;;  %4291 = vrot.lane.b32.xlu1 %v9768_v50, %s11235_s28  ;;  %v4437_v39 = vpack.c.bf16 %v11249_v21, %v11249_v21 }
 0x5ad   : > { %4067 = vrot.lane.b32.xlu2 %v9746_v2, %s11233_s17  ;;  %v7118_v44 = vld [vmem:[#allocation3 + $0x18] sm:$0xf]  ;;  %v3610_v43 = vpop.permute.xlu0 %3609  ;;  %v4058_v52 = vpop.permute.xlu1 %4057 }
 0x5ae   : > { %5575 = vst.msk [vmem:[#allocation3 + $0x18] sm:$0xf] %vm11160_vm2, %v5567_v8  ;;  %v7119_v40 = vor.u32 %v7314_v12, %v7118_v44  ;;  %v9857_v8 = vpack.c.bf16 %v11259_v60, %v11259_v60  ;;  %vm11164_vm2 = vcmask 1046534  }
 0x5af   : > { %v3390_v41 = vpop.permute.xlu2 %3389  ;;  %3696 = vst.msk [vmem:[#allocation3 + $0x24] sm:$0xf] %vm1434_vm5, %v3610_v43 }
 0x5b0   : > { %3920 = vst.msk [vmem:[#allocation3 + $0x24] sm:$0xf] %vm1659_vm6, %v3834_v29  ;;  %7187 = vmatmul.msk.bf16.gmra.mxu1 %vm11159_vm12, %v7119_v40  ;;  %v11261_v40 = vld [vmem:[#allocation53_spill] sm:$0xff] }
 0x5b1   : > { %4144 = vst.msk [vmem:[#allocation3 + $0x24] sm:$0xf] %vm1884_vm7, %v4058_v52  ;;  %v9876_v22 = vpack.c.bf16 %v11261_v40, %v11261_v40 }
 0x5b2   : > { %3474 = vst.msk [vmem:[#allocation3 + $0x2c] sm:$0xf] %vm1209_vm4, %v3390_v41 }
 0x5b3   : > { %4069 = vrot.lane.b32.xlu0 %v9731_v57, %s11233_s17  ;;  %4517 = vrot.lane.b32.xlu1 %v9782_v32, %s11234_s18 }
 0x5b5   : > { %4293 = vrot.lane.b32.xlu2 %v4214_v61, %s11235_s28  ;;  %v4056_v54 = vpop.permute.xlu0 %4055  ;;  %v4504_v49 = vpop.permute.xlu1 %4503 }
 0x5b6   : > { %4143 = vst.msk [vmem:[#allocation3 + $0x20] sm:$0xf] %vm1884_vm7, %v4056_v54 }
 0x5b7   : > { %v3836_v18 = vpop.permute.xlu2 %3835  ;;  %4367 = vst.msk [vmem:[#allocation3 + $0x20] sm:$0xf] %vm2110_vm8, %v4280_v28 }
 0x5b8   : > { %4591 = vst.msk [vmem:[#allocation3 + $0x20] sm:$0xf] %vm2335_vm9, %v4504_v49  ;;  %v9889_v49 = vpack.c.bf16 %v9289_v11, %v9289_v11  ;;  %v11263_v11 = vld [vmem:[#allocation55_spill] sm:$0xff] }
 0x5b9   : > { %v4215_v17 = vpack.c.bf16 %v11263_v11, %v11263_v11  ;;  %v4218_v11 = vpack.c.bf16 %v9334_v15, %v9334_v15  ;;  %v10045_v15 = vpack.c.bf16 %v9329_v6, %v9329_v6  ;;  %v4442_v6 = vpack.c.bf16 %v9336_v62, %v9336_v62 }
 0x5bb   : > { %4515 = vrot.lane.b32.xlu0 %v4437_v39, %s11234_s18  ;;  %3415 = vrot.lane.b32.xlu1 %v3327_v10, %s11237_s24 }
 0x5bd   : > { %4739 = vrot.lane.b32.xlu2 %v9801_v5, %s11236_s1  ;;  %v4282_v51 = vpop.permute.xlu0 %4281  ;;  %v4730_v37 = vpop.permute.xlu1 %4729 }
 0x5be   : > { %4368 = vst.msk [vmem:[#allocation3 + $0x24] sm:$0xf] %vm2110_vm8, %v4282_v51  ;;  %v11264_v51 = vld [vmem:[#allocation56_spill] sm:$0xff] }
 0x5bf   : > { %v4062_v45 = vpop.permute.xlu2 %4061  ;;  %4592 = vst.msk [vmem:[#allocation3 + $0x24] sm:$0xf] %vm2335_vm9, %v4506_v56  ;;  %v9845_v56 = vpack.c.bf16 %v11258_v31, %v11258_v31 }
 0x5c0   : > { %4816 = vst.msk [vmem:[#allocation3 + $0x24] sm:$0xf] %vm11161_vm11, %v4730_v37  ;;  %v9909_v37 = vpack.c.bf16 %v11264_v51, %v11264_v51 }
 0x5c3   : > { %4741 = vrot.lane.b32.xlu0 %v9812_v14, %s11236_s1  ;;  %3641 = vrot.lane.b32.xlu1 %v11254_v59, %s11232_s27 }
 0x5c5   : > { %3417 = vrot.lane.b32.xlu2 %v3328_v27, %s11237_s24  ;;  %v4728_v16 = vpop.permute.xlu0 %4727  ;;  %v3614_v7 = vpop.permute.xlu1 %3613 }
 0x5c6   : > { %4815 = vst.msk [vmem:[#allocation3 + $0x20] sm:$0xf] %vm11161_vm11, %v4728_v16  ;;  %v11266_v16 = vld [vmem:[#allocation51_spill] sm:$0xff] }
 0x5c7   : > { %v4508_v29 = vpop.permute.xlu2 %4507  ;;  %3698 = vst.msk [vmem:[#allocation3 + $0x2c] sm:$0xf] %vm1434_vm5, %v3614_v7  ;;  %v9925_v7 = vpack.c.bf16 %v11266_v16, %v11266_v16 }
 0x5cb   : > { %3639 = vrot.lane.b32.xlu0 %v11256_v58, %s11232_s27  ;;  %3863 = vrot.lane.b32.xlu1 %v3775_v9, %s11231_s16  ;;  %v11268_v9 = vld [vmem:[#allocation59_spill] sm:$0xff] }
 0x5cc   : > { %v4440_v58 = vpack.c.bf16 %v11268_v9, %v11268_v9 }
 0x5cd   : > { %3399 = vrot.lane.b32.xlu2 %v9746_v2, %s11237_s24  ;;  %v3612_v28 = vpop.permute.xlu0 %3611  ;;  %v4060_v34 = vpop.permute.xlu1 %4059  ;;  %v7315_v1 = vld [vmem:[#allocation3 + $0x20] sm:$0xff] }
 0x5ce   : > { %3697 = vst.msk [vmem:[#allocation3 + $0x28] sm:$0xf] %vm1434_vm5, %v3612_v28  ;;  %7188 = vmatmul.msk.bf16.gmra.mxu1 %vm11159_vm12, %v7315_v1 }
 0x5cf   : > { %v4734_v4 = vpop.permute.xlu2 %4733  ;;  %3921 = vst.msk [vmem:[#allocation3 + $0x28] sm:$0xf] %vm1659_vm6, %v3836_v18  ;;  %v11262_v18 = vld [vmem:[#allocation50_spill] sm:$0xff] }
 0x5d0   : > { %4145 = vst.msk [vmem:[#allocation3 + $0x28] sm:$0xf] %vm1884_vm7, %v4060_v34  ;;  %v9893_v21 = vpack.c.bf16 %v11262_v18, %v11262_v18 }
 0x5d3   : > { %3401 = vrot.lane.b32.xlu0 %v9731_v57, %s11237_s24  ;;  %3625 = vrot.lane.b32.xlu1 %v4214_v61, %s11232_s27 }
 0x5d5   : > { %3865 = vrot.lane.b32.xlu2 %v3776_v53, %s11231_s16  ;;  %v3838_v2 = vpop.permute.xlu0 %3837  ;;  %v4286_v47 = vpop.permute.xlu1 %4285 }
 0x5d6   : > { %3922 = vst.msk [vmem:[#allocation3 + $0x2c] sm:$0xf] %vm1659_vm6, %v3838_v2 }
 0x5d7   : > { %v3616_v19 = vpop.permute.xlu2 %3615  ;;  %4146 = vst.msk [vmem:[#allocation3 + $0x2c] sm:$0xf] %vm1884_vm7, %v4062_v45  ;;  %v11265_v45 = vld [vmem:[#allocation54_spill] sm:$0xff] }
 0x5d8   : > { %4370 = vst.msk [vmem:[#allocation3 + $0x2c] sm:$0xf] %vm2110_vm8, %v4286_v47  ;;  %v9913_v55 = vpack.c.bf16 %v11265_v45, %v11265_v45  ;;  %v11274_v45 = vld [vmem:[#allocation63_spill] sm:$0xff] }
 0x5db   : > { %3623 = vrot.lane.b32.xlu0 %v9768_v50, %s11232_s27  ;;  %3847 = vrot.lane.b32.xlu1 %v4437_v39, %s11231_s16  ;;  %v9861_v50 = vpack.c.bf16 %v9262_v42, %v9262_v42  ;;  %v11260_v42 = vld [vmem:[#allocation52_spill] sm:$0xff] }
 0x5dc   : > { %v4223_v41 = vpack.c.bf16 %v11260_v42, %v11260_v42 }
 0x5dd   : > { %4087 = vrot.lane.b32.xlu2 %v9845_v56, %s11233_s17  ;;  %v4284_v57 = vpop.permute.xlu0 %4283  ;;  %v4732_v12 = vpop.permute.xlu1 %4731 }
 0x5de   : > { %4369 = vst.msk [vmem:[#allocation3 + $0x28] sm:$0xf] %vm2110_vm8, %v4284_v57 }
 0x5df   : > { %v3842_v33 = vpop.permute.xlu2 %3841  ;;  %4593 = vst.msk [vmem:[#allocation3 + $0x28] sm:$0xf] %vm2335_vm9, %v4508_v29  ;;  %v11267_v29 = vld [vmem:[#allocation58_spill] sm:$0xff] }
 0x5e0   : > { %4817 = vst.msk [vmem:[#allocation3 + $0x28] sm:$0xf] %vm11161_vm11, %v4732_v12  ;;  %v9929_v36 = vpack.c.bf16 %v11267_v29, %v11267_v29 }
 0x5e3   : > { %4089 = vrot.lane.b32.xlu0 %v9857_v8, %s11233_s17  ;;  %4313 = vrot.lane.b32.xlu1 %v9861_v50, %s11235_s28 }
 0x5e5   : > { %3849 = vrot.lane.b32.xlu2 %v9782_v32, %s11231_s16  ;;  %v4510_v44 = vpop.permute.xlu0 %4509  ;;  %v3394_v43 = vpop.permute.xlu1 %3393 }
 0x5e6   : > { %4594 = vst.msk [vmem:[#allocation3 + $0x2c] sm:$0xf] %vm2335_vm9, %v4510_v44 }
 0x5e7   : > { %v4288_v52 = vpop.permute.xlu2 %4287  ;;  %4818 = vst.msk [vmem:[#allocation3 + $0x2c] sm:$0xf] %vm11161_vm11, %v4734_v4  ;;  %v11269_v4 = vld [vmem:[#allocation57_spill] sm:$0xff] }
 0x5e8   : > { %3476 = vst.msk [vmem:[#allocation3 + $0x34] sm:$0xf] %vm1209_vm4, %v3394_v43  ;;  %v9943_v0 = vpack.c.bf16 %v11269_v4, %v11269_v4 }
 0x5eb   : > { %4311 = vrot.lane.b32.xlu0 %v4223_v41, %s11235_s28  ;;  %4535 = vrot.lane.b32.xlu1 %v9876_v22, %s11234_s18 }
 0x5ed   : > { %4071 = vrot.lane.b32.xlu2 %v9801_v5, %s11233_s17  ;;  %v3392_v32 = vpop.permute.xlu0 %3391  ;;  %v3840_v20 = vpop.permute.xlu1 %3839 }
 0x5ee   : > { %3475 = vst.msk [vmem:[#allocation3 + $0x30] sm:$0xf] %vm1209_vm4, %v3392_v32  ;;  %v7316_v54 = vld [vmem:[#allocation3 + $0x28] sm:$0xff] }
 0x5ef   : > { %v4514_v61 = vpop.permute.xlu2 %4513  ;;  %3699 = vst.msk [vmem:[#allocation3 + $0x30] sm:$0xf] %vm1434_vm5, %v3616_v19  ;;  %7189 = vmatmul.msk.bf16.gmra.mxu1 %vm11159_vm12, %v7316_v54  ;;  %v10012_v54 = vpack.c.bf16 %v9304_v38, %v9304_v38  ;;  %v11272_v38 = vld [vmem:[#allocation62_spill] sm:$0xff] }
 0x5f0   : > { %3923 = vst.msk [vmem:[#allocation3 + $0x30] sm:$0xf] %vm1659_vm6, %v3840_v20 }
 0x5f3   : > { %4073 = vrot.lane.b32.xlu0 %v9812_v14, %s11233_s17  ;;  %4297 = vrot.lane.b32.xlu1 %v9889_v49, %s11235_s28 }
 0x5f5   : > { %4537 = vrot.lane.b32.xlu2 %v9893_v21, %s11234_s18  ;;  %v3618_v39 = vpop.permute.xlu0 %3617  ;;  %v4066_v63 = vpop.permute.xlu1 %4065 }
 0x5f6   : > { %3700 = vst.msk [vmem:[#allocation3 + $0x34] sm:$0xf] %vm1434_vm5, %v3618_v39  ;;  %v4450_v39 = vpack.c.bf16 %v11272_v38, %v11272_v38 }
 0x5f7   : > { %v3396_v10 = vpop.permute.xlu2 %3395  ;;  %3924 = vst.msk [vmem:[#allocation3 + $0x34] sm:$0xf] %vm1659_vm6, %v3842_v33 }
 0x5f8   : > { %4148 = vst.msk [vmem:[#allocation3 + $0x34] sm:$0xf] %vm1884_vm7, %v4066_v63  ;;  %v11273_v63 = vld [vmem:[#allocation64_spill] sm:$0xff] }
 0x5f9   : > { %3477 = vst.msk [vmem:[#allocation3 + $0x38] sm:$0xf] %vm1209_vm4, %v3396_v10  ;;  %v10028_v10 = vpack.c.bf16 %v11273_v63, %v11273_v63 }
 0x5fb   : > { %4295 = vrot.lane.b32.xlu0 %v4215_v17, %s11235_s28  ;;  %4519 = vrot.lane.b32.xlu1 %v9909_v37, %s11234_s18 }
 0x5fd   : > { %4759 = vrot.lane.b32.xlu2 %v9913_v55, %s11236_s1  ;;  %v4064_v30 = vpop.permute.xlu0 %4063  ;;  %v4512_v27 = vpop.permute.xlu1 %4511 }
 0x5fe   : > { %4147 = vst.msk [vmem:[#allocation3 + $0x30] sm:$0xf] %vm1884_vm7, %v4064_v30  ;;  %v10041_v30 = vpack.c.bf16 %v11274_v45, %v11274_v45 }
 0x5ff   : > { %v3622_v59 = vpop.permute.xlu2 %3621  ;;  %4371 = vst.msk [vmem:[#allocation3 + $0x30] sm:$0xf] %vm2110_vm8, %v4288_v52 }
 0x600   : > { %4595 = vst.msk [vmem:[#allocation3 + $0x30] sm:$0xf] %vm2335_vm9, %v4512_v27  ;;  %v4441_v27 = vpack.c.bf16 %v9331_v3, %v9331_v3  ;;  %v11275_v3 = vld [vmem:[#allocation65_spill] sm:$0xff] }
 0x601   : > { %v10061_v9 = vpack.c.bf16 %v11275_v3, %v11275_v3 }
 0x603   : > { %4761 = vrot.lane.b32.xlu0 %v9925_v7, %s11236_s1  ;;  %4745 = vrot.lane.b32.xlu1 %v9929_v36, %s11236_s1 }
 0x605   : > { %4521 = vrot.lane.b32.xlu2 %v4440_v58, %s11234_s18  ;;  %v4290_v28 = vpop.permute.xlu0 %4289  ;;  %v4738_v34 = vpop.permute.xlu1 %4737 }
 0x606   : > { %4372 = vst.msk [vmem:[#allocation3 + $0x34] sm:$0xf] %vm2110_vm8, %v4290_v28 }
 0x607   : > { %v4068_v1 = vpop.permute.xlu2 %4067  ;;  %4596 = vst.msk [vmem:[#allocation3 + $0x34] sm:$0xf] %vm2335_vm9, %v4514_v61  ;;  %v10008_v61 = vpack.c.bf16 %v9327_v24, %v9327_v24 }
 0x608   : > { %4820 = vst.msk [vmem:[#allocation3 + $0x34] sm:$0xf] %vm11161_vm11, %v4738_v34 }
 0x60b   : > { %4743 = vrot.lane.b32.xlu0 %v9943_v0, %s11236_s1  ;;  %3643 = vrot.lane.b32.xlu1 %v4223_v41, %s11232_s27  ;;  %v11271_v41 = vld [vmem:[#allocation61_spill] sm:$0xff] }
 0x60c   : > { %v9996_v40 = vpack.c.bf16 %v11271_v41, %v11271_v41  ;;  %v11276_v41 = vld [vmem:[#allocation19_spill] sm:$0xff] }
 0x60d   : > { %3419 = vrot.lane.b32.xlu2 %v9845_v56, %s11237_s24  ;;  %v4736_v53 = vpop.permute.xlu0 %4735  ;;  %v3620_v2 = vpop.permute.xlu1 %3619 }
 0x60e   : > { %4819 = vst.msk [vmem:[#allocation3 + $0x30] sm:$0xf] %vm11161_vm11, %v4736_v53 }
 0x60f   : > { %v4294_v47 = vpop.permute.xlu2 %4293  ;;  %3701 = vst.msk [vmem:[#allocation3 + $0x38] sm:$0xf] %vm1434_vm5, %v3620_v2 }
 0x613   : > { %3421 = vrot.lane.b32.xlu0 %v9857_v8, %s11237_s24  ;;  %3405 = vrot.lane.b32.xlu1 %v9812_v14, %s11237_s24 }
 0x615   : > { %3645 = vrot.lane.b32.xlu2 %v9861_v50, %s11232_s27  ;;  %v3398_v19 = vpop.permute.xlu0 %3397  ;;  %v3846_v31 = vpop.permute.xlu1 %3845  ;;  %v7317_v57 = vld [vmem:[#allocation3 + $0x30] sm:$0xff]  ;;  %v11270_v50 = vld [vmem:[#allocation60_spill] sm:$0xff] }
 0x616   : > { %3478 = vst.msk [vmem:[#allocation3 + $0x3c] sm:$0xf] %vm1209_vm4, %v3398_v19  ;;  %7190 = vmatmul.msk.bf16.gmra.mxu1 %vm11159_vm12, %v7317_v57  ;;  %v9983_v44 = vpack.c.bf16 %v11270_v50, %v11270_v50 }
 0x617   : > { %v4740_v56 = vpop.permute.xlu2 %4739  ;;  %3702 = vst.msk [vmem:[#allocation3 + $0x3c] sm:$0xf] %vm1434_vm5, %v3622_v59 }
 0x618   : > { %3926 = vst.msk [vmem:[#allocation3 + $0x3c] sm:$0xf] %vm1659_vm6, %v3846_v31 }
 0x61b   : > { %3403 = vrot.lane.b32.xlu0 %v9801_v5, %s11237_s24  ;;  %3627 = vrot.lane.b32.xlu1 %v4215_v17, %s11232_s27 }
 0x61d   : > { %3867 = vrot.lane.b32.xlu2 %v9876_v22, %s11231_s16  ;;  %v3844_v14 = vpop.permute.xlu0 %3843  ;;  %v4292_v12 = vpop.permute.xlu1 %4291 }
 0x61e   : > { %3925 = vst.msk [vmem:[#allocation3 + $0x38] sm:$0xf] %vm1659_vm6, %v3844_v14 }
 0x61f   : > { %v3418_v33 = vpop.permute.xlu2 %3417  ;;  %4149 = vst.msk [vmem:[#allocation3 + $0x38] sm:$0xf] %vm1884_vm7, %v4068_v1 }
 0x620   : > { %4373 = vst.msk [vmem:[#allocation3 + $0x38] sm:$0xf] %vm2110_vm8, %v4292_v12 }
 0x621   : > { %3488 = vst.msk [vmem:[#allocation3 + $0x64] sm:$0xf] %vm1209_vm4, %v3418_v33 }
 0x623   : > { %3869 = vrot.lane.b32.xlu0 %v9893_v21, %s11231_s16  ;;  %4093 = vrot.lane.b32.xlu1 %v9925_v7, %s11233_s17 }
 0x625   : > { %3629 = vrot.lane.b32.xlu2 %v9889_v49, %s11232_s27  ;;  %v4070_v5 = vpop.permute.xlu0 %4069  ;;  %v4518_v60 = vpop.permute.xlu1 %4517 }
 0x626   : > { %4150 = vst.msk [vmem:[#allocation3 + $0x3c] sm:$0xf] %vm1884_vm7, %v4070_v5 }
 0x627   : > { %v3400_v8 = vpop.permute.xlu2 %3399  ;;  %4374 = vst.msk [vmem:[#allocation3 + $0x3c] sm:$0xf] %vm2110_vm8, %v4294_v47  ;;  %v10099_v47 = vpop.f32.mrf.mxu1 }
 0x628   : > { %4598 = vst.msk [vmem:[#allocation3 + $0x3c] sm:$0xf] %vm2335_vm9, %v4518_v60 }
 0x629   : > { %3479 = vst.msk [vmem:[#allocation3 + $0x40] sm:$0xf] %vm1209_vm4, %v3400_v8  ;;  %v10124_v8 = vpack.c.bf16 %v9598_v25, %v9598_v25  ;;  %v4451_v25 = vpack.c.bf16 %v9589_v48, %v9589_v48 }
 0x62b   : > { %4091 = vrot.lane.b32.xlu0 %v9913_v55, %s11233_s17  ;;  %4315 = vrot.lane.b32.xlu1 %v9983_v44, %s11235_s28 }
 0x62d   : > { %3851 = vrot.lane.b32.xlu2 %v9909_v37, %s11231_s16  ;;  %v4516_v43 = vpop.permute.xlu0 %4515  ;;  %v3416_v52 = vpop.permute.xlu1 %3415 }
 0x62e   : > { %4597 = vst.msk [vmem:[#allocation3 + $0x38] sm:$0xf] %vm2335_vm9, %v4516_v43 }
 0x62f   : > { %v3866_v42 = vpop.permute.xlu2 %3865  ;;  %4821 = vst.msk [vmem:[#allocation3 + $0x38] sm:$0xf] %vm11161_vm11, %v4740_v56  ;;  %v10107_v56 = vpack.c.bf16 %v9587_v35, %v9587_v35  ;;  %v10114_v5 = vpop.f32.mrf.mxu1  ;;  %v4228_v35 = vpack.c.bf16 %v9596_v13, %v9596_v13 }
 0x630   : > { %3487 = vst.msk [vmem:[#allocation3 + $0x60] sm:$0xf] %vm1209_vm4, %v3416_v52 }
 0x633   : > { %3853 = vrot.lane.b32.xlu0 %v4440_v58, %s11231_s16  ;;  %4077 = vrot.lane.b32.xlu1 %v9929_v36, %s11233_s17 }
 0x635   : > { %4317 = vrot.lane.b32.xlu2 %v9996_v40, %s11235_s28  ;;  %v4742_v22 = vpop.permute.xlu0 %4741  ;;  %v3642_v32 = vpop.permute.xlu1 %3641 }
 0x636   : > { %4822 = vst.msk [vmem:[#allocation3 + $0x3c] sm:$0xf] %vm11161_vm11, %v4742_v22 }
 0x637   : > { %v4088_v20 = vpop.permute.xlu2 %4087  ;;  %3712 = vst.msk [vmem:[#allocation3 + $0x64] sm:$0xf] %vm1434_vm5, %v3642_v32  ;;  %v10131_v52 = vpop.f32.mrf.mxu1 }
 0x638   : > { %3936 = vst.msk [vmem:[#allocation3 + $0x64] sm:$0xf] %vm1659_vm6, %v3866_v42  ;;  %v10142_v42 = vpack.c.bf16 %v9591_v26, %v9591_v26 }
 0x63b   : > { %4075 = vrot.lane.b32.xlu0 %v9943_v0, %s11233_s17  ;;  %4299 = vrot.lane.b32.xlu1 %v10008_v61, %s11235_s28 }
 0x63d   : > { %4539 = vrot.lane.b32.xlu2 %v10012_v54, %s11234_s18  ;;  %v3640_v49 = vpop.permute.xlu0 %3639  ;;  %v3864_v18 = vpop.permute.xlu1 %3863  ;;  %v7318_v21 = vld [vmem:[#allocation3 + $0x38] sm:$0xff] }
 0x63e   : > { %3711 = vst.msk [vmem:[#allocation3 + $0x60] sm:$0xf] %vm1434_vm5, %v3640_v49  ;;  %7191 = vmatmul.msk.bf16.gmra.mxu1 %vm11159_vm12, %v7318_v21 }
 0x63f   : > { %v3850_v24 = vpop.permute.xlu2 %3849  ;;  %3935 = vst.msk [vmem:[#allocation3 + $0x60] sm:$0xf] %vm1659_vm6, %v3864_v18  ;;  %v10155_v26 = vpop.f32.mrf.mxu1  ;;  %v10166_v18 = vpack.c.bf16 %v9600_v46, %v9600_v46  ;;  %v11279_v46 = vld [vmem:[#allocation20_spill] sm:$0xff] }
 0x640   : > { %4159 = vst.msk [vmem:[#allocation3 + $0x60] sm:$0xf] %vm1884_vm7, %v4088_v20  ;;  %v11277_v20 = vld [vmem:[#allocation22_spill] sm:$0xff]  ;;  %v4443_v63 = vpack.c.bf16 %v11279_v46, %v11279_v46 }
 0x643   : > { %4541 = vrot.lane.b32.xlu0 %v4450_v39, %s11234_s18  ;;  %4765 = vrot.lane.b32.xlu1 %v10028_v10, %s11236_s1 }
 0x645   : > { %4301 = vrot.lane.b32.xlu2 %v4218_v11, %s11235_s28  ;;  %v3402_v17 = vpop.permute.xlu0 %3401  ;;  %v3626_v51 = vpop.permute.xlu1 %3625 }
 0x646   : > { %3480 = vst.msk [vmem:[#allocation3 + $0x44] sm:$0xf] %vm1209_vm4, %v3402_v17 }
 0x647   : > { %v4072_v37 = vpop.permute.xlu2 %4071  ;;  %3704 = vst.msk [vmem:[#allocation3 + $0x44] sm:$0xf] %vm1434_vm5, %v3626_v51 }
 0x648   : > { %3928 = vst.msk [vmem:[#allocation3 + $0x44] sm:$0xf] %vm1659_vm6, %v3850_v24 }
 0x64b   : > { %4763 = vrot.lane.b32.xlu0 %v10041_v30, %s11236_s1  ;;  %4747 = vrot.lane.b32.xlu1 %v10045_v15, %s11236_s1 }
 0x64d   : > { %4523 = vrot.lane.b32.xlu2 %v4441_v27, %s11234_s18  ;;  %v3624_v59 = vpop.permute.xlu0 %3623  ;;  %v3848_v16 = vpop.permute.xlu1 %3847 }
 0x64e   : > { %3703 = vst.msk [vmem:[#allocation3 + $0x40] sm:$0xf] %vm1434_vm5, %v3624_v59 }
 0x64f   : > { %v4538_v29 = vpop.permute.xlu2 %4537  ;;  %3927 = vst.msk [vmem:[#allocation3 + $0x40] sm:$0xf] %vm1659_vm6, %v3848_v16 }
 0x650   : > { %4151 = vst.msk [vmem:[#allocation3 + $0x40] sm:$0xf] %vm1884_vm7, %v4072_v37 }
 0x653   : > { %4525 = vrot.lane.b32.xlu0 %v4442_v6, %s11234_s18  ;;  %3425 = vrot.lane.b32.xlu1 %v9925_v7, %s11237_s24 }
 0x655   : > { %4749 = vrot.lane.b32.xlu2 %v10061_v9, %s11236_s1  ;;  %v4090_v58 = vpop.permute.xlu0 %4089  ;;  %v4314_v28 = vpop.permute.xlu1 %4313 }
 0x656   : > { %4160 = vst.msk [vmem:[#allocation3 + $0x64] sm:$0xf] %vm1884_vm7, %v4090_v58 }
 0x657   : > { %v4760_v34 = vpop.permute.xlu2 %4759  ;;  %4384 = vst.msk [vmem:[#allocation3 + $0x64] sm:$0xf] %vm2110_vm8, %v4314_v28 }
 0x658   : > { %4608 = vst.msk [vmem:[#allocation3 + $0x64] sm:$0xf] %vm2335_vm9, %v4538_v29 }
 0x65b   : > { %3423 = vrot.lane.b32.xlu0 %v9913_v55, %s11237_s24  ;;  %3407 = vrot.lane.b32.xlu1 %v9943_v0, %s11237_s24 }
 0x65d   : > { %3647 = vrot.lane.b32.xlu2 %v9983_v44, %s11232_s27  ;;  %v4312_v62 = vpop.permute.xlu0 %4311  ;;  %v4536_v7 = vpop.permute.xlu1 %4535 }
 0x65e   : > { %4383 = vst.msk [vmem:[#allocation3 + $0x60] sm:$0xf] %vm2110_vm8, %v4312_v62 }
 0x65f   : > { %v4522_v1 = vpop.permute.xlu2 %4521  ;;  %4607 = vst.msk [vmem:[#allocation3 + $0x60] sm:$0xf] %vm2335_vm9, %v4536_v7 }
 0x660   : > { %4831 = vst.msk [vmem:[#allocation3 + $0x60] sm:$0xf] %vm11161_vm11, %v4760_v34 }
 0x663   : > { %3649 = vrot.lane.b32.xlu0 %v9996_v40, %s11232_s27  ;;  %3873 = vrot.lane.b32.xlu1 %v4450_v39, %s11231_s16  ;;  %v10146_v40 = vpack.c.bf16 %v11276_v41, %v11276_v41  ;;  %v10175_v39 = vpop.f32.mrf.mxu1 }
 0x665   : > { %3409 = vrot.lane.b32.xlu2 %v9929_v36, %s11237_s24  ;;  %v4074_v55 = vpop.permute.xlu0 %4073  ;;  %v4298_v4 = vpop.permute.xlu1 %4297 }
 0x666   : > { %4152 = vst.msk [vmem:[#allocation3 + $0x44] sm:$0xf] %vm1884_vm7, %v4074_v55  ;;  %v4645_v55 = vld [vmem:[#allocation2 + $0x19a] sm:$0xff] }
 0x667   : > { %v3420_v0 = vpop.permute.xlu2 %3419  ;;  %4376 = vst.msk [vmem:[#allocation3 + $0x44] sm:$0xf] %vm2110_vm8, %v4298_v4 }
 0x668   : > { %4600 = vst.msk [vmem:[#allocation3 + $0x44] sm:$0xf] %vm2335_vm9, %v4522_v1  ;;  %v4421_v1 = vld [vmem:[#allocation2 + $0x199] sm:$0xff] }
 0x669   : > { %3489 = vst.msk [vmem:[#allocation3 + $0x68] sm:$0xf] %vm1209_vm4, %v3420_v0  ;;  %v4198_v0 = vld [vmem:[#allocation2 + $0x1a0] sm:$0xff] }
 0x66b   : > { %3871 = vrot.lane.b32.xlu0 %v10012_v54, %s11231_s16  ;;  %4095 = vrot.lane.b32.xlu1 %v10041_v30, %s11233_s17  ;;  %v11278_v54 = vld [vmem:[#allocation23_spill] sm:$0xff]  ;;  %v10196_v16 = vpop.f32.mrf.mxu1 }
 0x66c   : > { %v10162_v49 = vpack.c.bf16 %v11278_v54, %v11278_v54 }
 0x66d   : > { %3631 = vrot.lane.b32.xlu2 %v10008_v61, %s11232_s27  ;;  %v4296_v36 = vpop.permute.xlu0 %4295  ;;  %v4520_v53 = vpop.permute.xlu1 %4519  ;;  %v4220_v61 = vpack.c.bf16 %v11277_v20, %v11277_v20  ;;  %v4677_v20 = vpack.c.bf16 %v4645_v55, %v4645_v55 }
 0x66e   : > { %4375 = vst.msk [vmem:[#allocation3 + $0x40] sm:$0xf] %vm2110_vm8, %v4296_v36 }
 0x66f   : > { %v3646_v2 = vpop.permute.xlu2 %3645  ;;  %4599 = vst.msk [vmem:[#allocation3 + $0x40] sm:$0xf] %vm2335_vm9, %v4520_v53 }
 0x673   : > { %3633 = vrot.lane.b32.xlu0 %v4218_v11, %s11232_s27  ;;  %3857 = vrot.lane.b32.xlu1 %v4442_v6, %s11231_s16  ;;  %v11280_v11 = vld [vmem:[#allocation21_spill] sm:$0xff]  ;;  %v10206_v3 = vpop.f32.mrf.mxu1 }
 0x674   : > { %v10182_v17 = vpack.c.bf16 %v11280_v11, %v11280_v11  ;;  %v11285_v11 = vld [vmem:[#allocation38_spill] sm:$0xff] }
 0x675   : > { %4097 = vrot.lane.b32.xlu2 %v10028_v10, %s11233_s17  ;;  %v4762_v19 = vpop.permute.xlu0 %4761  ;;  %v4746_v31 = vpop.permute.xlu1 %4745 }
 0x676   : > { %4832 = vst.msk [vmem:[#allocation3 + $0x64] sm:$0xf] %vm11161_vm11, %v4762_v19  ;;  %v4230_v19 = vpack.c.bf16 %v4198_v0, %v4198_v0 }
 0x677   : > { %v3868_v57 = vpop.permute.xlu2 %3867  ;;  %4824 = vst.msk [vmem:[#allocation3 + $0x44] sm:$0xf] %vm11161_vm11, %v4746_v31  ;;  %v4422_v31 = vld [vmem:[#allocation2 + $0x1a1] sm:$0xff] }
 0x67b   : > { %3855 = vrot.lane.b32.xlu0 %v4441_v27, %s11231_s16  ;;  %4079 = vrot.lane.b32.xlu1 %v10045_v15, %s11233_s17  ;;  %v11281_v27 = vld [vmem:[#allocation24_spill] sm:$0xff]  ;;  %v10219_v34 = vpop.f32.mrf.mxu1 }
 0x67c   : > { %v10194_v59 = vpack.c.bf16 %v11281_v27, %v11281_v27 }
 0x67d   : > { %4319 = vrot.lane.b32.xlu2 %v10107_v56, %s11235_s28  ;;  %v4744_v14 = vpop.permute.xlu0 %4743  ;;  %v3644_v12 = vpop.permute.xlu1 %3643  ;;  %v7323_v33 = vld [vmem:[#allocation3 + $0x60] sm:$0xff] }
 0x67e   : > { %4823 = vst.msk [vmem:[#allocation3 + $0x40] sm:$0xf] %vm11161_vm11, %v4744_v14  ;;  %7196 = vmatmul.msk.bf16.vlgmr.msra.gmra.mxu3 %vm11159_vm12, %v7323_v33 }
 0x67f   : > { %v3630_v60 = vpop.permute.xlu2 %3629  ;;  %3713 = vst.msk [vmem:[#allocation3 + $0x68] sm:$0xf] %vm1434_vm5, %v3644_v12 }
 0x680   : > { %3937 = vst.msk [vmem:[#allocation3 + $0x68] sm:$0xf] %vm1659_vm6, %v3868_v57  ;;  %v4646_v57 = vld [vmem:[#allocation2 + $0x1a2] sm:$0xff] }
 0x681   : > { %5527 = vst.msk [vmem:[#allocation2 + $0x1a0] sm:$0xff] %vm11158_vm0, %v11194_v23  ;;  %v4678_v46 = vpack.c.bf16 %v4646_v57, %v4646_v57 }
 0x682   : > { %5528 = vst.msk [vmem:[#allocation2 + $0x1a8] sm:$0x3] %vm545_vm1, %v11194_v23  ;;  %vm5385_vm1 = vcmask 1043459  }
 0x683   : > { %4321 = vrot.lane.b32.xlu0 %v4228_v35, %s11235_s28  ;;  %4545 = vrot.lane.b32.xlu1 %v10124_v8, %s11234_s18  ;;  %v10228_v4 = vpop.f32.mrf.mxu1 }
 0x685   : > { %4081 = vrot.lane.b32.xlu2 %v10061_v9, %s11233_s17  ;;  %v3422_v50 = vpop.permute.xlu0 %3421  ;;  %v3406_v44 = vpop.permute.xlu1 %3405  ;;  %v7319_v43 = vld [vmem:[#allocation3 + $0x40] sm:$0xff] }
 0x686   : > { %3490 = vst.msk [vmem:[#allocation3 + $0x6c] sm:$0xf] %vm1209_vm4, %v3422_v50  ;;  %7192 = vmatmul.msk.bf16.gmra.mxu1 %vm11159_vm12, %v7319_v43 }
 0x687   : > { %v3852_v13 = vpop.permute.xlu2 %3851  ;;  %3714 = vst.msk [vmem:[#allocation3 + $0x6c] sm:$0xf] %vm1434_vm5, %v3646_v2 }
 0x688   : > { %3482 = vst.msk [vmem:[#allocation3 + $0x4c] sm:$0xf] %vm1209_vm4, %v3406_v44 }
 0x689   : > { %3706 = vst.msk [vmem:[#allocation3 + $0x4c] sm:$0xf] %vm1434_vm5, %v3630_v60 }
 0x68b   : > { %4543 = vrot.lane.b32.xlu0 %v4451_v25, %s11234_s18  ;;  %4767 = vrot.lane.b32.xlu1 %v10142_v42, %s11236_s1  ;;  %v10246_v33 = vpop.f32.mrf.mxu1 }
 0x68d   : > { %4303 = vrot.lane.b32.xlu2 %v10146_v40, %s11235_s28  ;;  %v3404_v22 = vpop.permute.xlu0 %3403  ;;  %v3628_v32 = vpop.permute.xlu1 %3627 }
 0x68e   : > { %3481 = vst.msk [vmem:[#allocation3 + $0x48] sm:$0xf] %vm1209_vm4, %v3404_v22 }
 0x68f   : > { %v4318_v48 = vpop.permute.xlu2 %4317  ;;  %3705 = vst.msk [vmem:[#allocation3 + $0x48] sm:$0xf] %vm1434_vm5, %v3628_v32 }
 0x690   : > { %3929 = vst.msk [vmem:[#allocation3 + $0x48] sm:$0xf] %vm1659_vm6, %v3852_v13 }
 0x693   : > { %4305 = vrot.lane.b32.xlu0 %v4220_v61, %s11235_s28  ;;  %4529 = vrot.lane.b32.xlu1 %v10162_v49, %s11234_s18  ;;  %v10256_v44 = vpop.f32.mrf.mxu1 }
 0x695   : > { %4769 = vrot.lane.b32.xlu2 %v10166_v18, %s11236_s1  ;;  %v3870_v21 = vpop.permute.xlu0 %3869  ;;  %v4094_v24 = vpop.permute.xlu1 %4093 }
 0x696   : > { %3938 = vst.msk [vmem:[#allocation3 + $0x6c] sm:$0xf] %vm1659_vm6, %v3870_v21 }
 0x697   : > { %v4540_v38 = vpop.permute.xlu2 %4539  ;;  %4162 = vst.msk [vmem:[#allocation3 + $0x6c] sm:$0xf] %vm1884_vm7, %v4094_v24 }
 0x698   : > { %4386 = vst.msk [vmem:[#allocation3 + $0x6c] sm:$0xf] %vm2110_vm8, %v4318_v48 }
 0x69b   : > { %4527 = vrot.lane.b32.xlu0 %v4443_v63, %s11234_s18  ;;  %3427 = vrot.lane.b32.xlu1 %v10041_v30, %s11237_s24  ;;  %v10271_v48 = vpop.f32.mrf.mxu1 }
 0x69d   : > { %4751 = vrot.lane.b32.xlu2 %v10182_v17, %s11236_s1  ;;  %v4092_v51 = vpop.permute.xlu0 %4091  ;;  %v4316_v37 = vpop.permute.xlu1 %4315 }
 0x69e   : > { %4161 = vst.msk [vmem:[#allocation3 + $0x68] sm:$0xf] %vm1884_vm7, %v4092_v51  ;;  %v11286_v51 = vld [vmem:[#allocation39_spill] sm:$0xff] }
 0x69f   : > { %v4302_v45 = vpop.permute.xlu2 %4301  ;;  %4385 = vst.msk [vmem:[#allocation3 + $0x68] sm:$0xf] %vm2110_vm8, %v4316_v37  ;;  %v4446_v37 = vpack.c.bf16 %v11286_v51, %v11286_v51 }
 0x6a0   : > { %4609 = vst.msk [vmem:[#allocation3 + $0x68] sm:$0xf] %vm2335_vm9, %v4540_v38 }
 0x6a3   : > { %4753 = vrot.lane.b32.xlu0 %v10194_v59, %s11236_s1  ;;  %3653 = vrot.lane.b32.xlu1 %v4228_v35, %s11232_s27  ;;  %v4453_v35 = vpack.c.bf16 %v4421_v1, %v4421_v1 }
 0x6a5   : > { %3429 = vrot.lane.b32.xlu2 %v10028_v10, %s11237_s24  ;;  %v3854_v30 = vpop.permute.xlu0 %3853  ;;  %v4078_v29 = vpop.permute.xlu1 %4077 }
 0x6a6   : > { %3930 = vst.msk [vmem:[#allocation3 + $0x4c] sm:$0xf] %vm1659_vm6, %v3854_v30  ;;  %v11287_v30 = vld [vmem:[#allocation42_spill] sm:$0xff] }
 0x6a7   : > { %v4524_v6 = vpop.permute.xlu2 %4523  ;;  %4154 = vst.msk [vmem:[#allocation3 + $0x4c] sm:$0xf] %vm1884_vm7, %v4078_v29  ;;  %v4669_v29 = vpack.c.bf16 %v11287_v30, %v11287_v30 }
 0x6a8   : > { %4378 = vst.msk [vmem:[#allocation3 + $0x4c] sm:$0xf] %vm2110_vm8, %v4302_v45 }
 0x6ab   : > { %3651 = vrot.lane.b32.xlu0 %v10107_v56, %s11232_s27  ;;  %3875 = vrot.lane.b32.xlu1 %v4451_v25, %s11231_s16  ;;  %v4454_v25 = vpack.c.bf16 %v4422_v31, %v4422_v31 }
 0x6ad   : > { %3411 = vrot.lane.b32.xlu2 %v10045_v15, %s11237_s24  ;;  %v4076_v10 = vpop.permute.xlu0 %4075  ;;  %v4300_v58 = vpop.permute.xlu1 %4299 }
 0x6ae   : > { %4153 = vst.msk [vmem:[#allocation3 + $0x48] sm:$0xf] %vm1884_vm7, %v4076_v10 }
 0x6af   : > { %v4750_v28 = vpop.permute.xlu2 %4749  ;;  %4377 = vst.msk [vmem:[#allocation3 + $0x48] sm:$0xf] %vm2110_vm8, %v4300_v58 }
 0x6b0   : > { %4601 = vst.msk [vmem:[#allocation3 + $0x48] sm:$0xf] %vm2335_vm9, %v4524_v6 }
 0x6b3   : > { %3413 = vrot.lane.b32.xlu0 %v10061_v9, %s11237_s24  ;;  %3637 = vrot.lane.b32.xlu1 %v4220_v61, %s11232_s27  ;;  %v4197_v9 = vld [vmem:[#allocation2 + $0x198] sm:$0xff]  ;;  %v11283_v61 = vld [vmem:[#allocation40_spill] sm:$0xff] }
 0x6b4   : > { %5526 = vst.msk [vmem:[#allocation2 + $0x198] sm:$0xff] %vm11158_vm0, %v11194_v23  ;;  %v4229_v23 = vpack.c.bf16 %v4197_v9, %v4197_v9  ;;  %v4221_v54 = vpack.c.bf16 %v11283_v61, %v11283_v61 }
 0x6b5   : > { %3877 = vrot.lane.b32.xlu2 %v10124_v8, %s11231_s16  ;;  %v4542_v15 = vpop.permute.xlu0 %4541  ;;  %v4766_v62 = vpop.permute.xlu1 %4765 }
 0x6b6   : > { %4610 = vst.msk [vmem:[#allocation3 + $0x6c] sm:$0xf] %vm2335_vm9, %v4542_v15 }
 0x6b7   : > { %v3648_v7 = vpop.permute.xlu2 %3647  ;;  %4834 = vst.msk [vmem:[#allocation3 + $0x6c] sm:$0xf] %vm11161_vm11, %v4766_v62 }
 0x6bb   : > { %3635 = vrot.lane.b32.xlu0 %v10146_v40, %s11232_s27  ;;  %3859 = vrot.lane.b32.xlu1 %v4443_v63, %s11231_s16  ;;  %v10283_v63 = vpop.f32.mrf.mxu1 }
 0x6bd   : > { %4099 = vrot.lane.b32.xlu2 %v10142_v42, %s11233_s17  ;;  %v4764_v36 = vpop.permute.xlu0 %4763  ;;  %v4748_v53 = vpop.permute.xlu1 %4747  ;;  %v11282_v42 = vld [vmem:[#allocation43_spill] sm:$0xff] }
 0x6be   : > { %4833 = vst.msk [vmem:[#allocation3 + $0x68] sm:$0xf] %vm11161_vm11, %v4764_v36  ;;  %v4222_v41 = vpack.c.bf16 %v11282_v42, %v11282_v42 }
 0x6bf   : > { %v3410_v2 = vpop.permute.xlu2 %3409  ;;  %4825 = vst.msk [vmem:[#allocation3 + $0x48] sm:$0xf] %vm11161_vm11, %v4748_v53  ;;  %v10317_v53 = vld [vmem:[%s11129_s8] ss:$0 sm:$0xff] }
 0x6c0   : > { %3484 = vst.msk [vmem:[#allocation3 + $0x54] sm:$0xf] %vm1209_vm4, %v3410_v2 }
 0x6c3   : > { %4101 = vrot.lane.b32.xlu0 %v10166_v18, %s11233_s17  ;;  %4325 = vrot.lane.b32.xlu1 %v4230_v19, %s11235_s28  ;;  %v10298_v6 = vpop.f32.mrf.mxu1 }
 0x6c5   : > { %3861 = vrot.lane.b32.xlu2 %v10162_v49, %s11231_s16  ;;  %v4526_v56 = vpop.permute.xlu0 %4525  ;;  %v3426_v14 = vpop.permute.xlu1 %3425  ;;  %v7324_v12 = vld [vmem:[#allocation3 + $0x68] sm:$0xff] }
 0x6c6   : > { %4602 = vst.msk [vmem:[#allocation3 + $0x4c] sm:$0xf] %vm2335_vm9, %v4526_v56  ;;  %7197 = vmatmul.msk.bf16.gmra.mxu3 %vm11159_vm12, %v7324_v12  ;;  %v11284_v49 = vld [vmem:[#allocation41_spill] sm:$0xff]  ;;  %v10324_v12 = vld [vmem:[%s11288_s9] ss:$0 sm:$0xff]  ;;  %s5436_s9 = sld [smem:[#allocation5]] }
 0x6c7   : > { %v3632_v60 = vpop.permute.xlu2 %3631  ;;  %4826 = vst.msk [vmem:[#allocation3 + $0x4c] sm:$0xf] %vm11161_vm11, %v4750_v28  ;;  %v4445_v18 = vpack.c.bf16 %v11284_v49, %v11284_v49 }
 0x6c8   : > { %3492 = vst.msk [vmem:[#allocation3 + $0x74] sm:$0xf] %vm1209_vm4, %v3426_v14 }
 0x6cb   : > { %4323 = vrot.lane.b32.xlu0 %v4229_v23, %s11235_s28  ;;  %4547 = vrot.lane.b32.xlu1 %v4453_v35, %s11234_s18  ;;  %v10304_v15 = vpop.f32.mrf.mxu1 }
 0x6cd   : > { %4083 = vrot.lane.b32.xlu2 %v10182_v17, %s11233_s17  ;;  %v3424_v8 = vpop.permute.xlu0 %3423  ;;  %v3408_v50 = vpop.permute.xlu1 %3407  ;;  %v4670_v17 = vpack.c.bf16 %v11285_v11, %v11285_v11 }
 0x6ce   : > { %3491 = vst.msk [vmem:[#allocation3 + $0x70] sm:$0xf] %vm1209_vm4, %v3424_v8  ;;  %v7320_v13 = vld [vmem:[#allocation3 + $0x48] sm:$0xff] }
 0x6cf   : > { %v4098_v43 = vpop.permute.xlu2 %4097  ;;  %3715 = vst.msk [vmem:[#allocation3 + $0x70] sm:$0xf] %vm1434_vm5, %v3648_v7  ;;  %7193 = vmatmul.msk.bf16.gmra.mxu1 %vm11159_vm12, %v7320_v13 }
 0x6d0   : > { %3483 = vst.msk [vmem:[#allocation3 + $0x50] sm:$0xf] %vm1209_vm4, %v3408_v50 }
 0x6d1   : > { %3707 = vst.msk [vmem:[#allocation3 + $0x50] sm:$0xf] %vm1434_vm5, %v3632_v60 }
 0x6d3   : > { %4085 = vrot.lane.b32.xlu0 %v10194_v59, %s11233_s17  ;;  %4309 = vrot.lane.b32.xlu1 %v4222_v41, %s11235_s28  ;;  %v10309_v1 = vpop.f32.mrf.mxu1 }
 0x6d5   : > { %4549 = vrot.lane.b32.xlu2 %v4454_v25, %s11234_s18  ;;  %v3650_v40 = vpop.permute.xlu0 %3649  ;;  %v3874_v22 = vpop.permute.xlu1 %3873 }
 0x6d6   : > { %3716 = vst.msk [vmem:[#allocation3 + $0x74] sm:$0xf] %vm1434_vm5, %v3650_v40 }
 0x6d7   : > { %v4320_v32 = vpop.permute.xlu2 %4319  ;;  %3940 = vst.msk [vmem:[#allocation3 + $0x74] sm:$0xf] %vm1659_vm6, %v3874_v22 }
 0x6d8   : > { %4164 = vst.msk [vmem:[#allocation3 + $0x74] sm:$0xf] %vm1884_vm7, %v4098_v43 }
 0x6db   : > { %4307 = vrot.lane.b32.xlu0 %v4221_v54, %s11235_s28  ;;  %4531 = vrot.lane.b32.xlu1 %v4445_v18, %s11234_s18 }
 0x6dd   : > { %4771 = vrot.lane.b32.xlu2 %v4677_v20, %s11236_s1  ;;  %v3872_v21 = vpop.permute.xlu0 %3871  ;;  %v4096_v24 = vpop.permute.xlu1 %4095 }
 0x6de   : > { %3939 = vst.msk [vmem:[#allocation3 + $0x70] sm:$0xf] %vm1659_vm6, %v3872_v21 }
 0x6df   : > { %v4082_v38 = vpop.permute.xlu2 %4081  ;;  %4163 = vst.msk [vmem:[#allocation3 + $0x70] sm:$0xf] %vm1884_vm7, %v4096_v24 }
 0x6e0   : > { %4387 = vst.msk [vmem:[#allocation3 + $0x70] sm:$0xf] %vm2110_vm8, %v4320_v32 }
 0x6e3   : > { %4773 = vrot.lane.b32.xlu0 %v4678_v46, %s11236_s1  ;;  %4757 = vrot.lane.b32.xlu1 %v4670_v17, %s11236_s1 }
 0x6e5   : > { %4533 = vrot.lane.b32.xlu2 %v4446_v37, %s11234_s18  ;;  %v3634_v45 = vpop.permute.xlu0 %3633  ;;  %v3858_v27 = vpop.permute.xlu1 %3857 }
 0x6e6   : > { %3708 = vst.msk [vmem:[#allocation3 + $0x54] sm:$0xf] %vm1434_vm5, %v3634_v45 }
 0x6e7   : > { %v4304_v59 = vpop.permute.xlu2 %4303  ;;  %3932 = vst.msk [vmem:[#allocation3 + $0x54] sm:$0xf] %vm1659_vm6, %v3858_v27 }
 0x6e8   : > { %4156 = vst.msk [vmem:[#allocation3 + $0x54] sm:$0xf] %vm1884_vm7, %v4082_v38 }
 0x6eb   : > { %4755 = vrot.lane.b32.xlu0 %v4669_v29, %s11236_s1 }
 0x6ed   : > { %v3856_v10 = vpop.permute.xlu0 %3855  ;;  %v4080_v58 = vpop.permute.xlu1 %4079 }
 0x6ee   : > { %3931 = vst.msk [vmem:[#allocation3 + $0x50] sm:$0xf] %vm1659_vm6, %v3856_v10 }
 0x6ef   : > { %v4770_v28 = vpop.permute.xlu2 %4769  ;;  %4155 = vst.msk [vmem:[#allocation3 + $0x50] sm:$0xf] %vm1884_vm7, %v4080_v58 }
 0x6f0   : > { %4379 = vst.msk [vmem:[#allocation3 + $0x50] sm:$0xf] %vm2110_vm8, %v4304_v59 }
 0x6f5   : > { %v4322_v62 = vpop.permute.xlu0 %4321  ;;  %v4546_v7 = vpop.permute.xlu1 %4545 }
 0x6f6   : > { %4388 = vst.msk [vmem:[#allocation3 + $0x74] sm:$0xf] %vm2110_vm8, %v4322_v62 }
 0x6f7   : > { %v4752_v9 = vpop.permute.xlu2 %4751  ;;  %4612 = vst.msk [vmem:[#allocation3 + $0x74] sm:$0xf] %vm2335_vm9, %v4546_v7 }
 0x6f8   : > { %4836 = vst.msk [vmem:[#allocation3 + $0x74] sm:$0xf] %vm11161_vm11, %v4770_v28 }
 0x6fd   : > { %v4544_v55 = vpop.permute.xlu0 %4543  ;;  %v4768_v0 = vpop.permute.xlu1 %4767 }
 0x6fe   : > { %4611 = vst.msk [vmem:[#allocation3 + $0x70] sm:$0xf] %vm2335_vm9, %v4544_v55 }
 0x6ff   : > { %v3430_v36 = vpop.permute.xlu2 %3429  ;;  %4835 = vst.msk [vmem:[#allocation3 + $0x70] sm:$0xf] %vm11161_vm11, %v4768_v0 }
 0x700   : > { %3494 = vst.msk [vmem:[#allocation3 + $0x7c] sm:$0xf] %vm1209_vm4, %v3430_v36 }
 0x703   : > { %v5091_v2 = vpop.f32.mrf.mxu1 }
 0x704   : > { %v5092_v57 = vadd.f32 %v10317_v53, %v5091_v2 }
 0x705   : > { %v4306_v19 = vpop.permute.xlu0 %4305  ;;  %v4530_v31 = vpop.permute.xlu1 %4529 }
 0x706   : > { %4380 = vst.msk [vmem:[#allocation3 + $0x54] sm:$0xf] %vm2110_vm8, %v4306_v19  ;;  %v7325_v14 = vld [vmem:[#allocation3 + $0x70] sm:$0xff]  ;;  %v5147_v60 = vmax.f32 %v5092_v57, 0.0 }
 0x707   : > { %v3412_v56 = vpop.permute.xlu2 %3411  ;;  %4604 = vst.msk [vmem:[#allocation3 + $0x54] sm:$0xf] %vm2335_vm9, %v4530_v31  ;;  %7198 = vmatmul.msk.bf16.gmra.mxu3 %vm11159_vm12, %v7325_v14 }
 0x708   : > { %3485 = vst.msk [vmem:[#allocation3 + $0x58] sm:$0xf] %vm1209_vm4, %v3412_v56  ;;  %v5183_v23 = vmul.f32 %v10324_v12, %v5147_v60 }
 0x70a   : > { %v5247_v35 = vsel %vm11158_vm0, %v5183_v23, 0.0 }
 0x70b   : > { %v5093_v8 = vpop.f32.mrf.mxu1 }
 0x70c   : > { %v5094_v13 = vadd.f32 %v10317_v53, %v5093_v8 }
 0x70d   : > { %v4528_v50 = vpop.permute.xlu0 %4527  ;;  %v3428_v43 = vpop.permute.xlu1 %3427 }
 0x70e   : > { %5248 = vadd.xlane.f32.xlu2 %v5247_v35  ;;  %4603 = vst.msk [vmem:[#allocation3 + $0x50] sm:$0xf] %vm2335_vm9, %v4528_v50  ;;  %v5148_v42 = vmax.f32 %v5094_v13, 0.0  ;;  %v10373_v35 = vpop.f32.mrf.mxu3 }
 0x70f   : > { %v3878_v25 = vpop.permute.xlu2 %3877  ;;  %4827 = vst.msk [vmem:[#allocation3 + $0x50] sm:$0xf] %vm11161_vm11, %v4752_v9  ;;  %v5052_v9 = vadd.f32 %v10317_v53, %v10099_v47  ;;  %v5059_v47 = vadd.f32 %v10317_v53, %v10155_v26 }
 0x710   : > { %3493 = vst.msk [vmem:[#allocation3 + $0x78] sm:$0xf] %vm1209_vm4, %v3428_v43  ;;  %v5184_v41 = vmul.f32 %v10324_v12, %v5148_v42  ;;  %v5062_v42 = vadd.f32 %v10317_v53, %v10175_v39 }
 0x711   : > { %v5131_v36 = vmax.f32 %v5052_v9, 0.0  ;;  %v5134_v8 = vmax.f32 %v5059_v47, 0.0 }
 0x712   : > { %v5250_v40 = vsel %vm11158_vm0, %v5184_v41, 0.0  ;;  %v5135_v41 = vmax.f32 %v5062_v42, 0.0 }
 0x713   : > { %v5167_v14 = vmul.f32 %v10324_v12, %v5131_v36  ;;  %v5170_v26 = vmul.f32 %v10324_v12, %v5134_v8  ;;  %v5057_v36 = vadd.f32 %v10317_v53, %v10131_v52 }
 0x715   : > { %v4754_v22 = vpop.permute.xlu0 %4753  ;;  %v3654_v32 = vpop.permute.xlu1 %3653  ;;  %5251 = vadd.xlane.f32.xlu0 %v5250_v40  ;;  %v5199_v43 = vsel %vm11158_vm0, %v5167_v14, 0.0  ;;  %v5208_v40 = vsel %vm11158_vm0, %v5170_v26, 0.0 }
 0x716   : > { %4828 = vst.msk [vmem:[#allocation3 + $0x54] sm:$0xf] %vm11161_vm11, %v4754_v22 }
 0x717   : > { %v4100_v20 = vpop.permute.xlu2 %4099  ;;  %3718 = vst.msk [vmem:[#allocation3 + $0x7c] sm:$0xf] %vm1434_vm5, %v3654_v32  ;;  %v5113_v32 = vpop.f32.mrf.mxu3 }
 0x718   : > { %3942 = vst.msk [vmem:[#allocation3 + $0x7c] sm:$0xf] %vm1659_vm6, %v3878_v25 }
 0x71d   : > { %v3652_v61 = vpop.permute.xlu0 %3651  ;;  %v3876_v54 = vpop.permute.xlu1 %3875  ;;  %v7321_v49 = vld [vmem:[#allocation3 + $0x50] sm:$0xff] }
 0x71e   : > { %3717 = vst.msk [vmem:[#allocation3 + $0x78] sm:$0xf] %vm1434_vm5, %v3652_v61  ;;  %7194 = vmatmul.msk.bf16.gmra.mxu1 %vm11159_vm12, %v7321_v49  ;;  %v5114_v61 = vadd.f32 %v10317_v53, %v5113_v32  ;;  %v5087_v32 = vadd.f32 %v10317_v53, %v10304_v15 }
 0x71f   : > { %v3862_v18 = vpop.permute.xlu2 %3861  ;;  %3941 = vst.msk [vmem:[#allocation3 + $0x78] sm:$0xf] %vm1659_vm6, %v3876_v54 }
 0x720   : > { %4165 = vst.msk [vmem:[#allocation3 + $0x78] sm:$0xf] %vm1884_vm7, %v4100_v20  ;;  %v5171_v20 = vmul.f32 %v10324_v12, %v5135_v41  ;;  %v5156_v54 = vmax.f32 %v5114_v61, 0.0 }
 0x722   : > { %v5211_v49 = vsel %vm11158_vm0, %v5171_v20, 0.0 }
 0x725   : > { %v3414_v21 = vpop.permute.xlu0 %3413  ;;  %v3638_v24 = vpop.permute.xlu1 %3637 }
 0x726   : > { %3486 = vst.msk [vmem:[#allocation3 + $0x5c] sm:$0xf] %vm1209_vm4, %v3414_v21  ;;  %v5192_v21 = vmul.f32 %v10324_v12, %v5156_v54 }
 0x727   : > { %3710 = vst.msk [vmem:[#allocation3 + $0x5c] sm:$0xf] %vm1434_vm5, %v3638_v24  ;;  %v4084_v38 = vpop.permute.xlu2 %4083 }
 0x728   : > { %3934 = vst.msk [vmem:[#allocation3 + $0x5c] sm:$0xf] %vm1659_vm6, %v3862_v18 }
 0x72d   : > { %v3636_v46 = vpop.permute.xlu0 %3635  ;;  %v3860_v11 = vpop.permute.xlu1 %3859 }
 0x72e   : > { %3709 = vst.msk [vmem:[#allocation3 + $0x58] sm:$0xf] %vm1434_vm5, %v3636_v46  ;;  %v5074_v46 = vadd.f32 %v10317_v53, %v10246_v33 }
 0x72f   : > { %3933 = vst.msk [vmem:[#allocation3 + $0x58] sm:$0xf] %vm1659_vm6, %v3860_v11  ;;  %v4550_v17 = vpop.permute.xlu2 %4549 }
 0x730   : > { %4157 = vst.msk [vmem:[#allocation3 + $0x58] sm:$0xf] %vm1884_vm7, %v4084_v38  ;;  %v5274_v38 = vsel %vm11158_vm0, %v5192_v21, 0.0 }
 0x735   : > { %v4102_v51 = vpop.permute.xlu0 %4101  ;;  %v4326_v37 = vpop.permute.xlu1 %4325 }
 0x736   : > { %4166 = vst.msk [vmem:[#allocation3 + $0x7c] sm:$0xf] %vm1884_vm7, %v4102_v51 }
 0x737   : > { %4390 = vst.msk [vmem:[#allocation3 + $0x7c] sm:$0xf] %vm2110_vm8, %v4326_v37  ;;  %v4772_v45 = vpop.permute.xlu2 %4771 }
 0x738   : > { %4614 = vst.msk [vmem:[#allocation3 + $0x7c] sm:$0xf] %vm2335_vm9, %v4550_v17  ;;  %v5140_v17 = vmax.f32 %v5074_v46, 0.0 }
 0x73a   : > { %v5176_v37 = vmul.f32 %v10324_v12, %v5140_v17 }
 0x73d   : > { %v4324_v27 = vpop.permute.xlu0 %4323  ;;  %v4548_v59 = vpop.permute.xlu1 %4547 }
 0x73e   : > { %4389 = vst.msk [vmem:[#allocation3 + $0x78] sm:$0xf] %vm2110_vm8, %v4324_v27 }
 0x73f   : > { %4613 = vst.msk [vmem:[#allocation3 + $0x78] sm:$0xf] %vm2335_vm9, %v4548_v59  ;;  %v4534_v10 = vpop.permute.xlu2 %4533  ;;  %v5226_v59 = vsel %vm11158_vm0, %v5176_v37, 0.0 }
 0x740   : > { %4837 = vst.msk [vmem:[#allocation3 + $0x78] sm:$0xf] %vm11161_vm11, %v4772_v45  ;;  %v5077_v45 = vadd.f32 %v10317_v53, %v10256_v44 }
 0x742   : > { %v5141_v27 = vmax.f32 %v5077_v45, 0.0 }
 0x745   : > { %v4086_v30 = vpop.permute.xlu0 %4085  ;;  %v4310_v29 = vpop.permute.xlu1 %4309 }
 0x746   : > { %4158 = vst.msk [vmem:[#allocation3 + $0x5c] sm:$0xf] %vm1884_vm7, %v4086_v30  ;;  %v5177_v30 = vmul.f32 %v10324_v12, %v5141_v27 }
 0x747   : > { %4382 = vst.msk [vmem:[#allocation3 + $0x5c] sm:$0xf] %vm2110_vm8, %v4310_v29 }
 0x748   : > { %4606 = vst.msk [vmem:[#allocation3 + $0x5c] sm:$0xf] %vm2335_vm9, %v4534_v10  ;;  %v5229_v29 = vsel %vm11158_vm0, %v5177_v30, 0.0 }
 0x749   : > { %v5116_v18 = vpop.f32.mrf.mxu3 }
 0x74a   : > { %v5117_v39 = vadd.f32 %v10317_v53, %v5116_v18 }
 0x74c   : > { %v5096_v62 = vpop.f32.mrf.mxu1  ;;  %v5157_v24 = vmax.f32 %v5117_v39, 0.0  ;;  %v5145_v39 = vmax.f32 %v5087_v32, 0.0  ;;  %v5689_v32 = vld [vmem:[#allocation2 + $0x18] sm:$0xff] }
 0x74d   : > { %v4308_v58 = vpop.permute.xlu0 %4307  ;;  %v4532_v28 = vpop.permute.xlu1 %4531  ;;  %v5097_v7 = vadd.f32 %v10317_v53, %v5096_v62 }
 0x74e   : > { %4381 = vst.msk [vmem:[#allocation3 + $0x58] sm:$0xf] %vm2110_vm8, %v4308_v58  ;;  %v5193_v11 = vmul.f32 %v10324_v12, %v5157_v24  ;;  %v5054_v58 = vadd.f32 %v10317_v53, %v10114_v5 }
 0x74f   : > { %4605 = vst.msk [vmem:[#allocation3 + $0x58] sm:$0xf] %vm2335_vm9, %v4532_v28  ;;  %v5149_v55 = vmax.f32 %v5097_v7, 0.0 }
 0x750   : > { %v5277_v51 = vsel %vm11158_vm0, %v5193_v11, 0.0  ;;  %v5132_v7 = vmax.f32 %v5054_v58, 0.0 }
 0x751   : > { %v5185_v0 = vmul.f32 %v10324_v12, %v5149_v55  ;;  %v5118_v47 = vpop.f32.mrf.mxu3 }
 0x752   : > { %v5119_v45 = vadd.f32 %v10317_v53, %v5118_v47 }
 0x753   : > { %v5253_v31 = vsel %vm11158_vm0, %v5185_v0, 0.0  ;;  %v5168_v0 = vmul.f32 %v10324_v12, %v5132_v7 }
 0x754   : > { %v5098_v57 = vpop.f32.mrf.mxu1  ;;  %5254 = vadd.xlane.f32.xlu1 %v5253_v31  ;;  %v5133_v31 = vmax.f32 %v5057_v36, 0.0  ;;  %v5158_v30 = vmax.f32 %v5119_v45, 0.0 }
 0x755   : > { %v4774_v2 = vpop.permute.xlu0 %4773  ;;  %v4758_v19 = vpop.permute.xlu1 %4757  ;;  %v5099_v56 = vadd.f32 %v10317_v53, %v5098_v57  ;;  %v5202_v57 = vsel %vm11158_vm0, %v5168_v0, 0.0  ;;  %v5079_v0 = vadd.f32 %v10317_v53, %v10271_v48 }
 0x756   : > { %4838 = vst.msk [vmem:[#allocation3 + $0x7c] sm:$0xf] %vm11161_vm11, %v4774_v2  ;;  %v5194_v58 = vmul.f32 %v10324_v12, %v5158_v30 }
 0x757   : > { %4830 = vst.msk [vmem:[#allocation3 + $0x5c] sm:$0xf] %vm11161_vm11, %v4758_v19  ;;  %v5150_v60 = vmax.f32 %v5099_v56, 0.0  ;;  %v5169_v56 = vmul.f32 %v10324_v12, %v5133_v31 }
 0x759   : > { %v5186_v23 = vmul.f32 %v10324_v12, %v5150_v60  ;;  %v5205_v14 = vsel %vm11158_vm0, %v5169_v56, 0.0  ;;  %v5082_v56 = vadd.f32 %v10317_v53, %v10283_v63  ;;  %v5089_v63 = vadd.f32 %v10317_v53, %v10309_v1 }
 0x75a   : > { %v5697_v1 = vpack.c.bf16 %v5689_v32, %v5689_v32 }
 0x75b   : > { %v5256_v13 = vsel %vm11158_vm0, %v5186_v23, 0.0  ;;  %v5143_v47 = vmax.f32 %v5082_v56, 0.0  ;;  %v5972_v56 = vld [vmem:[#allocation2 + $0x7a] sm:$0xff] }
 0x75c   : > { %5200 = vadd.xlane.f32.xlu1 %v5199_v43  ;;  %5257 = vadd.xlane.f32.xlu2 %v5256_v13  ;;  %v5064_v43 = vadd.f32 %v10317_v53, %v10196_v16  ;;  %v5067_v16 = vadd.f32 %v10317_v53, %v10206_v3  ;;  %v5181_v3 = vmul.f32 %v10324_v12, %v5145_v39 }
 0x75d   : > { %v4756_v50 = vpop.permute.xlu0 %4755  ;;  %v7326_v25 = vld [vmem:[#allocation3 + $0x78] sm:$0xff] }
 0x75e   : > { %4829 = vst.msk [vmem:[#allocation3 + $0x58] sm:$0xf] %vm11161_vm11, %v4756_v50  ;;  %7199 = vmatmul.msk.bf16.gmra.mxu3 %vm11159_vm12, %v7326_v25  ;;  %v5136_v26 = vmax.f32 %v5064_v43, 0.0  ;;  %v5137_v15 = vmax.f32 %v5067_v16, 0.0  ;;  %v5241_v27 = vsel %vm11158_vm0, %v5181_v3, 0.0  ;;  %v5084_v43 = vadd.f32 %v10317_v53, %v10298_v6 }
 0x75f   : > { %vm11163_vm11 = vcmask 1047559  }
 0x760   : > { %v5172_v54 = vmul.f32 %v10324_v12, %v5136_v26  ;;  %v5144_v26 = vmax.f32 %v5084_v43, 0.0 }
 0x762   : > { %v5214_v17 = vsel %vm11158_vm0, %v5172_v54, 0.0 }
 0x764   : > { %5209 = vadd.xlane.f32.xlu1 %v5208_v40 }
 0x765   : > { %v7322_v22 = vld [vmem:[#allocation3 + $0x58] sm:$0xff] }
 0x766   : > { %7195 = vmatmul.msk.bf16.gmra.mxu1 %vm11159_vm12, %v7322_v22  ;;  %vm11165_vm12 = vcmask 1045509  }
 0x76c   : > { %5212 = vadd.xlane.f32.xlu1 %v5211_v49  ;;  %v5112_v49 = vadd.f32 %v10317_v53, %v10373_v35  ;;  %v5173_v35 = vmul.f32 %v10324_v12, %v5137_v15  ;;  %v5634_v15 = vld [vmem:[#allocation2 + $0x1a] sm:$0xff] }
 0x76e   : > { %v5155_v46 = vmax.f32 %v5112_v49, 0.0  ;;  %v5690_v49 = vld [vmem:[#allocation2 + $0x30] sm:$0xff] }
 0x770   : > { %v5191_v37 = vmul.f32 %v10324_v12, %v5155_v46 }
 0x774   : > { %5275 = vadd.xlane.f32.xlu1 %v5274_v38 }
 0x77c   : > { %5278 = vadd.xlane.f32.xlu1 %v5277_v51  ;;  %v5069_v51 = vadd.f32 %v10317_v53, %v10219_v34  ;;  %v5072_v34 = vadd.f32 %v10317_v53, %v10228_v4 }
 0x781   : > { %v10495_v3 = vpop.xlane.xlu2 %5248 }
 0x784   : > { %5227 = vadd.xlane.f32.xlu1 %v5226_v59  ;;  %v5138_v59 = vmax.f32 %v5069_v51, 0.0 }
 0x78a   : > { %v5121_v60 = vpop.f32.mrf.mxu3 }
 0x78c   : > { %5230 = vadd.xlane.f32.xlu1 %v5229_v29  ;;  %v5271_v29 = vsel %vm11158_vm0, %v5191_v37, 0.0  ;;  %v5969_v37 = vld [vmem:[#allocation2 + $0x32] sm:$0xff] }
 0x792   : > { %v5123_v23 = vpop.f32.mrf.mxu3 }
 0x793   : > { %v5124_v4 = vadd.f32 %v10317_v53, %v5123_v23 }
 0x79b   : > { %v5101_v33 = vpop.f32.mrf.mxu1 }
 0x79c   : > { %v5102_v10 = vadd.f32 %v10317_v53, %v5101_v33  ;;  %v5217_v33 = vsel %vm11158_vm0, %v5173_v35, 0.0 }
 0x79e   : > { %v5151_v28 = vmax.f32 %v5102_v10, 0.0  ;;  %v5174_v10 = vmul.f32 %v10324_v12, %v5138_v59  ;;  %v5636_v59 = vld [vmem:[#allocation2 + $0x4a] sm:$0xff] }
 0x79f   : > { %v5644_v30 = vpack.c.bf16 %v5636_v59, %v5636_v59 }
 0x7a0   : > { %v5187_v62 = vmul.f32 %v10324_v12, %v5151_v28  ;;  %v5122_v28 = vadd.f32 %v10317_v53, %v5121_v60 }
 0x7a2   : > { %v5259_v44 = vsel %vm11158_vm0, %v5187_v62, 0.0  ;;  %v5139_v62 = vmax.f32 %v5072_v34, 0.0  ;;  %v5159_v7 = vmax.f32 %v5122_v28, 0.0 }
 0x7a3   : > { %v5103_v9 = vpop.f32.mrf.mxu1  ;;  %5260 = vadd.xlane.f32.xlu2 %v5259_v44  ;;  %v5220_v44 = vsel %vm11158_vm0, %v5174_v10, 0.0  ;;  %v5858_v10 = vld [vmem:[#allocation2 + $0x48] sm:$0xff] }
 0x7a4   : > { %v5104_v55 = vadd.f32 %v10317_v53, %v5103_v9  ;;  %v5280_v9 = vsel %vm11158_vm0, %v5194_v58, 0.0  ;;  %v5195_v36 = vmul.f32 %v10324_v12, %v5159_v7  ;;  %v5866_v58 = vpack.c.bf16 %v5858_v10, %v5858_v10  ;;  %v5804_v7 = vld [vmem:[#allocation2 + $0x62] sm:$0xff] }
 0x7a6   : > { %v5152_v2 = vmax.f32 %v5104_v55, 0.0  ;;  %v5175_v55 = vmul.f32 %v10324_v12, %v5139_v62 }
 0x7a8   : > { %v5188_v19 = vmul.f32 %v10324_v12, %v5152_v2  ;;  %v5142_v2 = vmax.f32 %v5079_v0, 0.0  ;;  %v5223_v31 = vsel %vm11158_vm0, %v5175_v55, 0.0 }
 0x7aa   : > { %v5262_v5 = vsel %vm11158_vm0, %v5188_v19, 0.0  ;;  %v5160_v19 = vmax.f32 %v5124_v4, 0.0 }
 0x7ab   : > { %5263 = vadd.xlane.f32.xlu0 %v5262_v5  ;;  %5203 = vadd.xlane.f32.xlu2 %v5202_v57  ;;  %v5283_v5 = vsel %vm11158_vm0, %v5195_v36, 0.0  ;;  %v5178_v57 = vmul.f32 %v10324_v12, %v5142_v2  ;;  %v5748_v36 = vld [vmem:[#allocation2 + $0x61] sm:$0xff] }
 0x7ac   : > { %v10532_v4 = vpack.c.bf16 %v5748_v36, %v5748_v36 }
 0x7b3   : > { %5206 = vadd.xlane.f32.xlu0 %v5205_v14  ;;  %v5196_v14 = vmul.f32 %v10324_v12, %v5160_v19 }
 0x7b5   : > { %v5286_v23 = vsel %vm11158_vm0, %v5196_v14, 0.0  ;;  %v10544_v14 = vpack.c.bf16 %v5972_v56, %v5972_v56 }
 0x7c7   : > { %v10481_v16 = vpop.xlane.xlu1 %5254 }
 0x7cf   : > { %v10486_v39 = vpop.xlane.xlu1 %5200  ;;  %v10502_v51 = vpop.xlane.xlu2 %5257 }
 0x7d7   : > { %v10497_v35 = vpop.xlane.xlu1 %5209 }
 0x7df   : > { %v10505_v45 = vpop.xlane.xlu1 %5212 }
 0x7e1   : > { %v10414_v8 = vpop.f32.mrf.mxu3 }
 0x7e2   : > { %v5127_v48 = vadd.f32 %v10317_v53, %v10414_v8 }
 0x7e3   : > { %v5106_v52 = vpop.f32.mrf.mxu1 }
 0x7e4   : > { %v5107_v50 = vadd.f32 %v10317_v53, %v5106_v52  ;;  %v5161_v60 = vmax.f32 %v5127_v48, 0.0  ;;  %v5232_v52 = vsel %vm11158_vm0, %v5178_v57, 0.0 }
 0x7e6   : > { %v5153_v13 = vmax.f32 %v5107_v50, 0.0  ;;  %v5179_v50 = vmul.f32 %v10324_v12, %v5143_v47 }
 0x7e7   : > { %v10514_v34 = vpop.xlane.xlu1 %5275 }
 0x7e8   : > { %v5189_v25 = vmul.f32 %v10324_v12, %v5153_v13  ;;  %v5197_v13 = vmul.f32 %v10324_v12, %v5161_v60 }
 0x7e9   : > { %v5128_v42 = vpop.f32.mrf.mxu3 }
 0x7ea   : > { %v5129_v41 = vadd.f32 %v10317_v53, %v5128_v42  ;;  %v5265_v40 = vsel %vm11158_vm0, %v5189_v25, 0.0  ;;  %v5578_v25 = vld [vmem:[#allocation2 + $0x19] sm:$0xff]  ;;  %v5146_v42 = vmax.f32 %v5089_v63, 0.0  ;;  %v5329_v63 = vlaneseq }
 0x7eb   : > { %v5108_v22 = vpop.f32.mrf.mxu1  ;;  %5266 = vadd.xlane.f32.xlu2 %v5265_v40  ;;  %v5586_v8 = vpack.c.bf16 %v5578_v25, %v5578_v25  ;;  %v5235_v40 = vsel %vm11158_vm0, %v5179_v50, 0.0  ;;  %v5860_v50 = vld [vmem:[#allocation2 + $0x78] sm:$0xff]  ;;  %v5694_v25 = vld [vmem:[#allocation2 + $0x90] sm:$0xff] }
 0x7ec   : > { %v5162_v20 = vmax.f32 %v5129_v41, 0.0  ;;  %v5109_v61 = vadd.f32 %v10317_v53, %v5108_v22  ;;  %v5289_v41 = vsel %vm11158_vm0, %v5197_v13, 0.0  ;;  %v5180_v22 = vmul.f32 %v10324_v12, %v5144_v26 }
 0x7ed   : > { %v5182_v6 = vmul.f32 %v10324_v12, %v5146_v42  ;;  %v10560_v43 = vpack.c.bf16 %v5860_v50, %v5860_v50  ;;  %v10568_v26 = vpack.c.bf16 %v5694_v25, %v5694_v25 }
 0x7ee   : > { %v5198_v18 = vmul.f32 %v10324_v12, %v5162_v20  ;;  %v5154_v21 = vmax.f32 %v5109_v61, 0.0  ;;  %v5238_v53 = vsel %vm11158_vm0, %v5180_v22, 0.0  ;;  %v5746_v61 = vld [vmem:[#allocation2 + $0x31] sm:$0xff]  ;;  %v5916_v22 = vld [vmem:[#allocation2 + $0x79] sm:$0xff] }
 0x7ef   : > { %v5244_v20 = vsel %vm11158_vm0, %v5182_v6, 0.0  ;;  %v5754_v54 = vpack.c.bf16 %v5746_v61, %v5746_v61 }
 0x7f0   : > { %v5190_v24 = vmul.f32 %v10324_v12, %v5154_v21  ;;  %v5292_v38 = vsel %vm11158_vm0, %v5198_v18, 0.0  ;;  %v5577_v18 = vld [vmem:[#allocation2 + $0x1] sm:$0xff]  ;;  %v5698_v21 = vpack.c.bf16 %v5690_v49, %v5690_v49 }
 0x7f1   : > { %5293 = vadd.xlane.f32.xlu1 %v5292_v38  ;;  %v10484_v12 = vpack.c.bf16 %v5577_v18, %v5577_v18  ;;  %v5914_v38 = vld [vmem:[#allocation2 + $0x49] sm:$0xff] }
 0x7f2   : > { %v5268_v11 = vsel %vm11158_vm0, %v5190_v24, 0.0  ;;  %v5633_v24 = vld [vmem:[#allocation2 + $0x2] sm:$0xff]  ;;  %vm11166_vm0 = vcmask 1044484  }
 0x7f3   : > { %5269 = vadd.xlane.f32.xlu0 %v5268_v11  ;;  %5215 = vadd.xlane.f32.xlu2 %v5214_v17  ;;  %v10490_v46 = vpack.c.bf16 %v5633_v24, %v5633_v24  ;;  %v5922_v11 = vpack.c.bf16 %v5914_v38, %v5914_v38  ;;  %v5642_v17 = vpack.c.bf16 %v5634_v15, %v5634_v15 }
 0x7f9   : > { %5242 = vadd.xlane.f32.xlu1 %v5241_v27  ;;  %v5977_v27 = vpack.c.bf16 %v5969_v37, %v5969_v37 }
 0x7fb   : > { %5272 = vadd.xlane.f32.xlu0 %v5271_v29  ;;  %5218 = vadd.xlane.f32.xlu2 %v5217_v33  ;;  %v10508_v29 = vpop.xlane.xlu0 %5251 }
 0x803   : > { %5221 = vadd.xlane.f32.xlu0 %v5220_v44  ;;  %5281 = vadd.xlane.f32.xlu2 %v5280_v9  ;;  %v5812_v44 = vpack.c.bf16 %v5804_v7, %v5804_v7  ;;  %v10525_v9 = vpop.xlane.xlu1 %5278 }
 0x80b   : > { %5224 = vadd.xlane.f32.xlu0 %v5223_v31  ;;  %5284 = vadd.xlane.f32.xlu2 %v5283_v5  ;;  %v5859_v31 = vld [vmem:[#allocation2 + $0x60] sm:$0xff]  ;;  %v10542_v5 = vpop.xlane.xlu1 %5227 }
 0x80c   : > { %v5867_v57 = vpack.c.bf16 %v5859_v31, %v5859_v31 }
 0x812   : > { %5603 = vrot.lane.b32.xlu1 %v5586_v8, %s11289_s3 }
 0x813   : > { %5287 = vadd.xlane.f32.xlu0 %v5286_v23  ;;  %5233 = vadd.xlane.f32.xlu2 %v5232_v52  ;;  %v10552_v60 = vpop.xlane.xlu1 %5230 }
 0x816   : > { %v10510_v33 = vpop.xlane.xlu2 %5260 }
 0x81a   : > { %5713 = vrot.lane.b32.xlu1 %v5697_v1, %s11232_s27 }
 0x81b   : > { %5290 = vadd.xlane.f32.xlu0 %v5289_v41  ;;  %5236 = vadd.xlane.f32.xlu2 %v5235_v40 }
 0x81e   : > { %v10517_v28 = vpop.xlane.xlu0 %5263  ;;  %v10520_v62 = vpop.xlane.xlu2 %5203 }
 0x822   : > { %5771 = vrot.lane.b32.xlu1 %v5754_v54, %s11231_s16 }
 0x823   : > { %5239 = vadd.xlane.f32.xlu0 %v5238_v53  ;;  %5245 = vadd.xlane.f32.xlu2 %v5244_v20  ;;  %v10584_v53 = vpack.c.bf16 %v5916_v22, %v5916_v22  ;;  %v5806_v22 = vld [vmem:[#allocation2 + $0x92] sm:$0xff] }
 0x826   : > { %v10527_v55 = vpop.xlane.xlu0 %5206 }
 0x82a   : > { %5881 = vrot.lane.b32.xlu1 %v5698_v21, %s11235_s28 }
 0x832   : > { %5939 = vrot.lane.b32.xlu1 %v5922_v11, %s11234_s18 }
 0x837   : > { %5601 = vrot.lane.b32.xlu0 %v10484_v12, %s11289_s3 }
 0x83a   : > { %5605 = vrot.lane.b32.xlu1 %v5754_v54, %s11289_s3 }
 0x83b   : > { %5657 = vrot.lane.b32.xlu2 %v10490_v46, %s11237_s24 }
 0x83f   : > { %5659 = vrot.lane.b32.xlu0 %v5642_v17, %s11237_s24 }
 0x842   : > { %5663 = vrot.lane.b32.xlu1 %v5644_v30, %s11237_s24 }
 0x843   : > { %5769 = vrot.lane.b32.xlu2 %v5586_v8, %s11231_s16  ;;  %v10566_v8 = vand.u32 127, %v5329_v63 }
 0x845   : > { %v10573_v40 = vadd.s32 4294967288, %v10566_v8  ;;  %v5360_v1 = vperm.slane %v10481_v16, %v10566_v8  ;;  %v5357_v61 = vperm.slane %v10495_v3, %v10566_v8  ;;  %v5363_v15 = vperm.slane %v10510_v33, %v10566_v8 }
 0x847   : > { %5715 = vrot.lane.b32.xlu0 %v5698_v21, %s11232_s27  ;;  %v5361_v6 = vperm.slane %v10502_v51, %v10573_v40  ;;  %v5358_v32 = vperm.slane %v10508_v29, %v10573_v40  ;;  %v5364_v49 = vperm.slane %v10517_v28, %v10573_v40  ;;  %v5370_v3 = vperm.slane %v10514_v34, %v10573_v40  ;;  %v5862_v29 = vld [vmem:[#allocation2 + $0xa8] sm:$0xff] }
 0x848   : > { %v10623_v10 = vpack.c.bf16 %v5862_v29, %v5862_v29  ;;  %v5336_v34 = vperm.slane %v10527_v55, %v10566_v8 }
 0x849   : > { %v5359_v16 = vsel %vm5334_vm13, %v5358_v32, %v5357_v61  ;;  %v5365_v59 = vsel %vm5334_vm13, %v5364_v49, %v5363_v15 }
 0x84a   : > { %5773 = vrot.lane.b32.xlu1 %v5922_v11, %s11231_s16 }
 0x84b   : > { %5827 = vrot.lane.b32.xlu2 %v5977_v27, %s11233_s17 }
 0x84f   : > { %5825 = vrot.lane.b32.xlu0 %v5642_v17, %s11233_s17  ;;  %v5337_v17 = vperm.slane %v10497_v35, %v10573_v40  ;;  %v5333_v35 = vperm.slane %v10520_v62, %v10573_v40 }
 0x851   : > { %v5338_v50 = vsel %vm5334_vm13, %v5337_v17, %v5336_v34  ;;  %v6041_v34 = vld [vmem:[%s11126_s5 + $0x20] sm:$0xf] }
 0x852   : > { %5831 = vrot.lane.b32.xlu1 %v5812_v44, %s11233_s17 }
 0x853   : > { %5937 = vrot.lane.b32.xlu2 %v5754_v54, %s11234_s18  ;;  %v5362_v54 = vsel %vm5334_vm13, %v5361_v6, %v5360_v1  ;;  %v5346_v6 = vperm.slane %v10542_v5, %v10573_v40 }
 0x854   : > { %v5395_v38 = vsel %vm5381_vm14, %v5362_v54, %v5359_v16 }
 0x857   : > { %5883 = vrot.lane.b32.xlu0 %v5866_v58, %s11235_s28 }
 0x85a   : > { %5941 = vrot.lane.b32.xlu1 %v10532_v4, %s11234_s18 }
 0x85b   : > { %5995 = vrot.lane.b32.xlu2 %v5644_v30, %s11236_s1 }
 0x85e   : > { %v10529_v0 = vpop.xlane.xlu2 %5266 }
 0x85f   : > { %5993 = vrot.lane.b32.xlu0 %v5977_v27, %s11236_s1  ;;  %v5366_v51 = vperm.slane %v10529_v0, %v10566_v8 }
 0x862   : > { %5999 = vrot.lane.b32.xlu1 %v10544_v14, %s11236_s1 }
 0x863   : > { %5661 = vrot.lane.b32.xlu2 %v5977_v27, %s11237_s24  ;;  %v5372_v27 = vperm.slane %v10525_v9, %v10566_v8 }
 0x864   : > { %v10562_v13 = vpop.xlane.xlu1 %5293 }
 0x865   : > { %v5379_v62 = vperm.slane %v10562_v13, %v10573_v40 }
 0x866   : > { %v10537_v2 = vpop.xlane.xlu0 %5269  ;;  %v10539_v19 = vpop.xlane.xlu2 %5215 }
 0x867   : > { %5607 = vrot.lane.b32.xlu0 %v5922_v11, %s11289_s3  ;;  %v5367_v24 = vperm.slane %v10537_v2, %v10573_v40  ;;  %v5340_v55 = vperm.slane %v10539_v19, %v10573_v40  ;;  %v5331_v19 = vperm.slane %v10486_v39, %v10566_v8 }
 0x869   : > { %v5368_v33 = vsel %vm5334_vm13, %v5367_v24, %v5366_v51 }
 0x86a   : > { %5665 = vrot.lane.b32.xlu1 %v5812_v44, %s11237_s24 }
 0x86b   : > { %5719 = vrot.lane.b32.xlu2 %v5867_v57, %s11232_s27 }
 0x86c   : > { %v10587_v20 = vpop.xlane.xlu1 %5242 }
 0x86d   : > { %v5354_v5 = vperm.slane %v10587_v20, %v10566_v8 }
 0x86e   : > { %v5273_v48 = vpop.xlane.xlu0 %5272  ;;  %v10549_v47 = vpop.xlane.xlu2 %5218 }
 0x86f   : > { %5717 = vrot.lane.b32.xlu0 %v5866_v58, %s11232_s27  ;;  %v5369_v11 = vperm.slane %v5273_v48, %v10566_v8  ;;  %v5342_v63 = vperm.slane %v10549_v47, %v10566_v8  ;;  %v5335_v47 = vsel %vm5334_vm13, %v5333_v35, %v5331_v19 }
 0x870   : > { %v5382_v1 = vsel %vm5381_vm14, %v5338_v50, %v5335_v47  ;;  %v7336_v50 = vld [vmem:[%s11126_s5 + $0x8] sm:$0xff] }
 0x871   : > { %v5371_v58 = vsel %vm5334_vm13, %v5370_v3, %v5369_v11 }
 0x872   : > { %5723 = vrot.lane.b32.xlu1 %v10568_v26, %s11232_s27 }
 0x873   : > { %5829 = vrot.lane.b32.xlu2 %v5644_v30, %s11233_s17 }
 0x876   : > { %v10556_v23 = vpop.xlane.xlu0 %5221  ;;  %v5282_v52 = vpop.xlane.xlu2 %5281 }
 0x877   : > { %5775 = vrot.lane.b32.xlu0 %v10532_v4, %s11231_s16  ;;  %v5373_v37 = vperm.slane %v5282_v52, %v10573_v40  ;;  %v5339_v52 = vperm.slane %v10505_v45, %v10566_v8 }
 0x879   : > { %v5374_v9 = vsel %vm5334_vm13, %v5373_v37, %v5372_v27 }
 0x87a   : > { %5833 = vrot.lane.b32.xlu1 %v10544_v14, %s11233_s17 }
 0x87b   : > { %5887 = vrot.lane.b32.xlu2 %v10560_v43, %s11235_s28 }
 0x87e   : > { %v10570_v42 = vpop.xlane.xlu0 %5224  ;;  %v5285_v41 = vpop.xlane.xlu2 %5284 }
 0x87f   : > { %5885 = vrot.lane.b32.xlu0 %v5867_v57, %s11235_s28  ;;  %v5375_v28 = vperm.slane %v5285_v41, %v10566_v8  ;;  %v5343_v57 = vperm.slane %v10556_v23, %v10573_v40  ;;  %v5341_v41 = vsel %vm5334_vm13, %v5340_v55, %v5339_v52  ;;  %v5974_v55 = vld [vmem:[#allocation2 + $0xaa] sm:$0xff] }
 0x880   : > { %v5384_v54 = vsel %vm5383_vm15, %v5341_v41, %v5382_v1  ;;  %v5296_v52 = vld [vmem:[%s11132_s11 + $0x8] sm:$0xff] }
 0x881   : > { %v5344_v32 = vsel %vm5334_vm13, %v5343_v57, %v5342_v63  ;;  %v7337_v57 = vld [vmem:[%s11126_s5 + $0x10] sm:$0xff]  ;;  %v7335_v63 = vld [vmem:[%s11126_s5] sm:$0xff] }
 0x882   : > { %5891 = vrot.lane.b32.xlu1 %v10623_v10, %s11235_s28 }
 0x883   : > { %5997 = vrot.lane.b32.xlu2 %v5812_v44, %s11236_s1  ;;  %v5396_v44 = vsel %vm5383_vm15, %v5365_v59, %v5395_v38  ;;  %v5917_v38 = vld [vmem:[#allocation2 + $0x91] sm:$0xff] }
 0x884   : > { %v5604_v7 = vpop.permute.xlu1 %5603  ;;  %v5397_v0 = vsel %vm5385_vm1, %v5368_v33, %v5396_v44  ;;  %v5925_v37 = vpack.c.bf16 %v5917_v38, %v5917_v38 }
 0x885   : > { %5626 = vst.msk [vmem:[#allocation3 + $0x4] sm:$0xf] %vm984_vm3, %v5604_v7  ;;  %v5398_v48 = vsel %vm11166_vm0, %v5371_v58, %v5397_v0  ;;  %v6083_v58 = vunpack.c.l.b16 %v6041_v34 }
 0x886   : > { %v5288_v18 = vpop.xlane.xlu0 %5287  ;;  %v10594_v21 = vpop.xlane.xlu2 %5233  ;;  %v5399_v23 = vsel %vm11165_vm12, %v5374_v9, %v5398_v48  ;;  %v7338_v9 = vld [vmem:[%s11126_s5 + $0x18] sm:$0xff] }
 0x887   : > { %5943 = vrot.lane.b32.xlu0 %v10584_v53, %s11234_s18  ;;  %v5376_v30 = vperm.slane %v5288_v18, %v10573_v40  ;;  %v5349_v39 = vperm.slane %v10594_v21, %v10573_v40  ;;  %v10673_v18 = vpack.c.bf16 %v5806_v22, %v5806_v22  ;;  %v5386_v21 = vsel %vm5385_vm1, %v5344_v32, %v5384_v54  ;;  %v5975_v22 = vld [vmem:[#allocation2 + $0xc2] sm:$0xff] }
 0x888   : > { %v5983_v32 = vpack.c.bf16 %v5975_v22, %v5975_v22 }
 0x889   : > { %v5377_v31 = vsel %vm5334_vm13, %v5376_v30, %v5375_v28  ;;  %v6088_v28 = vpack.c.b16 %v6083_v58, %v6083_v58 }
 0x88a   : > { %v5400_v25 = vsel %vm11164_vm2, %v5377_v31, %v5399_v23  ;;  %6001 = vrot.lane.b32.xlu1 %v10673_v18, %s11236_s1  ;;  %v5982_v31 = vpack.c.bf16 %v5974_v55, %v5974_v55 }
 0x88b   : > { %5611 = vrot.lane.b32.xlu2 %v10584_v53, %s11289_s3  ;;  %v6106_v7 = vsel %vm2794_vm10, %v6088_v28, 0 }
 0x88c   : > { %v5714_v61 = vpop.permute.xlu1 %5713 }
 0x88e   : > { %v5291_v36 = vpop.xlane.xlu0 %5290  ;;  %v5237_v2 = vpop.xlane.xlu2 %5236 }
 0x88f   : > { %v5378_v56 = vperm.slane %v5291_v36, %v10566_v8  ;;  %5609 = vrot.lane.b32.xlu0 %v10532_v4, %s11289_s3  ;;  %v5345_v4 = vperm.slane %v10570_v42, %v10566_v8  ;;  %v5348_v42 = vperm.slane %v10552_v60, %v10566_v8  ;;  %v5351_v60 = vperm.slane %v5237_v2, %v10566_v8  ;;  %v5696_v2 = vld [vmem:[#allocation2 + $0xc0] sm:$0xff] }
 0x891   : > { %v5380_v13 = vsel %vm5334_vm13, %v5379_v62, %v5378_v56  ;;  %v5347_v49 = vsel %vm5334_vm13, %v5346_v6, %v5345_v4  ;;  %v5350_v16 = vsel %vm5334_vm13, %v5349_v39, %v5348_v42  ;;  %v5704_v56 = vpack.c.bf16 %v5696_v2, %v5696_v2  ;;  %v5920_v4 = vld [vmem:[#allocation2 + $0xd9] sm:$0xff] }
 0x892   : > { %v5401_v45 = vsel %vm11163_vm11, %v5380_v13, %v5400_v25  ;;  %v5388_v20 = vsel %vm11166_vm0, %v5347_v49, %v5386_v21  ;;  %v10749_v13 = vpack.c.bf16 %v5920_v4, %v5920_v4  ;;  %v6153_v49 = vld [vmem:[#allocation2] sm:$0xff]  ;;  %vm11301_vm0 = vcmask 64512  }
 0x893   : > { %5425 = vmatpush.msrb.mxu2 %v5401_v45  ;;  %5721 = vrot.lane.b32.xlu2 %v10560_v43, %s11232_s27  ;;  %v5390_v51 = vsel %vm11165_vm12, %v5350_v16, %v5388_v20  ;;  %vm11296_vm12 = vcmask 588800   ;;  %v5434_v4 = vld [vmem:[%s11134_s13] sm:$0xff] }
 0x896   : > { %v5240_v43 = vpop.xlane.xlu0 %5239  ;;  %v5246_v24 = vpop.xlane.xlu2 %5245 }
 0x897   : > { %v5352_v15 = vperm.slane %v5240_v43, %v10573_v40  ;;  %v5355_v11 = vperm.slane %v5246_v24, %v10573_v40  ;;  %5667 = vrot.lane.b32.xlu0 %v10544_v14, %s11237_s24  ;;  %v5584_v40 = vld [vmem:[#allocation2 + $0xa9] sm:$0xff]  ;;  %v5772_v14 = vpop.permute.xlu1 %5771 }
 0x898   : > { %v10693_v30 = vpack.c.bf16 %v5584_v40, %v5584_v40 }
 0x899   : > { %v5353_v17 = vsel %vm5334_vm13, %v5352_v15, %v5351_v60  ;;  %v5356_v3 = vsel %vm5334_vm13, %v5355_v11, %v5354_v5  ;;  %vm5404_vm13 = vcmask 130048   ;;  %v6161_v5 = vpack.c.bf16 %v6153_v49, %v6153_v49 }
 0x89a   : > { %v5392_v27 = vsel %vm11164_vm2, %v5353_v17, %v5390_v51  ;;  %5615 = vrot.lane.b32.xlu1 %v10693_v30, %s11289_s3 }
 0x89b   : > { %v5394_v59 = vsel %vm11163_vm11, %v5356_v3, %v5392_v27  ;;  %5779 = vrot.lane.b32.xlu2 %v5925_v37, %s11231_s16  ;;  %vm11290_vm11 = vcmask 585216  }
 0x89c   : > { %5426 = vmatpush.msrb.mxu2 %v5394_v59  ;;  %vm11291_vm2 = vmmov %vm11290_vm11 }
 0x89e   : > { %v5658_v29 = vpop.permute.xlu2 %5657  ;;  %6111 = vmatpush.bf16.msra.mxu2 %v6106_v7 }
 0x89f   : > { %5777 = vrot.lane.b32.xlu0 %v10584_v53, %s11231_s16  ;;  %v5882_v35 = vpop.permute.xlu1 %5881 }
 0x8a2   : > { %5725 = vrot.lane.b32.xlu1 %v10623_v10, %s11232_s27  ;;  %v5752_v10 = vld [vmem:[#allocation2 + $0xc1] sm:$0xff]  ;;  %6112 = vmatpush.bf16.msra.mxu2 %v7338_v9 }
 0x8a3   : > { %5889 = vrot.lane.b32.xlu2 %v10568_v26, %s11235_s28  ;;  %v5295_v26 = vld [vmem:[%s11132_s11] sm:$0xff]  ;;  %v10718_v62 = vpack.c.bf16 %v5752_v10, %v5752_v10 }
 0x8a4   : > { %7200 = vmatmul.msk.f32.vlgmr.msrb.gmra.mxu2 %vm5404_vm13, %v5295_v26 }
 0x8a6   : > { %v5770_v33 = vpop.permute.xlu2 %5769  ;;  %6113 = vmatpush.bf16.msra.mxu2 %v7337_v57 }
 0x8a7   : > { %5835 = vrot.lane.b32.xlu0 %v10673_v18, %s11233_s17  ;;  %v5940_v44 = vpop.permute.xlu1 %5939 }
 0x8a9   : > { %v5602_v53 = vpop.permute.xlu0 %5601 }
 0x8aa   : > { %5625 = vst.msk [vmem:[#allocation3] sm:$0xf] %vm984_vm3, %v5602_v53  ;;  %5783 = vrot.lane.b32.xlu1 %v10718_v62, %s11231_s16  ;;  %6114 = vmatpush.bf16.msra.mxu2 %v7336_v50 }
 0x8ab   : > { %5681 = vst.msk [vmem:[#allocation3] sm:$0xf] %vm1209_vm4, %v5658_v29  ;;  %5947 = vrot.lane.b32.xlu2 %v10693_v30, %s11234_s18 }
 0x8ac   : > { %5737 = vst.msk [vmem:[#allocation3] sm:$0xf] %vm1434_vm5, %v5714_v61  ;;  %7201 = vmatmul.msk.f32.gmra.mxu2 %vm5404_vm13, %v5296_v52  ;;  %v5864_v61 = vld [vmem:[#allocation2 + $0xd8] sm:$0xff] }
 0x8ad   : > { %5793 = vst.msk [vmem:[#allocation3] sm:$0xf] %vm1659_vm6, %v5770_v33 }
 0x8ae   : > { %v5828_v0 = vpop.permute.xlu2 %5827  ;;  %6115 = vmatpush.bf16.msra.mxu2 %v7335_v63  ;;  %v5435_v63 = vld [vmem:[%s11134_s13 + $0x8] sm:$0xff] }
 0x8af   : > { %5945 = vrot.lane.b32.xlu0 %v5925_v37, %s11234_s18  ;;  %v5606_v19 = vpop.permute.xlu1 %5605  ;;  %5458 = vmatpush.msrb.mxu3 %v5435_v63 }
 0x8b0   : > { %5627 = vst.msk [vmem:[#allocation3 + $0x8] sm:$0xf] %vm984_vm3, %v5606_v19 }
 0x8b1   : > { %v5660_v36 = vpop.permute.xlu0 %5659  ;;  %5459 = vmatpush.msrb.mxu3 %v5434_v4 }
 0x8b2   : > { %5682 = vst.msk [vmem:[#allocation3 + $0x4] sm:$0xf] %vm1209_vm4, %v5660_v36  ;;  %5893 = vrot.lane.b32.xlu1 %v5704_v56, %s11235_s28 }
 0x8b3   : > { %5613 = vrot.lane.b32.xlu2 %v5925_v37, %s11289_s3 }
 0x8b6   : > { %v5938_v48 = vpop.permute.xlu2 %5937 }
 0x8b7   : > { %6003 = vrot.lane.b32.xlu0 %v5982_v31, %s11236_s1  ;;  %v5664_v41 = vpop.permute.xlu1 %5663 }
 0x8b9   : > { %v5716_v23 = vpop.permute.xlu0 %5715 }
 0x8ba   : > { %5738 = vst.msk [vmem:[#allocation3 + $0x4] sm:$0xf] %vm1434_vm5, %v5716_v23  ;;  %5951 = vrot.lane.b32.xlu1 %v10749_v13, %s11234_s18 }
 0x8bb   : > { %5794 = vst.msk [vmem:[#allocation3 + $0x4] sm:$0xf] %vm1659_vm6, %v5772_v14  ;;  %5671 = vrot.lane.b32.xlu2 %v5982_v31, %s11237_s24 }
 0x8bc   : > { %5850 = vst.msk [vmem:[#allocation3 + $0x4] sm:$0xf] %vm1884_vm7, %v5828_v0 }
 0x8be   : > { %v5996_v25 = vpop.permute.xlu2 %5995 }
 0x8bf   : > { %5669 = vrot.lane.b32.xlu0 %v10673_v18, %s11237_s24  ;;  %v5774_v6 = vpop.permute.xlu1 %5773  ;;  %v5976_v18 = vld [vmem:[#allocation2 + $0xda] sm:$0xff] }
 0x8c0   : > { %v10776_v24 = vpack.c.bf16 %v5976_v18, %v5976_v18 }
 0x8c1   : > { %v5826_v39 = vpop.permute.xlu0 %5825 }
 0x8c2   : > { %5849 = vst.msk [vmem:[#allocation3] sm:$0xf] %vm1884_vm7, %v5826_v39  ;;  %6201 = vrot.lane.b32.xlu1 %v10484_v12, %s11289_s3  ;;  %v10770_v12 = vpack.c.bf16 %v5864_v61, %v5864_v61 }
 0x8c3   : > { %5905 = vst.msk [vmem:[#allocation3] sm:$0xf] %vm2110_vm8, %v5882_v35  ;;  %5781 = vrot.lane.b32.xlu2 %v10693_v30, %s11231_s16 }
 0x8c4   : > { %5961 = vst.msk [vmem:[#allocation3] sm:$0xf] %vm2335_vm9, %v5938_v48 }
 0x8c6   : > { %v5662_v45 = vpop.permute.xlu2 %5661 }
 0x8c7   : > { %5727 = vrot.lane.b32.xlu0 %v5704_v56, %s11232_s27  ;;  %5683 = vst.msk [vmem:[#allocation3 + $0x8] sm:$0xf] %vm1209_vm4, %v5662_v45  ;;  %v5832_v1 = vpop.permute.xlu1 %5831 }
 0x8c9   : > { %v5884_v47 = vpop.permute.xlu0 %5883 }
 0x8ca   : > { %5906 = vst.msk [vmem:[#allocation3 + $0x4] sm:$0xf] %vm2110_vm8, %v5884_v47 }
 0x8cb   : > { %5962 = vst.msk [vmem:[#allocation3 + $0x4] sm:$0xf] %vm2335_vm9, %v5940_v44  ;;  %5839 = vrot.lane.b32.xlu2 %v5983_v32, %s11233_s17 }
 0x8cc   : > { %6018 = vst.msk [vmem:[#allocation3 + $0x4] sm:$0xf] %vm11290_vm11, %v5996_v25  ;;  %vm11292_vm11 = vcmask 60416  }
 0x8ce   : > { %v5720_v42 = vpop.permute.xlu2 %5719 }
 0x8cf   : > { %5837 = vrot.lane.b32.xlu0 %v5982_v31, %s11233_s17  ;;  %v5942_v16 = vpop.permute.xlu1 %5941 }
 0x8d1   : > { %v5994_v54 = vpop.permute.xlu0 %5993 }
 0x8d2   : > { %6017 = vst.msk [vmem:[#allocation3] sm:$0xf] %vm11291_vm2, %v5994_v54  ;;  %vm11293_vm2 = vcmask 588800  }
 0x8d3   : > { %5949 = vrot.lane.b32.xlu2 %v10718_v62, %s11234_s18  ;;  %v7331_v43 = vld [vmem:[#allocation3] sm:$0xf0] }
 0x8d6   : > { %v5830_v21 = vpop.permute.xlu2 %5829 }
 0x8d7   : > { %5895 = vrot.lane.b32.xlu0 %v10770_v12, %s11235_s28  ;;  %v6000_v20 = vpop.permute.xlu1 %5999 }
 0x8d9   : > { %v7206_v38 = vld [vmem:[#allocation3] sm:$0xf]  ;;  %v5608_v60 = vpop.permute.xlu0 %5607 }
 0x8da   : > { %6169 = vst.msk [vmem:[#allocation3] sm:$0xf] %vm11292_vm11, %v6161_v5  ;;  %v7207_v15 = vor.u32 %v7331_v43, %v7206_v38  ;;  %vm11294_vm11 = vcmask 585216  }
 0x8db   : > { %5628 = vst.msk [vmem:[#allocation3 + $0xc] sm:$0xf] %vm984_vm3, %v5608_v60  ;;  %6007 = vrot.lane.b32.xlu2 %v10776_v24, %s11236_s1 }
 0x8dc   : > { %5684 = vst.msk [vmem:[#allocation3 + $0xc] sm:$0xf] %vm1209_vm4, %v5664_v41  ;;  %7236 = vmatmul.msk.bf16.vlgmr.msra.gmra.mxu2 %vm11293_vm2, %v7207_v15  ;;  %vm11295_vm2 = vmmov %vm11294_vm11 }
 0x8dd   : > { %5740 = vst.msk [vmem:[#allocation3 + $0xc] sm:$0xf] %vm1434_vm5, %v5720_v42 }
 0x8de   : > { %v5888_v11 = vpop.permute.xlu2 %5887 }
 0x8df   : > { %6005 = vrot.lane.b32.xlu0 %v5983_v32, %s11236_s1  ;;  %v5666_v51 = vpop.permute.xlu1 %5665  ;;  %v10845_v32 = vld [vmem:[%s11128_s7] ss:$0 sm:$0xff] }
 0x8e1   : > { %v5718_v17 = vpop.permute.xlu0 %5717 }
 0x8e2   : > { %5739 = vst.msk [vmem:[#allocation3 + $0x8] sm:$0xf] %vm1434_vm5, %v5718_v17 }
 0x8e3   : > { %5795 = vst.msk [vmem:[#allocation3 + $0x8] sm:$0xf] %vm1659_vm6, %v5774_v6  ;;  %6257 = vrot.lane.b32.xlu2 %v10490_v46, %s11237_s24 }
 0x8e4   : > { %5851 = vst.msk [vmem:[#allocation3 + $0x8] sm:$0xf] %vm1884_vm7, %v5830_v21 }
 0x8e6   : > { %v5998_v3 = vpop.permute.xlu2 %5997 }
 0x8e7   : > { %v5724_v40 = vpop.permute.xlu1 %5723 }
 0x8e9   : > { %v5776_v37 = vpop.permute.xlu0 %5775 }
 0x8ea   : > { %5796 = vst.msk [vmem:[#allocation3 + $0xc] sm:$0xf] %vm1659_vm6, %v5776_v37 }
 0x8eb   : > { %5852 = vst.msk [vmem:[#allocation3 + $0xc] sm:$0xf] %vm1884_vm7, %v5832_v1 }
 0x8ec   : > { %5908 = vst.msk [vmem:[#allocation3 + $0xc] sm:$0xf] %vm2110_vm8, %v5888_v11 }
 0x8ee   : > { %v5612_v27 = vpop.permute.xlu2 %5611 }
 0x8ef   : > { %5630 = vst.msk [vmem:[#allocation3 + $0x14] sm:$0xf] %vm984_vm3, %v5612_v27  ;;  %v5834_v30 = vpop.permute.xlu1 %5833 }
 0x8f1   : > { %v5886_v59 = vpop.permute.xlu0 %5885 }
 0x8f2   : > { %5907 = vst.msk [vmem:[#allocation3 + $0x8] sm:$0xf] %vm2110_vm8, %v5886_v59 }
 0x8f3   : > { %5963 = vst.msk [vmem:[#allocation3 + $0x8] sm:$0xf] %vm2335_vm9, %v5942_v16 }
 0x8f4   : > { %6019 = vst.msk [vmem:[#allocation3 + $0x8] sm:$0xf] %vm11294_vm11, %v5998_v3  ;;  %vm11298_vm11 = vmmov %vm11295_vm2 }
 0x8f6   : > { %v5722_v46 = vpop.permute.xlu2 %5721 }
 0x8f7   : > { %v5892_v33 = vpop.permute.xlu1 %5891 }
 0x8f9   : > { %v5944_v14 = vpop.permute.xlu0 %5943 }
 0x8fa   : > { %5964 = vst.msk [vmem:[#allocation3 + $0xc] sm:$0xf] %vm2335_vm9, %v5944_v14 }
 0x8fb   : > { %6020 = vst.msk [vmem:[#allocation3 + $0xc] sm:$0xf] %vm11295_vm2, %v6000_v20 }
 0x8fe   : > { %v5780_v29 = vpop.permute.xlu2 %5779 }
 0x8ff   : > { %v6002_v28 = vpop.permute.xlu1 %6001 }
 0x901   : > { %v5610_v35 = vpop.permute.xlu0 %5609 }
 0x902   : > { %5629 = vst.msk [vmem:[#allocation3 + $0x10] sm:$0xf] %vm984_vm3, %v5610_v35  ;;  %v7332_v34 = vld [vmem:[#allocation3 + $0x8] sm:$0xff] }
 0x903   : > { %5685 = vst.msk [vmem:[#allocation3 + $0x10] sm:$0xf] %vm1209_vm4, %v5666_v51  ;;  %7237 = vmatmul.msk.bf16.gmra.mxu2 %vm11296_vm12, %v7332_v34  ;;  %vm11297_vm12 = vmmov %vm11295_vm2  ;;  %vm11299_vm2 = vcmask 588800  }
 0x904   : > { %5741 = vst.msk [vmem:[#allocation3 + $0x10] sm:$0xf] %vm1434_vm5, %v5722_v46 }
 0x906   : > { %v5890_v58 = vpop.permute.xlu2 %5889 }
 0x909   : > { %v5668_v53 = vpop.permute.xlu0 %5667 }
 0x90a   : > { %5686 = vst.msk [vmem:[#allocation3 + $0x14] sm:$0xf] %vm1209_vm4, %v5668_v53 }
 0x90b   : > { %5742 = vst.msk [vmem:[#allocation3 + $0x14] sm:$0xf] %vm1434_vm5, %v5724_v40 }
 0x90c   : > { %5798 = vst.msk [vmem:[#allocation3 + $0x14] sm:$0xf] %vm1659_vm6, %v5780_v29  ;;  %v5616_v7 = vpop.permute.xlu1 %5615 }
 0x90d   : > { %5632 = vst.msk [vmem:[#allocation3 + $0x1c] sm:$0xf] %vm984_vm3, %v5616_v7 }
 0x90e   : > { %v5948_v26 = vpop.permute.xlu2 %5947 }
 0x911   : > { %v5778_v10 = vpop.permute.xlu0 %5777 }
 0x912   : > { %5797 = vst.msk [vmem:[#allocation3 + $0x10] sm:$0xf] %vm1659_vm6, %v5778_v10 }
 0x913   : > { %5853 = vst.msk [vmem:[#allocation3 + $0x10] sm:$0xf] %vm1884_vm7, %v5834_v30 }
 0x914   : > { %5909 = vst.msk [vmem:[#allocation3 + $0x10] sm:$0xf] %vm2110_vm8, %v5890_v58  ;;  %v5726_v36 = vpop.permute.xlu1 %5725 }
 0x916   : > { %v5614_v44 = vpop.permute.xlu2 %5613 }
 0x917   : > { %5631 = vst.msk [vmem:[#allocation3 + $0x18] sm:$0xf] %vm984_vm3, %v5614_v44 }
 0x919   : > { %v5836_v62 = vpop.permute.xlu0 %5835 }
 0x91a   : > { %5854 = vst.msk [vmem:[#allocation3 + $0x14] sm:$0xf] %vm1884_vm7, %v5836_v62 }
 0x91b   : > { %5910 = vst.msk [vmem:[#allocation3 + $0x14] sm:$0xf] %vm2110_vm8, %v5892_v33 }
 0x91c   : > { %5966 = vst.msk [vmem:[#allocation3 + $0x14] sm:$0xf] %vm2335_vm9, %v5948_v26  ;;  %v5784_v56 = vpop.permute.xlu1 %5783 }
 0x91e   : > { %v5672_v9 = vpop.permute.xlu2 %5671 }
 0x91f   : > { %5688 = vst.msk [vmem:[#allocation3 + $0x1c] sm:$0xf] %vm1209_vm4, %v5672_v9 }
 0x921   : > { %v5946_v0 = vpop.permute.xlu0 %5945 }
 0x922   : > { %5965 = vst.msk [vmem:[#allocation3 + $0x10] sm:$0xf] %vm2335_vm9, %v5946_v0 }
 0x923   : > { %6021 = vst.msk [vmem:[#allocation3 + $0x10] sm:$0xf] %vm11297_vm12, %v6002_v28  ;;  %vm11300_vm12 = vmmov %vm11298_vm11 }
 0x924   : > { %v5894_v52 = vpop.permute.xlu1 %5893 }
 0x926   : > { %v5782_v2 = vpop.permute.xlu2 %5781 }
 0x927   : > { %v5428_v25 = vpop.f32.mrf.mxu2 }
 0x928   : > { %7202 = vmatmul.msk.f32.vlgmr.msrb.gmra.mxu3 %vm5404_vm13, %v5428_v25  ;;  %v5437_v25 = vstv %s5436_s9  ;;  %s6897_s9 = sshll.u32 %s10904_s26, 4  ;;  %s6898_s9 = int_to_ptr.vmem [resolvable:$true] %s6897_s9 }
 0x929   : > { %v6004_v55 = vpop.permute.xlu0 %6003 }
 0x92a   : > { %6022 = vst.msk [vmem:[#allocation3 + $0x14] sm:$0xf] %vm11298_vm11, %v6004_v55 }
 0x92c   : > { %v5952_v41 = vpop.permute.xlu1 %5951 }
 0x92e   : > { %v5840_v48 = vpop.permute.xlu2 %5839 }
 0x92f   : > { %v5431_v22 = vpop.f32.mrf.mxu2 }
 0x930   : > { %7203 = vmatmul.msk.f32.gmra.mxu3 %vm5404_vm13, %v5431_v22 }
 0x931   : > { %v5670_v31 = vpop.permute.xlu0 %5669  ;;  %v7333_v57 = vld [vmem:[#allocation3 + $0x10] sm:$0xff] }
 0x932   : > { %5687 = vst.msk [vmem:[#allocation3 + $0x18] sm:$0xf] %vm1209_vm4, %v5670_v31  ;;  %7238 = vmatmul.msk.bf16.gmra.mxu2 %vm11299_vm2, %v7333_v57 }
 0x933   : > { %5743 = vst.msk [vmem:[#allocation3 + $0x18] sm:$0xf] %vm1434_vm5, %v5726_v36 }
 0x934   : > { %5799 = vst.msk [vmem:[#allocation3 + $0x18] sm:$0xf] %vm1659_vm6, %v5782_v2  ;;  %v6202_v0 = vpop.permute.xlu1 %6201 }
 0x935   : > { %6225 = vst.msk [vmem:[#allocation3] sm:$0xf] %vm984_vm3, %v6202_v0 }
 0x936   : > { %v5950_v50 = vpop.permute.xlu2 %5949 }
 0x939   : > { %v5728_v19 = vpop.permute.xlu0 %5727 }
 0x93a   : > { %5744 = vst.msk [vmem:[#allocation3 + $0x1c] sm:$0xf] %vm1434_vm5, %v5728_v19 }
 0x93b   : > { %5800 = vst.msk [vmem:[#allocation3 + $0x1c] sm:$0xf] %vm1659_vm6, %v5784_v56 }
 0x93c   : > { %5856 = vst.msk [vmem:[#allocation3 + $0x1c] sm:$0xf] %vm1884_vm7, %v5840_v48 }
 0x93e   : > { %v6008_v45 = vpop.permute.xlu2 %6007 }
 0x941   : > { %v5838_v23 = vpop.permute.xlu0 %5837 }
 0x942   : > { %5855 = vst.msk [vmem:[#allocation3 + $0x18] sm:$0xf] %vm1884_vm7, %v5838_v23 }
 0x943   : > { %5911 = vst.msk [vmem:[#allocation3 + $0x18] sm:$0xf] %vm2110_vm8, %v5894_v52 }
 0x944   : > { %5967 = vst.msk [vmem:[#allocation3 + $0x18] sm:$0xf] %vm2335_vm9, %v5950_v50 }
 0x946   : > { %v6258_v36 = vpop.permute.xlu2 %6257 }
 0x947   : > { %6281 = vst.msk [vmem:[#allocation3] sm:$0xf] %vm1209_vm4, %v6258_v36 }
 0x949   : > { %v5896_v39 = vpop.permute.xlu0 %5895 }
 0x94a   : > { %5912 = vst.msk [vmem:[#allocation3 + $0x1c] sm:$0xf] %vm2110_vm8, %v5896_v39 }
 0x94b   : > { %5968 = vst.msk [vmem:[#allocation3 + $0x1c] sm:$0xf] %vm2335_vm9, %v5952_v41 }
 0x94c   : > { %6024 = vst.msk [vmem:[#allocation3 + $0x1c] sm:$0xf] %vm11300_vm12, %v6008_v45  ;;  %vm11302_vm12 = vmmov %vm11301_vm0 }
 0x951   : > { %v6006_v6 = vpop.permute.xlu0 %6005 }
 0x952   : > { %6023 = vst.msk [vmem:[#allocation3 + $0x18] sm:$0xf] %vm11298_vm11, %v6006_v6  ;;  %vm11303_vm11 = vcmask 60416  }
 0x959   : > { %v7334_v47 = vld [vmem:[#allocation3 + $0x18] sm:$0xff] }
 0x95a   : > { %7239 = vmatmul.msk.bf16.gmra.mxu2 %vm11299_vm2, %v7334_v47  ;;  %vm11305_vm2 = vmmov %vm11302_vm12  ;;  %v6641_v47 = vld [vmem:[%s11127_s6 + $0x20] sm:$0xf] }
 0x95f   : > { %v6117_v42 = vpop.f32.mrf.mxu2 }
 0x960   : > { %v6118_v1 = vadd.f32 %v10845_v32, %v6117_v42 }
 0x962   : > { %v6137_v61 = vmax.f32 %v6118_v1, 0.0 }
 0x964   : > { %6145 = vst.msk [vmem:[#allocation2 + $0x19] sm:$0xff] %vm11301_vm0, %v6137_v61  ;;  %vm11304_vm0 = vmmov %vm11303_vm11  ;;  %v6683_v61 = vunpack.c.l.b16 %v6641_v47 }
 0x967   : > { %v6119_v54 = vpop.f32.mrf.mxu2 }
 0x968   : > { %v6120_v49 = vadd.f32 %v10845_v32, %v6119_v54 }
 0x96a   : > { %v6138_v18 = vmax.f32 %v6120_v49, 0.0 }
 0x96b   : > { %v6234_v5 = vld [vmem:[#allocation2 + $0x1a] sm:$0xff] }
 0x96c   : > { %v6178_v21 = vld [vmem:[#allocation2 + $0x19] sm:$0xff]  ;;  %6146 = vst.msk [vmem:[#allocation2 + $0x31] sm:$0xff] %vm11302_vm12, %v6138_v18  ;;  %v6242_v43 = vpack.c.bf16 %v6234_v5, %v6234_v5  ;;  %vm11306_vm12 = vmmov %vm11305_vm2 }
 0x96d   : > { %v6289_v16 = vld [vmem:[#allocation2 + $0x18] sm:$0xff]  ;;  %v6186_v38 = vpack.c.bf16 %v6178_v21, %v6178_v21  ;;  %v6688_v21 = vpack.c.b16 %v6683_v61, %v6683_v61 }
 0x96e   : > { %v6297_v60 = vpack.c.bf16 %v6289_v16, %v6289_v16  ;;  %6259 = vrot.lane.b32.xlu1 %v6242_v43, %s11237_s24 }
 0x96f   : > { %6203 = vrot.lane.b32.xlu0 %v6186_v38, %s11289_s3 }
 0x970   : > { %6170 = vst.msk [vmem:[#allocation3 + $0x4] sm:$0xf] %vm11303_vm11, %v6297_v60  ;;  %vm11307_vm11 = vmmov %vm11304_vm0 }
 0x973   : > { %v6290_v15 = vld [vmem:[#allocation2 + $0x30] sm:$0xff] }
 0x974   : > { %v6298_v11 = vpack.c.bf16 %v6290_v15, %v6290_v15  ;;  %v6402_v20 = vld [vmem:[#allocation2 + $0x32] sm:$0xff] }
 0x975   : > { %v6346_v17 = vld [vmem:[#allocation2 + $0x31] sm:$0xff]  ;;  %v6410_v3 = vpack.c.bf16 %v6402_v20, %v6402_v20 }
 0x976   : > { %6315 = vrot.lane.b32.xlu2 %v6298_v11, %s11232_s27  ;;  %6369 = vrot.lane.b32.xlu1 %v6186_v38, %s11231_s16  ;;  %6171 = vst.msk [vmem:[#allocation3 + $0x8] sm:$0xf] %vm11304_vm0, %v6298_v11  ;;  %v6354_v51 = vpack.c.bf16 %v6346_v17, %v6346_v17  ;;  %v6706_v38 = vsel %vm2794_vm10, %v6688_v21, 0  ;;  %vm11310_vm10 = vmmov %vm11305_vm2 }
 0x977   : > { %6313 = vrot.lane.b32.xlu0 %v6297_v60, %s11232_s27  ;;  %6711 = vmatpush.bf16.msra.mxu3 %v6706_v38  ;;  %v7346_v60 = vld [vmem:[%s11127_s6 + $0x18] sm:$0xff] }
 0x97b   : > { %6712 = vmatpush.bf16.msra.mxu3 %v7346_v60 }
 0x97e   : > { %6425 = vrot.lane.b32.xlu2 %v6242_v43, %s11233_s17  ;;  %6427 = vrot.lane.b32.xlu1 %v6410_v3, %s11233_s17 }
 0x97f   : > { %6371 = vrot.lane.b32.xlu0 %v6354_v51, %s11231_s16 }
 0x986   : > { %6537 = vrot.lane.b32.xlu1 %v6354_v51, %s11234_s18  ;;  %v6122_v37 = vpop.f32.mrf.mxu2 }
 0x987   : > { %6481 = vrot.lane.b32.xlu0 %v6298_v11, %s11235_s28  ;;  %v6123_v27 = vadd.f32 %v10845_v32, %v6122_v37 }
 0x989   : > { %v6139_v59 = vmax.f32 %v6123_v27, 0.0 }
 0x98b   : > { %6147 = vst.msk [vmem:[#allocation2 + $0x49] sm:$0xff] %vm11305_vm2, %v6139_v59 }
 0x98e   : > { %v6124_v40 = vpop.f32.mrf.mxu2 }
 0x98f   : > { %v6125_v46 = vadd.f32 %v10845_v32, %v6124_v40  ;;  %v7345_v40 = vld [vmem:[%s11127_s6 + $0x10] sm:$0xff] }
 0x990   : > { %6713 = vmatpush.bf16.msra.mxu3 %v7345_v40 }
 0x991   : > { %v6140_v14 = vmax.f32 %v6125_v46, 0.0  ;;  %v7344_v46 = vld [vmem:[%s11127_s6 + $0x8] sm:$0xff] }
 0x992   : > { %v6570_v30 = vld [vmem:[#allocation2 + $0x4a] sm:$0xff] }
 0x993   : > { %v6514_v29 = vld [vmem:[#allocation2 + $0x49] sm:$0xff]  ;;  %6148 = vst.msk [vmem:[#allocation2 + $0x61] sm:$0xff] %vm11306_vm12, %v6140_v14  ;;  %v6578_v33 = vpack.c.bf16 %v6570_v30, %v6570_v30  ;;  %vm11308_vm12 = vmmov %vm11305_vm2 }
 0x994   : > { %v6458_v35 = vld [vmem:[#allocation2 + $0x48] sm:$0xff]  ;;  %v6522_v34 = vpack.c.bf16 %v6514_v29, %v6514_v29  ;;  %6714 = vmatpush.bf16.msra.mxu3 %v7344_v46 }
 0x995   : > { %v6466_v58 = vpack.c.bf16 %v6458_v35, %v6458_v35  ;;  %6595 = vrot.lane.b32.xlu1 %v6578_v33, %s11236_s1 }
 0x996   : > { %6539 = vrot.lane.b32.xlu0 %v6522_v34, %s11234_s18 }
 0x997   : > { %6172 = vst.msk [vmem:[#allocation3 + $0xc] sm:$0xf] %vm11307_vm11, %v6466_v58  ;;  %6483 = vrot.lane.b32.xlu2 %v6466_v58, %s11235_s28  ;;  %vm11309_vm11 = vmmov %vm11304_vm0 }
 0x99a   : > { %v6292_v53 = vld [vmem:[#allocation2 + $0x60] sm:$0xff] }
 0x99b   : > { %v6300_v28 = vpack.c.bf16 %v6292_v53, %v6292_v53  ;;  %v6404_v26 = vld [vmem:[#allocation2 + $0x62] sm:$0xff] }
 0x99c   : > { %v6348_v10 = vld [vmem:[#allocation2 + $0x61] sm:$0xff]  ;;  %v6412_v7 = vpack.c.bf16 %v6404_v26, %v6404_v26 }
 0x99d   : > { %6261 = vrot.lane.b32.xlu1 %v6410_v3, %s11237_s24  ;;  %6173 = vst.msk [vmem:[#allocation3 + $0x10] sm:$0xf] %vm11304_vm0, %v6300_v28  ;;  %v6356_v44 = vpack.c.bf16 %v6348_v10, %v6348_v10 }
 0x99e   : > { %6205 = vrot.lane.b32.xlu0 %v6354_v51, %s11289_s3 }
 0x99f   : > { %6593 = vrot.lane.b32.xlu2 %v6410_v3, %s11236_s1 }
 0x9a5   : > { %6319 = vrot.lane.b32.xlu1 %v6300_v28, %s11232_s27 }
 0x9a6   : > { %6263 = vrot.lane.b32.xlu0 %v6578_v33, %s11237_s24 }
 0x9a7   : > { %6207 = vrot.lane.b32.xlu2 %v6522_v34, %s11289_s3 }
 0x9ab   : > { %v5461_v41 = vpop.f32.mrf.mxu3 }
 0x9ac   : > { %v10901_v39 = vadd.f32 %v5461_v41, %v5437_v25 }
 0x9ad   : > { %6429 = vrot.lane.b32.xlu1 %v6578_v33, %s11233_s17 }
 0x9ae   : > { %6373 = vrot.lane.b32.xlu0 %v6522_v34, %s11231_s16  ;;  %5467 = vst.msk [vmem:[%s10904_s26] sm:$0xff] %vm5404_vm13, %v10901_v39  ;;  %v7343_v34 = vld [vmem:[%s11127_s6] sm:$0xff] }
 0x9af   : > { %6317 = vrot.lane.b32.xlu2 %v6466_v58, %s11232_s27  ;;  %6715 = vmatpush.bf16.msra.mxu3 %v7343_v34 }
 0x9b3   : > { %v5464_v45 = vpop.f32.mrf.mxu3 }
 0x9b4   : > { %v10911_v22 = vadd.f32 %v5464_v45, %v5437_v25 }
 0x9b5   : > { %v6127_v62 = vpop.f32.mrf.mxu2 }
 0x9b6   : > { %6431 = vrot.lane.b32.xlu0 %v6412_v7, %s11233_s17  ;;  %v6128_v9 = vadd.f32 %v10845_v32, %v6127_v62  ;;  %5468 = vst.msk [vmem:[%s10904_s26 + $0x8] sm:$0xff] %vm5404_vm13, %v10911_v22 }
 0x9b7   : > { %6375 = vrot.lane.b32.xlu2 %v6356_v44, %s11231_s16 }
 0x9b8   : > { %v6141_v55 = vmax.f32 %v6128_v9, 0.0 }
 0x9ba   : > { %6149 = vst.msk [vmem:[#allocation2 + $0x79] sm:$0xff] %vm11305_vm2, %v6141_v55 }
 0x9bd   : > { %v6129_v2 = vpop.f32.mrf.mxu2 }
 0x9be   : > { %6541 = vrot.lane.b32.xlu0 %v6356_v44, %s11234_s18  ;;  %v6130_v31 = vadd.f32 %v10845_v32, %v6129_v2 }
 0x9bf   : > { %6485 = vrot.lane.b32.xlu2 %v6300_v28, %s11235_s28 }
 0x9c0   : > { %v6142_v57 = vmax.f32 %v6130_v31, 0.0 }
 0x9c1   : > { %v6460_v56 = vld [vmem:[#allocation2 + $0x78] sm:$0xff] }
 0x9c2   : > { %v6572_v48 = vld [vmem:[#allocation2 + $0x7a] sm:$0xff]  ;;  %6150 = vst.msk [vmem:[#allocation2 + $0x91] sm:$0xff] %vm11308_vm12, %v6142_v57  ;;  %v6468_v52 = vpack.c.bf16 %v6460_v56, %v6460_v56  ;;  %vm11311_vm12 = vmmov %vm11304_vm0 }
 0x9c3   : > { %v6516_v19 = vld [vmem:[#allocation2 + $0x79] sm:$0xff]  ;;  %v6580_v50 = vpack.c.bf16 %v6572_v48, %v6572_v48 }
 0x9c4   : > { %v6524_v23 = vpack.c.bf16 %v6516_v19, %v6516_v19  ;;  %6487 = vrot.lane.b32.xlu1 %v6468_v52, %s11235_s28  ;;  %6174 = vst.msk [vmem:[#allocation3 + $0x14] sm:$0xf] %vm11309_vm11, %v6468_v52  ;;  %vm11312_vm11 = vcmask 585216  }
 0x9c6   : > { %6599 = vrot.lane.b32.xlu0 %v6580_v50, %s11236_s1 }
 0x9c7   : > { %6543 = vrot.lane.b32.xlu2 %v6524_v23, %s11234_s18 }
 0x9c9   : > { %v6294_v63 = vld [vmem:[#allocation2 + $0x90] sm:$0xff] }
 0x9ca   : > { %v6302_v4 = vpack.c.bf16 %v6294_v63, %v6294_v63  ;;  %v6350_v18 = vld [vmem:[#allocation2 + $0x91] sm:$0xff] }
 0x9cb   : > { %v6406_v16 = vld [vmem:[#allocation2 + $0x92] sm:$0xff]  ;;  %v6358_v43 = vpack.c.bf16 %v6350_v18, %v6350_v18 }
 0x9cc   : > { %6597 = vrot.lane.b32.xlu1 %v6412_v7, %s11236_s1  ;;  %6175 = vst.msk [vmem:[#allocation3 + $0x18] sm:$0xf] %vm11304_vm0, %v6302_v4  ;;  %v6414_v15 = vpack.c.bf16 %v6406_v16, %v6406_v16  ;;  %vm11313_vm0 = vmmov %vm11312_vm11 }
 0x9ce   : > { %6265 = vrot.lane.b32.xlu0 %v6412_v7, %s11237_s24 }
 0x9cf   : > { %6209 = vrot.lane.b32.xlu2 %v6356_v44, %s11289_s3 }
 0x9d0   : > { %v6316_v42 = vpop.permute.xlu2 %6315 }
 0x9d4   : > { %6211 = vrot.lane.b32.xlu1 %v6524_v23, %s11289_s3 }
 0x9d6   : > { %6323 = vrot.lane.b32.xlu0 %v6302_v4, %s11232_s27 }
 0x9d7   : > { %6267 = vrot.lane.b32.xlu2 %v6580_v50, %s11237_s24 }
 0x9d8   : > { %v6426_v3 = vpop.permute.xlu2 %6425 }
 0x9dc   : > { %6321 = vrot.lane.b32.xlu1 %v6468_v52, %s11232_s27 }
 0x9dd   : > { %v6132_v6 = vpop.f32.mrf.mxu2 }
 0x9de   : > { %6433 = vrot.lane.b32.xlu0 %v6580_v50, %s11233_s17  ;;  %v6133_v1 = vadd.f32 %v10845_v32, %v6132_v6 }
 0x9df   : > { %6377 = vrot.lane.b32.xlu2 %v6524_v23, %s11231_s16 }
 0x9e0   : > { %v6260_v49 = vpop.permute.xlu1 %6259  ;;  %v6143_v5 = vmax.f32 %v6133_v1, 0.0 }
 0x9e1   : > { %v6204_v54 = vpop.permute.xlu0 %6203 }
 0x9e2   : > { %6226 = vst.msk [vmem:[#allocation3 + $0x4] sm:$0xf] %vm984_vm3, %v6204_v54 }
 0x9e3   : > { %6282 = vst.msk [vmem:[#allocation3 + $0x4] sm:$0xf] %vm1209_vm4, %v6260_v49 }
 0x9e4   : > { %6151 = vst.msk [vmem:[#allocation2 + $0xa9] sm:$0xff] %vm11305_vm2, %v6143_v5  ;;  %6379 = vrot.lane.b32.xlu1 %v6358_v43, %s11231_s16  ;;  %vm11314_vm2 = vcmask 588800  }
 0x9e5   : > { %6338 = vst.msk [vmem:[#allocation3 + $0x4] sm:$0xf] %vm1434_vm5, %v6316_v42  ;;  %v6134_v11 = vpop.f32.mrf.mxu2 }
 0x9e6   : > { %v6135_v20 = vadd.f32 %v10845_v32, %v6134_v11 }
 0x9e7   : > { %6435 = vrot.lane.b32.xlu2 %v6414_v15, %s11233_s17 }
 0x9e8   : > { %v6370_v17 = vpop.permute.xlu1 %6369  ;;  %v6144_v51 = vmax.f32 %v6135_v20, 0.0 }
 0x9e9   : > { %v6314_v37 = vpop.permute.xlu0 %6313 }
 0x9ea   : > { %6337 = vst.msk [vmem:[#allocation3] sm:$0xf] %vm1434_vm5, %v6314_v37 }
 0x9eb   : > { %v6462_v27 = vld [vmem:[#allocation2 + $0xa8] sm:$0xff]  ;;  %6152 = vst.msk [vmem:[#allocation2 + $0xc1] sm:$0xff] %vm11310_vm10, %v6144_v51  ;;  %vm11315_vm10 = vmmov %vm11313_vm0 }
 0x9ec   : > { %v6470_v59 = vpack.c.bf16 %v6462_v27, %v6462_v27  ;;  %6393 = vst.msk [vmem:[#allocation3] sm:$0xf] %vm1659_vm6, %v6370_v17  ;;  %6489 = vrot.lane.b32.xlu1 %v6302_v4, %s11235_s28  ;;  %v6518_v32 = vld [vmem:[#allocation2 + $0xa9] sm:$0xff] }
 0x9ed   : > { %6449 = vst.msk [vmem:[#allocation3] sm:$0xf] %vm1884_vm7, %v6426_v3  ;;  %v6526_v35 = vpack.c.bf16 %v6518_v32, %v6518_v32  ;;  %v6574_v33 = vld [vmem:[#allocation2 + $0xaa] sm:$0xff] }
 0x9ee   : > { %6491 = vrot.lane.b32.xlu0 %v6470_v59, %s11235_s28  ;;  %6176 = vst.msk [vmem:[#allocation3 + $0x1c] sm:$0xf] %vm11311_vm12, %v6470_v59  ;;  %v6582_v58 = vpack.c.bf16 %v6574_v33, %v6574_v33  ;;  %vm11316_vm12 = vmmov %vm11313_vm0 }
 0x9ef   : > { %6545 = vrot.lane.b32.xlu2 %v6358_v43, %s11234_s18 }
 0x9f0   : > { %v6428_v14 = vpop.permute.xlu1 %6427 }
 0x9f1   : > { %v6372_v30 = vpop.permute.xlu0 %6371  ;;  %v6484_v29 = vpop.permute.xlu2 %6483 }
 0x9f2   : > { %6394 = vst.msk [vmem:[#allocation3 + $0x4] sm:$0xf] %vm1659_vm6, %v6372_v30  ;;  %v6296_v7 = vld [vmem:[#allocation2 + $0xc0] sm:$0xff] }
 0x9f3   : > { %6450 = vst.msk [vmem:[#allocation3 + $0x4] sm:$0xf] %vm1884_vm7, %v6428_v14  ;;  %v6304_v44 = vpack.c.bf16 %v6296_v7, %v6296_v7  ;;  %v6352_v0 = vld [vmem:[#allocation2 + $0xc1] sm:$0xff] }
 0x9f4   : > { %6506 = vst.msk [vmem:[#allocation3 + $0x4] sm:$0xf] %vm2110_vm8, %v6484_v29  ;;  %6547 = vrot.lane.b32.xlu1 %v6526_v35, %s11234_s18  ;;  %v6360_v36 = vpack.c.bf16 %v6352_v0, %v6352_v0  ;;  %v6408_v57 = vld [vmem:[#allocation2 + $0xc2] sm:$0xff] }
 0x9f5   : > { %v6416_v19 = vpack.c.bf16 %v6408_v57, %v6408_v57 }
 0x9f6   : > { %6601 = vrot.lane.b32.xlu0 %v6414_v15, %s11236_s1 }
 0x9f7   : > { %6603 = vrot.lane.b32.xlu2 %v6582_v58, %s11236_s1 }
 0x9f8   : > { %v6538_v53 = vpop.permute.xlu1 %6537 }
 0x9f9   : > { %v6482_v28 = vpop.permute.xlu0 %6481  ;;  %v6594_v26 = vpop.permute.xlu2 %6593 }
 0x9fa   : > { %6505 = vst.msk [vmem:[#allocation3] sm:$0xf] %vm2110_vm8, %v6482_v28 }
 0x9fb   : > { %6561 = vst.msk [vmem:[#allocation3] sm:$0xf] %vm2335_vm9, %v6538_v53  ;;  %v7531_v53 = vld [vmem:[%s11129_s8] ss:$0 sm:$0xff] }
 0x9fc   : > { %6617 = vst.msk [vmem:[#allocation3] sm:$0xf] %vm11312_vm11, %v6594_v26  ;;  %6213 = vrot.lane.b32.xlu1 %v6358_v43, %s11289_s3  ;;  %vm11317_vm11 = vmmov %vm11314_vm2 }
 0x9fe   : > { %6215 = vrot.lane.b32.xlu0 %v6526_v35, %s11289_s3 }
 0x9ff   : > { %6269 = vrot.lane.b32.xlu2 %v6414_v15, %s11237_s24 }
 0xa01   : > { %v6208_v10 = vpop.permute.xlu2 %6207 }
 0xa02   : > { %6228 = vst.msk [vmem:[#allocation3 + $0xc] sm:$0xf] %vm984_vm3, %v6208_v10  ;;  %v7532_v10 = vld [vmem:[%s11131_s10] ss:$0 sm:$0xff] }
 0xa04   : > { %6271 = vrot.lane.b32.xlu1 %v6582_v58, %s11237_s24 }
 0xa06   : > { %6325 = vrot.lane.b32.xlu0 %v6470_v59, %s11232_s27 }
 0xa07   : > { %6327 = vrot.lane.b32.xlu2 %v6304_v44, %s11232_s27  ;;  %v6596_v9 = vpop.permute.xlu1 %6595  ;;  %s6877_s27 = sld [smem:[#allocation4]] }
 0xa08   : > { %v6540_v62 = vpop.permute.xlu0 %6539 }
 0xa09   : > { %6562 = vst.msk [vmem:[#allocation3 + $0x4] sm:$0xf] %vm2335_vm9, %v6540_v62  ;;  %v6318_v55 = vpop.permute.xlu2 %6317 }
 0xa0a   : > { %6618 = vst.msk [vmem:[#allocation3 + $0x4] sm:$0xf] %vm11313_vm0, %v6596_v9 }
 0xa0c   : > { %6381 = vrot.lane.b32.xlu1 %v6526_v35, %s11231_s16 }
 0xa0e   : > { %6383 = vrot.lane.b32.xlu0 %v6360_v36, %s11231_s16  ;;  %s7283_s16 = sld [smem:[#allocation8 + $0x1]] }
 0xa0f   : > { %6437 = vrot.lane.b32.xlu2 %v6582_v58, %s11233_s17  ;;  %v6262_v31 = vpop.permute.xlu1 %6261 }
 0xa10   : > { %v6206_v2 = vpop.permute.xlu0 %6205 }
 0xa11   : > { %6227 = vst.msk [vmem:[#allocation3 + $0x8] sm:$0xf] %vm984_vm3, %v6206_v2  ;;  %v6376_v56 = vpop.permute.xlu2 %6375  ;;  %v7339_v48 = vld [vmem:[#allocation3] sm:$0xff] }
 0xa12   : > { %6283 = vst.msk [vmem:[#allocation3 + $0x8] sm:$0xf] %vm1209_vm4, %v6262_v31  ;;  %7272 = vmatmul.msk.bf16.vlgmr.msra.gmra.mxu3 %vm11314_vm2, %v7339_v48  ;;  %vm11318_vm2 = vmmov %vm11313_vm0 }
 0xa13   : > { %6339 = vst.msk [vmem:[#allocation3 + $0x8] sm:$0xf] %vm1434_vm5, %v6318_v55 }
 0xa14   : > { %6439 = vrot.lane.b32.xlu1 %v6416_v19, %s11233_s17  ;;  %s7456_s17 = smul.u32 48, %s7752_s2  ;;  %s6885_s2 = scalar_lea.sflag [#allocation6], %s528_s22 }
 0xa16   : > { %6493 = vrot.lane.b32.xlu0 %v6304_v44, %s11235_s28  ;;  %s6896_s24 = scalar_lea.hbm %s11136_s15, %s7456_s17 }
 0xa17   : > { %6495 = vrot.lane.b32.xlu2 %v10770_v12, %s11235_s28  ;;  %v6320_v50 = vpop.permute.xlu1 %6319  ;;  %s5469_s28 = sld [smem:[#allocation8]]  ;;  %s6899_s0 = sshll.u32 %s6896_s24, 4  ;;  %s6900_s0 = int_to_ptr.hbm [resolvable:$true] %s6899_s0 }
 0xa18   : > { %v6264_v52 = vpop.permute.xlu0 %6263  ;;  %s7578_s4 = sshra.s32 %s6900_s0, 4  ;;  %s7579_s4 = int_to_ptr.hbm [resolvable:$true] %s7578_s4 }
 0xa19   : > { %6284 = vst.msk [vmem:[#allocation3 + $0xc] sm:$0xf] %vm1209_vm4, %v6264_v52  ;;  %v6486_v23 = vpop.permute.xlu2 %6485  ;;  %p7585_p3 = scmp.lt.s32.totalorder %s7579_s4, %s11136_s15 }
 0xa1a   : > { %6340 = vst.msk [vmem:[#allocation3 + $0xc] sm:$0xf] %vm1434_vm5, %v6320_v50 }
 0xa1b   : > { %6396 = vst.msk [vmem:[#allocation3 + $0xc] sm:$0xf] %vm1659_vm6, %v6376_v56 }
 0xa1c   : > { %6549 = vrot.lane.b32.xlu1 %v6360_v36, %s11234_s18 }
 0xa1e   : > { %6551 = vrot.lane.b32.xlu0 %v10749_v13, %s11234_s18 }
 0xa1f   : > { %6605 = vrot.lane.b32.xlu2 %v6416_v19, %s11236_s1  ;;  %v6430_v4 = vpop.permute.xlu1 %6429 }
 0xa20   : > { %v6374_v63 = vpop.permute.xlu0 %6373 }
 0xa21   : > { %6395 = vst.msk [vmem:[#allocation3 + $0x8] sm:$0xf] %vm1659_vm6, %v6374_v63  ;;  %v6544_v12 = vpop.permute.xlu2 %6543 }
 0xa22   : > { %6451 = vst.msk [vmem:[#allocation3 + $0x8] sm:$0xf] %vm1884_vm7, %v6430_v4 }
 0xa23   : > { %6507 = vst.msk [vmem:[#allocation3 + $0x8] sm:$0xf] %vm2110_vm8, %v6486_v23 }
 0xa24   : > { %6607 = vrot.lane.b32.xlu1 %v10776_v24, %s11236_s1 }
 0xa28   : > { %v6432_v25 = vpop.permute.xlu0 %6431 }
 0xa29   : > { %6452 = vst.msk [vmem:[#allocation3 + $0xc] sm:$0xf] %vm1884_vm7, %v6432_v25  ;;  %v6210_v41 = vpop.permute.xlu2 %6209 }
 0xa2a   : > { %6229 = vst.msk [vmem:[#allocation3 + $0x10] sm:$0xf] %vm984_vm3, %v6210_v41 }
 0xa30   : > { %v6542_v13 = vpop.permute.xlu0 %6541 }
 0xa31   : > { %6563 = vst.msk [vmem:[#allocation3 + $0x8] sm:$0xf] %vm2335_vm9, %v6542_v13  ;;  %v6268_v45 = vpop.permute.xlu2 %6267 }
 0xa36   : > { %v6488_v6 = vpop.permute.xlu1 %6487 }
 0xa37   : > { %6508 = vst.msk [vmem:[#allocation3 + $0xc] sm:$0xf] %vm2110_vm8, %v6488_v6 }
 0xa38   : > { %v6600_v47 = vpop.permute.xlu0 %6599  ;;  %6564 = vst.msk [vmem:[#allocation3 + $0xc] sm:$0xf] %vm2335_vm9, %v6544_v12 }
 0xa39   : > { %6620 = vst.msk [vmem:[#allocation3 + $0xc] sm:$0xf] %vm11315_vm10, %v6600_v47  ;;  %v6378_v24 = vpop.permute.xlu2 %6377  ;;  %vm11319_vm10 = vmmov %vm11317_vm11 }
 0xa3e   : > { %v6598_v42 = vpop.permute.xlu1 %6597 }
 0xa3f   : > { %6619 = vst.msk [vmem:[#allocation3 + $0x8] sm:$0xf] %vm11316_vm12, %v6598_v42 }
 0xa40   : > { %v6266_v1 = vpop.permute.xlu0 %6265 }
 0xa41   : > { %6285 = vst.msk [vmem:[#allocation3 + $0x10] sm:$0xf] %vm1209_vm4, %v6266_v1  ;;  %v6436_v18 = vpop.permute.xlu2 %6435 }
 0xa46   : > { %v6212_v61 = vpop.permute.xlu1 %6211  ;;  %v7340_v54 = vld [vmem:[#allocation3 + $0x8] sm:$0xff] }
 0xa47   : > { %6230 = vst.msk [vmem:[#allocation3 + $0x14] sm:$0xf] %vm984_vm3, %v6212_v61  ;;  %7273 = vmatmul.msk.bf16.gmra.mxu3 %vm11317_vm11, %v7340_v54 }
 0xa48   : > { %v6324_v49 = vpop.permute.xlu0 %6323  ;;  %6286 = vst.msk [vmem:[#allocation3 + $0x14] sm:$0xf] %vm1209_vm4, %v6268_v45 }
 0xa49   : > { %6342 = vst.msk [vmem:[#allocation3 + $0x14] sm:$0xf] %vm1434_vm5, %v6324_v49  ;;  %v6546_v16 = vpop.permute.xlu2 %6545 }
 0xa4e   : > { %v6322_v5 = vpop.permute.xlu1 %6321 }
 0xa4f   : > { %6341 = vst.msk [vmem:[#allocation3 + $0x10] sm:$0xf] %vm1434_vm5, %v6322_v5 }
 0xa50   : > { %v6434_v21 = vpop.permute.xlu0 %6433  ;;  %6397 = vst.msk [vmem:[#allocation3 + $0x10] sm:$0xf] %vm1659_vm6, %v6378_v24 }
 0xa51   : > { %6453 = vst.msk [vmem:[#allocation3 + $0x10] sm:$0xf] %vm1884_vm7, %v6434_v21  ;;  %v6604_v38 = vpop.permute.xlu2 %6603 }
 0xa56   : > { %v6380_v43 = vpop.permute.xlu1 %6379 }
 0xa57   : > { %6398 = vst.msk [vmem:[#allocation3 + $0x14] sm:$0xf] %vm1659_vm6, %v6380_v43 }
 0xa58   : > { %6454 = vst.msk [vmem:[#allocation3 + $0x14] sm:$0xf] %vm1884_vm7, %v6436_v18 }
 0xa59   : > { %v6270_v17 = vpop.permute.xlu2 %6269 }
 0xa5e   : > { %v6490_v15 = vpop.permute.xlu1 %6489 }
 0xa5f   : > { %6509 = vst.msk [vmem:[#allocation3 + $0x10] sm:$0xf] %vm2110_vm8, %v6490_v15 }
 0xa60   : > { %v6492_v60 = vpop.permute.xlu0 %6491  ;;  %6565 = vst.msk [vmem:[#allocation3 + $0x10] sm:$0xf] %vm2335_vm9, %v6546_v16 }
 0xa61   : > { %6510 = vst.msk [vmem:[#allocation3 + $0x14] sm:$0xf] %vm2110_vm8, %v6492_v60  ;;  %v6328_v27 = vpop.permute.xlu2 %6327 }
 0xa66   : > { %v6548_v20 = vpop.permute.xlu1 %6547 }
 0xa67   : > { %6566 = vst.msk [vmem:[#allocation3 + $0x14] sm:$0xf] %vm2335_vm9, %v6548_v20 }
 0xa68   : > { %v6602_v11 = vpop.permute.xlu0 %6601  ;;  %6622 = vst.msk [vmem:[#allocation3 + $0x14] sm:$0xf] %vm11318_vm2, %v6604_v38 }
 0xa69   : > { %6621 = vst.msk [vmem:[#allocation3 + $0x10] sm:$0xf] %vm11313_vm0, %v6602_v11  ;;  %v6438_v32 = vpop.permute.xlu2 %6437 }
 0xa6e   : > { %v6214_v51 = vpop.permute.xlu1 %6213 }
 0xa6f   : > { %6231 = vst.msk [vmem:[#allocation3 + $0x18] sm:$0xf] %vm984_vm3, %v6214_v51 }
 0xa70   : > { %v6216_v3 = vpop.permute.xlu0 %6215  ;;  %v7341_v37 = vld [vmem:[#allocation3 + $0x10] sm:$0xff]  ;;  %6287 = vst.msk [vmem:[#allocation3 + $0x18] sm:$0xf] %vm1209_vm4, %v6270_v17 }
 0xa71   : > { %6232 = vst.msk [vmem:[#allocation3 + $0x1c] sm:$0xf] %vm984_vm3, %v6216_v3  ;;  %7274 = vmatmul.msk.bf16.gmra.mxu3 %vm11319_vm10, %v7341_v37  ;;  %v6496_v30 = vpop.permute.xlu2 %6495  ;;  %vm11320_vm3 = vmmov %vm11313_vm0 }
 0xa76   : > { %v6272_v40 = vpop.permute.xlu1 %6271 }
 0xa77   : > { %6288 = vst.msk [vmem:[#allocation3 + $0x1c] sm:$0xf] %vm1209_vm4, %v6272_v40  ;;  %vm11321_vm4 = vmmov %vm11313_vm0 }
 0xa78   : > { %v6326_v59 = vpop.permute.xlu0 %6325  ;;  %6344 = vst.msk [vmem:[#allocation3 + $0x1c] sm:$0xf] %vm1434_vm5, %v6328_v27 }
 0xa79   : > { %6343 = vst.msk [vmem:[#allocation3 + $0x18] sm:$0xf] %vm1434_vm5, %v6326_v59  ;;  %v6606_v58 = vpop.permute.xlu2 %6605  ;;  %vm11322_vm5 = vcmask 64512  }
 0xa7a   : > { %vm11327_vm12 = vmmov %vm11322_vm5 }
 0xa7b   : > { %vm11328_vm11 = vmmov %vm11322_vm5 }
 0xa7c   : > { %vm11329_vm0 = vmmov %vm11322_vm5 }
 0xa7d   : > { %vm11330_vm2 = vmmov %vm11329_vm0 }
 0xa7e   : > { %v6382_v14 = vpop.permute.xlu1 %6381 }
 0xa7f   : > { %6399 = vst.msk [vmem:[#allocation3 + $0x18] sm:$0xf] %vm1659_vm6, %v6382_v14 }
 0xa80   : > { %v6384_v46 = vpop.permute.xlu0 %6383  ;;  %6455 = vst.msk [vmem:[#allocation3 + $0x18] sm:$0xf] %vm1884_vm7, %v6438_v32 }
 0xa81   : > { %6400 = vst.msk [vmem:[#allocation3 + $0x1c] sm:$0xf] %vm1659_vm6, %v6384_v46  ;;  %vm11323_vm6 = vmmov %vm11319_vm10  ;;  %vm11331_vm10 = vcmask 1044484  }
 0xa86   : > { %v6440_v35 = vpop.permute.xlu1 %6439 }
 0xa87   : > { %6456 = vst.msk [vmem:[#allocation3 + $0x1c] sm:$0xf] %vm1884_vm7, %v6440_v35  ;;  %vm11324_vm7 = vmmov %vm11322_vm5 }
 0xa88   : > { %v6494_v29 = vpop.permute.xlu0 %6493  ;;  %6512 = vst.msk [vmem:[#allocation3 + $0x1c] sm:$0xf] %vm2110_vm8, %v6496_v30 }
 0xa89   : > { %6511 = vst.msk [vmem:[#allocation3 + $0x18] sm:$0xf] %vm2110_vm8, %v6494_v29  ;;  %vm11325_vm8 = vmmov %vm11322_vm5 }
 0xa8e   : > { %v6550_v33 = vpop.permute.xlu1 %6549 }
 0xa8f   : > { %6567 = vst.msk [vmem:[#allocation3 + $0x18] sm:$0xf] %vm2335_vm9, %v6550_v33 }
 0xa90   : > { %v6552_v34 = vpop.permute.xlu0 %6551  ;;  %6623 = vst.msk [vmem:[#allocation3 + $0x18] sm:$0xf] %vm11320_vm3, %v6606_v58  ;;  %vm11332_vm3 = vcmask 1045509  }
 0xa91   : > { %6568 = vst.msk [vmem:[#allocation3 + $0x1c] sm:$0xf] %vm2335_vm9, %v6552_v34  ;;  %vm11326_vm9 = vmmov %vm11322_vm5 }
 0xa95   : > { %v6717_v28 = vpop.f32.mrf.mxu3 }
 0xa96   : > { %v6718_v26 = vadd.f32 %v7531_v53, %v6717_v28  ;;  %v6608_v7 = vpop.permute.xlu1 %6607 }
 0xa97   : > { %6624 = vst.msk [vmem:[#allocation3 + $0x1c] sm:$0xf] %vm11321_vm4, %v6608_v7  ;;  %vm11333_vm4 = vcmask 1046534  }
 0xa98   : > { %v6737_v44 = vmax.f32 %v6718_v26, 0.0 }
 0xa9a   : > { %v6749_v62 = vmul.f32 %v7532_v10, %v6737_v44  ;;  %v6781_v44 = vld [vmem:[%s11133_s12] sm:$0xff] }
 0xa9c   : > { %v6757_v9 = vsel %vm11322_vm5, %v6749_v62, 0.0  ;;  %vm11337_vm5 = vmmov %vm11329_vm0 }
 0xa9d   : > { %v6719_v0 = vpop.f32.mrf.mxu3  ;;  %6758 = vadd.xlane.f32.xlu0 %v6757_v9  ;;  %v6782_v9 = vld [vmem:[%s11133_s12 + $0x8] sm:$0xff] }
 0xa9e   : > { %v6720_v55 = vadd.f32 %v7531_v53, %v6719_v0  ;;  %v7342_v36 = vld [vmem:[#allocation3 + $0x18] sm:$0xff] }
 0xa9f   : > { %7275 = vmatmul.msk.bf16.gmra.mxu3 %vm11323_vm6, %v7342_v36  ;;  %vm11338_vm6 = vmmov %vm11329_vm0  ;;  %v6838_v36 = vstv %s7278_s19  ;;  %s7580_s19 = scalar_lea.hbm %s7579_s4, 48 }
 0xaa0   : > { %v6738_v2 = vmax.f32 %v6720_v55, 0.0  ;;  %p7581_p0 = scmp.ne.s32.totalorder %s7579_s4, %s7580_s19 }
 0xaa2   : > { %v6750_v31 = vmul.f32 %v7532_v10, %v6738_v2  ;;  %v5470_v2 = vstv %s5469_s28  ;;  %p7582_p1 = pnand %p7581_p0, %p7769_p5 }
 0xaa4   : > { %v6760_v57 = vsel %vm11324_vm7, %v6750_v31, 0.0  ;;  %p7583_p2 = pneg %p7582_p1 }
 0xaa5   : > { %6761 = vadd.xlane.f32.xlu2 %v6760_v57  ;;  %v6872_v57 = vstv %s7283_s16 }
 0xaca   : > { %v6722_v56 = vpop.f32.mrf.mxu3 }
 0xacb   : > { %v6723_v48 = vadd.f32 %v7531_v53, %v6722_v56 }
 0xacd   : > { %v6739_v19 = vmax.f32 %v6723_v48, 0.0  ;;  %v5471_v48 = vmul.f32 %v5470_v2, %v10901_v39  ;;  %v5472_v39 = vmul.f32 %v5470_v2, %v10911_v22 }
 0xacf   : > { %v6751_v52 = vmul.f32 %v7532_v10, %v6739_v19 }
 0xad1   : > { %v6763_v50 = vsel %vm11325_vm8, %v6751_v52, 0.0  ;;  %v6878_v52 = vstv %s6877_s27  ;;  %s7584_s27 = scalar_lea.hbm %s11136_s15, 96 }
 0xad2   : > { %v6724_v23 = vpop.f32.mrf.mxu3  ;;  %6764 = vadd.xlane.f32.xlu1 %v6763_v50  ;;  %p7586_p4 = scmp.lt.s32.totalorder %s7584_s27, %s7580_s19 }
 0xad3   : > { %v6725_v63 = vadd.f32 %v7531_v53, %v6724_v23 }
 0xad4   : > { %p7587_p7 = por %p7586_p4, %p7585_p3 }
 0xad5   : > { %v6740_v4 = vmax.f32 %v6725_v63, 0.0 }
 0xad6   : > { %p7588_p8 = pnand %p7587_p7, %p7583_p2 }
 0xad7   : > { %v6752_v12 = vmul.f32 %v7532_v10, %v6740_v4 }
 0xad9   : > { %v6766_v25 = vsel %vm11326_vm9, %v6752_v12, 0.0 }
 0xada   : > { %6767 = vadd.xlane.f32.xlu0 %v6766_v25 }
 0xaf4   : > { %v6727_v41 = vpop.f32.mrf.mxu3 }
 0xaf5   : > { %v6728_v13 = vadd.f32 %v7531_v53, %v6727_v41 }
 0xaf7   : > { %v6741_v45 = vmax.f32 %v6728_v13, 0.0 }
 0xaf9   : > { %v6753_v6 = vmul.f32 %v7532_v10, %v6741_v45 }
 0xafb   : > { %v6769_v47 = vsel %vm11327_vm12, %v6753_v6, 0.0 }
 0xafc   : > { %v6729_v42 = vpop.f32.mrf.mxu3  ;;  %6770 = vadd.xlane.f32.xlu2 %v6769_v47 }
 0xafd   : > { %v6730_v24 = vadd.f32 %v7531_v53, %v6729_v42 }
 0xaff   : > { %v6742_v1 = vmax.f32 %v6730_v24, 0.0 }
 0xb01   : > { %v6754_v61 = vmul.f32 %v7532_v10, %v6742_v1 }
 0xb03   : > { %v6772_v54 = vsel %vm11328_vm11, %v6754_v61, 0.0 }
 0xb04   : > { %6773 = vadd.xlane.f32.xlu1 %v6772_v54 }
 0xb10   : > { %v6759_v20 = vpop.xlane.xlu0 %6758 }
 0xb11   : > { %v6791_v32 = vperm.slane %v6759_v20, %v10566_v8 }
 0xb18   : > { %v6762_v17 = vpop.xlane.xlu2 %6761 }
 0xb19   : > { %v6792_v27 = vperm.slane %v6762_v17, %v10566_v8 }
 0xb1b   : > { %v6799_v29 = vsel %vm5381_vm14, %v6792_v27, %v6791_v32  ;;  %vm11334_vm14 = vcmask 1047559  }
 0xb22   : > { %v6732_v49 = vpop.f32.mrf.mxu3 }
 0xb23   : > { %v6733_v18 = vadd.f32 %v7531_v53, %v6732_v49 }
 0xb25   : > { %v6743_v5 = vmax.f32 %v6733_v18, 0.0 }
 0xb27   : > { %v6755_v21 = vmul.f32 %v7532_v10, %v6743_v5 }
 0xb29   : > { %v6775_v16 = vsel %vm11329_vm0, %v6755_v21, 0.0 }
 0xb2a   : > { %v6734_v43 = vpop.f32.mrf.mxu3  ;;  %6776 = vadd.xlane.f32.xlu0 %v6775_v16 }
 0xb2b   : > { %v6735_v38 = vadd.f32 %v7531_v53, %v6734_v43 }
 0xb2d   : > { %v6744_v60 = vmax.f32 %v6735_v38, 0.0 }
 0xb2f   : > { %v6756_v15 = vmul.f32 %v7532_v10, %v6744_v60 }
 0xb31   : > { %v6778_v11 = vsel %vm11330_vm2, %v6756_v15, 0.0 }
 0xb32   : > { %6779 = vadd.xlane.f32.xlu2 %v6778_v11 }
 0xb45   : > { %v6765_v3 = vpop.xlane.xlu1 %6764 }
 0xb46   : > { %v6793_v59 = vperm.slane %v6765_v3, %v10566_v8 }
 0xb48   : > { %v6800_v33 = vsel %vm5383_vm15, %v6793_v59, %v6799_v29  ;;  %vm11335_vm15 = vmmov %vm11329_vm0 }
 0xb4d   : > { %v6768_v51 = vpop.xlane.xlu0 %6767 }
 0xb4e   : > { %v6794_v46 = vperm.slane %v6768_v51, %v10566_v8 }
 0xb50   : > { %v6801_v58 = vsel %vm5385_vm1, %v6794_v46, %v6800_v33  ;;  %vm11336_vm1 = vmmov %vm11329_vm0 }
 0xb6f   : > { %v6771_v37 = vpop.xlane.xlu2 %6770 }
 0xb70   : > { %v6795_v30 = vperm.slane %v6771_v37, %v10566_v8 }
 0xb72   : > { %v6802_v53 = vsel %vm11331_vm10, %v6795_v30, %v6801_v58 }
 0xb77   : > { %v6774_v40 = vpop.xlane.xlu1 %6773 }
 0xb78   : > { %v6796_v35 = vperm.slane %v6774_v40, %v10566_v8 }
 0xb7a   : > { %v6803_v26 = vsel %vm11332_vm3, %v6796_v35, %v6802_v53 }
 0xb9d   : > { %v6777_v14 = vpop.xlane.xlu0 %6776 }
 0xb9e   : > { %v6797_v34 = vperm.slane %v6777_v14, %v10566_v8 }
 0xba0   : > { %v6804_v7 = vsel %vm11333_vm4, %v6797_v34, %v6803_v26 }
 0xba5   : > { %v6780_v28 = vpop.xlane.xlu2 %6779 }
 0xba6   : > { %v6798_v10 = vperm.slane %v6780_v28, %v10566_v8  ;;  %v6836_v8 = vld [vmem:[%s11135_s14] sm:$0xff] }
 0xba7   : > { %6860 = vmatpush.msrb.mxu3 %v6836_v8 }
 0xba8   : > { %v6805_v62 = vsel %vm11334_vm14, %v6798_v10, %v6804_v7 }
 0xba9   : > { %6828 = vmatpush.msrb.mxu2 %v6805_v62 }
 0xbaa   : > { %7276 = vmatmul.msk.f32.vlgmr.msrb.gmra.mxu2 %vm11335_vm15, %v6781_v44 }
 0xbb2   : > { %7277 = vmatmul.msk.f32.gmra.mxu2 %vm11336_vm1, %v6782_v9 }
 0xc2d   : > { %v6830_v0 = vpop.f32.mrf.mxu2 }
 0xc2e   : > { %7279 = vmatmul.msk.f32.vlgmr.msrb.gmra.mxu3 %vm11337_vm5, %v6830_v0 }
 0xc35   : > { %v6833_v55 = vpop.f32.mrf.mxu2 }
 0xc36   : > { %7280 = vmatmul.msk.f32.gmra.mxu3 %vm11338_vm6, %v6833_v55 }
 0xcb1   : > { %v6862_v31 = vpop.f32.mrf.mxu3 }
 0xcb2   : > { %v6863_v56 = vadd.f32 %v6862_v31, %v6838_v36 }
 0xcb4   : > { %7281 = vst.msk [vmem:[%s10904_s26 + $0x10] sm:$0xff] %vm5404_vm13, %v6863_v56  ;;  %v6873_v19 = vmul.f32 %v6872_v57, %v6863_v56 }
 0xcb6   : > { %v6875_v50 = vadd.f32 %v6873_v19, %v5471_v48 }
 0xcb8   : > { %v6879_v23 = vadd.f32 %v6878_v52, %v6875_v50 }
 0xcb9   : > { %v6865_v63 = vpop.f32.mrf.mxu3 }
 0xcba   : > { %7284 = vst.msk [vmem:[%s10904_s26 + $0x20] sm:$0xff] %vm5404_vm13, %v6879_v23  ;;  %v6866_v4 = vadd.f32 %v6865_v63, %v6838_v36 }
 0xcbc   : > { %7282 = vst.msk [vmem:[%s10904_s26 + $0x18] sm:$0xff] %vm5404_vm13, %v6866_v4  ;;  %v6874_v12 = vmul.f32 %v6872_v57, %v6866_v4 }
 0xcbe   : > { %v6876_v25 = vadd.f32 %v6874_v12, %v5472_v39 }
 0xcc0   : > { %v6880_v41 = vadd.f32 %v6878_v52, %v6876_v25 }
 0xcc2   : > { %7285 = vst.msk [vmem:[%s10904_s26 + $0x28] sm:$0xff] %vm5404_vm13, %v6880_v41 }
 0xcc3   : > { %7591 = shalt.err (!%p7588_p8)
}
 0xcc4   : > { %s7647_s22 = smov 128  }
 0xcc5   : > { %7465 = dma.vmem_to_hbm [thread:$0]  (%p7769_p5), %s6898_s9, 768, %s6900_s0, %s6885_s2, %s7647_s22, %s7647_s22, %s11289_s3  }
 0xcc6 PF: > { %p7482_p9 = scmp.ge.s32.totalorder %s7634_s23, 2  ;;  %s6914_s26 = sand.u32 1, %s7622_s20  }
 0xcc7   : > { %s6915_s1 = scalar_lea.sflag [#allocation6], %s6914_s26 }
 0xcc8   : > { %p7475_p10 = pnand %p7482_p9, %p7773_p6 }
 0xcca   : > { %p7476_p11 = pneg %p7475_p10 }
 0xccc   : > { %7617 = dma.done.wait (%p7476_p11), %s6915_s1, 768  }
 0xccd   : > { %7619 = vsyncadd (%p7476_p11), %s6915_s1, 4294966528  ;;  %s11339_s24 = sld [smem:[#allocation14_spill]]  ;;  %p28_p12 = scmp.ge.s32.totalorder %s7756_s25, 4  }
 0xcce   : > { %s11340_s22 = sld [smem:[#allocation15_spill]]  ;;  %s11341_s20 = smov %s7626_s21 }
 0xccf   : > { %s11343_s23 = smov %s7756_s25  ;;  %30 = sbr.rel (!%p28_p12) target bundleno = 12 (0xc), region = 131 }
 0xcd3   : > { %s11342_s21 = smov %s11339_s24 }
 0xcd4   :  { %6921 = vsyncpa [#allocation6], 1 }
 0xcd5   :  { %6923 = vsyncpa [#allocation6 + $0x1], 1 }
 0xcd6   :  { %6924 = vsyncpa [#allocation7], 1 }
 0xcd7   :  { %6926 = vsyncpa [#allocation7 + $0x1], 1 }
 0xcd8   :  { %6927 = vsyncpa [#allocation9], 1 }

</bundles_post_ra>
